<compile_context>
chip_gen: v6e
topology: v6e:2x2x1
jax: 0.10.0
libtpu: 0.0.40
codegen_flags: <defaults>
</compile_context>

<pallas_src>
import math

import jax
import jax.numpy as jnp
import numpy as np
from jax.experimental import pallas as pl
from jax.experimental.pallas import tpu as pltpu

# ----- small hyperparameters consistent with the module structure -----
D_MODEL   = 32
D_STATE   = 16
D_CONV    = 4
EXPAND    = 2
HEADDIM   = 16
D_INNER   = EXPAND * D_MODEL                    # 64
NHEADS    = D_INNER // HEADDIM                  # 4
CONV_DIM  = D_INNER + 2 * D_STATE               # 96
D_IN_PROJ = 2 * D_INNER + 2 * D_STATE + NHEADS  # 164
EPS       = 1e-5

BATCH   = 2
SEQLEN  = 256
CHUNK   = 128       # sequence chunk per grid step (M=128 matmuls; 2 chunks carry state)
OUT_PAD = 128       # lane-dense padded output width (>= D_MODEL)

# fused in_proj weight column layout: one (D_MODEL, FUSED_N) bf16 matmul
_FZ     = 0                        # z                : cols [0, 64)
_FX     = D_INNER                  # xBC (pre-conv)   : cols [64, 160)
_FDT    = D_INNER + CONV_DIM       # dt head-expanded : cols [160, 224)
FUSED_N = 256                      # padded to lane-dense 256

# packed-parameter row layout (single (16, 128) f32 input)
_PR_CONVW = 0                   # rows [0, D_CONV): depthwise conv taps (CONV_DIM cols)
_PR_CONVB = D_CONV              # conv bias                             (CONV_DIM cols)
_PR_DTB   = D_CONV + 1          # dt_bias, head-expanded                (D_INNER cols)
_PR_A     = D_CONV + 2          # A = -exp(A_log), head-expanded        (D_INNER cols)
_PR_D     = D_CONV + 3          # D, head-expanded                      (D_INNER cols)
_PR_RMSW  = D_CONV + 4          # RMSNorm weight                        (D_INNER cols)
PARAM_ROWS = 16
PARAM_COLS = 128

_NEG      = -1e30   # mask value applied BEFORE the exp (exp -> exactly 0)
TAIL_ROWS = 8       # sublane-padded conv-boundary carry (only last D_CONV-1 rows used)


def _softplus(x):
    # branch-free stable softplus (matches F.softplus within f32 precision)
    return jnp.maximum(x, 0.0) + jnp.log1p(jnp.exp(-jnp.abs(x)))


def _cumsum_rows(x, n_rows):
    """Inclusive prefix-sum along axis 0 via log-step rolls (XLU, no (L,L) matmul)."""
    row = jax.lax.broadcasted_iota(jnp.int32, (n_rows, 1), 0)
    d = 1
    while d < n_rows:
        shifted = pltpu.roll(x, shift=d, axis=0)
        x = x + jnp.where(row >= d, shifted, 0.0)
        d *= 2
    return x


def _mamba2_chunk_kernel(u_ref, wfused_ref, wout_ref, params_ref,
                         o_ref, state_ref, convtail_ref):
    C = u_ref.shape[1]
    ci = pl.program_id(1)

    # reset carried SSM state + conv tail at the first chunk of every sequence
    @pl.when(ci == 0)
    def _():
        state_ref[...] = jnp.zeros_like(state_ref)
        convtail_ref[...] = jnp.zeros_like(convtail_ref)

    prm    = params_ref[...]                               # (16, 128) f32
    cbias  = prm[_PR_CONVB:_PR_CONVB + 1, 0:CONV_DIM]      # (1, CONV_DIM)
    dtb    = prm[_PR_DTB:_PR_DTB + 1, 0:D_INNER]           # (1, D_INNER) head-expanded
    a_full = prm[_PR_A:_PR_A + 1, 0:D_INNER]               # (1, D_INNER) head-expanded
    d_row  = prm[_PR_D:_PR_D + 1, 0:D_INNER]               # (1, D_INNER)
    rms_w  = prm[_PR_RMSW:_PR_RMSW + 1, 0:D_INNER]         # (1, D_INNER)

    # ---- fused in_proj: ONE lane-dense matmul (bf16 operands, f32 accumulate) ----
    u = u_ref[0].astype(jnp.bfloat16)                                          # (C, DM)
    fused = jnp.dot(u, wfused_ref[...], preferred_element_type=jnp.float32)    # (C, 256)
    z       = fused[:, _FZ:_FZ + D_INNER]                                      # (C, D_INNER)
    xbc_lin = fused[:, _FX:_FX + CONV_DIM]                                     # (C, CONV_DIM)
    dt_raw  = fused[:, _FDT:_FDT + D_INNER]                                    # (C, D_INNER)

    # ---- causal depthwise conv1d (+SiLU); boundary rows from the small carried tail ----
    tail = convtail_ref[...]                               # (8, CONV_DIM) last rows of prev chunk
    row  = jax.lax.broadcasted_iota(jnp.int32, (C, 1), 0)
    acc  = jnp.zeros((C, CONV_DIM), jnp.float32) + cbias
    for w in range(D_CONV):
        s = D_CONV - 1 - w                                                     # shift of tap w
        tap = prm[_PR_CONVW + w:_PR_CONVW + w + 1, 0:CONV_DIM]                 # (1, CONV_DIM)
        if s == 0:
            shifted = xbc_lin
        else:
            shifted = pltpu.roll(xbc_lin, shift=s, axis=0)
            # rows r < s need prev_chunk[C - s + r] == tail[TAIL_ROWS - s + r]
            for j in range(s):
                shifted = jnp.where(
                    row == j,
                    tail[TAIL_ROWS - s + j:TAIL_ROWS - s + j + 1, :],
                    shifted)
        acc = acc + shifted * tap
    convtail_ref[...] = xbc_lin[C - TAIL_ROWS:C, :]        # small carry for next chunk
    xbc = acc * jax.nn.sigmoid(acc)                        # SiLU (f32)

    xs = xbc[:, 0:D_INNER]                                                     # (C, D_INNER)
    Bm = xbc[:, D_INNER:D_INNER + D_STATE]                                     # (C, N)
    Cm = xbc[:, D_INNER + D_STATE:D_INNER + 2 * D_STATE]                       # (C, N)

    # ---- dt / chunk-local decay exponents: all head-expanded, pure elementwise ----
    dt    = _softplus(dt_raw + dtb)                                            # (C, D_INNER)
    acs   = _cumsum_rows(dt * a_full, C)                                       # (C, D_INNER), <= 0
    acsT  = jnp.transpose(acs)                                                 # (D_INNER, C)
    t_acs = acs[C - 1:C, :]                                                    # (1, D_INNER)
    xdt   = xs * dt                                                            # dt folded into x

    # ---- intra-chunk SSD: lane-dense per-head (C,C)@(C,D_INNER) accumulation ----
    ri = jax.lax.broadcasted_iota(jnp.int32, (C, C), 0)
    si = jax.lax.broadcasted_iota(jnp.int32, (C, C), 1)
    causal = ri >= si
    CB = jax.lax.dot_general(Cm.astype(jnp.bfloat16), Bm.astype(jnp.bfloat16),
                             (((1,), (1,)), ((), ())),
                             preferred_element_type=jnp.float32)               # (C, C)
    lane = jax.lax.broadcasted_iota(jnp.int32, (1, D_INNER), 1)
    y_intra = jnp.zeros((C, D_INNER), jnp.float32)
    for h in range(NHEADS):
        a_col = acs[:, h * HEADDIM:h * HEADDIM + 1]                            # (C, 1)
        a_row = acsT[h * HEADDIM:h * HEADDIM + 1, :]                           # (1, C)
        decay = jnp.exp(jnp.where(causal, a_col - a_row, _NEG))                # mask BEFORE exp
        Mh = (decay * CB).astype(jnp.bfloat16)                                 # (C, C)
        maskh = (lane >= h * HEADDIM) & (lane < (h + 1) * HEADDIM)
        Xh = jnp.where(maskh, xdt, 0.0).astype(jnp.bfloat16)                   # (C, D_INNER)
        y_intra = y_intra + jnp.dot(Mh, Xh, preferred_element_type=jnp.float32)

    # ---- inter-chunk contribution from the carried state (reads OLD state) ----
    y_state = jnp.dot(Cm.astype(jnp.bfloat16), state_ref[...].astype(jnp.bfloat16),
                      preferred_element_type=jnp.float32) * jnp.exp(acs)       # (C, D_INNER)

    # ---- state update (bf16 MXU operands, f32 state / accumulation) ----
    xw = xs * (jnp.exp(t_acs - acs) * dt)                                      # (C, D_INNER)
    contrib = jax.lax.dot_general(Bm.astype(jnp.bfloat16), xw.astype(jnp.bfloat16),
                                  (((0,), (0,)), ((), ())),                    # Bm^T @ xw on MXU
                                  preferred_element_type=jnp.float32)          # (N, D_INNER)
    state_ref[...] = state_ref[...] * jnp.exp(t_acs) + contrib

    # ---- combine + gated RMSNorm (gate before norm) + out_proj (lane-dense store) ----
    y   = y_intra + y_state + xs * d_row
    zg  = z * jax.nn.sigmoid(z)
    yg  = y * zg
    var = jnp.mean(yg * yg, axis=-1, keepdims=True)
    yn  = yg * jax.lax.rsqrt(var + EPS) * rms_w
    o_ref[0] = jnp.dot(yn.astype(jnp.bfloat16), wout_ref[...],
                       preferred_element_type=jnp.float32).astype(o_ref.dtype)  # (C, OUT_PAD) bf16


def mamba2_forward(u, wfused, wout_pad, params):
    B, L, _ = u.shape
    assert L % CHUNK == 0, "SEQLEN must be a multiple of CHUNK"
    nchunks = L // CHUNK

    def rep(arr):  # replicated (full-array, VMEM-resident) operand
        # TODO(synk): for production d_model, tile/stream these on v7x (64 MiB VMEM).
        return pl.BlockSpec(arr.shape, lambda b, c: (0,) * arr.ndim)

    flops = int(
        2 * B * L * D_MODEL * FUSED_N                       # fused in_proj
        + B * nchunks * (2 * CHUNK * CHUNK * D_STATE        # C @ B^T
                         + NHEADS * 2 * CHUNK * CHUNK * D_INNER   # intra SSD
                         + 2 * CHUNK * D_STATE * D_INNER * 2)     # y_state + contrib
        + 2 * B * L * D_INNER * OUT_PAD)                    # out_proj
    transcendentals = int(B * nchunks * (NHEADS * CHUNK * CHUNK
                                         + 8 * CHUNK * D_INNER
                                         + 2 * CHUNK * CONV_DIM))
    bytes_accessed = int(u.size * u.dtype.itemsize + B * L * OUT_PAD * 2
                         + wfused.size * 2 + wout_pad.size * 2 + params.size * 4)

    out = pl.pallas_call(
        _mamba2_chunk_kernel,
        out_shape=jax.ShapeDtypeStruct((B, L, OUT_PAD), jnp.bfloat16),
        grid_spec=pltpu.PrefetchScalarGridSpec(
            num_scalar_prefetch=0,
            grid=(B, nchunks),
            in_specs=[
                pl.BlockSpec((1, CHUNK, D_MODEL), lambda b, c: (b, c, 0)),
                rep(wfused), rep(wout_pad), rep(params),
            ],
            out_specs=pl.BlockSpec((1, CHUNK, OUT_PAD), lambda b, c: (b, c, 0)),
            scratch_shapes=[
                pltpu.VMEM((D_STATE, D_INNER), jnp.float32),     # carried SSM state
                pltpu.VMEM((TAIL_ROWS, CONV_DIM), jnp.float32),  # small conv boundary carry
            ],
        ),
        # batch axis shards across cores (v7x megacore); chunk axis carries state.
        compiler_params=pltpu.CompilerParams(
            dimension_semantics=("parallel", "arbitrary"),
            vmem_limit_bytes=32 * 1024 * 1024),
        cost_estimate=pl.CostEstimate(flops=flops,
                                      transcendentals=transcendentals,
                                      bytes_accessed=bytes_accessed),
    )(u, wfused, wout_pad, params)
    # kernel stores lane-dense (128 cols, bf16); slice + upcast back for the test.
    return out[:, :, :D_MODEL].astype(jnp.float32)


# ---------------- pure-JAX reference (sequential scan) ----------------
def ref_forward(u, win, convw, convb, dt_bias, a_log, dparam, rmsw, wout):
    B, L, _ = u.shape
    zxbcdt = jnp.einsum('bld,ed->ble', u, win)
    z   = zxbcdt[..., :D_INNER]
    xBC = zxbcdt[..., D_INNER:D_INNER + CONV_DIM]
    dt  = zxbcdt[..., D_INNER + CONV_DIM:]
    w = convw[:, 0, :]                                             # (CONV_DIM, D_CONV)
    xpad = jnp.pad(xBC, ((0, 0), (D_CONV - 1, 0), (0, 0)))
    conv = jnp.zeros_like(xBC) + convb[None, None, :]
    for k in range(D_CONV):
        conv = conv + xpad[:, k:k + L, :] * w[None, None, :, k]
    xBC = conv * jax.nn.sigmoid(conv)
    x  = xBC[..., :D_INNER].reshape(B, L, NHEADS, HEADDIM)
    Bm = xBC[..., D_INNER:D_INNER + D_STATE]
    Cm = xBC[..., D_INNER + D_STATE:]
    dt = _softplus(dt + dt_bias[None, None, :])
    A = -jnp.exp(a_log)
    dA = jnp.exp(dt * A[None, None, :])

    def step(state, inp):
        dA_t, dt_t, x_t, B_t, C_t = inp
        dBx = jnp.einsum('bh,bn,bhp->bhpn', dt_t, B_t, x_t)
        state = state * dA_t[:, :, None, None] + dBx
        y_t = jnp.einsum('bhpn,bn->bhp', state, C_t)
        return state, y_t

    state0 = jnp.zeros((B, NHEADS, HEADDIM, D_STATE), jnp.float32)
    xs = (jnp.moveaxis(dA, 1, 0), jnp.moveaxis(dt, 1, 0), jnp.moveaxis(x, 1, 0),
          jnp.moveaxis(Bm, 1, 0), jnp.moveaxis(Cm, 1, 0))
    _, ys = jax.lax.scan(step, state0, xs)
    y = jnp.moveaxis(ys, 0, 1) + dparam[None, None, :, None] * x
    y = y.reshape(B, L, D_INNER)
    zg = z * jax.nn.sigmoid(z)
    yg = y * zg
    yn = yg * jax.lax.rsqrt(jnp.mean(yg * yg, axis=-1, keepdims=True) + EPS)
    yn = yn * rmsw[None, None, :]
    return jnp.einsum('bld,ed->ble', yn, wout)


if __name__ == "__main__":
    key = jax.random.PRNGKey(0)
    ks = jax.random.split(key, 8)

    u = jax.random.normal(ks[0], (BATCH, SEQLEN, D_MODEL), jnp.float32)

    # deterministic parameter init mirroring Mamba2.__init__ shapes
    win   = jax.random.normal(ks[1], (D_IN_PROJ, D_MODEL), jnp.float32) * 0.05
    convw = jax.random.normal(ks[2], (CONV_DIM, 1, D_CONV), jnp.float32) * 0.2
    convb = jax.random.normal(ks[3], (CONV_DIM,), jnp.float32) * 0.1
    dt0 = jnp.exp(jax.random.uniform(ks[4], (NHEADS,), jnp.float32)
                  * (math.log(0.1) - math.log(0.001)) + math.log(0.001))
    dt0 = jnp.clip(dt0, 1e-4, None)
    dt_bias = dt0 + jnp.log(-jnp.expm1(-dt0))
    a_log  = jnp.log(jax.random.uniform(ks[5], (NHEADS,), jnp.float32,
                                        minval=1.0, maxval=1.1))
    dparam = jnp.ones((NHEADS,), jnp.float32)
    rmsw   = jnp.ones((D_INNER,), jnp.float32)
    wout   = jax.random.normal(ks[6], (D_MODEL, D_INNER), jnp.float32) * 0.05

    # ---- kernel-side packing: one fused bf16 in_proj weight, head-expanded scalars ----
    wz  = jnp.transpose(win[:D_INNER])                                   # (DM, D_INNER)
    wx  = jnp.transpose(win[D_INNER:D_INNER + CONV_DIM])                 # (DM, CONV_DIM)
    wdt = jnp.transpose(win[D_INNER + CONV_DIM:])                        # (DM, NHEADS)
    wfused = jnp.zeros((D_MODEL, FUSED_N), jnp.float32)
    wfused = wfused.at[:, _FZ:_FZ + D_INNER].set(wz)
    wfused = wfused.at[:, _FX:_FX + CONV_DIM].set(wx)
    wfused = wfused.at[:, _FDT:_FDT + D_INNER].set(jnp.repeat(wdt, HEADDIM, axis=1))
    wfused = wfused.astype(jnp.bfloat16)

    wout_pad = jnp.zeros((D_INNER, OUT_PAD), jnp.float32)
    wout_pad = wout_pad.at[:, :D_MODEL].set(jnp.transpose(wout)).astype(jnp.bfloat16)

    params = jnp.zeros((PARAM_ROWS, PARAM_COLS), jnp.float32)
    params = params.at[0:D_CONV, 0:CONV_DIM].set(jnp.transpose(convw[:, 0, :]))
    params = params.at[_PR_CONVB, 0:CONV_DIM].set(convb)
    params = params.at[_PR_DTB, 0:D_INNER].set(jnp.repeat(dt_bias, HEADDIM))
    params = params.at[_PR_A, 0:D_INNER].set(jnp.repeat(-jnp.exp(a_log), HEADDIM))
    params = params.at[_PR_D, 0:D_INNER].set(jnp.repeat(dparam, HEADDIM))
    params = params.at[_PR_RMSW, 0:D_INNER].set(rmsw)

    out = mamba2_forward(u, wfused, wout_pad, params)
    out = jax.block_until_ready(out)

    ref = jax.block_until_ready(
        ref_forward(u, win, convw, convb, dt_bias, a_log, dparam, rmsw, wout))

    np.testing.assert_allclose(np.asarray(out), np.asarray(ref), rtol=3e-2, atol=3e-2)
    assert not np.any(np.isnan(np.asarray(out)))
    print("KERNEL_OK")
</pallas_src>

<mosaic_0001>
module attributes {stable_mosaic.version = 11 : i64} {
  func.func @_mamba2_chunk_kernel(%arg0: i32, %arg1: i32, %arg2: memref<1x128x32xf32, #tpu.memory_space<vmem>>, %arg3: memref<32x256xbf16, #tpu.memory_space<vmem>>, %arg4: memref<64x128xbf16, #tpu.memory_space<vmem>>, %arg5: memref<16x128xf32, #tpu.memory_space<vmem>>, %arg6: memref<1x128x128xbf16, #tpu.memory_space<vmem>>, %arg7: memref<16x64xf32, #tpu.memory_space<vmem>>, %arg8: memref<8x96xf32, #tpu.memory_space<vmem>>) attributes {dimension_semantics = [#tpu.dimension_semantics<parallel>, #tpu.dimension_semantics<arbitrary>], iteration_bounds = array<i64: 2, 2>, scalar_prefetch = 0 : i64, scratch_operands = 2 : i64, tpu.core_type = #tpu.core_type<tc>, window_params = [{transform_indices = @transform_0, window_bounds = array<i64: 1, 128, 32>}, {pipeline_mode = #tpu.pipeline_mode<synchronous>, transform_indices = @transform_1, window_bounds = array<i64: 32, 256>}, {pipeline_mode = #tpu.pipeline_mode<synchronous>, transform_indices = @transform_2, window_bounds = array<i64: 64, 128>}, {pipeline_mode = #tpu.pipeline_mode<synchronous>, transform_indices = @transform_3, window_bounds = array<i64: 16, 128>}, {transform_indices = @transform_4, window_bounds = array<i64: 1, 128, 128>}]} {
    %c0_i32 = arith.constant 0 : i32
    %0 = arith.cmpi eq, %arg1, %c0_i32 : i32
    %1 = arith.extui %0 : i1 to i32
    %c0_i32_0 = arith.constant 0 : i32
    %2 = arith.cmpi ne, %1, %c0_i32_0 : i32
    scf.if %2 {
      %cst_76 = arith.constant 0.000000e+00 : f32
      %318 = vector.broadcast %cst_76 : f32 to vector<16x64xf32>
      %c0_77 = arith.constant 0 : index
      %c0_78 = arith.constant 0 : index
      %319 = vector.load %arg7[%c0_77, %c0_78] : memref<16x64xf32, #tpu.memory_space<vmem>>, vector<16x64xf32>
      tpu.vector_store %arg7[%c0_77, %c0_78], %318 {strides = array<i32>} : memref<16x64xf32, #tpu.memory_space<vmem>>, vector<16x64xf32>,
      %cst_79 = arith.constant 0.000000e+00 : f32
      %320 = vector.broadcast %cst_79 : f32 to vector<8x96xf32>
      %c0_80 = arith.constant 0 : index
      %c0_81 = arith.constant 0 : index
      %321 = vector.load %arg8[%c0_80, %c0_81] : memref<8x96xf32, #tpu.memory_space<vmem>>, vector<8x96xf32>
      tpu.vector_store %arg8[%c0_80, %c0_81], %320 {strides = array<i32>} : memref<8x96xf32, #tpu.memory_space<vmem>>, vector<8x96xf32>,
    } else {
    }
    %c0 = arith.constant 0 : index
    %c0_1 = arith.constant 0 : index
    %3 = vector.load %arg5[%c0, %c0_1] : memref<16x128xf32, #tpu.memory_space<vmem>>, vector<16x128xf32>
    %4 = vector.extract_strided_slice %3 {offsets = [4, 0], sizes = [1, 96], strides = [1, 1]} : vector<16x128xf32> to vector<1x96xf32>
    %5 = vector.extract_strided_slice %3 {offsets = [5, 0], sizes = [1, 64], strides = [1, 1]} : vector<16x128xf32> to vector<1x64xf32>
    %6 = vector.extract_strided_slice %3 {offsets = [6, 0], sizes = [1, 64], strides = [1, 1]} : vector<16x128xf32> to vector<1x64xf32>
    %7 = vector.extract_strided_slice %3 {offsets = [7, 0], sizes = [1, 64], strides = [1, 1]} : vector<16x128xf32> to vector<1x64xf32>
    %8 = vector.extract_strided_slice %3 {offsets = [8, 0], sizes = [1, 64], strides = [1, 1]} : vector<16x128xf32> to vector<1x64xf32>
    %c0_2 = arith.constant 0 : index
    %c0_3 = arith.constant 0 : index
    %c0_4 = arith.constant 0 : index
    %9 = vector.load %arg2[%c0_2, %c0_3, %c0_4] : memref<1x128x32xf32, #tpu.memory_space<vmem>>, vector<1x128x32xf32>
    %10 = vector.shape_cast %9 : vector<1x128x32xf32> to vector<128x32xf32>
    %11 = arith.truncf %10 : vector<128x32xf32> to vector<128x32xbf16>
    %c0_5 = arith.constant 0 : index
    %c0_6 = arith.constant 0 : index
    %12 = vector.load %arg3[%c0_5, %c0_6] : memref<32x256xbf16, #tpu.memory_space<vmem>>, vector<32x256xbf16>
    %cst = arith.constant dense<0.000000e+00> : vector<128x256xf32>
    %13 = tpu.matmul %11, %12, %cst {dimension_numbers = #tpu.dot_dimension_numbers<[1], [0], [0], [1], [0, 0, 1, 1], [], []>} : vector<128x32xbf16>, vector<32x256xbf16>, vector<128x256xf32> -> vector<128x256xf32>
    %14 = vector.extract_strided_slice %13 {offsets = [0, 0], sizes = [128, 64], strides = [1, 1]} : vector<128x256xf32> to vector<128x64xf32>
    %15 = vector.extract_strided_slice %13 {offsets = [0, 64], sizes = [128, 96], strides = [1, 1]} : vector<128x256xf32> to vector<128x96xf32>
    %16 = vector.extract_strided_slice %13 {offsets = [0, 160], sizes = [128, 64], strides = [1, 1]} : vector<128x256xf32> to vector<128x64xf32>
    %c0_7 = arith.constant 0 : index
    %c0_8 = arith.constant 0 : index
    %17 = vector.load %arg8[%c0_7, %c0_8] : memref<8x96xf32, #tpu.memory_space<vmem>>, vector<8x96xf32>
    %18 = tpu.iota {dimensions = array<i32: 0>} : vector<128x1xi32>
    %cst_9 = arith.constant 0.000000e+00 : f32
    %19 = vector.broadcast %cst_9 : f32 to vector<128x96xf32>
    %20 = vector.broadcast %4 : vector<1x96xf32> to vector<128x96xf32>
    %21 = arith.addf %19, %20 : vector<128x96xf32>
    %22 = vector.extract_strided_slice %3 {offsets = [0, 0], sizes = [1, 96], strides = [1, 1]} : vector<16x128xf32> to vector<1x96xf32>
    %c3_i32 = arith.constant 3 : i32
    %23 = tpu.dynamic_rotate %15 by %c3_i32 dim 0 : vector<128x96xf32>, i32 -> vector<128x96xf32>
    %c0_i32_10 = arith.constant 0 : i32
    %24 = vector.broadcast %c0_i32_10 : i32 to vector<128x1xi32>
    %25 = arith.cmpi eq, %18, %24 : vector<128x1xi32>
    %26 = vector.extract_strided_slice %17 {offsets = [5, 0], sizes = [1, 96], strides = [1, 1]} : vector<8x96xf32> to vector<1x96xf32>
    %27 = vector.shape_cast %25 : vector<128x1xi1> to vector<128x1xi1>
    %28 = vector.broadcast %27 : vector<128x1xi1> to vector<128x96xi1>
    %29 = vector.shape_cast %26 : vector<1x96xf32> to vector<1x96xf32>
    %30 = vector.broadcast %29 : vector<1x96xf32> to vector<128x96xf32>
    %31 = arith.select %28, %30, %23 : vector<128x96xi1>, vector<128x96xf32>
    %c1_i32 = arith.constant 1 : i32
    %32 = vector.broadcast %c1_i32 : i32 to vector<128x1xi32>
    %33 = arith.cmpi eq, %18, %32 : vector<128x1xi32>
    %34 = vector.extract_strided_slice %17 {offsets = [6, 0], sizes = [1, 96], strides = [1, 1]} : vector<8x96xf32> to vector<1x96xf32>
    %35 = vector.shape_cast %33 : vector<128x1xi1> to vector<128x1xi1>
    %36 = vector.broadcast %35 : vector<128x1xi1> to vector<128x96xi1>
    %37 = vector.shape_cast %34 : vector<1x96xf32> to vector<1x96xf32>
    %38 = vector.broadcast %37 : vector<1x96xf32> to vector<128x96xf32>
    %39 = arith.select %36, %38, %31 : vector<128x96xi1>, vector<128x96xf32>
    %c2_i32 = arith.constant 2 : i32
    %40 = vector.broadcast %c2_i32 : i32 to vector<128x1xi32>
    %41 = arith.cmpi eq, %18, %40 : vector<128x1xi32>
    %42 = vector.extract_strided_slice %17 {offsets = [7, 0], sizes = [1, 96], strides = [1, 1]} : vector<8x96xf32> to vector<1x96xf32>
    %43 = vector.shape_cast %41 : vector<128x1xi1> to vector<128x1xi1>
    %44 = vector.broadcast %43 : vector<128x1xi1> to vector<128x96xi1>
    %45 = vector.shape_cast %42 : vector<1x96xf32> to vector<1x96xf32>
    %46 = vector.broadcast %45 : vector<1x96xf32> to vector<128x96xf32>
    %47 = arith.select %44, %46, %39 : vector<128x96xi1>, vector<128x96xf32>
    %48 = vector.broadcast %22 : vector<1x96xf32> to vector<128x96xf32>
    %49 = arith.mulf %47, %48 : vector<128x96xf32>
    %50 = arith.addf %21, %49 : vector<128x96xf32>
    %51 = vector.extract_strided_slice %3 {offsets = [1, 0], sizes = [1, 96], strides = [1, 1]} : vector<16x128xf32> to vector<1x96xf32>
    %c2_i32_11 = arith.constant 2 : i32
    %52 = tpu.dynamic_rotate %15 by %c2_i32_11 dim 0 : vector<128x96xf32>, i32 -> vector<128x96xf32>
    %c0_i32_12 = arith.constant 0 : i32
    %53 = vector.broadcast %c0_i32_12 : i32 to vector<128x1xi32>
    %54 = arith.cmpi eq, %18, %53 : vector<128x1xi32>
    %55 = vector.extract_strided_slice %17 {offsets = [6, 0], sizes = [1, 96], strides = [1, 1]} : vector<8x96xf32> to vector<1x96xf32>
    %56 = vector.shape_cast %54 : vector<128x1xi1> to vector<128x1xi1>
    %57 = vector.broadcast %56 : vector<128x1xi1> to vector<128x96xi1>
    %58 = vector.shape_cast %55 : vector<1x96xf32> to vector<1x96xf32>
    %59 = vector.broadcast %58 : vector<1x96xf32> to vector<128x96xf32>
    %60 = arith.select %57, %59, %52 : vector<128x96xi1>, vector<128x96xf32>
    %c1_i32_13 = arith.constant 1 : i32
    %61 = vector.broadcast %c1_i32_13 : i32 to vector<128x1xi32>
    %62 = arith.cmpi eq, %18, %61 : vector<128x1xi32>
    %63 = vector.extract_strided_slice %17 {offsets = [7, 0], sizes = [1, 96], strides = [1, 1]} : vector<8x96xf32> to vector<1x96xf32>
    %64 = vector.shape_cast %62 : vector<128x1xi1> to vector<128x1xi1>
    %65 = vector.broadcast %64 : vector<128x1xi1> to vector<128x96xi1>
    %66 = vector.shape_cast %63 : vector<1x96xf32> to vector<1x96xf32>
    %67 = vector.broadcast %66 : vector<1x96xf32> to vector<128x96xf32>
    %68 = arith.select %65, %67, %60 : vector<128x96xi1>, vector<128x96xf32>
    %69 = vector.broadcast %51 : vector<1x96xf32> to vector<128x96xf32>
    %70 = arith.mulf %68, %69 : vector<128x96xf32>
    %71 = arith.addf %50, %70 : vector<128x96xf32>
    %72 = vector.extract_strided_slice %3 {offsets = [2, 0], sizes = [1, 96], strides = [1, 1]} : vector<16x128xf32> to vector<1x96xf32>
    %c1_i32_14 = arith.constant 1 : i32
    %73 = tpu.dynamic_rotate %15 by %c1_i32_14 dim 0 : vector<128x96xf32>, i32 -> vector<128x96xf32>
    %c0_i32_15 = arith.constant 0 : i32
    %74 = vector.broadcast %c0_i32_15 : i32 to vector<128x1xi32>
    %75 = arith.cmpi eq, %18, %74 : vector<128x1xi32>
    %76 = vector.extract_strided_slice %17 {offsets = [7, 0], sizes = [1, 96], strides = [1, 1]} : vector<8x96xf32> to vector<1x96xf32>
    %77 = vector.shape_cast %75 : vector<128x1xi1> to vector<128x1xi1>
    %78 = vector.broadcast %77 : vector<128x1xi1> to vector<128x96xi1>
    %79 = vector.shape_cast %76 : vector<1x96xf32> to vector<1x96xf32>
    %80 = vector.broadcast %79 : vector<1x96xf32> to vector<128x96xf32>
    %81 = arith.select %78, %80, %73 : vector<128x96xi1>, vector<128x96xf32>
    %82 = vector.broadcast %72 : vector<1x96xf32> to vector<128x96xf32>
    %83 = arith.mulf %81, %82 : vector<128x96xf32>
    %84 = arith.addf %71, %83 : vector<128x96xf32>
    %85 = vector.extract_strided_slice %3 {offsets = [3, 0], sizes = [1, 96], strides = [1, 1]} : vector<16x128xf32> to vector<1x96xf32>
    %86 = vector.broadcast %85 : vector<1x96xf32> to vector<128x96xf32>
    %87 = arith.mulf %15, %86 : vector<128x96xf32>
    %88 = arith.addf %84, %87 : vector<128x96xf32>
    %89 = vector.extract_strided_slice %15 {offsets = [120, 0], sizes = [8, 96], strides = [1, 1]} : vector<128x96xf32> to vector<8x96xf32>
    %c0_16 = arith.constant 0 : index
    %c0_17 = arith.constant 0 : index
    %90 = vector.load %arg8[%c0_16, %c0_17] : memref<8x96xf32, #tpu.memory_space<vmem>>, vector<8x96xf32>
    tpu.vector_store %arg8[%c0_16, %c0_17], %89 {strides = array<i32>} : memref<8x96xf32, #tpu.memory_space<vmem>>, vector<8x96xf32>,
    %91 = arith.negf %88 : vector<128x96xf32>
    %92 = math.exp %91 : vector<128x96xf32>
    %cst_18 = arith.constant 1.000000e+00 : f32
    %93 = vector.broadcast %cst_18 : f32 to vector<128x96xf32>
    %94 = arith.addf %93, %92 : vector<128x96xf32>
    %95 = arith.divf %93, %94 : vector<128x96xf32>
    %96 = arith.mulf %88, %95 : vector<128x96xf32>
    %97 = vector.extract_strided_slice %96 {offsets = [0, 0], sizes = [128, 64], strides = [1, 1]} : vector<128x96xf32> to vector<128x64xf32>
    %98 = vector.extract_strided_slice %96 {offsets = [0, 64], sizes = [128, 16], strides = [1, 1]} : vector<128x96xf32> to vector<128x16xf32>
    %99 = vector.extract_strided_slice %96 {offsets = [0, 80], sizes = [128, 16], strides = [1, 1]} : vector<128x96xf32> to vector<128x16xf32>
    %100 = vector.broadcast %5 : vector<1x64xf32> to vector<128x64xf32>
    %101 = arith.addf %16, %100 : vector<128x64xf32>
    %cst_19 = arith.constant 0.000000e+00 : f32
    %102 = vector.broadcast %cst_19 : f32 to vector<128x64xf32>
    %103 = arith.maximumf %101, %102 : vector<128x64xf32>
    %104 = math.absf %101 : vector<128x64xf32>
    %cst_20 = arith.constant 0.000000e+00 : f32
    %105 = vector.broadcast %cst_20 : f32 to vector<128x64xf32>
    %106 = arith.subf %105, %104 : vector<128x64xf32>
    %107 = math.exp %106 : vector<128x64xf32>
    %108 = math.log1p %107 : vector<128x64xf32>
    %109 = arith.addf %103, %108 : vector<128x64xf32>
    %110 = vector.broadcast %6 : vector<1x64xf32> to vector<128x64xf32>
    %111 = arith.mulf %109, %110 : vector<128x64xf32>
    %112 = tpu.iota {dimensions = array<i32: 0>} : vector<128x1xi32>
    %c1_i32_21 = arith.constant 1 : i32
    %113 = tpu.dynamic_rotate %111 by %c1_i32_21 dim 0 : vector<128x64xf32>, i32 -> vector<128x64xf32>
    %c1_i32_22 = arith.constant 1 : i32
    %114 = vector.broadcast %c1_i32_22 : i32 to vector<128x1xi32>
    %115 = arith.cmpi sge, %112, %114 : vector<128x1xi32>
    %cst_23 = arith.constant 0.000000e+00 : f32
    %116 = vector.shape_cast %115 : vector<128x1xi1> to vector<128x1xi1>
    %117 = vector.broadcast %116 : vector<128x1xi1> to vector<128x64xi1>
    %118 = vector.broadcast %cst_23 : f32 to vector<128x64xf32>
    %119 = arith.select %117, %113, %118 : vector<128x64xi1>, vector<128x64xf32>
    %120 = arith.addf %111, %119 : vector<128x64xf32>
    %c2_i32_24 = arith.constant 2 : i32
    %121 = tpu.dynamic_rotate %120 by %c2_i32_24 dim 0 : vector<128x64xf32>, i32 -> vector<128x64xf32>
    %c2_i32_25 = arith.constant 2 : i32
    %122 = vector.broadcast %c2_i32_25 : i32 to vector<128x1xi32>
    %123 = arith.cmpi sge, %112, %122 : vector<128x1xi32>
    %cst_26 = arith.constant 0.000000e+00 : f32
    %124 = vector.shape_cast %123 : vector<128x1xi1> to vector<128x1xi1>
    %125 = vector.broadcast %124 : vector<128x1xi1> to vector<128x64xi1>
    %126 = vector.broadcast %cst_26 : f32 to vector<128x64xf32>
    %127 = arith.select %125, %121, %126 : vector<128x64xi1>, vector<128x64xf32>
    %128 = arith.addf %120, %127 : vector<128x64xf32>
    %c4_i32 = arith.constant 4 : i32
    %129 = tpu.dynamic_rotate %128 by %c4_i32 dim 0 : vector<128x64xf32>, i32 -> vector<128x64xf32>
    %c4_i32_27 = arith.constant 4 : i32
    %130 = vector.broadcast %c4_i32_27 : i32 to vector<128x1xi32>
    %131 = arith.cmpi sge, %112, %130 : vector<128x1xi32>
    %cst_28 = arith.constant 0.000000e+00 : f32
    %132 = vector.shape_cast %131 : vector<128x1xi1> to vector<128x1xi1>
    %133 = vector.broadcast %132 : vector<128x1xi1> to vector<128x64xi1>
    %134 = vector.broadcast %cst_28 : f32 to vector<128x64xf32>
    %135 = arith.select %133, %129, %134 : vector<128x64xi1>, vector<128x64xf32>
    %136 = arith.addf %128, %135 : vector<128x64xf32>
    %c8_i32 = arith.constant 8 : i32
    %137 = tpu.dynamic_rotate %136 by %c8_i32 dim 0 : vector<128x64xf32>, i32 -> vector<128x64xf32>
    %c8_i32_29 = arith.constant 8 : i32
    %138 = vector.broadcast %c8_i32_29 : i32 to vector<128x1xi32>
    %139 = arith.cmpi sge, %112, %138 : vector<128x1xi32>
    %cst_30 = arith.constant 0.000000e+00 : f32
    %140 = vector.shape_cast %139 : vector<128x1xi1> to vector<128x1xi1>
    %141 = vector.broadcast %140 : vector<128x1xi1> to vector<128x64xi1>
    %142 = vector.broadcast %cst_30 : f32 to vector<128x64xf32>
    %143 = arith.select %141, %137, %142 : vector<128x64xi1>, vector<128x64xf32>
    %144 = arith.addf %136, %143 : vector<128x64xf32>
    %c16_i32 = arith.constant 16 : i32
    %145 = tpu.dynamic_rotate %144 by %c16_i32 dim 0 : vector<128x64xf32>, i32 -> vector<128x64xf32>
    %c16_i32_31 = arith.constant 16 : i32
    %146 = vector.broadcast %c16_i32_31 : i32 to vector<128x1xi32>
    %147 = arith.cmpi sge, %112, %146 : vector<128x1xi32>
    %cst_32 = arith.constant 0.000000e+00 : f32
    %148 = vector.shape_cast %147 : vector<128x1xi1> to vector<128x1xi1>
    %149 = vector.broadcast %148 : vector<128x1xi1> to vector<128x64xi1>
    %150 = vector.broadcast %cst_32 : f32 to vector<128x64xf32>
    %151 = arith.select %149, %145, %150 : vector<128x64xi1>, vector<128x64xf32>
    %152 = arith.addf %144, %151 : vector<128x64xf32>
    %c32_i32 = arith.constant 32 : i32
    %153 = tpu.dynamic_rotate %152 by %c32_i32 dim 0 : vector<128x64xf32>, i32 -> vector<128x64xf32>
    %c32_i32_33 = arith.constant 32 : i32
    %154 = vector.broadcast %c32_i32_33 : i32 to vector<128x1xi32>
    %155 = arith.cmpi sge, %112, %154 : vector<128x1xi32>
    %cst_34 = arith.constant 0.000000e+00 : f32
    %156 = vector.shape_cast %155 : vector<128x1xi1> to vector<128x1xi1>
    %157 = vector.broadcast %156 : vector<128x1xi1> to vector<128x64xi1>
    %158 = vector.broadcast %cst_34 : f32 to vector<128x64xf32>
    %159 = arith.select %157, %153, %158 : vector<128x64xi1>, vector<128x64xf32>
    %160 = arith.addf %152, %159 : vector<128x64xf32>
    %c64_i32 = arith.constant 64 : i32
    %161 = tpu.dynamic_rotate %160 by %c64_i32 dim 0 : vector<128x64xf32>, i32 -> vector<128x64xf32>
    %c64_i32_35 = arith.constant 64 : i32
    %162 = vector.broadcast %c64_i32_35 : i32 to vector<128x1xi32>
    %163 = arith.cmpi sge, %112, %162 : vector<128x1xi32>
    %cst_36 = arith.constant 0.000000e+00 : f32
    %164 = vector.shape_cast %163 : vector<128x1xi1> to vector<128x1xi1>
    %165 = vector.broadcast %164 : vector<128x1xi1> to vector<128x64xi1>
    %166 = vector.broadcast %cst_36 : f32 to vector<128x64xf32>
    %167 = arith.select %165, %161, %166 : vector<128x64xi1>, vector<128x64xf32>
    %168 = arith.addf %160, %167 : vector<128x64xf32>
    %169 = tpu.transpose %168, [1, 0] : vector<128x64xf32> -> vector<64x128xf32>
    %170 = vector.extract_strided_slice %168 {offsets = [127, 0], sizes = [1, 64], strides = [1, 1]} : vector<128x64xf32> to vector<1x64xf32>
    %171 = arith.mulf %97, %109 : vector<128x64xf32>
    %172 = tpu.iota {dimensions = array<i32: 0>} : vector<128x128xi32>
    %173 = tpu.iota {dimensions = array<i32: 1>} : vector<128x128xi32>
    %174 = arith.cmpi sge, %172, %173 : vector<128x128xi32>
    %175 = arith.truncf %99 : vector<128x16xf32> to vector<128x16xbf16>
    %176 = arith.truncf %98 : vector<128x16xf32> to vector<128x16xbf16>
    %cst_37 = arith.constant dense<0.000000e+00> : vector<128x128xf32>
    %177 = tpu.matmul %175, %176, %cst_37 {dimension_numbers = #tpu.dot_dimension_numbers<[1], [1], [0], [0], [0, 0, 1, 0], [], []>} : vector<128x16xbf16>, vector<128x16xbf16>, vector<128x128xf32> -> vector<128x128xf32>
    %178 = tpu.iota {dimensions = array<i32: 1>} : vector<1x64xi32>
    %cst_38 = arith.constant 0.000000e+00 : f32
    %179 = vector.broadcast %cst_38 : f32 to vector<128x64xf32>
    %180 = vector.extract_strided_slice %168 {offsets = [0, 0], sizes = [128, 1], strides = [1, 1]} : vector<128x64xf32> to vector<128x1xf32>
    %181 = vector.extract_strided_slice %169 {offsets = [0, 0], sizes = [1, 128], strides = [1, 1]} : vector<64x128xf32> to vector<1x128xf32>
    %182 = vector.broadcast %180 : vector<128x1xf32> to vector<128x128xf32>
    %183 = vector.broadcast %181 : vector<1x128xf32> to vector<128x128xf32>
    %184 = arith.subf %182, %183 : vector<128x128xf32>
    %cst_39 = arith.constant -1.000000e+30 : f32
    %185 = vector.broadcast %cst_39 : f32 to vector<128x128xf32>
    %186 = arith.select %174, %184, %185 : vector<128x128xi1>, vector<128x128xf32>
    %187 = math.exp %186 : vector<128x128xf32>
    %188 = arith.mulf %187, %177 : vector<128x128xf32>
    %189 = arith.truncf %188 : vector<128x128xf32> to vector<128x128xbf16>
    %c0_i32_40 = arith.constant 0 : i32
    %190 = vector.broadcast %c0_i32_40 : i32 to vector<1x64xi32>
    %191 = arith.cmpi sge, %178, %190 : vector<1x64xi32>
    %c16_i32_41 = arith.constant 16 : i32
    %192 = vector.broadcast %c16_i32_41 : i32 to vector<1x64xi32>
    %193 = arith.cmpi slt, %178, %192 : vector<1x64xi32>
    %194 = arith.andi %191, %193 : vector<1x64xi1>
    %cst_42 = arith.constant 0.000000e+00 : f32
    %195 = vector.shape_cast %194 : vector<1x64xi1> to vector<1x64xi1>
    %196 = vector.broadcast %195 : vector<1x64xi1> to vector<128x64xi1>
    %197 = vector.broadcast %cst_42 : f32 to vector<128x64xf32>
    %198 = arith.select %196, %171, %197 : vector<128x64xi1>, vector<128x64xf32>
    %199 = arith.truncf %198 : vector<128x64xf32> to vector<128x64xbf16>
    %cst_43 = arith.constant dense<0.000000e+00> : vector<128x64xf32>
    %200 = tpu.matmul %189, %199, %cst_43 {dimension_numbers = #tpu.dot_dimension_numbers<[1], [0], [0], [1], [0, 0, 1, 1], [], []>} : vector<128x128xbf16>, vector<128x64xbf16>, vector<128x64xf32> -> vector<128x64xf32>
    %201 = arith.addf %179, %200 : vector<128x64xf32>
    %202 = vector.extract_strided_slice %168 {offsets = [0, 16], sizes = [128, 1], strides = [1, 1]} : vector<128x64xf32> to vector<128x1xf32>
    %203 = vector.extract_strided_slice %169 {offsets = [16, 0], sizes = [1, 128], strides = [1, 1]} : vector<64x128xf32> to vector<1x128xf32>
    %204 = vector.broadcast %202 : vector<128x1xf32> to vector<128x128xf32>
    %205 = vector.broadcast %203 : vector<1x128xf32> to vector<128x128xf32>
    %206 = arith.subf %204, %205 : vector<128x128xf32>
    %cst_44 = arith.constant -1.000000e+30 : f32
    %207 = vector.broadcast %cst_44 : f32 to vector<128x128xf32>
    %208 = arith.select %174, %206, %207 : vector<128x128xi1>, vector<128x128xf32>
    %209 = math.exp %208 : vector<128x128xf32>
    %210 = arith.mulf %209, %177 : vector<128x128xf32>
    %211 = arith.truncf %210 : vector<128x128xf32> to vector<128x128xbf16>
    %c16_i32_45 = arith.constant 16 : i32
    %212 = vector.broadcast %c16_i32_45 : i32 to vector<1x64xi32>
    %213 = arith.cmpi sge, %178, %212 : vector<1x64xi32>
    %c32_i32_46 = arith.constant 32 : i32
    %214 = vector.broadcast %c32_i32_46 : i32 to vector<1x64xi32>
    %215 = arith.cmpi slt, %178, %214 : vector<1x64xi32>
    %216 = arith.andi %213, %215 : vector<1x64xi1>
    %cst_47 = arith.constant 0.000000e+00 : f32
    %217 = vector.shape_cast %216 : vector<1x64xi1> to vector<1x64xi1>
    %218 = vector.broadcast %217 : vector<1x64xi1> to vector<128x64xi1>
    %219 = vector.broadcast %cst_47 : f32 to vector<128x64xf32>
    %220 = arith.select %218, %171, %219 : vector<128x64xi1>, vector<128x64xf32>
    %221 = arith.truncf %220 : vector<128x64xf32> to vector<128x64xbf16>
    %cst_48 = arith.constant dense<0.000000e+00> : vector<128x64xf32>
    %222 = tpu.matmul %211, %221, %cst_48 {dimension_numbers = #tpu.dot_dimension_numbers<[1], [0], [0], [1], [0, 0, 1, 1], [], []>} : vector<128x128xbf16>, vector<128x64xbf16>, vector<128x64xf32> -> vector<128x64xf32>
    %223 = arith.addf %201, %222 : vector<128x64xf32>
    %224 = vector.extract_strided_slice %168 {offsets = [0, 32], sizes = [128, 1], strides = [1, 1]} : vector<128x64xf32> to vector<128x1xf32>
    %225 = vector.extract_strided_slice %169 {offsets = [32, 0], sizes = [1, 128], strides = [1, 1]} : vector<64x128xf32> to vector<1x128xf32>
    %226 = vector.broadcast %224 : vector<128x1xf32> to vector<128x128xf32>
    %227 = vector.broadcast %225 : vector<1x128xf32> to vector<128x128xf32>
    %228 = arith.subf %226, %227 : vector<128x128xf32>
    %cst_49 = arith.constant -1.000000e+30 : f32
    %229 = vector.broadcast %cst_49 : f32 to vector<128x128xf32>
    %230 = arith.select %174, %228, %229 : vector<128x128xi1>, vector<128x128xf32>
    %231 = math.exp %230 : vector<128x128xf32>
    %232 = arith.mulf %231, %177 : vector<128x128xf32>
    %233 = arith.truncf %232 : vector<128x128xf32> to vector<128x128xbf16>
    %c32_i32_50 = arith.constant 32 : i32
    %234 = vector.broadcast %c32_i32_50 : i32 to vector<1x64xi32>
    %235 = arith.cmpi sge, %178, %234 : vector<1x64xi32>
    %c48_i32 = arith.constant 48 : i32
    %236 = vector.broadcast %c48_i32 : i32 to vector<1x64xi32>
    %237 = arith.cmpi slt, %178, %236 : vector<1x64xi32>
    %238 = arith.andi %235, %237 : vector<1x64xi1>
    %cst_51 = arith.constant 0.000000e+00 : f32
    %239 = vector.shape_cast %238 : vector<1x64xi1> to vector<1x64xi1>
    %240 = vector.broadcast %239 : vector<1x64xi1> to vector<128x64xi1>
    %241 = vector.broadcast %cst_51 : f32 to vector<128x64xf32>
    %242 = arith.select %240, %171, %241 : vector<128x64xi1>, vector<128x64xf32>
    %243 = arith.truncf %242 : vector<128x64xf32> to vector<128x64xbf16>
    %cst_52 = arith.constant dense<0.000000e+00> : vector<128x64xf32>
    %244 = tpu.matmul %233, %243, %cst_52 {dimension_numbers = #tpu.dot_dimension_numbers<[1], [0], [0], [1], [0, 0, 1, 1], [], []>} : vector<128x128xbf16>, vector<128x64xbf16>, vector<128x64xf32> -> vector<128x64xf32>
    %245 = arith.addf %223, %244 : vector<128x64xf32>
    %246 = vector.extract_strided_slice %168 {offsets = [0, 48], sizes = [128, 1], strides = [1, 1]} : vector<128x64xf32> to vector<128x1xf32>
    %247 = vector.extract_strided_slice %169 {offsets = [48, 0], sizes = [1, 128], strides = [1, 1]} : vector<64x128xf32> to vector<1x128xf32>
    %248 = vector.broadcast %246 : vector<128x1xf32> to vector<128x128xf32>
    %249 = vector.broadcast %247 : vector<1x128xf32> to vector<128x128xf32>
    %250 = arith.subf %248, %249 : vector<128x128xf32>
    %cst_53 = arith.constant -1.000000e+30 : f32
    %251 = vector.broadcast %cst_53 : f32 to vector<128x128xf32>
    %252 = arith.select %174, %250, %251 : vector<128x128xi1>, vector<128x128xf32>
    %253 = math.exp %252 : vector<128x128xf32>
    %254 = arith.mulf %253, %177 : vector<128x128xf32>
    %255 = arith.truncf %254 : vector<128x128xf32> to vector<128x128xbf16>
    %c48_i32_54 = arith.constant 48 : i32
    %256 = vector.broadcast %c48_i32_54 : i32 to vector<1x64xi32>
    %257 = arith.cmpi sge, %178, %256 : vector<1x64xi32>
    %c64_i32_55 = arith.constant 64 : i32
    %258 = vector.broadcast %c64_i32_55 : i32 to vector<1x64xi32>
    %259 = arith.cmpi slt, %178, %258 : vector<1x64xi32>
    %260 = arith.andi %257, %259 : vector<1x64xi1>
    %cst_56 = arith.constant 0.000000e+00 : f32
    %261 = vector.shape_cast %260 : vector<1x64xi1> to vector<1x64xi1>
    %262 = vector.broadcast %261 : vector<1x64xi1> to vector<128x64xi1>
    %263 = vector.broadcast %cst_56 : f32 to vector<128x64xf32>
    %264 = arith.select %262, %171, %263 : vector<128x64xi1>, vector<128x64xf32>
    %265 = arith.truncf %264 : vector<128x64xf32> to vector<128x64xbf16>
    %cst_57 = arith.constant dense<0.000000e+00> : vector<128x64xf32>
    %266 = tpu.matmul %255, %265, %cst_57 {dimension_numbers = #tpu.dot_dimension_numbers<[1], [0], [0], [1], [0, 0, 1, 1], [], []>} : vector<128x128xbf16>, vector<128x64xbf16>, vector<128x64xf32> -> vector<128x64xf32>
    %267 = arith.addf %245, %266 : vector<128x64xf32>
    %268 = arith.truncf %99 : vector<128x16xf32> to vector<128x16xbf16>
    %c0_58 = arith.constant 0 : index
    %c0_59 = arith.constant 0 : index
    %269 = vector.load %arg7[%c0_58, %c0_59] : memref<16x64xf32, #tpu.memory_space<vmem>>, vector<16x64xf32>
    %270 = arith.truncf %269 : vector<16x64xf32> to vector<16x64xbf16>
    %cst_60 = arith.constant dense<0.000000e+00> : vector<128x64xf32>
    %271 = tpu.matmul %268, %270, %cst_60 {dimension_numbers = #tpu.dot_dimension_numbers<[1], [0], [0], [1], [0, 0, 1, 1], [], []>} : vector<128x16xbf16>, vector<16x64xbf16>, vector<128x64xf32> -> vector<128x64xf32>
    %272 = math.exp %168 : vector<128x64xf32>
    %273 = arith.mulf %271, %272 : vector<128x64xf32>
    %274 = vector.broadcast %170 : vector<1x64xf32> to vector<128x64xf32>
    %275 = arith.subf %274, %168 : vector<128x64xf32>
    %276 = math.exp %275 : vector<128x64xf32>
    %277 = arith.mulf %276, %109 : vector<128x64xf32>
    %278 = arith.mulf %97, %277 : vector<128x64xf32>
    %279 = arith.truncf %98 : vector<128x16xf32> to vector<128x16xbf16>
    %280 = arith.truncf %278 : vector<128x64xf32> to vector<128x64xbf16>
    %cst_61 = arith.constant dense<0.000000e+00> : vector<16x64xf32>
    %281 = tpu.matmul %279, %280, %cst_61 {dimension_numbers = #tpu.dot_dimension_numbers<[0], [0], [1], [1], [0, 1, 1, 1], [], []>} : vector<128x16xbf16>, vector<128x64xbf16>, vector<16x64xf32> -> vector<16x64xf32>
    %c0_62 = arith.constant 0 : index
    %c0_63 = arith.constant 0 : index
    %282 = vector.load %arg7[%c0_62, %c0_63] : memref<16x64xf32, #tpu.memory_space<vmem>>, vector<16x64xf32>
    %283 = math.exp %170 : vector<1x64xf32>
    %284 = vector.broadcast %283 : vector<1x64xf32> to vector<16x64xf32>
    %285 = arith.mulf %282, %284 : vector<16x64xf32>
    %286 = arith.addf %285, %281 : vector<16x64xf32>
    %c0_64 = arith.constant 0 : index
    %c0_65 = arith.constant 0 : index
    %287 = vector.load %arg7[%c0_64, %c0_65] : memref<16x64xf32, #tpu.memory_space<vmem>>, vector<16x64xf32>
    tpu.vector_store %arg7[%c0_64, %c0_65], %286 {strides = array<i32>} : memref<16x64xf32, #tpu.memory_space<vmem>>, vector<16x64xf32>,
    %288 = arith.addf %267, %273 : vector<128x64xf32>
    %289 = vector.broadcast %7 : vector<1x64xf32> to vector<128x64xf32>
    %290 = arith.mulf %97, %289 : vector<128x64xf32>
    %291 = arith.addf %288, %290 : vector<128x64xf32>
    %292 = arith.negf %14 : vector<128x64xf32>
    %293 = math.exp %292 : vector<128x64xf32>
    %cst_66 = arith.constant 1.000000e+00 : f32
    %294 = vector.broadcast %cst_66 : f32 to vector<128x64xf32>
    %295 = arith.addf %294, %293 : vector<128x64xf32>
    %296 = arith.divf %294, %295 : vector<128x64xf32>
    %297 = arith.mulf %14, %296 : vector<128x64xf32>
    %298 = arith.mulf %291, %297 : vector<128x64xf32>
    %299 = arith.mulf %298, %298 : vector<128x64xf32>
    %cst_67 = arith.constant dense<0.000000e+00> : vector<128xf32>
    %300 = vector.multi_reduction <add>, %299, %cst_67 [1] : vector<128x64xf32> to vector<128xf32>
    %301 = vector.shape_cast %300 : vector<128xf32> to vector<128x1xf32>
    %cst_68 = arith.constant 6.400000e+01 : f32
    %302 = vector.broadcast %cst_68 : f32 to vector<128x1xf32>
    %303 = arith.divf %301, %302 : vector<128x1xf32>
    %cst_69 = arith.constant 9.99999974E-6 : f32
    %304 = vector.broadcast %cst_69 : f32 to vector<128x1xf32>
    %305 = arith.addf %303, %304 : vector<128x1xf32>
    %306 = math.rsqrt %305 : vector<128x1xf32>
    %307 = vector.broadcast %306 : vector<128x1xf32> to vector<128x64xf32>
    %308 = arith.mulf %298, %307 : vector<128x64xf32>
    %309 = vector.broadcast %8 : vector<1x64xf32> to vector<128x64xf32>
    %310 = arith.mulf %308, %309 : vector<128x64xf32>
    %311 = arith.truncf %310 : vector<128x64xf32> to vector<128x64xbf16>
    %c0_70 = arith.constant 0 : index
    %c0_71 = arith.constant 0 : index
    %312 = vector.load %arg4[%c0_70, %c0_71] : memref<64x128xbf16, #tpu.memory_space<vmem>>, vector<64x128xbf16>
    %cst_72 = arith.constant dense<0.000000e+00> : vector<128x128xf32>
    %313 = tpu.matmul %311, %312, %cst_72 {dimension_numbers = #tpu.dot_dimension_numbers<[1], [0], [0], [1], [0, 0, 1, 1], [], []>} : vector<128x64xbf16>, vector<64x128xbf16>, vector<128x128xf32> -> vector<128x128xf32>
    %314 = arith.truncf %313 : vector<128x128xf32> to vector<128x128xbf16>
    %c0_73 = arith.constant 0 : index
    %c0_74 = arith.constant 0 : index
    %c0_75 = arith.constant 0 : index
    %315 = vector.load %arg6[%c0_73, %c0_74, %c0_75] : memref<1x128x128xbf16, #tpu.memory_space<vmem>>, vector<1x128x128xbf16>
    %316 = vector.shape_cast %315 : vector<1x128x128xbf16> to vector<128x128xbf16>
    %317 = vector.shape_cast %314 : vector<128x128xbf16> to vector<1x128x128xbf16>
    tpu.vector_store %arg6[%c0_73, %c0_74, %c0_75], %317 {strides = array<i32>} : memref<1x128x128xbf16, #tpu.memory_space<vmem>>, vector<1x128x128xbf16>,
    return
  }
  func.func @transform_0(%arg0: i32, %arg1: i32) -> (i32, i32, i32) {
    %c0_i32 = arith.constant 0 : i32
    %c0_i32_0 = arith.constant 0 : i32
    return %arg0, %arg1, %c0_i32 : i32, i32, i32
  }
  func.func @transform_1(%arg0: i32, %arg1: i32) -> (i32, i32) {
    %c0_i32 = arith.constant 0 : i32
    %c0_i32_0 = arith.constant 0 : i32
    %c0_i32_1 = arith.constant 0 : i32
    return %c0_i32, %c0_i32_0 : i32, i32
  }
  func.func @transform_2(%arg0: i32, %arg1: i32) -> (i32, i32) {
    %c0_i32 = arith.constant 0 : i32
    %c0_i32_0 = arith.constant 0 : i32
    %c0_i32_1 = arith.constant 0 : i32
    return %c0_i32, %c0_i32_0 : i32, i32
  }
  func.func @transform_3(%arg0: i32, %arg1: i32) -> (i32, i32) {
    %c0_i32 = arith.constant 0 : i32
    %c0_i32_0 = arith.constant 0 : i32
    %c0_i32_1 = arith.constant 0 : i32
    return %c0_i32, %c0_i32_0 : i32, i32
  }
  func.func @transform_4(%arg0: i32, %arg1: i32) -> (i32, i32, i32) {
    %c0_i32 = arith.constant 0 : i32
    %c0_i32_0 = arith.constant 0 : i32
    return %arg0, %arg1, %c0_i32 : i32, i32, i32
  }
}

</mosaic_0001>

<bundles_post_ra>
// kernel: tpu_custom_call.1
= control target key start
LH: loop header
LB: loop body
LE: loop exit
PB: predicated region body
PF: predicated region fallthrough
CT: control target
= control target key end

     0   :  { %9 = vsyncpa [#allocation5], 0  ;;  %s11137_s0 = inlined_call_operand.vmem [shape: f32[2,256,32], index: 0, kind: input, shape index: {}]   ;;  %s11138_s1 = inlined_call_operand.vmem [shape: bf16[32,256], index: 1, kind: input, shape index: {}]   ;;  %s11139_s2 = inlined_call_operand.vmem [shape: bf16[64,128], index: 2, kind: input, shape index: {}]   ;;  %s11140_s3 = inlined_call_operand.vmem [shape: f32[16,128], index: 3, kind: input, shape index: {}]   ;;  %s11141_s4 = inlined_call_operand.hbm [shape: bf16[2,256,128], index: 4, kind: output, shape index: {}]  }
   0x1   :  { %11 = vsyncpa [#allocation5 + $0x1], 0  ;;  %s7160_s15 = smov 0   ;;  %s7162_s16 = smov 0  }
   0x2   :  { %s7164_s17 = smov 0   ;;  %s7166_s18 = smov 0  }
   0x3   :  { %s7168_s19 = smov 0   ;;  %s7170_s20 = smov 0  }
   0x4   :  { %s7172_s21 = smov 0   ;;  %s7174_s22 = smov 0  }
   0x5 LB: > { %s5838_s23 = sadd.s32 4294967295, %s7119_s22   ;;  %s5839_s24 = sadd.s32 4294967294, %s7119_s22   ;;  %s7119_s22 = sphi %s7174_s22, %s17_s22   ;;  %s7115_s21 = sphi %s7172_s21, %s11849_s21   ;;  %s7111_s20 = sphi %s7170_s20, %s11848_s20   ;;  %s7107_s19 = sphi %s7168_s19, %s11847_s19   ;;  %s7103_s18 = sphi %s7166_s18, %s11846_s18   ;;  %s7099_s17 = sphi %s7164_s17, %s11845_s17   ;;  %s7095_s16 = sphi %s7162_s16, %s11844_s16   ;;  %s7091_s15 = sphi %s7160_s15, %s11843_s15  }
   0x6   : > { %s26_s25 = sadd.s32 1, %s7111_s20  ;;  %s29_s26 = sadd.s32 1, %s7115_s21 }
   0x7   : > { %p27_p0 = scmp.ge.s32.totalorder %s26_s25, 2  ;;  %p139_p1 = scmp.ne.s32.totalorder %s7099_s17, %s7095_s16 }
   0x8   : > { %p140_p2 = scmp.eq.s32.totalorder %s5838_s23, 3  ;;  %p145_p5 = scmp.ne.s32.totalorder %s7095_s16, %s7091_s15 }
   0x9   : > { %s11851_s25 = smov (%p27_p0, %s26_s25), 0  ;;  %s11853_s26 = smov (!%p27_p0, %s29_s26), %s7115_s21 }
   0xa   : > { %s125_s27 = ssub.s32 %s7111_s20, %s11851_s25  ;;  %p7211_p3 = por %p140_p2, %p139_p1 }
   0xb   : > { %p31_p4 = scmp.ge.s32.totalorder %s11853_s26, 2  ;;  %p146_p6 = scmp.eq.s32.totalorder %s5839_s24, 3 }
   0xc   : > { %p5842_p7 = scmp.ge.s32.totalorder %s7119_s22, 1  ;;  %p186_p9 = scmp.lt.s32.totalorder %s7119_s22, 5 }
   0xd   : > { %s11855_s26 = smov (%p31_p4, %s11853_s26), 0  ;;  %p7220_p8 = por %p146_p6, %p145_p5 }
   0xe   : > { %s124_s30 = ssub.s32 %s7115_s21, %s11855_s26  ;;  %s129_s5 = sadd.s32 1, %s7099_s17 }
   0xf   : > { %s126_s6 = sor.u32 %s125_s27, %s124_s30  ;;  %p187_p10 = pnand %p5842_p7, %p186_p9 }
  0x10   : > { %p127_p11 = scmp.eq.s32.totalorder %s126_s6, 0 }
  0x11   : > { %190 = sbr.rel (%p187_p10) target bundleno = 3283 (0xcd3), region = 36 }
  0x12   : > { %s7229_s7 = scalar_select %p127_p11, %s7099_s17, %s129_s5  }
  0x16   : > { %s213_s8 = sand.u32 1, %s7095_s16   ;;  %s7233_s9 = sshll.u32 %s7103_s18, 4 }
  0x17   : > { %s5843_s10 = sshll.u32 %s213_s8, 6  ;;  %p217_p12 = scmp.lt.s32.totalorder %s7107_s19, 1 }
  0x18   : > { %p219_p13 = scmp.lt.s32.totalorder %s7233_s9, 31  ;;  %s7246_s5 = scalar_lea.vmem [#allocation4], %s5843_s10 }
  0x19   : > { %s218_s11 = scalar_select %p217_p12, %s7107_s19, 1 }
  0x1a   : > { %s220_s12 = scalar_select %p219_p13, %s7233_s9, 31 }
  0x1b   : > { %s5845_s13 = sshll.u32 %s218_s11, 5  ;;  %p5847_p0 = scmp.ne.s32.totalorder %s7103_s18, 0 }
  0x1c   : > { %s222_s14 = sadd.s32 %s5845_s13, %s220_s12 }
  0x1d   : > { %s5846_s23 = sshll.u32 %s222_s14, 3  ;;  %231 = sbr.rel (%p5847_p0) target bundleno = 37 (0x25), region = 40 }
  0x1e   : > { %s7244_s30 = scalar_lea.vmem %s11137_s0, %s5846_s23 }
  0x22   : > { %vm232_vm0 = vcmask 523264   ;;  %vm235_vm1 = vcmask 785408   ;;  %v7121_v0 = vmov 0.0  }
  0x23   : > { %233 = vst.msk [vmem:[#allocation2] sm:$0xff] %vm232_vm0, %v7121_v0  ;;  %234 = vst.msk [vmem:[#allocation2 + $0x8] sm:$0xff] %vm232_vm0, %v7121_v0 }
  0x24   : > { %236 = vst.msk [vmem:[#allocation3] sm:$0xff] %vm235_vm1, %v7121_v0 }
  0x25 PF: > { %v6583_v1 = vld [vmem:[%s11138_s1 + $0x14] ss:$8 sps:$4 sm:$0xff]   ;;  %v11142_v2 = vlaneseq  ;;  %v6585_v3 = vld [vmem:[%s11138_s1 + $0x10] ss:$8 sps:$4 sm:$0xff]   ;;  %v7122_v4 = vmov 0   ;;  %v239_v8 = vld [vmem:[%s7244_s30] sm:$0xff] }
  0x26   : > { %344 = vmatprep.mubr.bf16.mxu1 %v7122_v4  ;;  %324 = vmatprep.subr.bf16.mxu1 %v6583_v1  ;;  %v6586_v5 = vld [vmem:[%s11138_s1 + $0x4] ss:$8 sps:$4 sm:$0xff]   ;;  %v6588_v7 = vld [vmem:[%s11138_s1] ss:$8 sps:$4 sm:$0xff]   ;;  %vm287_vm2 = vcmask 261120   ;;  %v241_v15 = vld [vmem:[%s7244_s30 + $0x10] sm:$0xff] }
  0x27   : > { %v7259_v6 = vshrl.u32 %v11142_v2, 7  ;;  %325 = vmatpush1.bf16.msra.mxu1 %v6585_v3  ;;  %v240_v9 = vld [vmem:[%s7244_s30 + $0x8] sm:$0xff]  ;;  %v237_v13 = vld [vmem:[%s11140_s3] sm:$0xff]  ;;  %v242_v16 = vld [vmem:[%s7244_s30 + $0x18] sm:$0xff]  ;;  %s7123_s6 = smov 32   ;;  %s7126_s10 = smov 64  }
  0x28   : > { %326 = vmatprep.subr.bf16.mxu1 %v6586_v5  ;;  %v255_v11 = vpack.c.bf16 %v240_v9, %v239_v8  ;;  %v256_v18 = vpack.c.bf16 %v242_v16, %v241_v15  ;;  %v243_v19 = vld [vmem:[%s7244_s30 + $0x20] sm:$0xff]  ;;  %v244_v20 = vld [vmem:[%s7244_s30 + $0x28] sm:$0xff]  ;;  %v245_v22 = vld [vmem:[%s7244_s30 + $0x30] sm:$0xff]  ;;  %s7127_s18 = smov 48   ;;  %s6034_s23 = sshll.u32 %s7107_s19, 5 }
  0x29   : > { %v11144_v10 = vsub.s32 5, %v7259_v6  ;;  %v11143_v12 = vsub.s32 6, %v7259_v6  ;;  %v257_v21 = vpack.c.bf16 %v244_v20, %v243_v19  ;;  %v246_v23 = vld [vmem:[%s7244_s30 + $0x38] sm:$0xff]  ;;  %v247_v25 = vld [vmem:[%s7244_s30 + $0x40] sm:$0xff]  ;;  %v248_v26 = vld [vmem:[%s7244_s30 + $0x48] sm:$0xff]  ;;  %vm967_vm10 = vcmp.lt.s32.totalorder %v7259_v6, 1  ;;  %s5753_s24 = sadd.s32 %s6034_s23, %s7233_s9 }
  0x2a   : > { %v258_v24 = vpack.c.bf16 %v246_v23, %v245_v22  ;;  %v259_v27 = vpack.c.bf16 %v248_v26, %v247_v25  ;;  %v249_v28 = vld [vmem:[%s7244_s30 + $0x50] sm:$0xff]  ;;  %v250_v29 = vld [vmem:[%s7244_s30 + $0x58] sm:$0xff]  ;;  %v251_v31 = vld [vmem:[%s7244_s30 + $0x60] sm:$0xff]  ;;  %vm1718_vm11 = vcmp.ge.s32.totalorder %v7259_v6, 1  ;;  %vm866_vm1 = vcmp.lt.s32.totalorder %v7259_v6, 2  ;;  %s5756_s27 = sshll.u32 %s7246_s5, 4  ;;  %s11073_s27 = int_to_ptr.vmem [resolvable:$true] %s5756_s27 }
  0x2b   : > { %327 = vmatpush1.bf16.msra.mxu1 %v6588_v7  ;;  %v1337_v14 = vrot.slane %v237_v13, %v11144_v10  ;;  %v1601_v17 = vrot.slane %v237_v13, %v11143_v12  ;;  %v260_v30 = vpack.c.bf16 %v250_v29, %v249_v28  ;;  %v252_v32 = vld [vmem:[%s7244_s30 + $0x68] sm:$0xff]  ;;  %v253_v34 = vld [vmem:[%s7244_s30 + $0x70] sm:$0xff]  ;;  %v254_v35 = vld [vmem:[%s7244_s30 + $0x78] sm:$0xff]  ;;  %s7124_s30 = smov 96   ;;  %s11084_s9 = scalar_lea.sflag [#allocation5], %s213_s8 }
  0x2c   : > { %v261_v33 = vpack.c.bf16 %v252_v32, %v251_v31  ;;  %v262_v36 = vpack.c.bf16 %v254_v35, %v253_v34  ;;  %s7133_s13 = smov [#allocation4]  }
  0x2d   : > { %1339 = vrot.lane.b32.xlu0 %v1337_v14, %s7123_s6 }
  0x2e   : > { %5852 = vmatmul.mubr.msk.bf16.vlgmr.msra.gmra.mxu1 %vm287_vm2, %v255_v11 }
  0x2f   : > { %354 = vmatprep.mubr.bf16.mxu1 %v7122_v4 }
  0x31   : > { %1603 = vrot.lane.b32.xlu0 %v1601_v17, %s7123_s6 }
  0x36   : > { %5853 = vmatmul.mubr.msk.bf16.gmra.mxu1 %vm287_vm2, %v256_v18 }
  0x37   : > { %364 = vmatprep.mubr.bf16.mxu1 %v7122_v4 }
  0x3e   : > { %5854 = vmatmul.mubr.msk.bf16.gmra.mxu1 %vm287_vm2, %v257_v21 }
  0x3f   : > { %374 = vmatprep.mubr.bf16.mxu1 %v7122_v4 }
  0x46   : > { %5855 = vmatmul.mubr.msk.bf16.gmra.mxu1 %vm287_vm2, %v258_v24 }
  0x47   : > { %384 = vmatprep.mubr.bf16.mxu1 %v7122_v4 }
  0x4e   : > { %5856 = vmatmul.mubr.msk.bf16.gmra.mxu1 %vm287_vm2, %v259_v27 }
  0x4f   : > { %394 = vmatprep.mubr.bf16.mxu1 %v7122_v4 }
  0x56   : > { %5857 = vmatmul.mubr.msk.bf16.gmra.mxu1 %vm287_vm2, %v260_v30 }
  0x57   : > { %404 = vmatprep.mubr.bf16.mxu1 %v7122_v4 }
  0x5e   : > { %5858 = vmatmul.mubr.msk.bf16.gmra.mxu1 %vm287_vm2, %v261_v33 }
  0x5f   : > { %414 = vmatprep.mubr.bf16.mxu1 %v7122_v4 }
  0x66   : > { %5859 = vmatmul.mubr.msk.bf16.gmra.mxu1 %vm287_vm2, %v262_v36  ;;  %vm1958_vm2 = vcmp.ge.s32.totalorder %v7259_v6, 2 }
  0x9f   : > { %v7325_v50 = vpop.permute.xlu0 %1339 }
  0xa3   : > { %v7376_v31 = vpop.permute.xlu0 %1603 }
  0xee   : > { %v7299_v37 = vpop.f32.mrf.mxu1 }
  0xef   : > { %11348 = vst [vmem:[#allocation7_spill] sm:$0xff] %v7299_v37 }
  0xf0   : > { %v7301_v38 = vpop.f32.mrf.mxu1 }
  0xf1   : > { %11349 = vst [vmem:[#allocation8_spill] sm:$0xff] %v7301_v38  ;;  %v1342_v53 = vadd.f32 %v7325_v50, %v7301_v38 }
  0xf2   : > { %v7303_v39 = vpop.f32.mrf.mxu1 }
  0xf3   : > { %11350 = vst [vmem:[#allocation9_spill] sm:$0xff] %v7303_v39  ;;  %v1374_v56 = vand.u32 2147483647, %v1342_v53  ;;  %v1358_v30 = vmax.f32 %v1342_v53, 0.0 }
  0xf4   : > { %v7305_v40 = vpop.f32.mrf.mxu1 }
  0xf5   : > { %11351 = vst [vmem:[#allocation10_spill] sm:$0xff] %v7305_v40  ;;  %v1390_v59 = vsub.f32 0.0, %v1374_v56 }
  0xf6   : > { %v7307_v41 = vpop.f32.mrf.mxu1 }
  0xf7   : > { %11352 = vst [vmem:[#allocation11_spill] sm:$0xff] %v7307_v41  ;;  %v1406_v62 = vmul.f32 1.442695, %v1390_v59 }
  0xf8   : > { %v7309_v42 = vpop.f32.mrf.mxu1 }
  0xf9   : > { %11353 = vst [vmem:[#allocation12_spill] sm:$0xff] %v7309_v42  ;;  %6593 = vpow2.f32 %v1406_v62 }
  0xfa   : > { %v7311_v43 = vpop.f32.mrf.mxu1 }
  0xfb   : > { %11354 = vst [vmem:[#allocation13_spill] sm:$0xff] %v7311_v43 }
  0xfc   : > { %v7313_v44 = vpop.f32.mrf.mxu1 }
  0xfd   : > { %11355 = vst [vmem:[#allocation14_spill] sm:$0xff] %v7313_v44 }
  0xfe   : > { %v7315_v45 = vpop.f32.mrf.mxu1 }
  0xff   : > { %11356 = vst [vmem:[#allocation15_spill] sm:$0xff] %v7315_v45 }
 0x100   : > { %v7317_v46 = vpop.f32.mrf.mxu1 }
 0x101   : > { %11357 = vst [vmem:[#allocation16_spill] sm:$0xff] %v7317_v46 }
 0x102   : > { %v7319_v47 = vpop.f32.mrf.mxu1 }
 0x103   : > { %11358 = vst [vmem:[#allocation17_spill] sm:$0xff] %v7319_v47 }
 0x104   : > { %v7321_v48 = vpop.f32.mrf.mxu1 }
 0x105   : > { %11359 = vst [vmem:[#allocation18_spill] sm:$0xff] %v7321_v48 }
 0x106   : > { %v7323_v49 = vpop.f32.mrf.mxu1  ;;  %v6594_v7 = vpop.eup %6593 }
 0x107   : > { %11360 = vst [vmem:[#allocation19_spill] sm:$0xff] %v7323_v49  ;;  %v1438_v9 = vadd.f32 1.0, %v6594_v7  ;;  %v1441_v15 = vmul.f32 -0.5, %v6594_v7  ;;  %v1444_v22 = vand.u32 2147483647, %v6594_v7 }
 0x108   : > { %v7327_v51 = vpop.f32.mrf.mxu1 }
 0x109   : > { %11361 = vst [vmem:[#allocation20_spill] sm:$0xff] %v7327_v51  ;;  %6595 = vlog2.f32 %v1438_v9  ;;  %v1442_v20 = vadd.f32 1.0, %v1441_v15  ;;  %vm1445_vm3 = vcmp.lt.f32.partialorder %v1444_v22, 0.0004427343 }
 0x10a   : > { %v7329_v52 = vpop.f32.mrf.mxu1 }
 0x10b   : > { %11362 = vst [vmem:[#allocation21_spill] sm:$0xff] %v7329_v52  ;;  %v1443_v28 = vmul.f32 %v6594_v7, %v1442_v20 }
 0x10c   : > { %v7333_v54 = vpop.f32.mrf.mxu1 }
 0x10e   : > { %v7335_v55 = vpop.f32.mrf.mxu1 }
 0x10f   : > { %11363 = vst [vmem:[#allocation22_spill] sm:$0xff] %v7335_v55 }
 0x110   : > { %v7337_v57 = vpop.f32.mrf.mxu1 }
 0x111   : > { %11364 = vst [vmem:[#allocation23_spill] sm:$0xff] %v7337_v57 }
 0x112   : > { %v7339_v58 = vpop.f32.mrf.mxu1 }
 0x113   : > { %11365 = vst [vmem:[#allocation24_spill] sm:$0xff] %v7339_v58 }
 0x114   : > { %v7341_v60 = vpop.f32.mrf.mxu1 }
 0x116   : > { %v7343_v61 = vpop.f32.mrf.mxu1  ;;  %v6596_v24 = vpop.eup %6595 }
 0x117   : > { %11366 = vst [vmem:[#allocation25_spill] sm:$0xff] %v7343_v61  ;;  %v1440_v27 = vmul.f32 0.6931472, %v6596_v24 }
 0x118   : > { %v7345_v63 = vpop.f32.mrf.mxu1 }
 0x119   : > { %v1446_v32 = vsel %vm1445_vm3, %v1443_v28, %v1440_v27 }
 0x11a   : > { %v7347_v0 = vpop.f32.mrf.mxu1  ;;  %v7378_v34 = vadd.f32 %v1446_v32, %v1358_v30 }
 0x11b   : > { %11367 = vst [vmem:[#allocation26_spill] sm:$0xff] %v7347_v0 }
 0x11c   : > { %v7349_v1 = vpop.f32.mrf.mxu1  ;;  %11372 = vst [vmem:[#allocation31_spill] sm:$0xff] %v7378_v34  ;;  %v7382_v36 = vmul.f32 %v7376_v31, %v7378_v34 }
 0x11e   : > { %v7351_v3 = vpop.f32.mrf.mxu1  ;;  %1638 = vrot.lane.b32.xlu1 %v7382_v36, %s7124_s30 }
 0x11f   : > { %11368 = vst [vmem:[#allocation27_spill] sm:$0xff] %v7351_v3 }
 0x120   : > { %v7353_v4 = vpop.f32.mrf.mxu1 }
 0x122   : > { %v7355_v5 = vpop.f32.mrf.mxu1 }
 0x123   : > { %11369 = vst [vmem:[#allocation28_spill] sm:$0xff] %v7355_v5 }
 0x124   : > { %v7357_v8 = vpop.f32.mrf.mxu1 }
 0x125   : > { %v7365_v14 = vadd.f32 %v7325_v50, %v7357_v8 }
 0x126   : > { %v7359_v11 = vpop.f32.mrf.mxu1 }
 0x127   : > { %11370 = vst [vmem:[#allocation29_spill] sm:$0xff] %v7359_v11  ;;  %v1387_v16 = vand.u32 2147483647, %v7365_v14 }
 0x128   : > { %v7361_v13 = vpop.f32.mrf.mxu1 }
 0x129   : > { %v1403_v18 = vsub.f32 0.0, %v1387_v16  ;;  %v1356_v19 = vadd.f32 %v7325_v50, %v7361_v13 }
 0x12a   : > { %v7368_v17 = vpop.f32.mrf.mxu1 }
 0x12b   : > { %11371 = vst [vmem:[#allocation30_spill] sm:$0xff] %v7368_v17  ;;  %v1388_v23 = vand.u32 2147483647, %v1356_v19  ;;  %v1432_v25 = vmul.f32 1.442695, %v1403_v18  ;;  %v1372_v30 = vmax.f32 %v1356_v19, 0.0 }
 0x12c   : > { %v7372_v21 = vpop.f32.mrf.mxu1 }
 0x12d   : > { %v1357_v26 = vadd.f32 %v7325_v50, %v7372_v21  ;;  %v1404_v29 = vsub.f32 0.0, %v1388_v23  ;;  %6597 = vpow2.f32 %v1432_v25 }
 0x12f   : > { %v1434_v33 = vmul.f32 1.442695, %v1404_v29  ;;  %v1389_v35 = vand.u32 2147483647, %v1357_v26 }
 0x131   : > { %6599 = vpow2.f32 %v1434_v33  ;;  %v1405_v56 = vsub.f32 0.0, %v1389_v35 }
 0x133   : > { %v1436_v53 = vmul.f32 1.442695, %v1405_v56 }
 0x135   : > { %6601 = vpow2.f32 %v1436_v53 }
 0x13a   : > { %v6598_v59 = vpop.eup %6597 }
 0x13b   : > { %v1555_v7 = vadd.f32 1.0, %v6598_v59  ;;  %v1558_v23 = vmul.f32 -0.5, %v6598_v59  ;;  %v1561_v56 = vand.u32 2147483647, %v6598_v59 }
 0x13d   : > { %v1559_v32 = vadd.f32 1.0, %v1558_v23  ;;  %vm1562_vm5 = vcmp.lt.f32.partialorder %v1561_v56, 0.0004427343 }
 0x13e   : > { %v6600_v62 = vpop.eup %6599 }
 0x13f   : > { %v1564_v9 = vadd.f32 1.0, %v6600_v62  ;;  %v1567_v18 = vmul.f32 -0.5, %v6600_v62  ;;  %v1570_v22 = vand.u32 2147483647, %v6600_v62 }
 0x141   : > { %6603 = vlog2.f32 %v1564_v9  ;;  %v1568_v20 = vadd.f32 1.0, %v1567_v18  ;;  %vm1571_vm4 = vcmp.lt.f32.partialorder %v1570_v22, 0.0004427343  ;;  %v1560_v18 = vmul.f32 %v6598_v59, %v1559_v32 }
 0x142   : > { %6605 = vlog2.f32 %v1555_v7  ;;  %v6602_v15 = vpop.eup %6601  ;;  %v1371_v22 = vmax.f32 %v7365_v14, 0.0  ;;  %v7422_v59 = vadd.f32 %v7325_v50, %v7309_v42  ;;  %v7432_v32 = vadd.f32 %v7325_v50, %v7317_v46 }
 0x143   : > { %v1573_v16 = vadd.f32 1.0, %v6602_v15  ;;  %v1576_v24 = vmul.f32 -0.5, %v6602_v15  ;;  %v1569_v28 = vmul.f32 %v6600_v62, %v1568_v20  ;;  %v1579_v7 = vand.u32 2147483647, %v6602_v15 }
 0x144   : > { %v1373_v62 = vmax.f32 %v1357_v26, 0.0  ;;  %v7418_v26 = vadd.f32 %v7325_v50, %v7313_v44  ;;  %v1360_v45 = vmax.f32 %v7422_v59, 0.0 }
 0x145   : > { %6607 = vlog2.f32 %v1573_v16  ;;  %v1577_v35 = vadd.f32 1.0, %v1576_v24  ;;  %vm1580_vm6 = vcmp.lt.f32.partialorder %v1579_v7, 0.0004427343  ;;  %v7437_v7 = vadd.f32 %v7325_v50, %v7333_v54 }
 0x14e   : > { %v6604_v25 = vpop.eup %6603 }
 0x14f   : > { %v1566_v27 = vmul.f32 0.6931472, %v6604_v25  ;;  %v6606_v29 = vpop.eup %6605  ;;  %v1578_v25 = vmul.f32 %v6602_v15, %v1577_v35 }
 0x150   : > { %v1557_v9 = vmul.f32 0.6931472, %v6606_v29  ;;  %v7427_v29 = vadd.f32 %v7325_v50, %v7321_v48 }
 0x151   : > { %v1572_v33 = vsel %vm1571_vm4, %v1569_v28, %v1566_v27  ;;  %v1377_v28 = vand.u32 2147483647, %v7418_v26 }
 0x152   : > { %v7386_v53 = vadd.f32 %v1572_v33, %v1372_v30  ;;  %v6608_v2 = vpop.eup %6607  ;;  %v1563_v19 = vsel %vm1562_vm5, %v1560_v18, %v1557_v9  ;;  %v1376_v30 = vand.u32 2147483647, %v7422_v59  ;;  %v1379_v56 = vand.u32 2147483647, %v7427_v29 }
 0x153   : > { %v1575_v12 = vmul.f32 0.6931472, %v6608_v2  ;;  %v7397_v24 = vadd.f32 %v1563_v19, %v1371_v22  ;;  %v1393_v35 = vsub.f32 0.0, %v1377_v28  ;;  %v1378_v18 = vand.u32 2147483647, %v7432_v32 }
 0x154   : > { %11373 = vst [vmem:[#allocation32_spill] sm:$0xff] %v7386_v53  ;;  %v7390_v16 = vmul.f32 %v7376_v31, %v7386_v53  ;;  %v1392_v9 = vsub.f32 0.0, %v1376_v30  ;;  %v1395_v19 = vsub.f32 0.0, %v1379_v56  ;;  %v7448_v28 = vadd.f32 %v7325_v50, %v7337_v57 }
 0x155   : > { %v1581_v20 = vsel %vm1580_vm6, %v1578_v25, %v1575_v12  ;;  %11375 = vst [vmem:[#allocation34_spill] sm:$0xff] %v7397_v24  ;;  %v7407_v2 = vmul.f32 %v7376_v31, %v7397_v24  ;;  %v7413_v12 = vadd.f32 %v7325_v50, %v7305_v40  ;;  %v7442_v25 = vadd.f32 %v7325_v50, %v7327_v51 }
 0x156   : > { %1666 = vrot.lane.b32.xlu0 %v7390_v16, %s7124_s30  ;;  %v7395_v23 = vadd.f32 %v1581_v20, %v1373_v62  ;;  %v1412_v62 = vmul.f32 1.442695, %v1393_v35  ;;  %v1381_v20 = vand.u32 2147483647, %v7437_v7  ;;  %v1410_v22 = vmul.f32 1.442695, %v1392_v9 }
 0x157   : > { %v1375_v14 = vand.u32 2147483647, %v7413_v12  ;;  %v1416_v30 = vmul.f32 1.442695, %v1395_v19  ;;  %v1359_v39 = vmax.f32 %v7413_v12, 0.0 }
 0x158   : > { %11374 = vst [vmem:[#allocation33_spill] sm:$0xff] %v7395_v23  ;;  %v7401_v27 = vmul.f32 %v7376_v31, %v7395_v23  ;;  %v1397_v10 = vsub.f32 0.0, %v1381_v20 }
 0x159   : > { %v1391_v15 = vsub.f32 0.0, %v1375_v14  ;;  %v1394_v14 = vsub.f32 0.0, %v1378_v18 }
 0x15a   : > { %1668 = vrot.lane.b32.xlu1 %v7401_v27, %s7124_s30  ;;  %v1420_v35 = vmul.f32 1.442695, %v1397_v10 }
 0x15b   : > { %v1408_v33 = vmul.f32 1.442695, %v1391_v15  ;;  %v1380_v15 = vand.u32 2147483647, %v7442_v25  ;;  %v1414_v34 = vmul.f32 1.442695, %v1394_v14 }
 0x15d   : > { %6609 = vpow2.f32 %v1408_v33  ;;  %v1396_v53 = vsub.f32 0.0, %v1380_v15  ;;  %v1382_v33 = vand.u32 2147483647, %v7448_v28 }
 0x15e   : > { %1664 = vrot.lane.b32.xlu1 %v7407_v2, %s7124_s30  ;;  %6611 = vpow2.f32 %v1412_v62 }
 0x15f   : > { %6613 = vpow2.f32 %v1410_v22  ;;  %v1418_v56 = vmul.f32 1.442695, %v1396_v53  ;;  %v1398_v9 = vsub.f32 0.0, %v1382_v33 }
 0x160   : > { %6615 = vpow2.f32 %v1416_v30 }
 0x161   : > { %6617 = vpow2.f32 %v1414_v34  ;;  %v1422_v24 = vmul.f32 1.442695, %v1398_v9 }
 0x162   : > { %6619 = vpow2.f32 %v1420_v35 }
 0x163   : > { %6621 = vpow2.f32 %v1418_v56 }
 0x164   : > { %6623 = vpow2.f32 %v1422_v24 }
 0x16a   : > { %v6610_v18 = vpop.eup %6609 }
 0x16b   : > { %v1447_v23 = vadd.f32 1.0, %v6610_v18  ;;  %v6612_v38 = vpop.eup %6611  ;;  %v1450_v33 = vmul.f32 -0.5, %v6610_v18 }
 0x16c   : > { %v6614_v62 = vpop.eup %6613  ;;  %v1465_v19 = vadd.f32 1.0, %v6612_v38  ;;  %v1468_v56 = vmul.f32 -0.5, %v6612_v38  ;;  %v1471_v46 = vand.u32 2147483647, %v6612_v38 }
 0x16d   : > { %6625 = vlog2.f32 %v1447_v23  ;;  %v7451_v20 = vpop.eup %6615  ;;  %v1456_v22 = vadd.f32 1.0, %v6614_v62  ;;  %v1459_v35 = vmul.f32 -0.5, %v6614_v62  ;;  %v1451_v42 = vadd.f32 1.0, %v1450_v33 }
 0x16e   : > { %v6618_v14 = vpop.eup %6617  ;;  %6627 = vlog2.f32 %v1465_v19  ;;  %v1483_v10 = vadd.f32 1.0, %v7451_v20  ;;  %v1453_v19 = vand.u32 2147483647, %v6610_v18  ;;  %v1462_v40 = vand.u32 2147483647, %v6614_v62 }
 0x16f   : > { %v7454_v34 = vpop.eup %6619  ;;  %6629 = vlog2.f32 %v1456_v22  ;;  %v1474_v53 = vadd.f32 1.0, %v6618_v14  ;;  %v1477_v37 = vmul.f32 -0.5, %v6618_v14  ;;  %v1486_v41 = vmul.f32 -0.5, %v7451_v20 }
 0x170   : > { %v7456_v15 = vpop.eup %6621  ;;  %6631 = vlog2.f32 %v1483_v10  ;;  %v1501_v30 = vadd.f32 1.0, %v7454_v34  ;;  %v1460_v10 = vadd.f32 1.0, %v1459_v35  ;;  %v1452_v33 = vmul.f32 %v6610_v18, %v1451_v42 }
 0x171   : > { %6633 = vlog2.f32 %v1474_v53  ;;  %v1492_v23 = vadd.f32 1.0, %v7456_v15  ;;  %v7460_v24 = vpop.eup %6623  ;;  %v1469_v53 = vadd.f32 1.0, %v1468_v56  ;;  %vm7469_vm7 = vcmp.lt.f32.partialorder %v1453_v19, 0.0004427343 }
 0x172   : > { %6635 = vlog2.f32 %v1501_v30  ;;  %v1510_v22 = vadd.f32 1.0, %v7460_v24  ;;  %v1361_v30 = vmax.f32 %v7418_v26, 0.0  ;;  %vm7473_vm8 = vcmp.lt.f32.partialorder %v1462_v40, 0.0004427343 }
 0x173   : > { %6637 = vlog2.f32 %v1492_v23  ;;  %vm7477_vm9 = vcmp.lt.f32.partialorder %v1471_v46, 0.0004427343  ;;  %v1461_v12 = vmul.f32 %v6614_v62, %v1460_v10  ;;  %v1478_v59 = vadd.f32 1.0, %v1477_v37 }
 0x174   : > { %6639 = vlog2.f32 %v1510_v22  ;;  %v1480_v26 = vand.u32 2147483647, %v6618_v14  ;;  %v1470_v19 = vmul.f32 %v6612_v38, %v1469_v53  ;;  %v1487_v47 = vadd.f32 1.0, %v1486_v41 }
 0x175   : > { %v1495_v52 = vmul.f32 -0.5, %v7456_v15  ;;  %v1504_v46 = vmul.f32 -0.5, %v7454_v34  ;;  %v1479_v38 = vmul.f32 %v6618_v14, %v1478_v59 }
 0x176   : > { %vm7491_vm12 = vcmp.lt.f32.partialorder %v1480_v26, 0.0004427343  ;;  %v1488_v59 = vmul.f32 %v7451_v20, %v1487_v47  ;;  %v1513_v47 = vmul.f32 -0.5, %v7460_v24 }
 0x17a   : > { %v6626_v9 = vpop.eup %6625 }
 0x17b   : > { %v1449_v44 = vmul.f32 0.6931472, %v6626_v9  ;;  %v6628_v51 = vpop.eup %6627  ;;  %v1489_v9 = vand.u32 2147483647, %v7451_v20 }
 0x17c   : > { %v6630_v43 = vpop.eup %6629  ;;  %v1467_v18 = vmul.f32 0.6931472, %v6628_v51 }
 0x17d   : > { %v1455_v42 = vsel %vm7469_vm7, %v1452_v33, %v1449_v44  ;;  %v6632_v40 = vpop.eup %6631  ;;  %v1458_v55 = vmul.f32 0.6931472, %v6630_v43  ;;  %vm7495_vm13 = vcmp.lt.f32.partialorder %v1489_v9, 0.0004427343  ;;  %vm2182_vm7 = vcmp.lt.s32.totalorder %v7259_v6, 4 }
 0x17e   : > { %v6634_v37 = vpop.eup %6633  ;;  %v7489_v44 = vadd.f32 %v1455_v42, %v1359_v39  ;;  %v1473_v49 = vsel %vm7477_vm9, %v1470_v19, %v1467_v18  ;;  %v1485_v51 = vmul.f32 0.6931472, %v6632_v40  ;;  %v1498_v42 = vand.u32 2147483647, %v7456_v15 }
 0x17f   : > { %v6636_v14 = vpop.eup %6635  ;;  %v1464_v53 = vsel %vm7473_vm8, %v1461_v12, %v1458_v55  ;;  %v1476_v33 = vmul.f32 0.6931472, %v6634_v37  ;;  %v1505_v18 = vadd.f32 1.0, %v1504_v46  ;;  %v1507_v55 = vand.u32 2147483647, %v7454_v34 }
 0x180   : > { %11382 = vst [vmem:[#allocation35_spill] sm:$0xff] %v7489_v44  ;;  %v6638_v9 = vpop.eup %6637  ;;  %v7522_v20 = vmul.f32 %v7376_v31, %v7489_v44  ;;  %v7524_v35 = vadd.f32 %v1464_v53, %v1360_v45  ;;  %v1503_v12 = vmul.f32 0.6931472, %v6636_v14  ;;  %v1363_v46 = vmax.f32 %v7427_v29, 0.0 }
 0x181   : > { %v1482_v40 = vsel %vm7491_vm12, %v1479_v38, %v1476_v33  ;;  %v1494_v37 = vmul.f32 0.6931472, %v6638_v9  ;;  %v6640_v45 = vpop.eup %6639  ;;  %vm7539_vm14 = vcmp.lt.f32.partialorder %v1498_v42, 0.0004427343  ;;  %vm1508_vm15 = vcmp.lt.f32.partialorder %v1507_v55, 0.0004427343 }
 0x182   : > { %11388 = vst [vmem:[#allocation37_spill] sm:$0xff] %v7524_v35  ;;  %v1514_v29 = vadd.f32 1.0, %v1513_v47  ;;  %v1365_v14 = vmax.f32 %v7437_v7, 0.0  ;;  %v1512_v53 = vmul.f32 0.6931472, %v6640_v45  ;;  %v1364_v33 = vmax.f32 %v7442_v25, 0.0 }
 0x183   : > { %v1366_v25 = vmax.f32 %v7448_v28, 0.0  ;;  %vm2199_vm8 = vcmp.ge.s32.totalorder %v7259_v6, 4  ;;  %vm1220_vm9 = vcmask 785408   ;;  %vm593_vm12 = vcmp.lt.s32.totalorder %v7259_v6, 3 }
 0x190   : > { %v7467_v23 = vpop.permute.xlu1 %1638 }
 0x191   : > { %v1686_v62 = vrot.slane %v7467_v23, 7 }
 0x1c8   : > { %v1667_v22 = vpop.permute.xlu0 %1666 }
 0x1c9   : > { %v1700_v10 = vrot.slane %v1667_v22, 7  ;;  %v1496_v22 = vadd.f32 1.0, %v1495_v52  ;;  %v1491_v52 = vsel %vm7495_vm13, %v1488_v59, %v1485_v51  ;;  %vm610_vm13 = vcmp.eq.s32.totalorder %v7259_v6, 0 }
 0x1ca   : > { %v7545_v38 = vadd.f32 %v1491_v52, %v1363_v46 }
 0x1cb   : > { %v1497_v43 = vmul.f32 %v7456_v15, %v1496_v22  ;;  %v1516_v15 = vand.u32 2147483647, %v7460_v24 }
 0x1cc   : > { %v1669_v48 = vpop.permute.xlu1 %1668  ;;  %11391 = vst [vmem:[#allocation38_spill] sm:$0xff] %v7545_v38  ;;  %v7571_v9 = vmul.f32 %v7376_v31, %v7545_v38 }
 0x1cd   : > { %v1701_v57 = vrot.slane %v1669_v48, 7  ;;  %vm1517_vm0 = vcmp.lt.f32.partialorder %v1516_v15, 0.0004427343 }
 0x1cf   : > { %v1702_v48 = vsel %vm967_vm10, %v1700_v10, %v1701_v57  ;;  %v1717_v39 = vsel %vm967_vm10, %v1701_v57, %v1686_v62  ;;  %v7516_v57 = vadd.f32 %v1473_v49, %v1361_v30  ;;  %v1362_v49 = vmax.f32 %v7432_v32, 0.0 }
 0x1d0   : > { %1828 = vrot.lane.b32.xlu1 %v1702_v48, %s7123_s6  ;;  %v7511_v56 = vpop.permute.xlu1 %1664  ;;  %v1766_v26 = vsel %vm1718_vm11, %v1717_v39, 0.0  ;;  %v7556_v39 = vmul.f32 %v7376_v31, %v7524_v35  ;;  %vm11339_vm11 = vcmask 523264  }
 0x1d1   : > { %v11178_v19 = vrot.slane %v7511_v56, 7  ;;  %1798 = vrot.lane.b32.xlu0 %v1766_v26, %s7123_s6  ;;  %11387 = vst [vmem:[#allocation36_spill] sm:$0xff] %v7516_v57  ;;  %v7549_v41 = vmul.f32 %v7376_v31, %v7516_v57  ;;  %v7551_v48 = vadd.f32 %v1482_v40, %v1362_v49  ;;  %v1515_v26 = vmul.f32 %v7460_v24, %v1514_v29 }
 0x1d3   : > { %v1703_v30 = vsel %vm967_vm10, %v11178_v19, %v1700_v10  ;;  %v1506_v10 = vmul.f32 %v7454_v34, %v1505_v18  ;;  %11392 = vst [vmem:[#allocation39_spill] sm:$0xff] %v7551_v48  ;;  %v1500_v34 = vsel %vm7539_vm14, %v1497_v43, %v1494_v37  ;;  %v7577_v7 = vmul.f32 %v7376_v31, %v7551_v48 }
 0x1d4   : > { %1640 = vrot.lane.b32.xlu1 %v7522_v20, %s7124_s30  ;;  %v7573_v22 = vadd.f32 %v1500_v34, %v1364_v33  ;;  %v1518_v42 = vsel %vm1517_vm0, %v1515_v26, %v1512_v53  ;;  %vm678_vm14 = vcmp.eq.s32.totalorder %v7259_v6, 1 }
 0x1d5   : > { %1826 = vrot.lane.b32.xlu0 %v1703_v30, %s7123_s6  ;;  %v1509_v32 = vsel %vm1508_vm15, %v1506_v10, %v1503_v12  ;;  %v7588_v18 = vadd.f32 %v1518_v42, %v1366_v25  ;;  %vm746_vm15 = vcmp.eq.s32.totalorder %v7259_v6, 2 }
 0x1d6   : > { %v7566_v59 = vadd.f32 %v1509_v32, %v1365_v14  ;;  %11394 = vst [vmem:[#allocation41_spill] sm:$0xff] %v7573_v22  ;;  %v7592_v55 = vmul.f32 %v7376_v31, %v7573_v22 }
 0x1d7   : > { %11395 = vst [vmem:[#allocation42_spill] sm:$0xff] %v7588_v18  ;;  %v7600_v28 = vmul.f32 %v7376_v31, %v7588_v18 }
 0x1d8   : > { %1644 = vrot.lane.b32.xlu1 %v7549_v41, %s7124_s30  ;;  %11393 = vst [vmem:[#allocation40_spill] sm:$0xff] %v7566_v59  ;;  %v7586_v24 = vmul.f32 %v7376_v31, %v7566_v59 }
 0x1d9   : > { %1642 = vrot.lane.b32.xlu0 %v7556_v39, %s7124_s30 }
 0x1dc   : > { %1648 = vrot.lane.b32.xlu1 %v7571_v9, %s7124_s30 }
 0x1dd   : > { %1646 = vrot.lane.b32.xlu0 %v7577_v7, %s7124_s30 }
 0x1e0   : > { %1652 = vrot.lane.b32.xlu1 %v7586_v24, %s7124_s30 }
 0x1e1   : > { %1650 = vrot.lane.b32.xlu0 %v7592_v55, %s7124_s30 }
 0x1e5   : > { %1654 = vrot.lane.b32.xlu0 %v7600_v28, %s7124_s30 }
 0x242   : > { %v1829_v47 = vpop.permute.xlu1 %1828 }
 0x243   : > { %v7605_v52 = vadd.f32 %v1829_v47, %v7401_v27  ;;  %v1799_v12 = vpop.permute.xlu0 %1798 }
 0x244   : > { %v7608_v30 = vadd.f32 %v1799_v12, %v7382_v36 }
 0x245   : > { %1908 = vrot.lane.b32.xlu0 %v7605_v52, %s7124_s30 }
 0x246   : > { %1878 = vrot.lane.b32.xlu1 %v7608_v30, %s7124_s30  ;;  %v1641_v40 = vpop.permute.xlu1 %1640 }
 0x247   : > { %v1687_v46 = vrot.slane %v1641_v40, 7  ;;  %v1827_v37 = vpop.permute.xlu0 %1826 }
 0x248   : > { %v7615_v45 = vadd.f32 %v1827_v37, %v7390_v16 }
 0x249   : > { %v1716_v27 = vsel %vm967_vm10, %v1686_v62, %v1687_v46 }
 0x24a   : > { %11396 = vst [vmem:[#allocation43_spill] sm:$0xff] %v7615_v45  ;;  %1906 = vrot.lane.b32.xlu1 %v7615_v45, %s7124_s30  ;;  %1800 = vrot.lane.b32.xlu0 %v1716_v27, %s7123_s6  ;;  %v1645_v36 = vpop.permute.xlu1 %1644  ;;  %v7657_v27 = vadd.f32 %v7325_v50, %v7345_v63 }
 0x24b   : > { %v1689_v49 = vrot.slane %v1645_v36, 7  ;;  %v1643_v43 = vpop.permute.xlu0 %1642 }
 0x24c   : > { %v1688_v51 = vrot.slane %v1643_v43, 7  ;;  %v7662_v43 = vadd.f32 %v7325_v50, %v7349_v1 }
 0x24e   : > { %v1649_v10 = vpop.permute.xlu1 %1648  ;;  %v1715_v29 = vsel %vm967_vm10, %v1687_v46, %v1688_v51  ;;  %v1714_v16 = vsel %vm967_vm10, %v1688_v51, %v1689_v49  ;;  %v7652_v46 = vadd.f32 %v7325_v50, %v7341_v60 }
 0x24f   : > { %v1691_v23 = vrot.slane %v1649_v10, 7  ;;  %v1647_v32 = vpop.permute.xlu0 %1646  ;;  %1802 = vrot.lane.b32.xlu1 %v1715_v29, %s7123_s6  ;;  %1804 = vrot.lane.b32.xlu0 %v1714_v16, %s7123_s6  ;;  %v1385_v29 = vand.u32 2147483647, %v7662_v43  ;;  %v7667_v16 = vadd.f32 %v7325_v50, %v7353_v4 }
 0x250   : > { %v1690_v62 = vrot.slane %v1647_v32, 7  ;;  %v1383_v37 = vand.u32 2147483647, %v7652_v46  ;;  %v1367_v38 = vmax.f32 %v7652_v46, 0.0 }
 0x251   : > { %v1401_v32 = vsub.f32 0.0, %v1385_v29 }
 0x252   : > { %v1653_v15 = vpop.permute.xlu1 %1652  ;;  %v1713_v34 = vsel %vm967_vm10, %v1689_v49, %v1690_v62  ;;  %v1712_v14 = vsel %vm967_vm10, %v1690_v62, %v1691_v23  ;;  %v1399_v36 = vsub.f32 0.0, %v1383_v37  ;;  %v1384_v49 = vand.u32 2147483647, %v7657_v27 }
 0x253   : > { %v1693_v53 = vrot.slane %v1653_v15, 7  ;;  %v1651_v33 = vpop.permute.xlu0 %1650  ;;  %1806 = vrot.lane.b32.xlu1 %v1713_v34, %s7123_s6  ;;  %1808 = vrot.lane.b32.xlu0 %v1712_v14, %s7123_s6  ;;  %v1386_v62 = vand.u32 2147483647, %v7667_v16  ;;  %v1428_v15 = vmul.f32 1.442695, %v1401_v32 }
 0x254   : > { %v1692_v26 = vrot.slane %v1651_v33, 7  ;;  %v1424_v51 = vmul.f32 1.442695, %v1399_v36  ;;  %v1400_v10 = vsub.f32 0.0, %v1384_v49 }
 0x255   : > { %v1402_v34 = vsub.f32 0.0, %v1386_v62 }
 0x256   : > { %v1711_v42 = vsel %vm967_vm10, %v1691_v23, %v1692_v26  ;;  %v1710_v25 = vsel %vm967_vm10, %v1692_v26, %v1693_v53  ;;  %6641 = vpow2.f32 %v1424_v51  ;;  %v1426_v23 = vmul.f32 1.442695, %v1400_v10 }
 0x257   : > { %v7640_v47 = vpop.permute.xlu0 %1654  ;;  %1810 = vrot.lane.b32.xlu1 %v1711_v42, %s7123_s6  ;;  %1812 = vrot.lane.b32.xlu0 %v1710_v25, %s7123_s6  ;;  %v1430_v14 = vmul.f32 1.442695, %v1402_v34 }
 0x258   : > { %v11179_v12 = vrot.slane %v7640_v47, 7  ;;  %6643 = vpow2.f32 %v1426_v23 }
 0x259   : > { %6645 = vpow2.f32 %v1428_v15 }
 0x25a   : > { %v1709_v40 = vsel %vm967_vm10, %v1693_v53, %v11179_v12  ;;  %6647 = vpow2.f32 %v1430_v14 }
 0x25b   : > { %1814 = vrot.lane.b32.xlu1 %v1709_v40, %s7123_s6 }
 0x263   : > { %v6642_v53 = vpop.eup %6641 }
 0x264   : > { %v1519_v33 = vadd.f32 1.0, %v6642_v53  ;;  %v1522_v36 = vmul.f32 -0.5, %v6642_v53  ;;  %v1525_v29 = vand.u32 2147483647, %v6642_v53 }
 0x265   : > { %v6644_v26 = vpop.eup %6643 }
 0x266   : > { %6649 = vlog2.f32 %v1519_v33  ;;  %v1528_v42 = vadd.f32 1.0, %v6644_v26  ;;  %v6646_v25 = vpop.eup %6645  ;;  %v1523_v51 = vadd.f32 1.0, %v1522_v36  ;;  %v1531_v10 = vmul.f32 -0.5, %v6644_v26 }
 0x267   : > { %v1537_v50 = vadd.f32 1.0, %v6646_v25  ;;  %v7670_v40 = vpop.eup %6647  ;;  %vm1526_vm3 = vcmp.lt.f32.partialorder %v1525_v29, 0.0004427343 }
 0x268   : > { %6651 = vlog2.f32 %v1528_v42  ;;  %v1546_v37 = vadd.f32 1.0, %v7670_v40  ;;  %v1524_v33 = vmul.f32 %v6642_v53, %v1523_v51  ;;  %v1532_v42 = vadd.f32 1.0, %v1531_v10 }
 0x269   : > { %6653 = vlog2.f32 %v1537_v50  ;;  %v1534_v50 = vand.u32 2147483647, %v6644_v26 }
 0x26a   : > { %6655 = vlog2.f32 %v1546_v37  ;;  %v1540_v37 = vmul.f32 -0.5, %v6646_v25  ;;  %v1533_v51 = vmul.f32 %v6644_v26, %v1532_v42 }
 0x26b   : > { %vm7687_vm4 = vcmp.lt.f32.partialorder %v1534_v50, 0.0004427343  ;;  %v1368_v50 = vmax.f32 %v7657_v27, 0.0 }
 0x26c   : > { %v1541_v29 = vadd.f32 1.0, %v1540_v37 }
 0x273   : > { %v6650_v49 = vpop.eup %6649 }
 0x274   : > { %v1521_v32 = vmul.f32 0.6931472, %v6650_v49 }
 0x275   : > { %v6652_v34 = vpop.eup %6651 }
 0x276   : > { %v1527_v49 = vsel %vm1526_vm3, %v1524_v33, %v1521_v32  ;;  %v6654_v57 = vpop.eup %6653  ;;  %v1549_v32 = vmul.f32 -0.5, %v7670_v40  ;;  %v1543_v33 = vand.u32 2147483647, %v6646_v25 }
 0x277   : > { %v1539_v26 = vmul.f32 0.6931472, %v6654_v57  ;;  %v6656_v42 = vpop.eup %6655 }
 0x278   : > { %vm1544_vm5 = vcmp.lt.f32.partialorder %v1543_v33, 0.0004427343 }
 0x2b7   : > { %v1909_v23 = vpop.permute.xlu0 %1908 }
 0x2b8   : > { %v1941_v62 = vrot.slane %v1909_v23, 6  ;;  %v7673_v15 = vpop.permute.xlu1 %1878  ;;  %v1530_v23 = vmul.f32 0.6931472, %v6652_v34  ;;  %v7692_v34 = vadd.f32 %v1527_v49, %v1367_v38 }
 0x2b9   : > { %v1926_v14 = vrot.slane %v7673_v15, 6 }
 0x2ba   : > { %11399 = vst [vmem:[#allocation44_spill] sm:$0xff] %v7692_v34 }
 0x2bb   : > { %v1957_v36 = vsel %vm866_vm1, %v1941_v62, %v1926_v14 }
 0x2bc   : > { %v1801_v19 = vpop.permute.xlu0 %1800  ;;  %v7682_v12 = vpop.permute.xlu1 %1906  ;;  %v2006_v44 = vsel %vm1958_vm2, %v1957_v36, 0.0 }
 0x2bd   : > { %v11188_v53 = vrot.slane %v7682_v12, 6  ;;  %2038 = vrot.lane.b32.xlu0 %v2006_v44, %s7123_s6  ;;  %v7695_v36 = vadd.f32 %v1801_v19, %v7522_v20  ;;  %v1536_v44 = vsel %vm7687_vm4, %v1533_v51, %v1530_v23  ;;  %v1542_v19 = vmul.f32 %v6646_v25, %v1541_v29 }
 0x2be   : > { %v1550_v20 = vadd.f32 1.0, %v1549_v32  ;;  %v7710_v49 = vadd.f32 %v1536_v44, %v1368_v50  ;;  %v7715_v23 = vmul.f32 %v7376_v31, %v7692_v34  ;;  %v1548_v51 = vmul.f32 0.6931472, %v6656_v42 }
 0x2bf   : > { %v1942_v46 = vsel %vm866_vm1, %v11188_v53, %v1941_v62  ;;  %v1552_v62 = vand.u32 2147483647, %v7670_v40  ;;  %v1545_v27 = vsel %vm1544_vm5, %v1542_v19, %v1539_v26  ;;  %v1369_v25 = vmax.f32 %v7662_v43, 0.0 }
 0x2c0   : > { %2068 = vrot.lane.b32.xlu1 %v1942_v46, %s7123_s6  ;;  %11400 = vst [vmem:[#allocation45_spill] sm:$0xff] %v7710_v49  ;;  %v7730_v33 = vmul.f32 %v7376_v31, %v7710_v49  ;;  %v1370_v43 = vmax.f32 %v7667_v16, 0.0 }
 0x2c1   : > { %1880 = vrot.lane.b32.xlu0 %v7695_v36, %s7124_s30  ;;  %v1803_v38 = vpop.permute.xlu1 %1802  ;;  %v1805_v57 = vpop.permute.xlu0 %1804  ;;  %v7726_v29 = vadd.f32 %v1545_v27, %v1369_v25  ;;  %vm1553_vm6 = vcmp.lt.f32.partialorder %v1552_v62, 0.0004427343 }
 0x2c2   : > { %v7708_v37 = vadd.f32 %v1803_v38, %v7556_v39  ;;  %v1551_v39 = vmul.f32 %v7670_v40, %v1550_v20  ;;  %v7724_v10 = vadd.f32 %v1805_v57, %v7549_v41 }
 0x2c3   : > { %11401 = vst [vmem:[#allocation46_spill] sm:$0xff] %v7726_v29  ;;  %v7744_v26 = vmul.f32 %v7376_v31, %v7726_v29 }
 0x2c4   : > { %1882 = vrot.lane.b32.xlu1 %v7708_v37, %s7124_s30  ;;  %v1554_v46 = vsel %vm1553_vm6, %v1551_v39, %v1548_v51 }
 0x2c5   : > { %1656 = vrot.lane.b32.xlu0 %v7715_v23, %s7124_s30  ;;  %v1807_v32 = vpop.permute.xlu1 %1806  ;;  %v1809_v40 = vpop.permute.xlu0 %1808  ;;  %v7740_v44 = vadd.f32 %v1554_v46, %v1370_v43  ;;  %v11403_v46 = vrot.slane %v7640_v47, 7 }
 0x2c6   : > { %v7738_v41 = vadd.f32 %v1807_v32, %v7577_v7  ;;  %v7751_v16 = vadd.f32 %v1809_v40, %v7571_v9 }
 0x2c7   : > { %11402 = vst [vmem:[#allocation47_spill] sm:$0xff] %v7740_v44  ;;  %v7755_v7 = vmul.f32 %v7376_v31, %v7740_v44 }
 0x2c8   : > { %1884 = vrot.lane.b32.xlu1 %v7724_v10, %s7124_s30 }
 0x2c9   : > { %1658 = vrot.lane.b32.xlu0 %v7730_v33, %s7124_s30  ;;  %v1811_v42 = vpop.permute.xlu1 %1810  ;;  %v1813_v50 = vpop.permute.xlu0 %1812 }
 0x2ca   : > { %v7762_v38 = vadd.f32 %v1811_v42, %v7592_v55  ;;  %v7765_v19 = vadd.f32 %v1813_v50, %v7586_v24 }
 0x2cc   : > { %1886 = vrot.lane.b32.xlu1 %v7738_v41, %s7124_s30 }
 0x2cd   : > { %1660 = vrot.lane.b32.xlu0 %v7744_v26, %s7124_s30  ;;  %v1815_v20 = vpop.permute.xlu1 %1814 }
 0x2ce   : > { %v7772_v31 = vadd.f32 %v1815_v20, %v7600_v28 }
 0x2d0   : > { %1888 = vrot.lane.b32.xlu1 %v7751_v16, %s7124_s30 }
 0x2d1   : > { %1662 = vrot.lane.b32.xlu0 %v7755_v7, %s7124_s30 }
 0x2d4   : > { %1890 = vrot.lane.b32.xlu1 %v7762_v38, %s7124_s30 }
 0x2d5   : > { %1892 = vrot.lane.b32.xlu0 %v7765_v19, %s7124_s30 }
 0x2d8   : > { %1894 = vrot.lane.b32.xlu1 %v7772_v31, %s7124_s30 }
 0x32f   : > { %v2039_v9 = vpop.permute.xlu0 %2038 }
 0x332   : > { %v2069_v62 = vpop.permute.xlu1 %2068 }
 0x333   : > { %v1881_v55 = vpop.permute.xlu0 %1880 }
 0x334   : > { %v1927_v57 = vrot.slane %v1881_v55, 6 }
 0x336   : > { %v1883_v27 = vpop.permute.xlu1 %1882  ;;  %v1956_v24 = vsel %vm866_vm1, %v1926_v14, %v1927_v57 }
 0x337   : > { %v1928_v51 = vrot.slane %v1883_v27, 6  ;;  %2040 = vrot.lane.b32.xlu0 %v1956_v24, %s7123_s6  ;;  %v1657_v25 = vpop.permute.xlu0 %1656 }
 0x338   : > { %v1695_v39 = vrot.slane %v1657_v25, 7 }
 0x339   : > { %v1955_v28 = vsel %vm866_vm1, %v1927_v57, %v1928_v51 }
 0x33a   : > { %2042 = vrot.lane.b32.xlu1 %v1955_v28, %s7123_s6  ;;  %v1885_v32 = vpop.permute.xlu1 %1884  ;;  %v1708_v43 = vsel %vm967_vm10, %v11403_v46, %v1695_v39 }
 0x33b   : > { %v1929_v15 = vrot.slane %v1885_v32, 6  ;;  %1816 = vrot.lane.b32.xlu0 %v1708_v43, %s7123_s6  ;;  %v1659_v14 = vpop.permute.xlu0 %1658 }
 0x33c   : > { %v1696_v40 = vrot.slane %v1659_v14, 7 }
 0x33d   : > { %v1954_v42 = vsel %vm866_vm1, %v1928_v51, %v1929_v15 }
 0x33e   : > { %2044 = vrot.lane.b32.xlu1 %v1954_v42, %s7123_s6  ;;  %v1887_v50 = vpop.permute.xlu1 %1886  ;;  %v1707_v20 = vsel %vm967_vm10, %v1695_v39, %v1696_v40 }
 0x33f   : > { %v1930_v55 = vrot.slane %v1887_v50, 6  ;;  %1818 = vrot.lane.b32.xlu0 %v1707_v20, %s7123_s6  ;;  %v1661_v47 = vpop.permute.xlu0 %1660 }
 0x340   : > { %v1697_v57 = vrot.slane %v1661_v47, 7  ;;  %v7817_v47 = vadd.f32 %v2039_v9, %v7608_v30 }
 0x341   : > { %v1953_v27 = vsel %vm866_vm1, %v1929_v15, %v1930_v55 }
 0x342   : > { %2046 = vrot.lane.b32.xlu1 %v1953_v27, %s7123_s6  ;;  %v1889_v24 = vpop.permute.xlu1 %1888  ;;  %v1706_v51 = vsel %vm967_vm10, %v1696_v40, %v1697_v57 }
 0x343   : > { %v1931_v25 = vrot.slane %v1889_v24, 6  ;;  %1820 = vrot.lane.b32.xlu0 %v1706_v51, %s7123_s6  ;;  %v1663_v28 = vpop.permute.xlu0 %1662 }
 0x344   : > { %v1698_v32 = vrot.slane %v1663_v28, 7 }
 0x345   : > { %v1952_v39 = vsel %vm866_vm1, %v1930_v55, %v1931_v25  ;;  %v7814_v55 = vadd.f32 %v2069_v62, %v7605_v52 }
 0x346   : > { %2048 = vrot.lane.b32.xlu1 %v1952_v39, %s7123_s6  ;;  %v1891_v46 = vpop.permute.xlu1 %1890  ;;  %v1705_v43 = vsel %vm967_vm10, %v1697_v57, %v1698_v32 }
 0x347   : > { %v1932_v15 = vrot.slane %v1891_v46, 6  ;;  %1822 = vrot.lane.b32.xlu0 %v1705_v43, %s7123_s6  ;;  %v1893_v14 = vpop.permute.xlu0 %1892  ;;  %11404 = vst [vmem:[#allocation48_spill] sm:$0xff] %v7814_v55 }
 0x348   : > { %v1933_v42 = vrot.slane %v1893_v14, 6 }
 0x349   : > { %v1951_v40 = vsel %vm866_vm1, %v1931_v25, %v1932_v15 }
 0x34a   : > { %2050 = vrot.lane.b32.xlu1 %v1951_v40, %s7123_s6  ;;  %v1895_v50 = vpop.permute.xlu1 %1894  ;;  %v1950_v20 = vsel %vm866_vm1, %v1932_v15, %v1933_v42 }
 0x34b   : > { %2052 = vrot.lane.b32.xlu0 %v1950_v20, %s7123_s6  ;;  %v1934_v57 = vrot.slane %v1895_v50, 6 }
 0x34d   : > { %v1949_v27 = vsel %vm866_vm1, %v1933_v42, %v1934_v57 }
 0x34e   : > { %2148 = vrot.lane.b32.xlu1 %v7814_v55, %s7124_s30 }
 0x34f   : > { %2118 = vrot.lane.b32.xlu0 %v7817_v47, %s7124_s30 }
 0x352   : > { %2054 = vrot.lane.b32.xlu1 %v1949_v27, %s7123_s6 }
 0x3a9   : > { %v2041_v24 = vpop.permute.xlu0 %2040 }
 0x3aa   : > { %v7827_v51 = vadd.f32 %v2041_v24, %v7695_v36 }
 0x3ac   : > { %2120 = vrot.lane.b32.xlu1 %v7827_v51, %s7124_s30  ;;  %v2043_v52 = vpop.permute.xlu1 %2042 }
 0x3ad   : > { %v7832_v30 = vadd.f32 %v2043_v52, %v7708_v37  ;;  %v1817_v9 = vpop.permute.xlu0 %1816 }
 0x3ae   : > { %v7835_v62 = vadd.f32 %v1817_v9, %v7715_v23 }
 0x3af   : > { %2122 = vrot.lane.b32.xlu0 %v7832_v30, %s7124_s30 }
 0x3b0   : > { %1896 = vrot.lane.b32.xlu1 %v7835_v62, %s7124_s30  ;;  %v2045_v25 = vpop.permute.xlu1 %2044 }
 0x3b1   : > { %v7842_v36 = vadd.f32 %v2045_v25, %v7724_v10  ;;  %v1819_v28 = vpop.permute.xlu0 %1818 }
 0x3b2   : > { %v7845_v39 = vadd.f32 %v1819_v28, %v7730_v33 }
 0x3b3   : > { %2124 = vrot.lane.b32.xlu0 %v7842_v36, %s7124_s30 }
 0x3b4   : > { %1898 = vrot.lane.b32.xlu1 %v7845_v39, %s7124_s30  ;;  %v2047_v37 = vpop.permute.xlu1 %2046 }
 0x3b5   : > { %v7852_v23 = vadd.f32 %v2047_v37, %v7738_v41  ;;  %v1821_v46 = vpop.permute.xlu0 %1820 }
 0x3b6   : > { %v7855_v43 = vadd.f32 %v1821_v46, %v7744_v26 }
 0x3b7   : > { %2126 = vrot.lane.b32.xlu0 %v7852_v23, %s7124_s30 }
 0x3b8   : > { %1900 = vrot.lane.b32.xlu1 %v7855_v43, %s7124_s30  ;;  %v2049_v10 = vpop.permute.xlu1 %2048 }
 0x3b9   : > { %v7862_v33 = vadd.f32 %v2049_v10, %v7751_v16  ;;  %v1823_v15 = vpop.permute.xlu0 %1822 }
 0x3ba   : > { %v7865_v14 = vadd.f32 %v1823_v15, %v7755_v7  ;;  %v11406_v7 = vrot.slane %v7511_v56, 7 }
 0x3bb   : > { %2128 = vrot.lane.b32.xlu0 %v7862_v33, %s7124_s30 }
 0x3bc   : > { %1902 = vrot.lane.b32.xlu1 %v7865_v14, %s7124_s30  ;;  %v2051_v41 = vpop.permute.xlu1 %2050  ;;  %v1704_v50 = vsel %vm967_vm10, %v1698_v32, %v11406_v7 }
 0x3bd   : > { %v7872_v26 = vadd.f32 %v2051_v41, %v7762_v38  ;;  %v2053_v42 = vpop.permute.xlu0 %2052 }
 0x3be   : > { %v7875_v40 = vadd.f32 %v2053_v42, %v7765_v19 }
 0x3bf   : > { %2130 = vrot.lane.b32.xlu0 %v7872_v26, %s7124_s30 }
 0x3c0   : > { %2132 = vrot.lane.b32.xlu1 %v7875_v40, %s7124_s30  ;;  %v7881_v16 = vpop.permute.xlu1 %2148 }
 0x3c1   : > { %11405 = vst [vmem:[#allocation49_spill] sm:$0xff] %v7881_v16  ;;  %v7893_v19 = vpop.permute.xlu0 %2118 }
 0x3c4   : > { %1824 = vrot.lane.b32.xlu1 %v1704_v50, %s7123_s6  ;;  %v2055_v38 = vpop.permute.xlu1 %2054 }
 0x3c5   : > { %v7889_v20 = vadd.f32 %v2055_v38, %v7772_v31 }
 0x3c7   : > { %2134 = vrot.lane.b32.xlu0 %v7889_v20, %s7124_s30 }
 0x41e   : > { %v7895_v27 = vpop.permute.xlu1 %2120 }
 0x421   : > { %v7897_v24 = vpop.permute.xlu0 %2122 }
 0x422   : > { %v1897_v52 = vpop.permute.xlu1 %1896 }
 0x423   : > { %v1935_v56 = vrot.slane %v1897_v52, 6 }
 0x425   : > { %v2125_v9 = vpop.permute.xlu0 %2124  ;;  %v1948_v32 = vsel %vm866_vm1, %v1934_v57, %v1935_v56 }
 0x426   : > { %2056 = vrot.lane.b32.xlu1 %v1948_v32, %s7123_s6  ;;  %v1899_v25 = vpop.permute.xlu1 %1898  ;;  %v11186_v32 = vmov 0.0  }
 0x427   : > { %v1936_v31 = vrot.slane %v1899_v25, 6 }
 0x429   : > { %v2127_v28 = vpop.permute.xlu0 %2126  ;;  %v1947_v37 = vsel %vm866_vm1, %v1935_v56, %v1936_v31 }
 0x42a   : > { %2058 = vrot.lane.b32.xlu1 %v1947_v37, %s7123_s6  ;;  %v1901_v46 = vpop.permute.xlu1 %1900 }
 0x42b   : > { %v1937_v10 = vrot.slane %v1901_v46, 6 }
 0x42d   : > { %v2129_v15 = vpop.permute.xlu0 %2128  ;;  %v1946_v41 = vsel %vm866_vm1, %v1936_v31, %v1937_v10  ;;  %v1038_v31 = vsub.s32 3, %v7259_v6 }
 0x42e   : > { %2060 = vrot.lane.b32.xlu1 %v1946_v41, %s7123_s6  ;;  %v7908_v42 = vpop.permute.xlu1 %1902  ;;  %v2171_v53 = vrot.slane %v2129_v15, 4 }
 0x42f   : > { %v1938_v57 = vrot.slane %v7908_v42, 6 }
 0x431   : > { %v1945_v7 = vsel %vm866_vm1, %v1937_v10, %v1938_v57  ;;  %v2131_v50 = vpop.permute.xlu0 %2130  ;;  %v7931_v10 = vld [vmem:[%s11140_s3] sm:$0xff] }
 0x432   : > { %2062 = vrot.lane.b32.xlu1 %v1945_v7, %s7123_s6  ;;  %v2133_v38 = vpop.permute.xlu1 %2132  ;;  %v2172_v52 = vrot.slane %v2131_v50, 4  ;;  %v1039_v41 = vrot.slane %v7931_v10, %v1038_v31  ;;  %v2169_v50 = vrot.slane %v2125_v9, 4 }
 0x433   : > { %v2173_v56 = vrot.slane %v2133_v38, 4  ;;  %v2168_v38 = vrot.slane %v7897_v24, 4 }
 0x434   : > { %v2192_v15 = vsel %vm2182_vm7, %v2171_v53, %v2172_v52 }
 0x435   : > { %v2191_v46 = vsel %vm2182_vm7, %v2172_v52, %v2173_v56  ;;  %v2166_v52 = vrot.slane %v7893_v19, 4 }
 0x436   : > { %6526 = vrot.lane.b32.xlu1 %v11186_v32, %s7123_s6  ;;  %v1825_v25 = vpop.permute.xlu1 %1824  ;;  %v2195_v32 = vsel %vm2182_vm7, %v2168_v38, %v2169_v50 }
 0x437   : > { %v7920_v37 = vadd.f32 %v1825_v25, %v7407_v2 }
 0x439   : > { %1904 = vrot.lane.b32.xlu0 %v7920_v37, %s7124_s30 }
 0x43a   : > { %2293 = vrot.lane.b32.xlu1 %v2191_v46, %s7123_s6  ;;  %v2170_v46 = vrot.slane %v2127_v28, 4  ;;  %v2135_v28 = vpop.permute.xlu0 %2134 }
 0x43c   : > { %v2193_v24 = vsel %vm2182_vm7, %v2170_v46, %v2171_v53  ;;  %v11189_v53 = vrot.slane %v7881_v16, 4 }
 0x43e   : > { %1041 = vrot.lane.b32.xlu1 %v1039_v41, %s7126_s10  ;;  %v2194_v41 = vsel %vm2182_vm7, %v2169_v50, %v2170_v46 }
 0x498   : > { %v2057_v2 = vpop.permute.xlu1 %2056 }
 0x499   : > { %v7936_v7 = vadd.f32 %v2057_v2, %v7835_v62  ;;  %v2167_v2 = vrot.slane %v7895_v27, 4  ;;  %v2198_v27 = vsel %vm2182_vm7, %v11189_v53, %v2166_v52 }
 0x49b   : > { %2136 = vrot.lane.b32.xlu0 %v7936_v7, %s7124_s30  ;;  %v2196_v50 = vsel %vm2182_vm7, %v2167_v2, %v2168_v38  ;;  %v2247_v38 = vsel %vm2199_vm8, %v2198_v27, 0.0 }
 0x49c   : > { %v2059_v25 = vpop.permute.xlu1 %2058 }
 0x49d   : > { %v7983_v19 = vadd.f32 %v2059_v25, %v7845_v39 }
 0x49f   : > { %2285 = vrot.lane.b32.xlu0 %v2195_v32, %s7123_s6  ;;  %v2174_v32 = vrot.slane %v2135_v28, 4 }
 0x4a0   : > { %v2061_v31 = vpop.permute.xlu1 %2060 }
 0x4a1   : > { %v7988_v46 = vadd.f32 %v2061_v31, %v7855_v43 }
 0x4a3   : > { %2287 = vrot.lane.b32.xlu0 %v2194_v41, %s7123_s6 }
 0x4a4   : > { %v2063_v62 = vpop.permute.xlu1 %2062 }
 0x4a5   : > { %v7948_v9 = vadd.f32 %v2063_v62, %v7865_v14  ;;  %v2190_v14 = vsel %vm2182_vm7, %v2173_v56, %v2174_v32  ;;  %v2197_v56 = vsel %vm2182_vm7, %v2166_v52, %v2167_v2  ;;  %v11408_v2 = vrot.slane %v7682_v12, 6 }
 0x4a7   : > { %11407 = vst [vmem:[#allocation50_spill] sm:$0xff] %v7948_v9  ;;  %2289 = vrot.lane.b32.xlu0 %v2193_v24, %s7123_s6  ;;  %2142 = vrot.lane.b32.xlu1 %v7948_v9, %s7124_s30 }
 0x4a8   : > { %v8007_v31 = vpop.permute.xlu1 %6526 }
 0x4ab   : > { %2291 = vrot.lane.b32.xlu0 %v2192_v15, %s7123_s6  ;;  %532 = vrot.lane.b32.xlu1 %v7355_v5, %s7126_s10  ;;  %v1905_v41 = vpop.permute.xlu0 %1904 }
 0x4ac   : > { %v1939_v62 = vrot.slane %v1905_v41, 6 }
 0x4ae   : > { %v1944_v39 = vsel %vm866_vm1, %v1938_v57, %v1939_v62  ;;  %v2294_v57 = vpop.permute.xlu1 %2293 }
 0x4af   : > { %2295 = vrot.lane.b32.xlu0 %v2190_v14, %s7123_s6  ;;  %536 = vrot.lane.b32.xlu1 %v7359_v11, %s7126_s10 }
 0x4b2   : > { %v8016_v14 = vpop.permute.xlu1 %1041 }
 0x4b3   : > { %2283 = vrot.lane.b32.xlu0 %v2196_v50, %s7123_s6  ;;  %540 = vrot.lane.b32.xlu1 %v7368_v17, %s7126_s10  ;;  %v1943_v50 = vsel %vm866_vm1, %v1939_v62, %v11408_v2  ;;  %v1073_v52 = vmul.f32 %v8016_v14, %v7361_v13  ;;  %v1075_v27 = vmul.f32 %v8016_v14, %v7372_v21 }
 0x4b4   : > { %v1062_v29 = vmul.f32 %v8016_v14, %v7339_v58 }
 0x4b7   : > { %2281 = vrot.lane.b32.xlu0 %v2197_v56, %s7123_s6 }
 0x4bb   : > { %2279 = vrot.lane.b32.xlu0 %v2247_v38, %s7123_s6 }
 0x4bf   : > { %2138 = vrot.lane.b32.xlu0 %v7983_v19, %s7124_s30 }
 0x4c3   : > { %2140 = vrot.lane.b32.xlu0 %v7988_v46, %s7124_s30 }
 0x4c7   : > { %534 = vrot.lane.b32.xlu0 %v7357_v8, %s7126_s10 }
 0x4cb   : > { %538 = vrot.lane.b32.xlu0 %v7361_v13, %s7126_s10 }
 0x4cf   : > { %542 = vrot.lane.b32.xlu0 %v7372_v21, %s7126_s10 }
 0x4d3   : > { %2064 = vrot.lane.b32.xlu0 %v1944_v39, %s7123_s6  ;;  %v8040_v39 = vadd.f32 %v2294_v57, %v7875_v40  ;;  %v1072_v57 = vmul.f32 %v8016_v14, %v7359_v11 }
 0x4d5   : > { %11409 = vst [vmem:[#allocation51_spill] sm:$0xff] %v8040_v39 }
 0x4d7   : > { %526 = vrot.lane.b32.xlu0 %v7349_v1, %s7126_s10 }
 0x4db   : > { %530 = vrot.lane.b32.xlu0 %v7353_v4, %s7126_s10 }
 0x50d   : > { %v2137_v43 = vpop.permute.xlu0 %2136 }
 0x50e   : > { %v2175_v25 = vrot.slane %v2137_v43, 4 }
 0x510   : > { %v2189_v24 = vsel %vm2182_vm7, %v2174_v32, %v2175_v25 }
 0x511   : > { %v2286_v28 = vpop.permute.xlu0 %2285  ;;  %2297 = vrot.lane.b32.xlu1 %v2189_v24, %s7123_s6 }
 0x512   : > { %v8030_v12 = vadd.f32 %v2286_v28, %v7842_v36 }
 0x515   : > { %v2288_v42 = vpop.permute.xlu0 %2287  ;;  %524 = vrot.lane.b32.xlu1 %v7347_v0, %s7126_s10 }
 0x516   : > { %v8035_v62 = vadd.f32 %v2288_v42, %v7852_v23 }
 0x519   : > { %v2290_v15 = vpop.permute.xlu0 %2289  ;;  %528 = vrot.lane.b32.xlu1 %v7351_v3, %s7126_s10  ;;  %v8042_v21 = vpop.permute.xlu1 %2142 }
 0x51a   : > { %11410 = vst [vmem:[#allocation52_spill] sm:$0xff] %v8042_v21 }
 0x51d   : > { %v2292_v32 = vpop.permute.xlu0 %2291  ;;  %2066 = vrot.lane.b32.xlu1 %v1943_v50, %s7123_s6  ;;  %v8051_v28 = vpop.permute.xlu1 %532  ;;  %v1074_v50 = vmul.f32 %v8016_v14, %v7368_v17 }
 0x521   : > { %v2296_v56 = vpop.permute.xlu0 %2295  ;;  %1166 = vrot.lane.b32.xlu1 %v1073_v52, %s7126_s10 }
 0x525   : > { %v2284_v38 = vpop.permute.xlu0 %2283  ;;  %1170 = vrot.lane.b32.xlu1 %v1075_v27, %s7126_s10  ;;  %v8075_v27 = vld [vmem:[#allocation3] sm:$0xff] }
 0x526   : > { %v8047_v24 = vadd.f32 %v2284_v38, %v7832_v30  ;;  %v8066_v30 = vpop.permute.xlu1 %536  ;;  %11411 = vst [vmem:[#allocation53_spill] sm:$0xff] %v8075_v27 }
 0x529   : > { %v2282_v41 = vpop.permute.xlu0 %2281  ;;  %2365 = vrot.lane.b32.xlu1 %v8030_v12, %s7124_s30 }
 0x52a   : > { %v8057_v40 = vadd.f32 %v2282_v41, %v7827_v51  ;;  %v541_v41 = vpop.permute.xlu1 %540 }
 0x52d   : > { %v2280_v13 = vpop.permute.xlu0 %2279  ;;  %2367 = vrot.lane.b32.xlu1 %v8035_v62, %s7124_s30 }
 0x531   : > { %v2139_v43 = vpop.permute.xlu0 %2138  ;;  %2373 = vrot.lane.b32.xlu1 %v8040_v39, %s7124_s30  ;;  %v11432_v39 = vld [vmem:[#allocation7_spill] sm:$0xff] }
 0x532   : > { %v2176_v36 = vrot.slane %v2139_v43, 4 }
 0x534   : > { %v2188_v23 = vsel %vm2182_vm7, %v2175_v25, %v2176_v36  ;;  %v2327_v25 = vadd.f32 %v2280_v13, %v7817_v47  ;;  %v11190_v47 = vrot.slane %v8042_v21, 4 }
 0x535   : > { %2299 = vrot.lane.b32.xlu0 %v2188_v23, %s7123_s6  ;;  %v2141_v42 = vpop.permute.xlu0 %2140  ;;  %2363 = vrot.lane.b32.xlu1 %v8047_v24, %s7124_s30  ;;  %v1069_v23 = vmul.f32 %v8016_v14, %v7353_v4  ;;  %v8115_v4 = vadd.f32 %v2296_v56, %v7889_v20  ;;  %v1068_v20 = vmul.f32 %v8016_v14, %v7351_v3 }
 0x536   : > { %v2177_v52 = vrot.slane %v2141_v42, 4  ;;  %v11412_v42 = vmov 0.0   ;;  %v1070_v56 = vmul.f32 %v8016_v14, %v7355_v5 }
 0x538   : > { %v2187_v38 = vsel %vm2182_vm7, %v2176_v36, %v2177_v52  ;;  %v2186_v36 = vsel %vm2182_vm7, %v2177_v52, %v11190_v47  ;;  %v8108_v52 = vadd.f32 %v2292_v32, %v7872_v26  ;;  %v1067_v26 = vmul.f32 %v8016_v14, %v7349_v1  ;;  %v11417_v1 = vld [vmem:[#allocation22_spill] sm:$0xff] }
 0x539   : > { %v8061_v2 = vpop.permute.xlu0 %534  ;;  %2361 = vrot.lane.b32.xlu1 %v8057_v40, %s7124_s30  ;;  %1164 = vrot.lane.b32.xlu0 %v1072_v57, %s7126_s10  ;;  %v8100_v57 = vadd.f32 %v2290_v15, %v7862_v33  ;;  %v11414_v33 = vld [vmem:[#allocation23_spill] sm:$0xff]  ;;  %v11415_v15 = vld [vmem:[#allocation18_spill] sm:$0xff]  ;;  %v8137_v32 = vadd.low.f32.bf16 %v2327_v25, %v8007_v31  ;;  %v1060_v59 = vmul.f32 %v8016_v14, %v11417_v1 }
 0x53a   : > { %11413 = vst [vmem:[#allocation54_spill] sm:$0xff] %v8108_v52 }
 0x53d   : > { %v8071_v51 = vpop.permute.xlu0 %538  ;;  %2359 = vrot.lane.b32.xlu1 %v2327_v25, %s7124_s30  ;;  %1168 = vrot.lane.b32.xlu0 %v1074_v50, %s7126_s10  ;;  %v1071_v50 = vmul.f32 %v8016_v14, %v7357_v8  ;;  %v1065_v8 = vmul.f32 %v8016_v14, %v7345_v63  ;;  %v1066_v25 = vmul.f32 %v8016_v14, %v7347_v0 }
 0x541   : > { %v543_v43 = vpop.permute.xlu0 %542  ;;  %516 = vrot.lane.b32.xlu1 %v7339_v58, %s7126_s10  ;;  %2301 = vrot.lane.b32.xlu0 %v2187_v38, %s7123_s6  ;;  %v1064_v38 = vmul.f32 %v8016_v14, %v7343_v61 }
 0x542   : > { %v8084_v13 = vsel %vm11339_vm11, %v541_v41, %v543_v43  ;;  %v11418_v41 = vld [vmem:[#allocation17_spill] sm:$0xff] }
 0x543   : > { %1221 = vst.msk [vmem:[#allocation3] sm:$0xff] %vm1220_vm9, %v8084_v13 }
 0x545   : > { %520 = vrot.lane.b32.xlu1 %v7343_v61, %s7126_s10  ;;  %2303 = vrot.lane.b32.xlu0 %v2186_v36, %s7123_s6 }
 0x549   : > { %1158 = vrot.lane.b32.xlu1 %v1069_v23, %s7126_s10  ;;  %6531 = vrot.lane.b32.xlu0 %v11412_v42, %s7123_s6 }
 0x54d   : > { %1162 = vrot.lane.b32.xlu1 %v1071_v50, %s7126_s10  ;;  %2369 = vrot.lane.b32.xlu0 %v8100_v57, %s7124_s30 }
 0x551   : > { %510 = vrot.lane.b32.xlu1 %v7333_v54, %s7126_s10  ;;  %2371 = vrot.lane.b32.xlu0 %v8108_v52, %s7124_s30  ;;  %v1002_v52 = vsub.s32 2, %v7259_v6 }
 0x555   : > { %514 = vrot.lane.b32.xlu1 %v11414_v33, %s7126_s10  ;;  %2375 = vrot.lane.b32.xlu0 %v8115_v4, %s7124_s30 }
 0x559   : > { %1150 = vrot.lane.b32.xlu1 %v1065_v8, %s7126_s10  ;;  %518 = vrot.lane.b32.xlu0 %v7341_v60, %s7126_s10 }
 0x55d   : > { %1154 = vrot.lane.b32.xlu1 %v1067_v26, %s7126_s10  ;;  %522 = vrot.lane.b32.xlu0 %v7345_v63, %s7126_s10  ;;  %v11416_v63 = vld [vmem:[#allocation21_spill] sm:$0xff]  ;;  %v8166_v26 = vpop.permute.xlu0 %2064 }
 0x55e   : > { %v1058_v22 = vmul.f32 %v8016_v14, %v11416_v63 }
 0x561   : > { %502 = vrot.lane.b32.xlu1 %v11415_v15, %s7126_s10  ;;  %1156 = vrot.lane.b32.xlu0 %v1068_v20, %s7126_s10 }
 0x565   : > { %2567 = vrot.lane.b32.xlu1 %v8137_v32, %s7124_s30  ;;  %1160 = vrot.lane.b32.xlu0 %v1070_v56, %s7126_s10 }
 0x569   : > { %508 = vrot.lane.b32.xlu0 %v11416_v63, %s7126_s10  ;;  %v11428_v63 = vld [vmem:[#allocation11_spill] sm:$0xff] }
 0x56a   : > { %v1048_v45 = vmul.f32 %v8016_v14, %v11428_v63 }
 0x56d   : > { %512 = vrot.lane.b32.xlu0 %v11417_v1, %s7126_s10  ;;  %v11423_v1 = vld [vmem:[#allocation13_spill] sm:$0xff] }
 0x571   : > { %1148 = vrot.lane.b32.xlu0 %v1064_v38, %s7126_s10  ;;  %v8171_v38 = vpop.permute.xlu0 %526 }
 0x575   : > { %1152 = vrot.lane.b32.xlu0 %v1066_v25, %s7126_s10  ;;  %v8174_v53 = vpop.permute.xlu0 %530 }
 0x579   : > { %500 = vrot.lane.b32.xlu0 %v11418_v41, %s7126_s10 }
 0x583   : > { %v8156_v43 = vpop.permute.xlu1 %2297 }
 0x587   : > { %v8158_v36 = vpop.permute.xlu1 %524 }
 0x58b   : > { %v8160_v23 = vpop.permute.xlu1 %528 }
 0x58f   : > { %v8162_v50 = vpop.permute.xlu1 %2066 }
 0x590   : > { %11419 = vst [vmem:[#allocation23_spill] sm:$0xff] %v8162_v50 }
 0x593   : > { %v8164_v8 = vpop.permute.xlu1 %1166 }
 0x597   : > { %v8168_v20 = vpop.permute.xlu1 %1170 }
 0x59b   : > { %v2366_v56 = vpop.permute.xlu1 %2365 }
 0x59c   : > { %2495 = vrot.lane.b32.xlu1 %v2366_v56, %s7123_s6 }
 0x59f   : > { %v2368_v25 = vpop.permute.xlu1 %2367 }
 0x5a0   : > { %2497 = vrot.lane.b32.xlu0 %v2368_v25, %s7123_s6  ;;  %v11420_v25 = vld [vmem:[#allocation19_spill] sm:$0xff] }
 0x5a1   : > { %v1056_v58 = vmul.f32 %v8016_v14, %v11420_v25 }
 0x5a3   : > { %v2374_v47 = vpop.permute.xlu1 %2373 }
 0x5a7   : > { %v8176_v5 = vpop.permute.xlu0 %2299  ;;  %v2364_v17 = vpop.permute.xlu1 %2363 }
 0x5a8   : > { %2493 = vrot.lane.b32.xlu0 %v2364_v17, %s7123_s6 }
 0x5ab   : > { %v8179_v11 = vpop.permute.xlu0 %1164  ;;  %v2362_v3 = vpop.permute.xlu1 %2361 }
 0x5af   : > { %v8181_v0 = vpop.permute.xlu0 %1168  ;;  %v2360_v61 = vpop.permute.xlu1 %2359 }
 0x5b0   : > { %2489 = vrot.lane.b32.xlu0 %v2360_v61, %s7123_s6 }
 0x5b3   : > { %v8184_v56 = vpop.permute.xlu0 %2301  ;;  %v517_v55 = vpop.permute.xlu1 %516 }
 0x5b4   : > { %504 = vrot.lane.b32.xlu0 %v11420_v25, %s7126_s10  ;;  %v11426_v25 = vld [vmem:[#allocation9_spill] sm:$0xff] }
 0x5b7   : > { %v8190_v34 = vpop.permute.xlu0 %2303  ;;  %v8192_v17 = vpop.permute.xlu1 %520 }
 0x5b8   : > { %11421 = vst [vmem:[#allocation18_spill] sm:$0xff] %v8190_v34  ;;  %1140 = vrot.lane.b32.xlu0 %v1060_v59, %s7126_s10  ;;  %v11424_v59 = vld [vmem:[#allocation15_spill] sm:$0xff] }
 0x5bb   : > { %v8197_v49 = vpop.permute.xlu0 %6531  ;;  %v8200_v61 = vpop.permute.xlu1 %1158 }
 0x5bc   : > { %11422 = vst [vmem:[#allocation55_spill] sm:$0xff] %v8197_v49  ;;  %1144 = vrot.lane.b32.xlu0 %v1062_v29, %s7126_s10  ;;  %v1054_v49 = vmul.f32 %v8016_v14, %v11418_v41 }
 0x5bf   : > { %v2370_v44 = vpop.permute.xlu0 %2369  ;;  %v8205_v48 = vpop.permute.xlu1 %1162 }
 0x5c0   : > { %2499 = vrot.lane.b32.xlu1 %v2370_v44, %s7123_s6  ;;  %492 = vrot.lane.b32.xlu0 %v11423_v1, %s7126_s10 }
 0x5c3   : > { %v2372_v35 = vpop.permute.xlu0 %2371  ;;  %v8214_v44 = vpop.permute.xlu1 %510 }
 0x5c4   : > { %2501 = vrot.lane.b32.xlu1 %v2372_v35, %s7123_s6  ;;  %496 = vrot.lane.b32.xlu0 %v11424_v59, %s7126_s10  ;;  %11425 = vst [vmem:[#allocation56_spill] sm:$0xff] %v8214_v44  ;;  %v1063_v44 = vmul.f32 %v8016_v14, %v7341_v60  ;;  %v445_v60 = vsub.s32 4, %v7259_v6 }
 0x5c7   : > { %v2376_v29 = vpop.permute.xlu0 %2375  ;;  %v515_v16 = vpop.permute.xlu1 %514 }
 0x5c8   : > { %2503 = vrot.lane.b32.xlu1 %v2374_v47, %s7123_s6  ;;  %1132 = vrot.lane.b32.xlu0 %v1056_v58, %s7126_s10  ;;  %v11427_v58 = vld [vmem:[#allocation20_spill] sm:$0xff] }
 0x5cb   : > { %v519_v18 = vpop.permute.xlu0 %518  ;;  %v8231_v21 = vpop.permute.xlu1 %1150 }
 0x5cc   : > { %2505 = vrot.lane.b32.xlu1 %v2376_v29, %s7123_s6  ;;  %1136 = vrot.lane.b32.xlu0 %v1058_v22, %s7126_s10  ;;  %v1061_v22 = vmul.f32 %v8016_v14, %v11414_v33  ;;  %v8251_v33 = vsel %vm11339_vm11, %v517_v55, %v519_v18 }
 0x5cd   : > { %v11434_v55 = vrot.slane %v8251_v33, 6 }
 0x5cf   : > { %v8220_v35 = vpop.permute.xlu0 %522  ;;  %v8247_v34 = vpop.permute.xlu1 %1154 }
 0x5d0   : > { %2491 = vrot.lane.b32.xlu1 %v2362_v3, %s7123_s6  ;;  %484 = vrot.lane.b32.xlu0 %v11426_v25, %s7126_s10  ;;  %v1052_v3 = vmul.f32 %v8016_v14, %v11424_v59  ;;  %v917_v59 = vsub.s32 1, %v7259_v6 }
 0x5d2   : > { %v8298_v18 = vrot.slane %v7931_v10, %v917_v59  ;;  %v1057_v59 = vmul.f32 %v8016_v14, %v11427_v58 }
 0x5d3   : > { %v8225_v47 = vpop.permute.xlu0 %1156 }
 0x5d4   : > { %506 = vrot.lane.b32.xlu1 %v11427_v58, %s7126_s10  ;;  %488 = vrot.lane.b32.xlu0 %v11428_v63, %s7126_s10 }
 0x5d7   : > { %v8235_v29 = vpop.permute.xlu0 %1160 }
 0x5d8   : > { %1142 = vrot.lane.b32.xlu1 %v1061_v22, %s7126_s10  ;;  %1124 = vrot.lane.b32.xlu0 %v1052_v3, %s7126_s10  ;;  %v8255_v22 = vsub.s32 0, %v7259_v6 }
 0x5da   : > { %11430 = vst [vmem:[#allocation57_spill] sm:$0xff] %v8255_v22 }
 0x5db   : > { %v8243_v27 = vpop.permute.xlu0 %508 }
 0x5dc   : > { %11429 = vst [vmem:[#allocation20_spill] sm:$0xff] %v8243_v27  ;;  %1146 = vrot.lane.b32.xlu1 %v1063_v44, %s7126_s10  ;;  %1128 = vrot.lane.b32.xlu0 %v1054_v49, %s7126_s10  ;;  %v11240_v27 = vrot.slane %v8251_v33, 5  ;;  %v11431_v44 = vld [vmem:[#allocation14_spill] sm:$0xff] }
 0x5df   : > { %v513_v3 = vpop.permute.xlu0 %512 }
 0x5e0   : > { %v8261_v41 = vsel %vm11339_vm11, %v513_v3, %v515_v16  ;;  %494 = vrot.lane.b32.xlu1 %v11431_v44, %s7126_s10  ;;  %480 = vrot.lane.b32.xlu0 %v11432_v39, %s7126_s10  ;;  %v8274_v16 = vrot.slane %v7931_v10, %v8255_v22  ;;  %v8277_v3 = vpop.permute.xlu1 %502 }
 0x5e1   : > { %v11239_v49 = vrot.slane %v8261_v41, 5  ;;  %11433 = vst [vmem:[#allocation14_spill] sm:$0xff] %v8277_v3  ;;  %v11435_v50 = vrot.slane %v8261_v41, 6  ;;  %v8295_v3 = vrot.slane %v7931_v10, %v445_v60  ;;  %v8311_v60 = vrot.slane %v7931_v10, %v1002_v52  ;;  %v11439_v52 = vld [vmem:[#allocation10_spill] sm:$0xff] }
 0x5e3   : > { %v600_v9 = vsel %vm593_vm12, %v11239_v49, %v11240_v27  ;;  %v873_v22 = vsel %vm866_vm1, %v11435_v50, %v11434_v55  ;;  %v11436_v49 = vld [vmem:[#allocation16_spill] sm:$0xff]  ;;  %v11437_v27 = vrot.slane %v8251_v33, 7  ;;  %v11438_v50 = vrot.slane %v8261_v41, 7 }
 0x5e4   : > { %v827_v25 = vmul.f32 %v8274_v16, %v600_v9  ;;  %498 = vrot.lane.b32.xlu1 %v11436_v49, %s7126_s10  ;;  %1116 = vrot.lane.b32.xlu0 %v1048_v45, %s7126_s10  ;;  %v928_v63 = vmul.f32 %v8298_v18, %v873_v22  ;;  %v2568_v39 = vpop.permute.xlu1 %2567  ;;  %v8346_v22 = vsel %vm11339_vm11, %v8158_v36, %v8171_v38 }
 0x5e5   : > { %v974_v55 = vsel %vm967_vm10, %v11438_v50, %v11437_v27  ;;  %v1059_v27 = vmul.f32 %v8016_v14, %v7333_v54  ;;  %v557_v54 = vsel %vm11339_vm11, %v8160_v23, %v8174_v53  ;;  %v11245_v53 = vrot.slane %v8346_v22, 5 }
 0x5e6   : > { %v843_v9 = vadd.f32 %v827_v25, %v8295_v3  ;;  %v1013_v42 = vmul.f32 %v8311_v60, %v974_v55  ;;  %v11440_v25 = vld [vmem:[#allocation12_spill] sm:$0xff]  ;;  %v589_v58 = vrot.slane %v557_v54, 5  ;;  %v862_v36 = vrot.slane %v557_v54, 6  ;;  %v8363_v55 = vpop.permute.xlu0 %1148 }
 0x5e8   : > { %1134 = vrot.lane.b32.xlu1 %v1057_v59, %s7126_s10  ;;  %v944_v45 = vadd.f32 %v928_v63, %v843_v9  ;;  %2699 = vrot.lane.b32.xlu0 %v2568_v39, %s7123_s6  ;;  %v1053_v63 = vmul.f32 %v8016_v14, %v11436_v49  ;;  %v1055_v39 = vmul.f32 %v8016_v14, %v11415_v15  ;;  %v11441_v15 = vld [vmem:[#allocation8_spill] sm:$0xff] }
 0x5e9   : > { %v1051_v59 = vmul.f32 %v8016_v14, %v11431_v44 }
 0x5ea   : > { %v8322_v10 = vadd.f32 %v1013_v42, %v944_v45  ;;  %v8341_v42 = vsel %vm11339_vm11, %v8051_v28, %v8061_v2  ;;  %v1049_v28 = vmul.f32 %v8016_v14, %v11440_v25  ;;  %v597_v2 = vsel %vm593_vm12, %v11245_v53, %v589_v58 }
 0x5eb   : > { %v590_v49 = vrot.slane %v8341_v42, 5  ;;  %v11243_v50 = vrot.slane %v8341_v42, 6  ;;  %v830_v9 = vmul.f32 %v8274_v16, %v597_v2  ;;  %v11242_v45 = vrot.slane %v8346_v22, 6  ;;  %v8387_v2 = vpop.permute.xlu0 %1152 }
 0x5ec   : > { %1138 = vrot.lane.b32.xlu1 %v1059_v27, %s7126_s10 }
 0x5ed   : > { %v596_v23 = vsel %vm593_vm12, %v589_v58, %v590_v49  ;;  %v869_v27 = vsel %vm866_vm1, %v862_v36, %v11243_v50  ;;  %v870_v44 = vsel %vm866_vm1, %v11242_v45, %v862_v36  ;;  %v846_v58 = vadd.f32 %v830_v9, %v8295_v3 }
 0x5ee   : > { %v831_v38 = vmul.f32 %v8274_v16, %v596_v23  ;;  %v932_v23 = vmul.f32 %v8298_v18, %v869_v27  ;;  %v1185_v45 = vsel %vm11339_vm11, %v8235_v29, %v8205_v48 }
 0x5f0   : > { %486 = vrot.lane.b32.xlu1 %v11439_v52, %s7126_s10 }
 0x5f4   : > { %490 = vrot.lane.b32.xlu1 %v11440_v25, %s7126_s10  ;;  %v963_v25 = vrot.slane %v557_v54, 7 }
 0x5f8   : > { %1126 = vrot.lane.b32.xlu1 %v1053_v63, %s7126_s10  ;;  %v847_v63 = vadd.f32 %v831_v38, %v8295_v3  ;;  %v931_v38 = vmul.f32 %v8298_v18, %v870_v44  ;;  %v1184_v44 = vsel %vm11339_vm11, %v8225_v47, %v8200_v61  ;;  %v8417_v61 = vadd.f32 %v8166_v26, %v7920_v37 }
 0x5f9   : > { %v559_v47 = vsel %vm11339_vm11, %v8066_v30, %v8071_v51  ;;  %v1045_v37 = vmul.f32 %v8016_v14, %v11441_v15 }
 0x5fa   : > { %v947_v9 = vadd.f32 %v931_v38, %v846_v58  ;;  %11442 = vst [vmem:[#allocation16_spill] sm:$0xff] %v8417_v61 }
 0x5fc   : > { %1130 = vrot.lane.b32.xlu1 %v1055_v39, %s7126_s10  ;;  %v11244_v39 = vrot.slane %v8341_v42, 7 }
 0x5fe   : > { %v970_v54 = vsel %vm967_vm10, %v963_v25, %v11244_v39 }
 0x5ff   : > { %v1017_v27 = vmul.f32 %v8311_v60, %v970_v54 }
 0x600   : > { %482 = vrot.lane.b32.xlu1 %v11441_v15, %s7126_s10 }
 0x604   : > { %1118 = vrot.lane.b32.xlu1 %v1049_v28, %s7126_s10  ;;  %v962_v28 = vrot.slane %v8346_v22, 7 }
 0x606   : > { %v971_v36 = vsel %vm967_vm10, %v962_v28, %v963_v25 }
 0x607   : > { %v1016_v50 = vmul.f32 %v8311_v60, %v971_v36  ;;  %v11246_v36 = vrot.slane %v8084_v13, 6 }
 0x608   : > { %1122 = vrot.lane.b32.xlu1 %v1051_v59, %s7126_s10  ;;  %v948_v59 = vadd.f32 %v932_v23, %v847_v63  ;;  %v8402_v63 = vpop.permute.xlu0 %500 }
 0x609   : > { %v1032_v23 = vadd.f32 %v1016_v50, %v947_v9  ;;  %v11247_v50 = vrot.slane %v8084_v13, 5  ;;  %v864_v9 = vrot.slane %v559_v47, 6 }
 0x60a   : > { %v1033_v39 = vadd.f32 %v1017_v27, %v948_v59 }
 0x60b   : > { %v8406_v25 = vadd.f32 %v1184_v44, %v1032_v23 }
 0x60c   : > { %v8404_v53 = vadd.f32 %v1185_v45, %v1033_v39  ;;  %v8428_v39 = vsel %vm11339_vm11, %v8192_v17, %v8220_v35  ;;  %v1047_v17 = vmul.f32 %v8016_v14, %v11439_v52  ;;  %v1050_v35 = vmul.f32 %v8016_v14, %v11423_v1 }
 0x60d   : > { %v5872_v38 = vmul.f32 -1.442695, %v8406_v25  ;;  %v587_v51 = vrot.slane %v8428_v39, 5 }
 0x60e   : > { %v5873_v54 = vmul.f32 -1.442695, %v8404_v53 }
 0x610   : > { %6657 = vpow2.f32 %v5873_v54 }
 0x611   : > { %6659 = vpow2.f32 %v5872_v38 }
 0x612   : > { %v2498_v58 = vpop.permute.xlu0 %2497 }
 0x61a   : > { %v2494_v48 = vpop.permute.xlu0 %2493 }
 0x61b   : > { %v8411_v29 = vadd.f32 %v2494_v48, %v8030_v12  ;;  %v591_v12 = vrot.slane %v559_v47, 5  ;;  %v8463_v48 = vadd.f32 %v2498_v58, %v8100_v57 }
 0x61d   : > { %2573 = vrot.lane.b32.xlu1 %v8411_v29, %s7124_s30  ;;  %v594_v30 = vsel %vm593_vm12, %v591_v12, %v11247_v50  ;;  %v6658_v15 = vpop.eup %6657  ;;  %v8484_v50 = vpop.permute.xlu1 %2495 }
 0x61e   : > { %v833_v27 = vmul.f32 %v8274_v16, %v594_v30  ;;  %v6660_v44 = vpop.eup %6659  ;;  %v1283_v38 = vadd.f32 1.0, %v6658_v15 }
 0x61f   : > { %v1282_v15 = vadd.f32 1.0, %v6660_v44 }
 0x620   : > { %v849_v58 = vadd.f32 %v833_v27, %v8295_v3  ;;  %6661 = vrcp.f32 %v1283_v38 }
 0x621   : > { %2144 = vrot.lane.b32.xlu1 %v8417_v61, %s7124_s30  ;;  %6663 = vrcp.f32 %v1282_v15 }
 0x622   : > { %v2490_v45 = vpop.permute.xlu0 %2489 }
 0x623   : > { %v8431_v59 = vadd.f32 %v2490_v45, %v8057_v40  ;;  %v595_v40 = vsel %vm593_vm12, %v590_v49, %v591_v12  ;;  %v11443_v49 = vrot.slane %v8346_v22, 5  ;;  %v11248_v45 = vrot.slane %v8084_v13, 7 }
 0x624   : > { %v832_v23 = vmul.f32 %v8274_v16, %v595_v40  ;;  %v867_v12 = vsel %vm866_vm1, %v864_v9, %v11246_v36  ;;  %v860_v40 = vrot.slane %v8428_v39, 6 }
 0x625   : > { %1110 = vrot.lane.b32.xlu1 %v1045_v37, %s7126_s10  ;;  %2569 = vrot.lane.b32.xlu0 %v8431_v59, %s7124_s30  ;;  %v598_v52 = vsel %vm593_vm12, %v587_v51, %v11443_v49  ;;  %v11444_v37 = vrot.slane %v8251_v33, 5  ;;  %v965_v49 = vrot.slane %v559_v47, 7 }
 0x626   : > { %v8443_v26 = vpop.permute.xlu0 %504  ;;  %v848_v36 = vadd.f32 %v832_v23, %v8295_v3  ;;  %v11446_v23 = vrot.slane %v8346_v22, 6 }
 0x627   : > { %v599_v30 = vsel %vm593_vm12, %v11444_v37, %v587_v51  ;;  %v8490_v37 = vadd.f32 %v8176_v5, %v7983_v19  ;;  %v968_v47 = vsel %vm967_vm10, %v965_v49, %v11248_v45  ;;  %v961_v5 = vrot.slane %v8428_v39, 7 }
 0x628   : > { %v828_v27 = vmul.f32 %v8274_v16, %v599_v30  ;;  %v11447_v30 = vrot.slane %v8341_v42, 7  ;;  %v1019_v39 = vmul.f32 %v8311_v60, %v968_v47 }
 0x629   : > { %1114 = vrot.lane.b32.xlu1 %v1047_v17, %s7126_s10  ;;  %1120 = vrot.lane.b32.xlu0 %v1050_v35, %s7126_s10  ;;  %v11445_v17 = vrot.slane %v8341_v42, 6  ;;  %v829_v35 = vmul.f32 %v8274_v16, %v598_v52  ;;  %v871_v52 = vsel %vm866_vm1, %v860_v40, %v11446_v23 }
 0x62a   : > { %v8460_v54 = vpop.permute.xlu0 %1140  ;;  %v930_v42 = vmul.f32 %v8298_v18, %v871_v52 }
 0x62b   : > { %v868_v57 = vsel %vm866_vm1, %v11445_v17, %v864_v9  ;;  %v934_v9 = vmul.f32 %v8298_v18, %v867_v12  ;;  %v845_v12 = vadd.f32 %v829_v35, %v8295_v3  ;;  %v969_v17 = vsel %vm967_vm10, %v11447_v30, %v965_v49 }
 0x62c   : > { %v933_v44 = vmul.f32 %v8298_v18, %v868_v57  ;;  %v11448_v57 = vrot.slane %v8251_v33, 6  ;;  %v1187_v35 = vsel %vm11339_vm11, %v8181_v0, %v8168_v20  ;;  %v1018_v49 = vmul.f32 %v8311_v60, %v969_v17 }
 0x62d   : > { %2577 = vrot.lane.b32.xlu1 %v8463_v48, %s7124_s30  ;;  %v950_v19 = vadd.f32 %v934_v9, %v849_v58  ;;  %v8520_v58 = vadd.f32 %v8184_v56, %v7988_v46  ;;  %v946_v56 = vadd.f32 %v930_v42, %v845_v12  ;;  %v1186_v0 = vsel %vm11339_vm11, %v8179_v11, %v8164_v8 }
 0x62e   : > { %v8486_v51 = vpop.permute.xlu0 %1144  ;;  %v949_v38 = vadd.f32 %v933_v44, %v848_v36  ;;  %v872_v23 = vsel %vm866_vm1, %v11448_v57, %v860_v40  ;;  %v844_v36 = vadd.f32 %v828_v27, %v8295_v3  ;;  %v972_v40 = vsel %vm967_vm10, %v961_v5, %v962_v28 }
 0x62f   : > { %11449 = vst [vmem:[#allocation10_spill] sm:$0xff] %v8520_v58  ;;  %v1035_v9 = vadd.f32 %v1019_v39, %v950_v19  ;;  %v929_v46 = vmul.f32 %v8298_v18, %v872_v23  ;;  %v8539_v27 = vadd.high.f32.bf16 %v8137_v32, %v8007_v31  ;;  %v11450_v20 = vrot.slane %v8251_v33, 7 }
 0x630   : > { %v1034_v44 = vadd.f32 %v1018_v49, %v949_v38  ;;  %v1015_v19 = vmul.f32 %v8311_v60, %v972_v40  ;;  %v1183_v31 = vsel %vm11339_vm11, %v8387_v2, %v8247_v34  ;;  %v1182_v33 = vsel %vm11339_vm11, %v8363_v55, %v8231_v21  ;;  %v6662_v2 = vpop.eup %6661 }
 0x631   : > { %2379 = vrot.lane.b32.xlu1 %v8490_v37, %s7124_s30  ;;  %v973_v22 = vsel %vm967_vm10, %v11450_v20, %v961_v5  ;;  %v8550_v47 = vadd.f32 %v1187_v35, %v1035_v9  ;;  %v945_v52 = vadd.f32 %v929_v46, %v844_v36  ;;  %v2336_v57 = vadd.f32 %v8156_v43, %v7936_v7  ;;  %v6664_v21 = vpop.eup %6663 }
 0x632   : > { %v8515_v45 = vpop.permute.xlu1 %2499  ;;  %v8531_v15 = vpop.permute.xlu0 %492  ;;  %v8556_v32 = vadd.f32 %v1186_v0, %v1034_v44  ;;  %v1014_v11 = vmul.f32 %v8311_v60, %v973_v22  ;;  %v1031_v8 = vadd.f32 %v1015_v19, %v946_v56  ;;  %v8580_v36 = vmul.f32 %v6662_v2, %v8404_v53  ;;  %v11457_v0 = vld [vmem:[#allocation7_spill] sm:$0xff] }
 0x633   : > { %v5875_v38 = vmul.f32 -1.442695, %v8550_v47  ;;  %v8588_v7 = vmul.f32 %v6664_v21, %v8406_v25  ;;  %v8610_v46 = vadd.f32 %v8484_v50, %v8035_v62  ;;  %v1044_v20 = vmul.f32 %v8016_v14, %v11457_v0  ;;  %v11458_v50 = vld [vmem:[#allocation9_spill] sm:$0xff]  ;;  %v11459_v21 = vld [vmem:[#allocation43_spill] sm:$0xff] }
 0x634   : > { %v1030_v30 = vadd.f32 %v1014_v11, %v945_v52  ;;  %v8567_v17 = vadd.f32 %v1183_v31, %v1031_v8  ;;  %v5874_v23 = vmul.f32 -1.442695, %v8556_v32  ;;  %11452 = vst [vmem:[#allocation8_spill] sm:$0xff] %v8580_v36  ;;  %v1046_v31 = vmul.f32 %v8016_v14, %v11458_v50  ;;  %v11475_v0 = vld [vmem:[#allocation53_spill] sm:$0xff] }
 0x635   : > { %2381 = vrot.lane.b32.xlu1 %v8520_v58, %s7124_s30  ;;  %6665 = vpow2.f32 %v5875_v38  ;;  %11454 = vst [vmem:[#allocation59_spill] sm:$0xff] %v8588_v7  ;;  %v8598_v49 = vpack.c.bf16 %v8580_v36, %v8588_v7  ;;  %v11474_v50 = vsub.s32 5, %v7259_v6  ;;  %v8715_v36 = vsub.s32 7, %v7259_v6 }
 0x636   : > { %v8548_v28 = vpop.permute.xlu1 %2501  ;;  %v8564_v5 = vpop.permute.xlu0 %496  ;;  %v8575_v39 = vadd.f32 %v1182_v33, %v1030_v30  ;;  %6667 = vpow2.f32 %v5874_v23  ;;  %v11486_v58 = vrot.slane %v8261_v41, 7 }
 0x637   : > { %11455 = vst [vmem:[#allocation60_spill] sm:$0xff] %v8598_v49  ;;  %v661_v7 = vrot.slane %v11475_v0, %v11474_v50  ;;  %11477 = vst [vmem:[#allocation53_spill] sm:$0xff] %v8715_v36  ;;  %v11479_v50 = vrot.slane %v8084_v13, 5 }
 0x638   : > { %v5870_v43 = vmul.f32 -1.442695, %v8575_v39 }
 0x639   : > { %2775 = vrot.lane.b32.xlu1 %v8539_v27, %s7124_s30 }
 0x63a   : > { %v2504_v12 = vpop.permute.xlu1 %2503  ;;  %v8585_v35 = vpop.permute.xlu0 %1132 }
 0x63b   : > { %v8570_v34 = vadd.f32 %v2504_v12, %v8115_v4  ;;  %v5871_v4 = vmul.f32 -1.442695, %v8567_v17 }
 0x63d   : > { %11451 = vst [vmem:[#allocation12_spill] sm:$0xff] %v8570_v34  ;;  %2583 = vrot.lane.b32.xlu1 %v8570_v34, %s7124_s30  ;;  %6669 = vpow2.f32 %v5871_v4 }
 0x63e   : > { %v2506_v55 = vpop.permute.xlu1 %2505  ;;  %6671 = vpow2.f32 %v5870_v43  ;;  %v8604_v25 = vpop.permute.xlu0 %1136 }
 0x63f   : > { %v8583_v42 = vadd.f32 %v2506_v55, %v2336_v57  ;;  %v11460_v55 = vld [vmem:[#allocation23_spill] sm:$0xff] }
 0x640   : > { %v8637_v14 = vadd.f32 %v11460_v55, %v11459_v21 }
 0x641   : > { %11453 = vst [vmem:[#allocation58_spill] sm:$0xff] %v8583_v42  ;;  %2585 = vrot.lane.b32.xlu1 %v8583_v42, %s7124_s30 }
 0x642   : > { %v2492_v40 = vpop.permute.xlu1 %2491  ;;  %v6666_v22 = vpop.eup %6665  ;;  %11461 = vst [vmem:[#allocation43_spill] sm:$0xff] %v8637_v14 }
 0x643   : > { %v8594_v53 = vadd.f32 %v2492_v40, %v8047_v24  ;;  %v11456_v24 = vmov 0.0   ;;  %v8620_v44 = vpop.permute.xlu0 %484  ;;  %v6668_v52 = vpop.eup %6667  ;;  %v1285_v62 = vadd.f32 1.0, %v6666_v22  ;;  %v11462_v40 = vld [vmem:[#allocation54_spill] sm:$0xff] }
 0x644   : > { %v1284_v8 = vadd.f32 1.0, %v6668_v52  ;;  %v11463_v52 = vld [vmem:[#allocation51_spill] sm:$0xff] }
 0x645   : > { %2571 = vrot.lane.b32.xlu0 %v8594_v53, %s7124_s30  ;;  %3413 = vrot.lane.b32.xlu1 %v8598_v49, %s7126_s10  ;;  %6673 = vrcp.f32 %v1285_v62  ;;  %v8657_v62 = vadd.f32 %v8548_v28, %v11463_v52 }
 0x646   : > { %v8606_v9 = vpop.permute.xlu1 %506  ;;  %6675 = vrcp.f32 %v1284_v8 }
 0x647   : > { %v8628_v12 = vpop.permute.xlu0 %488 }
 0x649   : > { %2575 = vrot.lane.b32.xlu0 %v8610_v46, %s7124_s30  ;;  %6536 = vrot.lane.b32.xlu1 %v11456_v24, %s7123_s6 }
 0x64a   : > { %v8616_v56 = vpop.permute.xlu1 %1142  ;;  %v6670_v11 = vpop.eup %6669 }
 0x64b   : > { %v6672_v33 = vpop.eup %6671  ;;  %v1281_v30 = vadd.f32 1.0, %v6670_v11  ;;  %v8639_v4 = vpop.permute.xlu0 %1124 }
 0x64c   : > { %v1280_v2 = vadd.f32 1.0, %v6672_v33  ;;  %v11465_v33 = vld [vmem:[#allocation50_spill] sm:$0xff] }
 0x64d   : > { %1108 = vrot.lane.b32.xlu0 %v1044_v20, %s7126_s10  ;;  %6677 = vrcp.f32 %v1281_v30  ;;  %v8647_v20 = vadd.f32 %v8515_v45, %v11462_v40  ;;  %v11466_v30 = vld [vmem:[#allocation18_spill] sm:$0xff] }
 0x64e   : > { %v8623_v19 = vpop.permute.xlu1 %1146  ;;  %6679 = vrcp.f32 %v1280_v2  ;;  %v8668_v2 = vadd.f32 %v11466_v30, %v11465_v33  ;;  %v11473_v30 = vld [vmem:[#allocation55_spill] sm:$0xff] }
 0x650   : > { %11467 = vst [vmem:[#allocation54_spill] sm:$0xff] %v8668_v2 }
 0x651   : > { %1112 = vrot.lane.b32.xlu0 %v1046_v31, %s7126_s10 }
 0x652   : > { %v8630_v38 = vpop.permute.xlu1 %494  ;;  %v6674_v31 = vpop.eup %6673 }
 0x653   : > { %v6676_v11 = vpop.eup %6675  ;;  %v8664_v45 = vmul.f32 %v6674_v31, %v8550_v47 }
 0x654   : > { %v8671_v40 = vmul.f32 %v6676_v11, %v8556_v32 }
 0x655   : > { %2377 = vrot.lane.b32.xlu0 %v2336_v57, %s7124_s30  ;;  %v8651_v57 = vpop.permute.xlu0 %1128  ;;  %11464 = vst [vmem:[#allocation23_spill] sm:$0xff] %v8664_v45 }
 0x656   : > { %v8633_v23 = vpop.permute.xlu1 %498  ;;  %11468 = vst [vmem:[#allocation51_spill] sm:$0xff] %v8671_v40  ;;  %v8680_v47 = vpack.c.bf16 %v8664_v45, %v8671_v40 }
 0x658   : > { %11470 = vst [vmem:[#allocation18_spill] sm:$0xff] %v8680_v47 }
 0x659   : > { %2146 = vrot.lane.b32.xlu0 %v8637_v14, %s7124_s30  ;;  %v481_v55 = vpop.permute.xlu0 %480 }
 0x65a   : > { %v8643_v43 = vpop.permute.xlu1 %1134  ;;  %v6678_v21 = vpop.eup %6677 }
 0x65b   : > { %v6680_v28 = vpop.eup %6679  ;;  %v8676_v1 = vmul.f32 %v6678_v21, %v8567_v17 }
 0x65c   : > { %v8683_v31 = vmul.f32 %v6680_v28, %v8575_v39  ;;  %v8701_v39 = vadd.low.f32.bf16 %v8431_v59, %v11473_v30  ;;  %v11478_v59 = vsub.s32 6, %v7259_v6 }
 0x65d   : > { %2579 = vrot.lane.b32.xlu0 %v8647_v20, %s7124_s30  ;;  %11469 = vst [vmem:[#allocation50_spill] sm:$0xff] %v8676_v1  ;;  %v8687_v32 = vpop.permute.xlu0 %1116 }
 0x65e   : > { %v8653_v22 = vpop.permute.xlu1 %1138  ;;  %11471 = vst [vmem:[#allocation61_spill] sm:$0xff] %v8683_v31  ;;  %v8693_v33 = vpack.c.bf16 %v8676_v1, %v8683_v31  ;;  %v729_v40 = vrot.slane %v11475_v0, %v11478_v59 }
 0x660   : > { %11472 = vst [vmem:[#allocation62_spill] sm:$0xff] %v8693_v33 }
 0x661   : > { %2581 = vrot.lane.b32.xlu0 %v8657_v62, %s7124_s30  ;;  %v2700_v21 = vpop.permute.xlu0 %2699 }
 0x662   : > { %v8661_v8 = vpop.permute.xlu1 %486  ;;  %v8709_v1 = vadd.f32 %v2700_v21, %v8594_v53  ;;  %v8728_v53 = vrot.slane %v11475_v0, %v8715_v36  ;;  %v11480_v21 = vrot.slane %v8084_v13, 6 }
 0x664   : > { %11476 = vst [vmem:[#allocation55_spill] sm:$0xff] %v8709_v1 }
 0x665   : > { %2383 = vrot.lane.b32.xlu0 %v8668_v2, %s7124_s30 }
 0x666   : > { %v491_v52 = vpop.permute.xlu1 %490 }
 0x669   : > { %3415 = vrot.lane.b32.xlu0 %v8680_v47, %s7126_s10 }
 0x66a   : > { %v8689_v11 = vpop.permute.xlu1 %1126 }
 0x66d   : > { %3411 = vrot.lane.b32.xlu0 %v8693_v33, %s7126_s10 }
 0x66e   : > { %v8697_v17 = vpop.permute.xlu1 %1130 }
 0x671   : > { %2777 = vrot.lane.b32.xlu0 %v8701_v39, %s7124_s30 }
 0x672   : > { %v483_v28 = vpop.permute.xlu1 %482 }
 0x673   : > { %v8712_v31 = vsel %vm11339_vm11, %v481_v55, %v483_v28 }
 0x674   : > { %v11266_v45 = vrot.slane %v8712_v31, 5  ;;  %v11269_v47 = vrot.slane %v8712_v31, 6 }
 0x675   : > { %2779 = vrot.lane.b32.xlu0 %v8709_v1, %s7124_s30 }
 0x676   : > { %v609_v55 = vsel %vm593_vm12, %v11479_v50, %v11266_v45  ;;  %v882_v28 = vsel %vm866_vm1, %v11480_v21, %v11269_v47  ;;  %v8754_v47 = vpop.permute.xlu1 %1118 }
 0x677   : > { %v662_v0 = vsel %vm610_vm13, %v661_v7, %v609_v55  ;;  %v883_v36 = vsel %vm610_vm13, %v729_v40, %v882_v28  ;;  %v11481_v7 = vld [vmem:[#allocation56_spill] sm:$0xff] }
 0x678   : > { %v730_v59 = vsel %vm678_vm14, %v729_v40, %v662_v0  ;;  %v899_v50 = vsel %vm678_vm14, %v8728_v53, %v883_v36  ;;  %v11482_v55 = vld [vmem:[#allocation20_spill] sm:$0xff]  ;;  %v11483_v36 = vrot.slane %v8261_v41, 5 }
 0x679   : > { %v798_v49 = vsel %vm746_vm15, %v8728_v53, %v730_v59  ;;  %v919_v14 = vmul.f32 %v8298_v18, %v899_v50  ;;  %v552_v40 = vsel %vm11339_vm11, %v11482_v55, %v11481_v7  ;;  %v11484_v59 = vld [vmem:[#allocation14_spill] sm:$0xff]  ;;  %v11485_v55 = vrot.slane %v8261_v41, 6 }
 0x67a   : > { %v818_v45 = vmul.f32 %v8274_v16, %v798_v49  ;;  %v8756_v2 = vpop.permute.xlu1 %1122  ;;  %v584_v28 = vrot.slane %v552_v40, 5  ;;  %v8773_v50 = vsel %vm11339_vm11, %v8402_v63, %v11484_v59  ;;  %v8790_v59 = vsel %vm11339_vm11, %v8564_v5, %v8633_v23 }
 0x67b   : > { %v8806_v5 = vsel %vm11339_vm11, %v8531_v15, %v8630_v38  ;;  %v581_v41 = vrot.slane %v8790_v59, 5 }
 0x67c   : > { %v834_v42 = vadd.f32 %v818_v45, %v8295_v3  ;;  %v601_v49 = vsel %vm593_vm12, %v584_v28, %v11483_v36  ;;  %v857_v45 = vrot.slane %v552_v40, 6  ;;  %v582_v36 = vrot.slane %v8773_v50, 5 }
 0x67e   : > { %v8752_v21 = vadd.f32 %v919_v14, %v834_v42  ;;  %v551_v42 = vsel %vm11339_vm11, %v8443_v26, %v8606_v9  ;;  %v826_v14 = vmul.f32 %v8274_v16, %v601_v49  ;;  %v958_v26 = vrot.slane %v552_v40, 7 }
 0x67f   : > { %v583_v7 = vrot.slane %v551_v42, 5  ;;  %v8798_v40 = vsel %vm11339_vm11, %v8628_v12, %v491_v52  ;;  %v957_v23 = vrot.slane %v551_v42, 7 }
 0x680   : > { %v842_v34 = vadd.f32 %v826_v14, %v8295_v3  ;;  %v579_v12 = vrot.slane %v8798_v40, 5 }
 0x681   : > { %v602_v9 = vsel %vm593_vm12, %v583_v7, %v584_v28  ;;  %v603_v63 = vsel %vm593_vm12, %v582_v36, %v583_v7  ;;  %v855_v28 = vrot.slane %v8773_v50, 6 }
 0x682   : > { %v824_v7 = vmul.f32 %v8274_v16, %v603_v63  ;;  %v1180_v63 = vsel %vm11339_vm11, %v8460_v54, %v8616_v56  ;;  %v854_v56 = vrot.slane %v8790_v59, 6 }
 0x68f   : > { %v2574_v0 = vpop.permute.xlu1 %2573 }
 0x690   : > { %2705 = vrot.lane.b32.xlu1 %v2574_v0, %s7123_s6  ;;  %v874_v0 = vsel %vm866_vm1, %v857_v45, %v11485_v55  ;;  %v856_v55 = vrot.slane %v551_v42, 6  ;;  %v580_v42 = vrot.slane %v8806_v5, 5 }
 0x691   : > { %v927_v49 = vmul.f32 %v8298_v18, %v874_v0  ;;  %v825_v0 = vmul.f32 %v8274_v16, %v602_v9  ;;  %v956_v9 = vrot.slane %v8773_v50, 7 }
 0x692   : > { %v876_v52 = vsel %vm866_vm1, %v855_v28, %v856_v55  ;;  %v875_v15 = vsel %vm866_vm1, %v856_v55, %v857_v45  ;;  %v606_v55 = vsel %vm593_vm12, %v579_v12, %v580_v42  ;;  %v605_v54 = vsel %vm593_vm12, %v580_v42, %v581_v41 }
 0x693   : > { %v943_v14 = vadd.f32 %v927_v49, %v842_v34  ;;  %v8816_v34 = vsel %vm11339_vm11, %v8620_v44, %v8661_v8  ;;  %v604_v49 = vsel %vm593_vm12, %v581_v41, %v582_v36  ;;  %v841_v44 = vadd.f32 %v825_v0, %v8295_v3 }
 0x694   : > { %v977_v8 = vsel %vm967_vm10, %v956_v9, %v957_v23  ;;  %v925_v50 = vmul.f32 %v8298_v18, %v876_v52  ;;  %v578_v45 = vrot.slane %v8816_v34, 5  ;;  %v976_v36 = vsel %vm967_vm10, %v957_v23, %v958_v26 }
 0x695   : > { %v823_v0 = vmul.f32 %v8274_v16, %v604_v49  ;;  %v852_v52 = vrot.slane %v8798_v40, 6  ;;  %v853_v41 = vrot.slane %v8806_v5, 6  ;;  %v821_v1 = vmul.f32 %v8274_v16, %v606_v55 }
 0x696   : > { %v822_v23 = vmul.f32 %v8274_v16, %v605_v54  ;;  %v955_v49 = vrot.slane %v8790_v59, 7 }
 0x697   : > { %v2570_v33 = vpop.permute.xlu0 %2569  ;;  %v837_v59 = vadd.f32 %v821_v1, %v8295_v3 }
 0x698   : > { %2701 = vrot.lane.b32.xlu1 %v2570_v33, %s7123_s6  ;;  %v975_v33 = vsel %vm967_vm10, %v958_v26, %v11486_v58  ;;  %v1181_v26 = vsel %vm11339_vm11, %v8486_v51, %v8623_v19  ;;  %v851_v51 = vrot.slane %v8816_v34, 6  ;;  %v879_v19 = vsel %vm866_vm1, %v852_v52, %v853_v41 }
 0x699   : > { %v1012_v58 = vmul.f32 %v8311_v60, %v975_v33  ;;  %v840_v33 = vadd.f32 %v824_v7, %v8295_v3  ;;  %v922_v1 = vmul.f32 %v8298_v18, %v879_v19 }
 0x69b   : > { %v1028_v38 = vadd.f32 %v1012_v58, %v943_v14  ;;  %v926_v14 = vmul.f32 %v8298_v18, %v875_v15  ;;  %v607_v58 = vsel %vm593_vm12, %v578_v45, %v579_v12  ;;  %v941_v42 = vadd.f32 %v925_v50, %v840_v33 }
 0x69c   : > { %v1010_v15 = vmul.f32 %v8311_v60, %v977_v8  ;;  %v877_v12 = vsel %vm866_vm1, %v854_v56, %v855_v28  ;;  %v820_v33 = vmul.f32 %v8274_v16, %v607_v58  ;;  %v953_v8 = vrot.slane %v8798_v40, 7 }
 0x69d   : > { %v8841_v7 = vadd.f32 %v1180_v63, %v1028_v38  ;;  %v942_v61 = vadd.f32 %v926_v14, %v841_v44  ;;  %v1011_v38 = vmul.f32 %v8311_v60, %v976_v36  ;;  %v878_v63 = vsel %vm866_vm1, %v853_v41, %v854_v56  ;;  %v8863_v44 = vpop.permute.xlu1 %2144 }
 0x69e   : > { %v839_v50 = vadd.f32 %v823_v0, %v8295_v3  ;;  %v8871_v28 = vadd.f32 %v1181_v26, %v8322_v10  ;;  %v1026_v55 = vadd.f32 %v1010_v15, %v941_v42  ;;  %v954_v56 = vrot.slane %v8806_v5, 7  ;;  %v1121_v15 = vpop.permute.xlu0 %1120 }
 0x69f   : > { %v1027_v54 = vadd.f32 %v1011_v38, %v942_v61  ;;  %v880_v36 = vsel %vm866_vm1, %v851_v51, %v852_v52  ;;  %v838_v14 = vadd.f32 %v822_v23, %v8295_v3  ;;  %v924_v40 = vmul.f32 %v8298_v18, %v877_v12 }
 0x6a0   : > { %v923_v0 = vmul.f32 %v8298_v18, %v878_v63  ;;  %v978_v10 = vsel %vm967_vm10, %v955_v49, %v956_v9  ;;  %v836_v61 = vadd.f32 %v820_v33, %v8295_v3  ;;  %v1179_v5 = vsel %vm11339_vm11, %v8604_v25, %v8653_v22 }
 0x6a1   : > { %v952_v58 = vrot.slane %v8816_v34, 7  ;;  %v940_v52 = vadd.f32 %v924_v40, %v839_v50  ;;  %v980_v41 = vsel %vm967_vm10, %v953_v8, %v954_v56  ;;  %v5869_v42 = vmul.f32 -1.442695, %v8871_v28  ;;  %v1111_v23 = vpop.permute.xlu1 %1110 }
 0x6a2   : > { %v979_v26 = vsel %vm967_vm10, %v954_v56, %v955_v49  ;;  %v921_v9 = vmul.f32 %v8298_v18, %v880_v36  ;;  %v938_v38 = vadd.f32 %v922_v1, %v837_v59  ;;  %v1178_v25 = vsel %vm11339_vm11, %v8585_v35, %v8643_v43 }
 0x6a3   : > { %v939_v22 = vadd.f32 %v923_v0, %v838_v14  ;;  %v1009_v12 = vmul.f32 %v8311_v60, %v978_v10  ;;  %v981_v63 = vsel %vm967_vm10, %v952_v58, %v953_v8  ;;  %v8902_v33 = vadd.f32 %v1179_v5, %v1027_v54 }
 0x6a4   : > { %v1177_v49 = vsel %vm11339_vm11, %v8651_v57, %v8697_v17  ;;  %v937_v19 = vadd.f32 %v921_v9, %v836_v61  ;;  %v1007_v50 = vmul.f32 %v8311_v60, %v980_v41  ;;  %v5868_v59 = vmul.f32 -1.442695, %v8841_v7 }
 0x6a5   : > { %v1008_v56 = vmul.f32 %v8311_v60, %v979_v26  ;;  %v1025_v35 = vadd.f32 %v1009_v12, %v940_v52  ;;  %v1175_v43 = vsel %vm11339_vm11, %v1121_v15, %v8756_v2  ;;  %v8912_v36 = vadd.f32 %v1178_v25, %v1026_v55  ;;  %v1115_v61 = vpop.permute.xlu1 %1114 }
 0x6a6   : > { %v1176_v8 = vsel %vm11339_vm11, %v8639_v4, %v8689_v11  ;;  %v1006_v54 = vmul.f32 %v8311_v60, %v981_v63  ;;  %v1023_v57 = vadd.f32 %v1007_v50, %v938_v38  ;;  %6681 = vpow2.f32 %v5869_v42 }
 0x6a7   : > { %v1024_v17 = vadd.f32 %v1008_v56, %v939_v22  ;;  %v8918_v14 = vadd.f32 %v1177_v49, %v1025_v35  ;;  %v1174_v40 = vsel %vm11339_vm11, %v8687_v32, %v8754_v47  ;;  %v5867_v0 = vmul.f32 -1.442695, %v8902_v33 }
 0x6a8   : > { %v951_v2 = vrot.slane %v8712_v31, 7  ;;  %v1022_v55 = vadd.f32 %v1006_v54, %v937_v19  ;;  %v8925_v10 = vadd.f32 %v1175_v43, %v1023_v57  ;;  %6683 = vpow2.f32 %v5868_v59 }
 0x6a9   : > { %v8927_v4 = vadd.f32 %v1176_v8, %v1024_v17  ;;  %v11487_v11 = vrot.slane %v8712_v31, 5  ;;  %v5866_v47 = vmul.f32 -1.442695, %v8912_v36  ;;  %v5865_v5 = vmul.f32 -1.442695, %v8918_v14  ;;  %v2578_v38 = vpop.permute.xlu1 %2577 }
 0x6aa   : > { %v8936_v32 = vadd.f32 %v1174_v40, %v1022_v55  ;;  %6685 = vpow2.f32 %v5867_v0  ;;  %v11488_v41 = vrot.slane %v8084_v13, 7  ;;  %v5863_v26 = vmul.f32 -1.442695, %v8925_v10 }
 0x6ab   : > { %v608_v1 = vsel %vm593_vm12, %v11487_v11, %v578_v45  ;;  %v5864_v15 = vmul.f32 -1.442695, %v8927_v4  ;;  %6687 = vpow2.f32 %v5866_v47  ;;  %v11489_v25 = vrot.slane %v8712_v31, 6 }
 0x6ac   : > { %v819_v52 = vmul.f32 %v8274_v16, %v608_v1  ;;  %v983_v42 = vsel %vm967_vm10, %v11488_v41, %v951_v2  ;;  %v5862_v45 = vmul.f32 -1.442695, %v8936_v32  ;;  %6689 = vpow2.f32 %v5865_v5 }
 0x6ad   : > { %v881_v13 = vsel %vm866_vm1, %v11489_v25, %v851_v51  ;;  %v984_v16 = vsel %vm610_vm13, %v8728_v53, %v983_v42  ;;  %6691 = vpow2.f32 %v5863_v26  ;;  %v982_v31 = vsel %vm967_vm10, %v951_v2, %v952_v58  ;;  %v2380_v49 = vpop.permute.xlu1 %2379 }
 0x6ae   : > { %v835_v12 = vadd.f32 %v819_v52, %v8295_v3  ;;  %6693 = vpow2.f32 %v5864_v15  ;;  %v1004_v63 = vmul.f32 %v8311_v60, %v984_v16  ;;  %v920_v34 = vmul.f32 %v8298_v18, %v881_v13 }
 0x6af   : > { %6695 = vpow2.f32 %v5862_v45  ;;  %v1005_v35 = vmul.f32 %v8311_v60, %v982_v31  ;;  %v2179_v60 = vrot.slane %v8863_v44, 4  ;;  %v11490_v44 = vld [vmem:[#allocation52_spill] sm:$0xff]  ;;  %vm11340_vm10 = vcmask 130048  }
 0x6b0   : > { %v1020_v53 = vadd.f32 %v1004_v63, %v8752_v21  ;;  %v936_v50 = vadd.f32 %v920_v34, %v835_v12 }
 0x6b1   : > { %v2382_v21 = vpop.permute.xlu1 %2381 }
 0x6b2   : > { %v1021_v58 = vadd.f32 %v1005_v35, %v936_v50 }
 0x6b3   : > { %v6682_v51 = vpop.eup %6681 }
 0x6b4   : > { %v1279_v43 = vadd.f32 1.0, %v6682_v51 }
 0x6b5   : > { %v6684_v3 = vpop.eup %6683  ;;  %v2776_v42 = vpop.permute.xlu1 %2775 }
 0x6b6   : > { %v1278_v57 = vadd.f32 1.0, %v6684_v3 }
 0x6b7   : > { %v2572_v9 = vpop.permute.xlu0 %2571  ;;  %v6686_v54 = vpop.eup %6685 }
 0x6b8   : > { %v6688_v40 = vpop.eup %6687  ;;  %v1277_v2 = vadd.f32 1.0, %v6686_v54 }
 0x6b9   : > { %v6690_v0 = vpop.eup %6689  ;;  %v1276_v47 = vadd.f32 1.0, %v6688_v40  ;;  %v2584_v16 = vpop.permute.xlu1 %2583 }
 0x6ba   : > { %v6692_v1 = vpop.eup %6691  ;;  %v1275_v52 = vadd.f32 1.0, %v6690_v0 }
 0x6bb   : > { %v2576_v22 = vpop.permute.xlu0 %2575  ;;  %v1273_v41 = vadd.f32 1.0, %v6692_v1 }
 0x6bc   : > { %2707 = vrot.lane.b32.xlu0 %v2576_v22, %s7123_s6 }
 0x6bf   : > { %v1109_v19 = vpop.permute.xlu0 %1108 }
 0x6c0   : > { %v1172_v59 = vsel %vm11339_vm11, %v1109_v19, %v1111_v23  ;;  %2703 = vrot.lane.b32.xlu0 %v2572_v9, %s7123_s6  ;;  %v11491_v9 = vrot.slane %v11490_v44, 4 }
 0x6c1   : > { %v8965_v56 = vadd.f32 %v1172_v59, %v1020_v53  ;;  %v2586_v53 = vpop.permute.xlu1 %2585 }
 0x6c2   : > { %v2185_v15 = vsel %vm2182_vm7, %v11491_v9, %v2179_v60 }
 0x6c3   : > { %v5860_v18 = vmul.f32 -1.442695, %v8965_v56  ;;  %v1113_v8 = vpop.permute.xlu0 %1112 }
 0x6c4   : > { %v1173_v17 = vsel %vm11339_vm11, %v1113_v8, %v1115_v61  ;;  %2709 = vrot.lane.b32.xlu0 %v2578_v38, %s7123_s6  ;;  %v6694_v61 = vpop.eup %6693 }
 0x6c5   : > { %6697 = vpow2.f32 %v5860_v18  ;;  %v8971_v23 = vadd.f32 %v1173_v17, %v1021_v58  ;;  %v6696_v5 = vpop.eup %6695  ;;  %v1274_v45 = vadd.f32 1.0, %v6694_v61  ;;  %v9020_v17 = vpop.permute.xlu1 %3413 }
 0x6c6   : > { %6699 = vrcp.f32 %v1279_v43  ;;  %v1272_v38 = vadd.f32 1.0, %v6696_v5  ;;  %11497 = vst [vmem:[#allocation64_spill] sm:$0xff] %v9020_v17 }
 0x6c7   : > { %v5861_v55 = vmul.f32 -1.442695, %v8971_v23  ;;  %v2378_v11 = vpop.permute.xlu0 %2377  ;;  %6701 = vrcp.f32 %v1278_v57 }
 0x6c8   : > { %2507 = vrot.lane.b32.xlu1 %v2378_v11, %s7123_s6  ;;  %2509 = vrot.lane.b32.xlu0 %v2380_v49, %s7123_s6 }
 0x6c9   : > { %6703 = vpow2.f32 %v5861_v55 }
 0x6ca   : > { %6705 = vrcp.f32 %v1277_v2 }
 0x6cb   : > { %v8977_v26 = vpop.permute.xlu0 %2146  ;;  %6707 = vrcp.f32 %v1276_v47 }
 0x6cc   : > { %2305 = vrot.lane.b32.xlu1 %v2185_v15, %s7123_s6  ;;  %6541 = vrot.lane.b32.xlu0 %v11456_v24, %s7123_s6  ;;  %6709 = vrcp.f32 %v1275_v52  ;;  %v2180_v25 = vrot.slane %v8977_v26, 4  ;;  %v6537_v52 = vpop.permute.xlu1 %6536 }
 0x6cd   : > { %6711 = vrcp.f32 %v1273_v41  ;;  %v9076_v41 = vadd.low.f32.bf16 %v8701_v39, %v6537_v52 }
 0x6ce   : > { %6713 = vrcp.f32 %v1274_v45  ;;  %v2184_v34 = vsel %vm2182_vm7, %v2179_v60, %v2180_v25 }
 0x6cf   : > { %v2580_v13 = vpop.permute.xlu0 %2579  ;;  %6715 = vrcp.f32 %v1272_v38 }
 0x6d0   : > { %2711 = vrot.lane.b32.xlu1 %v2580_v13, %s7123_s6  ;;  %2511 = vrot.lane.b32.xlu0 %v2382_v21, %s7123_s6 }
 0x6d2   : > { %v6698_v22 = vpop.eup %6697 }
 0x6d3   : > { %v1270_v12 = vadd.f32 1.0, %v6698_v22  ;;  %v2582_v63 = vpop.permute.xlu0 %2581  ;;  %v6700_v31 = vpop.eup %6699 }
 0x6d4   : > { %2307 = vrot.lane.b32.xlu1 %v2184_v34, %s7123_s6  ;;  %2911 = vrot.lane.b32.xlu0 %v2776_v42, %s7123_s6  ;;  %v6702_v51 = vpop.eup %6701  ;;  %v8996_v19 = vmul.f32 %v6700_v31, %v8871_v28 }
 0x6d5   : > { %6717 = vrcp.f32 %v1270_v12  ;;  %v9001_v35 = vmul.f32 %v6702_v51, %v8841_v7 }
 0x6d6   : > { %v6704_v49 = vpop.eup %6703  ;;  %11492 = vst [vmem:[#allocation56_spill] sm:$0xff] %v8996_v19 }
 0x6d7   : > { %v1271_v50 = vadd.f32 1.0, %v6704_v49  ;;  %v2384_v59 = vpop.permute.xlu0 %2383  ;;  %v6706_v3 = vpop.eup %6705  ;;  %11493 = vst [vmem:[#allocation20_spill] sm:$0xff] %v9001_v35  ;;  %v9010_v58 = vpack.c.bf16 %v8996_v19, %v9001_v35  ;;  %v11507_v49 = vld [vmem:[#allocation10_spill] sm:$0xff] }
 0x6d8   : > { %2713 = vrot.lane.b32.xlu1 %v2582_v63, %s7123_s6  ;;  %2715 = vrot.lane.b32.xlu0 %v2584_v16, %s7123_s6  ;;  %v6708_v43 = vpop.eup %6707  ;;  %v9004_v8 = vmul.f32 %v6706_v3, %v8902_v33 }
 0x6d9   : > { %6719 = vrcp.f32 %v1271_v50  ;;  %v6710_v18 = vpop.eup %6709  ;;  %v9018_v33 = vmul.f32 %v6708_v43, %v8912_v36  ;;  %v11509_v43 = vld [vmem:[#allocation62_spill] sm:$0xff] }
 0x6da   : > { %11494 = vst [vmem:[#allocation14_spill] sm:$0xff] %v9004_v8  ;;  %v6712_v54 = vpop.eup %6711  ;;  %v9025_v40 = vmul.f32 %v6710_v18, %v8918_v14 }
 0x6db   : > { %v9006_v28 = vpop.permute.xlu0 %3415  ;;  %v6714_v57 = vpop.eup %6713  ;;  %11496 = vst [vmem:[#allocation63_spill] sm:$0xff] %v9018_v33  ;;  %v9030_v0 = vmul.f32 %v6712_v54, %v8925_v10  ;;  %v3372_v36 = vpack.c.bf16 %v9004_v8, %v9018_v33 }
 0x6dc   : > { %11495 = vst [vmem:[#allocation52_spill] sm:$0xff] %v9006_v28  ;;  %6433 = vmatprep.subr.msk.bf16.mxu1 %vm11340_vm10, %v9006_v28  ;;  %2513 = vrot.lane.b32.xlu1 %v2384_v59, %s7123_s6  ;;  %v3464_v7 = vsel %vm11340_vm10, %v9006_v28, 0  ;;  %v6716_v21 = vpop.eup %6715  ;;  %11498 = vst [vmem:[#allocation65_spill] sm:$0xff] %v9025_v40  ;;  %v9035_v2 = vmul.f32 %v6714_v57, %v8927_v4  ;;  %v3461_v4 = vsel %vm11340_vm10, %v9020_v17, 0  ;;  %v11542_v28 = vld [vmem:[#allocation46_spill] sm:$0xff] }
 0x6dd   : > { %3409 = vrot.lane.b32.xlu0 %v9010_v58, %s7126_s10  ;;  %6212 = vmatpush3.bf16.xpose.msra.mxu1 %v3464_v7  ;;  %11499 = vst [vmem:[#allocation66_spill] sm:$0xff] %v9030_v0  ;;  %v9039_v60 = vmul.f32 %v6716_v21, %v8936_v32  ;;  %v11510_v7 = vld [vmem:[#allocation54_spill] sm:$0xff]  ;;  %v11511_v21 = vld [vmem:[#allocation43_spill] sm:$0xff] }
 0x6de   : > { %6434 = vmatprep.subr.msk.bf16.mxu1 %vm11340_vm10, %v9020_v17  ;;  %11500 = vst [vmem:[#allocation67_spill] sm:$0xff] %v9035_v2  ;;  %v3371_v14 = vpack.c.bf16 %v9025_v40, %v9035_v2 }
 0x6df   : > { %11501 = vst [vmem:[#allocation68_spill] sm:$0xff] %v9039_v60  ;;  %v3370_v10 = vpack.c.bf16 %v9030_v0, %v9039_v60  ;;  %v9049_v11 = vpop.permute.xlu0 %3411 }
 0x6e0   : > { %2717 = vrot.lane.b32.xlu1 %v2586_v53, %s7123_s6  ;;  %11502 = vst [vmem:[#allocation69_spill] sm:$0xff] %v9049_v11  ;;  %v3458_v5 = vsel %vm11340_vm10, %v9049_v11, 0 }
 0x6e1   : > { %3407 = vrot.lane.b32.xlu0 %v3372_v36, %s7126_s10 }
 0x6e2   : > { %v6718_v55 = vpop.eup %6717 }
 0x6e3   : > { %v9055_v1 = vmul.f32 %v6718_v55, %v8965_v56  ;;  %v9070_v56 = vadd.high.f32.bf16 %v8539_v27, %v11473_v30 }
 0x6e4   : > { %3405 = vrot.lane.b32.xlu1 %v3371_v14, %s7126_s10 }
 0x6e5   : > { %3403 = vrot.lane.b32.xlu0 %v3370_v10, %s7126_s10  ;;  %6214 = vmatpush3.bf16.xpose.msra.mxu1 %v3461_v4  ;;  %11503 = vst [vmem:[#allocation70_spill] sm:$0xff] %v9055_v1 }
 0x6e6   : > { %v6720_v32 = vpop.eup %6719  ;;  %6435 = vmatprep.subr.msk.bf16.mxu1 %vm11340_vm10, %v9049_v11 }
 0x6e7   : > { %v9058_v61 = vmul.f32 %v6720_v32, %v8971_v23  ;;  %v2778_v23 = vpop.permute.xlu0 %2777 }
 0x6e9   : > { %11504 = vst [vmem:[#allocation71_spill] sm:$0xff] %v9058_v61  ;;  %v3369_v47 = vpack.c.bf16 %v9058_v61, %v9055_v1 }
 0x6eb   : > { %3385 = vrot.lane.b32.xlu0 %v3369_v47, %s7127_s18  ;;  %3401 = vrot.lane.b32.xlu1 %v3369_v47, %s7126_s10  ;;  %v2780_v42 = vpop.permute.xlu0 %2779 }
 0x6ed   : > { %6216 = vmatpush3.bf16.xpose.msra.mxu1 %v3458_v5 }
 0x6ef   : > { %3391 = vrot.lane.b32.xlu0 %v3372_v36, %s7127_s18  ;;  %3387 = vrot.lane.b32.xlu1 %v3370_v10, %s7127_s18  ;;  %v11512_v10 = vld [vmem:[#allocation58_spill] sm:$0xff] }
 0x6f3   : > { %2983 = vrot.lane.b32.xlu0 %v9070_v56, %s7124_s30  ;;  %3389 = vrot.lane.b32.xlu1 %v3371_v14, %s7127_s18 }
 0x6f7   : > { %2985 = vrot.lane.b32.xlu0 %v9076_v41, %s7124_s30  ;;  %2913 = vrot.lane.b32.xlu1 %v2778_v23, %s7123_s6 }
 0x6fb   : > { %2915 = vrot.lane.b32.xlu0 %v2780_v42, %s7123_s6 }
 0x702   : > { %v2706_v30 = vpop.permute.xlu1 %2705 }
 0x703   : > { %v9088_v39 = vadd.f32 %v2706_v30, %v8463_v48 }
 0x70a   : > { %v2702_v45 = vpop.permute.xlu1 %2701 }
 0x70b   : > { %v9098_v38 = vadd.f32 %v2702_v45, %v8411_v29  ;;  %v11505_v29 = vld [vmem:[#allocation55_spill] sm:$0xff]  ;;  %v11518_v45 = vld [vmem:[#allocation18_spill] sm:$0xff] }
 0x70c   : > { %v9112_v63 = vadd.high.f32.bf16 %v11505_v29, %v6537_v52 }
 0x72e   : > { %v2708_v44 = vpop.permute.xlu0 %2707 }
 0x72f   : > { %v9083_v27 = vadd.f32 %v2708_v44, %v8647_v20 }
 0x731   : > { %2787 = vrot.lane.b32.xlu1 %v9083_v27, %s7124_s30 }
 0x732   : > { %v2704_v9 = vpop.permute.xlu0 %2703 }
 0x733   : > { %v9091_v15 = vadd.f32 %v2704_v9, %v8610_v46  ;;  %v11517_v9 = vld [vmem:[#allocation60_spill] sm:$0xff] }
 0x735   : > { %2783 = vrot.lane.b32.xlu0 %v9091_v15, %s7124_s30  ;;  %2785 = vrot.lane.b32.xlu1 %v9088_v39, %s7124_s30 }
 0x736   : > { %v2710_v20 = vpop.permute.xlu0 %2709 }
 0x737   : > { %v9101_v13 = vadd.f32 %v2710_v20, %v8657_v62  ;;  %v11506_v62 = vld [vmem:[#allocation16_spill] sm:$0xff] }
 0x739   : > { %2789 = vrot.lane.b32.xlu0 %v9101_v13, %s7124_s30  ;;  %2781 = vrot.lane.b32.xlu1 %v9098_v38, %s7124_s30 }
 0x73a   : > { %v2508_v48 = vpop.permute.xlu1 %2507  ;;  %v2510_v46 = vpop.permute.xlu0 %2509 }
 0x73b   : > { %v2545_v16 = vadd.f32 %v2508_v48, %v8490_v37  ;;  %v2546_v53 = vadd.f32 %v2510_v46, %v11507_v49  ;;  %v11508_v37 = vld [vmem:[#allocation12_spill] sm:$0xff] }
 0x73d   : > { %2587 = vrot.lane.b32.xlu1 %v2545_v16, %s7124_s30 }
 0x73e   : > { %v2306_v22 = vpop.permute.xlu1 %2305  ;;  %v9109_v12 = vpop.permute.xlu0 %6541 }
 0x73f   : > { %v2340_v34 = vadd.f32 %v2306_v22, %v11506_v62 }
 0x741   : > { %2385 = vrot.lane.b32.xlu0 %v2340_v34, %s7124_s30  ;;  %2987 = vrot.lane.b32.xlu1 %v9112_v63, %s7124_s30 }
 0x742   : > { %v2712_v31 = vpop.permute.xlu1 %2711  ;;  %v2512_v51 = vpop.permute.xlu0 %2511 }
 0x743   : > { %v9120_v50 = vadd.f32 %v2712_v31, %v11508_v37  ;;  %v9130_v57 = vadd.f32 %v2512_v51, %v11510_v7  ;;  %v11276_v37 = vmov 48  }
 0x744   : > { %6560 = vset.pattern.permute.xlu1 %v11276_v37  ;;  %6561 = vset.pattern.permute.xlu0 %v11276_v37 }
 0x745   : > { %2791 = vrot.lane.b32.xlu0 %v9120_v50, %s7124_s30  ;;  %2589 = vrot.lane.b32.xlu1 %v2546_v53, %s7124_s30 }
 0x746   : > { %v2308_v59 = vpop.permute.xlu1 %2307  ;;  %v2912_v3 = vpop.permute.xlu0 %2911 }
 0x747   : > { %v9133_v36 = vadd.f32 %v2308_v59, %v11511_v21  ;;  %v9189_v46 = vadd.f32 %v2912_v3, %v9091_v15  ;;  %v9205_v15 = vadd.low.f32.bf16 %v9098_v38, %v9109_v12  ;;  %v11524_v21 = vld [vmem:[#allocation49_spill] sm:$0xff] }
 0x749   : > { %3393 = vrot.lane.b32.xlu0 %v9010_v58, %s7127_s18  ;;  %3395 = vrot.lane.b32.xlu1 %v11509_v43, %s7127_s18 }
 0x74a   : > { %v2714_v18 = vpop.permute.xlu1 %2713  ;;  %v2716_v54 = vpop.permute.xlu0 %2715 }
 0x74b   : > { %v9140_v58 = vadd.f32 %v2714_v18, %v11512_v10  ;;  %v9144_v4 = vadd.f32 %v2716_v54, %v2545_v16 }
 0x74d   : > { %2387 = vrot.lane.b32.xlu0 %v9133_v36, %s7124_s30  ;;  %2591 = vrot.lane.b32.xlu1 %v9130_v57, %s7124_s30 }
 0x74e   : > { %v2514_v14 = vpop.permute.xlu1 %2513 }
 0x74f   : > { %v9142_v55 = vpop.permute.xlu0 %3409  ;;  %v9154_v5 = vadd.f32 %v2514_v14, %v2340_v34  ;;  %v11525_v14 = vrot.slane %v11524_v21, 4 }
 0x750   : > { %11513 = vst [vmem:[#allocation55_spill] sm:$0xff] %v9142_v55  ;;  %6436 = vmatprep.subr.msk.bf16.mxu1 %vm11340_vm10, %v9142_v55  ;;  %v3455_v32 = vsel %vm11340_vm10, %v9142_v55, 0 }
 0x751   : > { %6218 = vmatpush3.bf16.xpose.msra.mxu1 %v3455_v32  ;;  %2793 = vrot.lane.b32.xlu0 %v9140_v58, %s7124_s30  ;;  %v2183_v10 = vsel %vm2182_vm7, %v2180_v25, %v11525_v14 }
 0x752   : > { %2795 = vrot.lane.b32.xlu1 %v9144_v4, %s7124_s30  ;;  %v2718_v47 = vpop.permute.xlu1 %2717 }
 0x753   : > { %v9156_v52 = vadd.f32 %v2718_v47, %v2546_v53  ;;  %v9158_v23 = vpop.permute.xlu0 %3407 }
 0x754   : > { %11514 = vst [vmem:[#allocation16_spill] sm:$0xff] %v9158_v23  ;;  %6437 = vmatprep.subr.msk.bf16.mxu1 %vm11340_vm10, %v9158_v23  ;;  %v3452_v42 = vsel %vm11340_vm10, %v9158_v23, 0 }
 0x755   : > { %2593 = vrot.lane.b32.xlu0 %v9154_v5, %s7124_s30 }
 0x756   : > { %2797 = vrot.lane.b32.xlu1 %v9156_v52, %s7124_s30  ;;  %v9168_v44 = vpop.permute.xlu1 %3405 }
 0x757   : > { %11515 = vst [vmem:[#allocation10_spill] sm:$0xff] %v9168_v44  ;;  %v9170_v30 = vpop.permute.xlu0 %3403  ;;  %v3449_v16 = vsel %vm11340_vm10, %v9168_v44, 0 }
 0x758   : > { %11516 = vst [vmem:[#allocation12_spill] sm:$0xff] %v9170_v30  ;;  %v3446_v31 = vsel %vm11340_vm10, %v9170_v30, 0 }
 0x759   : > { %6220 = vmatpush3.bf16.xpose.msra.mxu1 %v3452_v42  ;;  %3397 = vrot.lane.b32.xlu0 %v11517_v9, %s7127_s18 }
 0x75a   : > { %6438 = vmatprep.subr.msk.bf16.mxu1 %vm11340_vm10, %v9168_v44  ;;  %3399 = vrot.lane.b32.xlu1 %v11518_v45, %s7127_s18  ;;  %v11543_v44 = vld [vmem:[#allocation44_spill] sm:$0xff]  ;;  %s7027_s18 = scalar_lea.vmem %s11073_s27, 1024 }
 0x75b   : > { %p7028_p1 = scmp.ne.s32.totalorder %s11073_s27, %s7027_s18 }
 0x75d   : > { %6546 = vrot.lane.b32.xlu0 %v11456_v24, %s7123_s6  ;;  %v9180_v20 = vpop.permute.xlu0 %3385  ;;  %v9182_v48 = vpop.permute.xlu1 %3401  ;;  %p7029_p2 = pnand %p7028_p1, %p7211_p3 }
 0x75e   : > { %11519 = vst [vmem:[#allocation62_spill] sm:$0xff] %v9180_v20  ;;  %11520 = vst [vmem:[#allocation54_spill] sm:$0xff] %v9182_v48  ;;  %6551 = vrot.lane.b32.xlu1 %v11456_v24, %s7123_s6  ;;  %6227 = vmatprep.mubr.msk.bf16.mxu1 %vm11340_vm10, %v9180_v20  ;;  %v3443_v3 = vsel %vm11340_vm10, %v9182_v48, 0 }
 0x75f   : > { %p7030_p4 = pneg %p7029_p2 }
 0x761   : > { %6222 = vmatpush3.bf16.xpose.msra.mxu1 %v3449_v16  ;;  %6556 = vrot.lane.b32.xlu0 %v11456_v24, %s7123_s6  ;;  %v9195_v22 = vpop.permute.xlu0 %3391  ;;  %v9197_v29 = vpop.permute.xlu1 %3387 }
 0x762   : > { %11521 = vst [vmem:[#allocation43_spill] sm:$0xff] %v9195_v22  ;;  %11522 = vst [vmem:[#allocation58_spill] sm:$0xff] %v9197_v29  ;;  %6439 = vmatprep.subr.msk.bf16.mxu1 %vm11340_vm10, %v9170_v30  ;;  %2991 = vrot.lane.b32.xlu1 %v9189_v46, %s7124_s30 }
 0x765   : > { %3125 = vrot.lane.b32.xlu0 %v11456_v24, %s7123_s6  ;;  %v2984_v62 = vpop.permute.xlu0 %2983  ;;  %v9209_v34 = vpop.permute.xlu1 %3389 }
 0x766   : > { %11523 = vst [vmem:[#allocation60_spill] sm:$0xff] %v9209_v34  ;;  %2989 = vrot.lane.b32.xlu1 %v9205_v15, %s7124_s30 }
 0x769   : > { %6224 = vmatpush3.bf16.xpose.msra.mxu1 %v3446_v31  ;;  %3127 = vrot.lane.b32.xlu0 %v2984_v62, %s7123_s6  ;;  %v2986_v51 = vpop.permute.xlu0 %2985  ;;  %v2914_v49 = vpop.permute.xlu1 %2913 }
 0x76a   : > { %6440 = vmatprep.subr.msk.bf16.mxu1 %vm11340_vm10, %v9182_v48  ;;  %v9219_v38 = vadd.f32 %v2914_v49, %v9088_v39 }
 0x76d   : > { %v2916_v53 = vpop.permute.xlu0 %2915  ;;  %2993 = vrot.lane.b32.xlu0 %v9219_v38, %s7124_s30 }
 0x76e   : > { %v9225_v59 = vadd.f32 %v2916_v53, %v9083_v27 }
 0x771   : > { %6226 = vmatpush3.bf16.xpose.msra.mxu1 %v3443_v3  ;;  %2995 = vrot.lane.b32.xlu0 %v9225_v59, %s7124_s30 }
 0x775   : > { %3129 = vrot.lane.b32.xlu0 %v2986_v51, %s7123_s6 }
 0x778   : > { %6228 = vmatmul.mubr.msk.bf16.vlgmr.msra.gmra.mxu1 %vm11340_vm10, %v9197_v29 }
 0x779   : > { %6231 = vmatprep.mubr.msk.bf16.mxu1 %vm11340_vm10, %v9209_v34 }
 0x780   : > { %6232 = vmatmul.mubr.msk.bf16.gmra.mxu1 %vm11340_vm10, %v9195_v22 }
 0x7a3   : > { %v2788_v27 = vpop.permute.xlu1 %2787 }
 0x7a7   : > { %v2784_v39 = vpop.permute.xlu0 %2783  ;;  %v2786_v43 = vpop.permute.xlu1 %2785 }
 0x7a8   : > { %2921 = vrot.lane.b32.xlu1 %v2786_v43, %s7123_s6  ;;  %v9280_v43 = vadd.high.f32.bf16 %v9070_v56, %v9109_v12 }
 0x7aa   : > { %11530 = vst [vmem:[#allocation74_spill] sm:$0xff] %v9280_v43 }
 0x7ab   : > { %v2790_v18 = vpop.permute.xlu0 %2789  ;;  %v2782_v54 = vpop.permute.xlu1 %2781 }
 0x7ac   : > { %2925 = vrot.lane.b32.xlu0 %v2790_v18, %s7123_s6  ;;  %2919 = vrot.lane.b32.xlu1 %v2784_v39, %s7123_s6 }
 0x7af   : > { %v2588_v7 = vpop.permute.xlu1 %2587 }
 0x7b0   : > { %2309 = vrot.lane.b32.xlu0 %v2183_v10, %s7123_s6  ;;  %2917 = vrot.lane.b32.xlu1 %v2782_v54, %s7123_s6 }
 0x7b3   : > { %v2386_v32 = vpop.permute.xlu0 %2385  ;;  %v2988_v47 = vpop.permute.xlu1 %2987 }
 0x7b4   : > { %2923 = vrot.lane.b32.xlu1 %v2788_v27, %s7123_s6 }
 0x7b7   : > { %v2792_v42 = vpop.permute.xlu0 %2791  ;;  %v2590_v9 = vpop.permute.xlu1 %2589 }
 0x7b8   : > { %2719 = vrot.lane.b32.xlu1 %v2588_v7, %s7123_s6  ;;  %2721 = vrot.lane.b32.xlu0 %v2590_v9, %s7123_s6  ;;  %v11537_v9 = vld [vmem:[#allocation39_spill] sm:$0xff] }
 0x7bb   : > { %v9253_v45 = vpop.permute.xlu0 %3393  ;;  %v9255_v26 = vpop.permute.xlu1 %3395 }
 0x7bc   : > { %11526 = vst [vmem:[#allocation18_spill] sm:$0xff] %v9253_v45  ;;  %11527 = vst [vmem:[#allocation49_spill] sm:$0xff] %v9255_v26  ;;  %6235 = vmatprep.mubr.msk.bf16.mxu1 %vm11340_vm10, %v9253_v45  ;;  %3131 = vrot.lane.b32.xlu1 %v2988_v47, %s7123_s6  ;;  %v11535_v47 = vld [vmem:[#allocation42_spill] sm:$0xff]  ;;  %v11544_v45 = vld [vmem:[#allocation40_spill] sm:$0xff] }
 0x7bd   : > { %6236 = vmatmul.mubr.msk.bf16.gmra.mxu1 %vm11340_vm10, %v9255_v26 }
 0x7bf   : > { %v2388_v25 = vpop.permute.xlu0 %2387  ;;  %v2592_v16 = vpop.permute.xlu1 %2591 }
 0x7c0   : > { %2515 = vrot.lane.b32.xlu1 %v2386_v32, %s7123_s6  ;;  %2723 = vrot.lane.b32.xlu0 %v2592_v16, %s7123_s6  ;;  %v11533_v32 = vld [vmem:[#allocation33_spill] sm:$0xff] }
 0x7c3   : > { %v2794_v62 = vpop.permute.xlu0 %2793 }
 0x7c4   : > { %v2796_v31 = vpop.permute.xlu1 %2795  ;;  %2927 = vrot.lane.b32.xlu1 %v2792_v42, %s7123_s6  ;;  %v11536_v42 = vld [vmem:[#allocation41_spill] sm:$0xff] }
 0x7c5   : > { %2931 = vrot.lane.b32.xlu0 %v2796_v31, %s7123_s6 }
 0x7c7   : > { %v2594_v51 = vpop.permute.xlu0 %2593 }
 0x7c8   : > { %v2798_v49 = vpop.permute.xlu1 %2797  ;;  %2517 = vrot.lane.b32.xlu1 %v2388_v25, %s7123_s6  ;;  %v11538_v25 = vld [vmem:[#allocation37_spill] sm:$0xff] }
 0x7c9   : > { %2933 = vrot.lane.b32.xlu0 %v2798_v49, %s7123_s6 }
 0x7cb   : > { %v9268_v53 = vpop.permute.xlu0 %3397 }
 0x7cc   : > { %11528 = vst [vmem:[#allocation72_spill] sm:$0xff] %v9268_v53  ;;  %v9270_v3 = vpop.permute.xlu1 %3399  ;;  %2929 = vrot.lane.b32.xlu1 %v2794_v62, %s7123_s6  ;;  %6239 = vmatprep.mubr.msk.bf16.mxu1 %vm11340_vm10, %v9268_v53 }
 0x7cd   : > { %11529 = vst [vmem:[#allocation73_spill] sm:$0xff] %v9270_v3  ;;  %6240 = vmatmul.mubr.msk.bf16.gmra.mxu1 %vm11340_vm10, %v9270_v3 }
 0x7cf   : > { %v6547_v27 = vpop.permute.xlu0 %6546 }
 0x7d0   : > { %v6552_v39 = vpop.permute.xlu1 %6551  ;;  %2725 = vrot.lane.b32.xlu1 %v2594_v51, %s7123_s6  ;;  %v9283_v18 = vadd.low.f32.bf16 %v9076_v41, %v6547_v27  ;;  %v9290_v7 = vadd.high.f32.bf16 %v9112_v63, %v6547_v27 }
 0x7d1   : > { %v9293_v21 = vadd.low.f32.bf16 %v9205_v15, %v6552_v39  ;;  %v9300_v56 = vadd.high.f32.bf16 %v9189_v46, %v6552_v39 }
 0x7d2   : > { %11531 = vst [vmem:[#allocation75_spill] sm:$0xff] %v9283_v18  ;;  %3193 = vrot.lane.b32.xlu0 %v9283_v18, %s7124_s30 }
 0x7d3   : > { %v6557_v54 = vpop.permute.xlu0 %6556  ;;  %11532 = vst [vmem:[#allocation76_spill] sm:$0xff] %v9293_v21 }
 0x7d4   : > { %3191 = vrot.lane.b32.xlu1 %v9280_v43, %s7124_s30  ;;  %v9303_v41 = vadd.low.f32.bf16 %v9219_v38, %v6557_v54  ;;  %v2992_v63 = vpop.permute.xlu1 %2991  ;;  %v9310_v15 = vadd.high.f32.bf16 %v9225_v59, %v6557_v54  ;;  %v11534_v59 = vld [vmem:[#allocation34_spill] sm:$0xff] }
 0x7d6   : > { %3197 = vrot.lane.b32.xlu0 %v9293_v21, %s7124_s30 }
 0x7d7   : > { %v3126_v14 = vpop.permute.xlu0 %3125 }
 0x7d8   : > { %3195 = vrot.lane.b32.xlu1 %v9290_v7, %s7124_s30  ;;  %v2990_v10 = vpop.permute.xlu1 %2989 }
 0x7da   : > { %3201 = vrot.lane.b32.xlu0 %v9303_v41, %s7124_s30 }
 0x7db   : > { %v3128_v12 = vpop.permute.xlu0 %3127 }
 0x7dc   : > { %3199 = vrot.lane.b32.xlu1 %v9300_v56, %s7124_s30 }
 0x7de   : > { %3135 = vrot.lane.b32.xlu0 %v2992_v63, %s7123_s6 }
 0x7df   : > { %v2994_v46 = vpop.permute.xlu0 %2993 }
 0x7e0   : > { %3203 = vrot.lane.b32.xlu1 %v9310_v15, %s7124_s30 }
 0x7e2   : > { %3133 = vrot.lane.b32.xlu0 %v2990_v10, %s7123_s6 }
 0x7e3   : > { %v2996_v38 = vpop.permute.xlu0 %2995 }
 0x7e4   : > { %3137 = vrot.lane.b32.xlu1 %v2994_v46, %s7123_s6 }
 0x7e6   : > { %3317 = vrot.lane.b32.xlu0 %v11533_v32, %s7124_s30 }
 0x7e7   : > { %v3130_v31 = vpop.permute.xlu0 %3129 }
 0x7e8   : > { %3139 = vrot.lane.b32.xlu1 %v2996_v38, %s7123_s6 }
 0x7ea   : > { %3313 = vrot.lane.b32.xlu0 %v11534_v59, %s7124_s30 }
 0x7ee   : > { %3753 = vperm.xlu0 %6561, %v9283_v18  }
 0x7f2   : > { %3757 = vperm.xlu0 %6561, %v9290_v7  }
 0x7f6   : > { %3303 = vrot.lane.b32.xlu0 %v11535_v47, %s7124_s30 }
 0x7fa   : > { %3765 = vperm.xlu0 %6561, %v9300_v56  }
 0x7fe   : > { %3299 = vrot.lane.b32.xlu0 %v11536_v42, %s7124_s30 }
 0x802   : > { %3773 = vperm.xlu0 %6561, %v9310_v15  }
 0x806   : > { %3295 = vrot.lane.b32.xlu0 %v11537_v9, %s7124_s30 }
 0x80a   : > { %3291 = vrot.lane.b32.xlu0 %v11538_v25, %s7124_s30 }
 0x81a   : > { %v2922_v16 = vpop.permute.xlu1 %2921 }
 0x81b   : > { %v2960_v62 = vadd.f32 %v2922_v16, %v9140_v58 }
 0x81d   : > { %v9335_v51 = vadd.f32 %v3130_v31, %v2960_v62  ;;  %v11539_v31 = vld [vmem:[#allocation32_spill] sm:$0xff] }
 0x81e   : > { %v2920_v49 = vpop.permute.xlu1 %2919  ;;  %v2926_v10 = vpop.permute.xlu0 %2925 }
 0x81f   : > { %v2959_v27 = vadd.f32 %v2920_v49, %v9120_v50  ;;  %3209 = vrot.lane.b32.xlu0 %v9335_v51, %s7124_s30  ;;  %v2962_v26 = vadd.f32 %v2926_v10, %v9156_v52  ;;  %v11546_v52 = vld [vmem:[#allocation36_spill] sm:$0xff] }
 0x821   : > { %v9340_v39 = vadd.f32 %v3128_v12, %v2959_v27 }
 0x822   : > { %v2918_v54 = vpop.permute.xlu1 %2917  ;;  %v9350_v16 = vpop.permute.xlu0 %2309 }
 0x823   : > { %v2958_v63 = vadd.f32 %v2918_v54, %v9101_v13  ;;  %3781 = vperm.xlu0 %6561, %v9340_v39   ;;  %v11540_v54 = vld [vmem:[#allocation47_spill] sm:$0xff] }
 0x825   : > { %v9344_v46 = vadd.f32 %v3126_v14, %v2958_v63  ;;  %2997 = vrot.lane.b32.xlu1 %v2958_v63, %s7124_s30 }
 0x826   : > { %v2924_v58 = vpop.permute.xlu1 %2923 }
 0x827   : > { %3205 = vrot.lane.b32.xlu0 %v9344_v46, %s7124_s30  ;;  %v2961_v38 = vadd.f32 %v2924_v58, %v9144_v4 }
 0x82a   : > { %v2720_v50 = vpop.permute.xlu1 %2719  ;;  %v2722_v13 = vpop.permute.xlu0 %2721 }
 0x82b   : > { %v2756_v34 = vadd.f32 %v2722_v13, %v9154_v5 }
 0x82e   : > { %v3132_v12 = vpop.permute.xlu1 %3131 }
 0x82f   : > { %v9352_v62 = vadd.f32 %v3132_v12, %v2961_v38  ;;  %v11541_v38 = vld [vmem:[#allocation45_spill] sm:$0xff] }
 0x831   : > { %3211 = vrot.lane.b32.xlu1 %v9352_v62, %s7124_s30 }
 0x832   : > { %v2516_v14 = vpop.permute.xlu1 %2515  ;;  %v2724_v49 = vpop.permute.xlu0 %2723 }
 0x833   : > { %v2549_v5 = vadd.f32 %v2516_v14, %v9133_v36  ;;  %v11296_v36 = vmov 32   ;;  %v11548_v14 = vlaneseq }
 0x835   : > { %3315 = vrot.lane.b32.xlu1 %v11539_v31, %s7124_s30 }
 0x836   : > { %v2928_v27 = vpop.permute.xlu1 %2927 }
 0x837   : > { %v2932_v4 = vpop.permute.xlu0 %2931 }
 0x839   : > { %3311 = vrot.lane.b32.xlu1 %v11540_v54, %s7124_s30 }
 0x83a   : > { %v9360_v63 = vpop.permute.xlu1 %2517 }
 0x83b   : > { %v9365_v12 = vpop.permute.xlu0 %2933 }
 0x83d   : > { %3749 = vperm.xlu1 %6560, %v9280_v43  }
 0x83e   : > { %v2930_v58 = vpop.permute.xlu1 %2929 }
 0x83f   : > { %v2964_v24 = vadd.f32 %v2930_v58, %v2756_v34  ;;  %v2757_v34 = vadd.f32 %v2724_v49, %v2549_v5  ;;  %v9436_v49 = vand.u32 127, %v11548_v14 }
 0x841   : > { %3307 = vrot.lane.b32.xlu1 %v11541_v38, %s7124_s30  ;;  %vm3904_vm0 = vcmp.ge.s32.totalorder %v9436_v49, 16  ;;  %vm3905_vm1 = vcmp.lt.s32.totalorder %v9436_v49, 32  ;;  %vm3720_vm3 = vcmp.lt.s32.totalorder %v9436_v49, 16  ;;  %vm4283_vm6 = vcmp.ge.s32.totalorder %v9436_v49, 32 }
 0x842   : > { %v9367_v37 = vpop.permute.xlu1 %2725  ;;  %vm3906_vm2 = vmand %vm3904_vm0, %vm3905_vm1  ;;  %vm4284_vm7 = vcmp.lt.s32.totalorder %v9436_v49, 48  ;;  %vm4581_vm8 = vcmp.ge.s32.totalorder %v9436_v49, 48  ;;  %vm4582_vm9 = vcmp.lt.s32.totalorder %v9436_v49, 64  ;;  %vm3353_vm0 = vcmp.ge.s32.totalorder %v7259_v6, %v9436_v49 }
 0x843   : > { %vm9452_vm4 = vmpackc.low %vm3906_vm2, %vm3906_vm2 }
 0x844   : > { %v9371_v17 = vpop.permute.xlu0 %3193  ;;  %vm9457_vm5 = vmpackc.low %vm3720_vm3, %vm3720_vm3 }
 0x845   : > { %3309 = vrot.lane.b32.xlu1 %v11542_v28, %s7124_s30  ;;  %vm4285_vm12 = vmand %vm4283_vm6, %vm4284_vm7 }
 0x846   : > { %v9373_v11 = vpop.permute.xlu1 %3191  ;;  %vm4583_vm13 = vmand %vm4581_vm8, %vm4582_vm9 }
 0x847   : > { %vm9660_vm14 = vmpackc.low %vm4285_vm12, %vm4285_vm12 }
 0x848   : > { %v9376_v55 = vpop.permute.xlu0 %3197  ;;  %vm9668_vm15 = vmpackc.low %vm4583_vm13, %vm4583_vm13 }
 0x849   : > { %3761 = vperm.xlu1 %6560, %v9293_v21  }
 0x84a   : > { %v9378_v23 = vpop.permute.xlu1 %3195 }
 0x84c   : > { %v9382_v30 = vpop.permute.xlu0 %3201 }
 0x84d   : > { %3305 = vrot.lane.b32.xlu1 %v11543_v44, %s7124_s30  ;;  %v11545_v44 = vld [vmem:[#allocation38_spill] sm:$0xff] }
 0x84e   : > { %v9384_v48 = vpop.permute.xlu1 %3199 }
 0x850   : > { %v3136_v3 = vpop.permute.xlu0 %3135 }
 0x851   : > { %3769 = vperm.xlu1 %6560, %v9303_v41  }
 0x852   : > { %v9387_v53 = vpop.permute.xlu1 %3203 }
 0x854   : > { %v3134_v22 = vpop.permute.xlu0 %3133 }
 0x855   : > { %3301 = vrot.lane.b32.xlu1 %v11544_v45, %s7124_s30  ;;  %v9393_v29 = vadd.f32 %v3134_v22, %v2962_v26  ;;  %v2755_v22 = vadd.f32 %v2720_v50, %v9130_v57  ;;  %v11547_v57 = vld [vmem:[#allocation35_spill] sm:$0xff]  ;;  %v11564_v45 = vld [vmem:[#allocation50_spill] sm:$0xff] }
 0x856   : > { %v3138_v20 = vpop.permute.xlu1 %3137 }
 0x857   : > { %3213 = vrot.lane.b32.xlu0 %v9393_v29, %s7124_s30  ;;  %v9399_v28 = vadd.f32 %v3138_v20, %v2964_v24  ;;  %v2963_v26 = vadd.f32 %v2928_v27, %v2755_v22  ;;  %v2965_v20 = vadd.f32 %v2932_v4, %v2757_v34  ;;  %v11549_v27 = vld [vmem:[#allocation31_spill] sm:$0xff] }
 0x858   : > { %v3318_v4 = vpop.permute.xlu0 %3317  ;;  %v11550_v22 = vld [vmem:[#allocation23_spill] sm:$0xff] }
 0x859   : > { %3297 = vrot.lane.b32.xlu1 %v11545_v44, %s7124_s30  ;;  %v9410_v10 = vadd.f32 %v3136_v3, %v2963_v26  ;;  %v11294_v3 = vmov 64   ;;  %v3350_v34 = vmul.f32 %v3318_v4, %v11550_v22  ;;  %v11558_v4 = vld [vmem:[#allocation59_spill] sm:$0xff] }
 0x85a   : > { %v3140_v24 = vpop.permute.xlu1 %3139 }
 0x85b   : > { %3217 = vrot.lane.b32.xlu0 %v9399_v28, %s7124_s30  ;;  %v9414_v13 = vadd.f32 %v3140_v24, %v2965_v20  ;;  %v11551_v24 = vld [vmem:[#allocation51_spill] sm:$0xff] }
 0x85c   : > { %v3314_v26 = vpop.permute.xlu0 %3313 }
 0x85d   : > { %3293 = vrot.lane.b32.xlu1 %v11546_v52, %s7124_s30 }
 0x861   : > { %3785 = vperm.xlu1 %6560, %v9335_v51  }
 0x865   : > { %3207 = vrot.lane.b32.xlu1 %v9340_v39, %s7124_s30 }
 0x869   : > { %3215 = vrot.lane.b32.xlu1 %v9410_v10, %s7124_s30 }
 0x86d   : > { %3219 = vrot.lane.b32.xlu1 %v9414_v13, %s7124_s30 }
 0x871   : > { %3777 = vperm.xlu1 %6560, %v9344_v46  }
 0x875   : > { %3793 = vperm.xlu1 %6560, %v9393_v29  }
 0x879   : > { %3289 = vrot.lane.b32.xlu1 %v11547_v57, %s7124_s30  ;;  %v11556_v57 = vld [vmem:[#allocation8_spill] sm:$0xff] }
 0x87a   : > { %v3348_v52 = vmul.f32 %v3314_v26, %v11556_v57 }
 0x87d   : > { %3797 = vperm.xlu1 %6560, %v9410_v10  }
 0x881   : > { %3801 = vperm.xlu1 %6560, %v9399_v28  }
 0x885   : > { %3805 = vperm.xlu1 %6560, %v9414_v13  }
 0x889   : > { %6562 = vset.pattern.permute.xlu1 %v11296_v36 }
 0x88a   : > { %3564 = vperm.xlu1 %6562, %v9280_v43  }
 0x88e   : > { %3568 = vperm.xlu1 %6562, %v9283_v18  }
 0x892   : > { %6563 = vset.pattern.permute.xlu1 %v11294_v3 }
 0x893   : > { %4128 = vperm.xlu1 %6563, %v9280_v43  }
 0x897   : > { %v2998_v50 = vpop.permute.xlu1 %2997  ;;  %4132 = vperm.xlu1 %6563, %v9283_v18  }
 0x898   : > { %3141 = vrot.lane.b32.xlu0 %v2998_v50, %s7123_s6  ;;  %s6035_s6 = sshll.u32 %s5753_s24, 6 }
 0x899   : > { %s11079_s19 = scalar_lea.hbm %s11141_s4, %s6035_s6 }
 0x89b   : > { %6564 = vset.pattern.permute.xlu1 %v11296_v36 }
 0x89c   : > { %3572 = vperm.xlu1 %6564, %v9290_v7   ;;  %3789 = vperm.xlu0 %6561, %v9352_v62  }
 0x8a0   : > { %3576 = vperm.xlu1 %6564, %v9293_v21   ;;  %3287 = vrot.lane.b32.xlu0 %v11549_v27, %s7124_s30  ;;  %v9464_v27 = vpop.permute.xlu0 %3753 }
 0x8a1   : > { %6572 = vset.pattern.permute.xlu0 %v11294_v3  ;;  %11557 = vst [vmem:[#allocation33_spill] sm:$0xff] %v9464_v27 }
 0x8a3   : > { %v9444_v58 = vpop.permute.xlu1 %3211 }
 0x8a4   : > { %6565 = vset.pattern.permute.xlu1 %v11294_v3  ;;  %4164 = vperm.xlu0 %6572, %v9335_v51  }
 0x8a5   : > { %4136 = vperm.xlu1 %6565, %v9290_v7  }
 0x8a7   : > { %v3316_v5 = vpop.permute.xlu1 %3315 }
 0x8a8   : > { %v3349_v20 = vmul.f32 %v3316_v5, %v11551_v24  ;;  %v11559_v5 = vmov 32   ;;  %v11563_v24 = vld [vmem:[#allocation61_spill] sm:$0xff] }
 0x8a9   : > { %4140 = vperm.xlu1 %6565, %v9293_v21  }
 0x8aa   : > { %v9461_v3 = vpack.c.bf16 %v3350_v34, %v3349_v20 }
 0x8ab   : > { %v3312_v36 = vpop.permute.xlu1 %3311 }
 0x8ac   : > { %v3347_v22 = vmul.f32 %v3312_v36, %v11558_v4  ;;  %6243 = vmatprep.subr.msk.bf16.mxu0 %vm9452_vm4, %v9461_v3  ;;  %6275 = vmatprep.subr.msk.bf16.mxu1 %vm9457_vm5, %v9461_v3  ;;  %v11562_v36 = vmov 64  }
 0x8ad   : > { %6566 = vset.pattern.permute.xlu1 %v11559_v5  ;;  %6244 = vmatpush3.bf16.msk.msra.mxu0 %vm9452_vm4, %v9461_v3 }
 0x8ae   : > { %v9477_v34 = vpack.c.bf16 %v3348_v52, %v3347_v22  ;;  %6276 = vmatpush3.bf16.msk.msra.mxu1 %vm9457_vm5, %v9461_v3  ;;  %3580 = vperm.xlu1 %6566, %v9300_v56   ;;  %v9492_v52 = vpop.permute.xlu0 %3757 }
 0x8af   : > { %11561 = vst [vmem:[#allocation41_spill] sm:$0xff] %v9492_v52 }
 0x8b0   : > { %11560 = vst [vmem:[#allocation42_spill] sm:$0xff] %v9477_v34  ;;  %6245 = vmatprep.subr.msk.bf16.mxu0 %vm9452_vm4, %v9477_v34  ;;  %6277 = vmatprep.subr.msk.bf16.mxu1 %vm9457_vm5, %v9477_v34 }
 0x8b1   : > { %6246 = vmatpush3.bf16.msk.msra.mxu0 %vm9452_vm4, %v9477_v34 }
 0x8b2   : > { %6278 = vmatpush3.bf16.msk.msra.mxu1 %vm9457_vm5, %v9477_v34  ;;  %3584 = vperm.xlu1 %6566, %v9303_v41   ;;  %v3304_v22 = vpop.permute.xlu0 %3303 }
 0x8b6   : > { %6567 = vset.pattern.permute.xlu1 %v11562_v36  ;;  %v9503_v57 = vpop.permute.xlu0 %3765 }
 0x8b7   : > { %4144 = vperm.xlu1 %6567, %v9300_v56  }
 0x8b8   : > { %v9500_v26 = vpop.permute.xlu1 %3749 }
 0x8ba   : > { %v3300_v27 = vpop.permute.xlu0 %3299 }
 0x8bb   : > { %4148 = vperm.xlu1 %6567, %v9303_v41  }
 0x8bc   : > { %v3308_v20 = vpop.permute.xlu1 %3307 }
 0x8bd   : > { %v3345_v44 = vmul.f32 %v3308_v20, %v11563_v24 }
 0x8be   : > { %v9530_v20 = vpop.permute.xlu0 %3773 }
 0x8bf   : > { %6568 = vset.pattern.permute.xlu1 %v11559_v5  ;;  %11566 = vst [vmem:[#allocation37_spill] sm:$0xff] %v9530_v20 }
 0x8c0   : > { %v3310_v4 = vpop.permute.xlu1 %3309  ;;  %3588 = vperm.xlu1 %6568, %v9310_v15  }
 0x8c1   : > { %v3346_v34 = vmul.f32 %v3310_v4, %v11564_v45  ;;  %v3343_v4 = vmul.f32 %v3304_v22, %v9001_v35 }
 0x8c2   : > { %v3296_v22 = vpop.permute.xlu0 %3295 }
 0x8c3   : > { %v9509_v52 = vpack.c.bf16 %v3346_v34, %v3345_v44 }
 0x8c4   : > { %v9511_v59 = vpop.permute.xlu1 %3761  ;;  %3592 = vperm.xlu1 %6568, %v9344_v46  }
 0x8c5   : > { %11565 = vst [vmem:[#allocation39_spill] sm:$0xff] %v9509_v52  ;;  %6247 = vmatprep.subr.msk.bf16.mxu0 %vm9452_vm4, %v9509_v52  ;;  %6279 = vmatprep.subr.msk.bf16.mxu1 %vm9457_vm5, %v9509_v52 }
 0x8c6   : > { %6248 = vmatpush3.bf16.msk.msra.mxu0 %vm9452_vm4, %v9509_v52  ;;  %6280 = vmatpush3.bf16.msk.msra.mxu1 %vm9457_vm5, %v9509_v52  ;;  %v3339_v52 = vmul.f32 %v3296_v22, %v9035_v2 }
 0x8c8   : > { %v3306_v44 = vpop.permute.xlu1 %3305  ;;  %6569 = vset.pattern.permute.xlu1 %v11562_v36 }
 0x8c9   : > { %v3344_v34 = vmul.f32 %v3306_v44, %v8996_v19  ;;  %4152 = vperm.xlu1 %6569, %v9310_v15  }
 0x8cb   : > { %v9532_v45 = vpack.c.bf16 %v3344_v34, %v3343_v4  ;;  %v3341_v4 = vmul.f32 %v3300_v27, %v9018_v33  ;;  %v3292_v27 = vpop.permute.xlu0 %3291 }
 0x8cc   : > { %v9534_v24 = vpop.permute.xlu1 %3769  ;;  %v3337_v22 = vmul.f32 %v3292_v27, %v9039_v60 }
 0x8cd   : > { %11567 = vst [vmem:[#allocation32_spill] sm:$0xff] %v9532_v45  ;;  %4156 = vperm.xlu1 %6569, %v9344_v46   ;;  %6249 = vmatprep.subr.msk.bf16.mxu0 %vm9452_vm4, %v9532_v45 }
 0x8ce   : > { %6281 = vmatprep.subr.msk.bf16.mxu1 %vm9457_vm5, %v9532_v45  ;;  %6250 = vmatpush3.bf16.msk.msra.mxu0 %vm9452_vm4, %v9532_v45 }
 0x8cf   : > { %6282 = vmatpush3.bf16.msk.msra.mxu1 %vm9457_vm5, %v9532_v45 }
 0x8d0   : > { %v3302_v44 = vpop.permute.xlu1 %3301 }
 0x8d1   : > { %v3342_v34 = vmul.f32 %v3302_v44, %v9004_v8  ;;  %6570 = vset.pattern.permute.xlu1 %v11559_v5 }
 0x8d2   : > { %3596 = vperm.xlu1 %6570, %v9340_v39  }
 0x8d3   : > { %v9553_v19 = vpack.c.bf16 %v3342_v34, %v3341_v4  ;;  %v9608_v34 = vpop.permute.xlu0 %3209 }
 0x8d4   : > { %v3298_v35 = vpop.permute.xlu1 %3297 }
 0x8d5   : > { %11568 = vst [vmem:[#allocation47_spill] sm:$0xff] %v9553_v19  ;;  %v3340_v20 = vmul.f32 %v3298_v35, %v9025_v40  ;;  %6251 = vmatprep.subr.msk.bf16.mxu0 %vm9452_vm4, %v9553_v19  ;;  %6283 = vmatprep.subr.msk.bf16.mxu1 %vm9457_vm5, %v9553_v19  ;;  %v11573_v40 = vld [vmem:[#allocation48_spill] sm:$0xff] }
 0x8d6   : > { %3600 = vperm.xlu1 %6570, %v9335_v51   ;;  %6252 = vmatpush3.bf16.msk.msra.mxu0 %vm9452_vm4, %v9553_v19  ;;  %v2342_v2 = vadd.f32 %v9350_v16, %v11573_v40 }
 0x8d7   : > { %v9567_v44 = vpack.c.bf16 %v3340_v20, %v3339_v52  ;;  %6284 = vmatpush3.bf16.msk.msra.mxu1 %vm9457_vm5, %v9553_v19  ;;  %v11571_v20 = vmov 48  }
 0x8d8   : > { %v3294_v35 = vpop.permute.xlu1 %3293  ;;  %v2550_v8 = vadd.f32 %v9360_v63, %v2342_v2 }
 0x8d9   : > { %11569 = vst [vmem:[#allocation45_spill] sm:$0xff] %v9567_v44  ;;  %v3338_v4 = vmul.f32 %v3294_v35, %v9030_v0  ;;  %6253 = vmatprep.subr.msk.bf16.mxu0 %vm9452_vm4, %v9567_v44  ;;  %6285 = vmatprep.subr.msk.bf16.mxu1 %vm9457_vm5, %v9567_v44  ;;  %v9612_v35 = vpop.permute.xlu0 %3781 }
 0x8da   : > { %6571 = vset.pattern.permute.xlu1 %v11562_v36  ;;  %6254 = vmatpush3.bf16.msk.msra.mxu0 %vm9452_vm4, %v9567_v44 }
 0x8db   : > { %v9584_v52 = vpack.c.bf16 %v3338_v4, %v3337_v22  ;;  %6286 = vmatpush3.bf16.msk.msra.mxu1 %vm9457_vm5, %v9567_v44  ;;  %4160 = vperm.xlu1 %6571, %v9340_v39  }
 0x8dc   : > { %v9610_v27 = vpop.permute.xlu1 %3785 }
 0x8dd   : > { %11570 = vst [vmem:[#allocation77_spill] sm:$0xff] %v9584_v52  ;;  %6255 = vmatprep.subr.msk.bf16.mxu0 %vm9452_vm4, %v9584_v52  ;;  %6287 = vmatprep.subr.msk.bf16.mxu1 %vm9457_vm5, %v9584_v52  ;;  %11572 = vst [vmem:[#allocation78_spill] sm:$0xff] %v9610_v27  ;;  %v9616_v4 = vpop.permute.xlu0 %3205 }
 0x8de   : > { %6256 = vmatpush3.bf16.msk.msra.mxu0 %vm9452_vm4, %v9584_v52 }
 0x8df   : > { %6288 = vmatpush3.bf16.msk.msra.mxu1 %vm9457_vm5, %v9584_v52  ;;  %6573 = vset.pattern.permute.xlu1 %v11559_v5 }
 0x8e0   : > { %3604 = vperm.xlu1 %6573, %v9352_v62   ;;  %v9614_v22 = vpop.permute.xlu1 %3207 }
 0x8e1   : > { %v9620_v60 = vpop.permute.xlu0 %3213 }
 0x8e4   : > { %3608 = vperm.xlu1 %6573, %v9393_v29   ;;  %v9618_v0 = vpop.permute.xlu1 %3215 }
 0x8e5   : > { %v9628_v52 = vpop.permute.xlu0 %3217 }
 0x8e8   : > { %6574 = vset.pattern.permute.xlu1 %v11562_v36  ;;  %v9626_v33 = vpop.permute.xlu1 %3219 }
 0x8e9   : > { %4168 = vperm.xlu1 %6574, %v9352_v62  }
 0x8ec   : > { %v9631_v45 = vpop.permute.xlu1 %3777 }
 0x8ed   : > { %6575 = vset.pattern.permute.xlu1 %v11571_v20  ;;  %v2758_v20 = vadd.f32 %v9367_v37, %v2550_v8  ;;  %v7131_v8 = vmov 80  }
 0x8ef   : > { %v2966_v44 = vadd.f32 %v9365_v12, %v2758_v20  ;;  %v11576_v20 = vmov 0 }
 0x8f0   : > { %v9638_v40 = vpop.permute.xlu1 %3793  ;;  %v11577_v20 = vsel %vm9660_vm14, 4294967295, %v11576_v20 }
 0x8f1   : > { %11578 = vst [vmem:[#allocation80_spill] sm:$0xff] %v11577_v20 }
 0x90a   : > { %v3142_v19 = vpop.permute.xlu0 %3141 }
 0x90b   : > { %v9633_v27 = vadd.f32 %v3142_v19, %v2966_v44  ;;  %v3290_v19 = vpop.permute.xlu1 %3289 }
 0x90c   : > { %v3336_v16 = vmul.f32 %v3290_v19, %v9058_v61 }
 0x90d   : > { %3809 = vperm.xlu1 %6575, %v9633_v27   ;;  %3221 = vrot.lane.b32.xlu0 %v9633_v27, %s7124_s30 }
 0x90f   : > { %v9655_v12 = vpop.permute.xlu1 %3797 }
 0x910   : > { %11574 = vst [vmem:[#allocation48_spill] sm:$0xff] %v9655_v12 }
 0x911   : > { %6576 = vset.pattern.permute.xlu1 %v11562_v36  ;;  %4184 = vperm.xlu0 %6572, %v9414_v13  }
 0x912   : > { %4172 = vperm.xlu1 %6576, %v9393_v29  }
 0x915   : > { %6580 = vset.pattern.permute.xlu0 %v7131_v8 }
 0x916   : > { %6577 = vset.pattern.permute.xlu1 %v11559_v5  ;;  %4426 = vperm.xlu0 %6580, %v9280_v43  }
 0x917   : > { %3612 = vperm.xlu1 %6577, %v9410_v10   ;;  %v9646_v2 = vpop.permute.xlu0 %3789 }
 0x91b   : > { %3616 = vperm.xlu1 %6577, %v9399_v28   ;;  %v3288_v37 = vpop.permute.xlu0 %3287 }
 0x91c   : > { %v3335_v63 = vmul.f32 %v3288_v37, %v9055_v1  ;;  %v9684_v37 = vpop.permute.xlu1 %3801 }
 0x91d   : > { %11581 = vst [vmem:[#allocation81_spill] sm:$0xff] %v9684_v37 }
 0x91e   : > { %v9657_v44 = vpack.c.bf16 %v3336_v16, %v3335_v63 }
 0x91f   : > { %6578 = vset.pattern.permute.xlu1 %v11562_v36 }
 0x920   : > { %11575 = vst [vmem:[#allocation79_spill] sm:$0xff] %v9657_v44  ;;  %4176 = vperm.xlu1 %6578, %v9410_v10   ;;  %6257 = vmatprep.subr.msk.bf16.mxu0 %vm9452_vm4, %v9657_v44  ;;  %v9691_v50 = vpop.permute.xlu1 %3805 }
 0x921   : > { %6289 = vmatprep.subr.msk.bf16.mxu1 %vm9457_vm5, %v9657_v44  ;;  %6258 = vmatpush3.bf16.msk.msra.mxu0 %vm9452_vm4, %v9657_v44  ;;  %11582 = vst [vmem:[#allocation82_spill] sm:$0xff] %v9691_v50 }
 0x922   : > { %6290 = vmatpush3.bf16.msk.msra.mxu1 %vm9457_vm5, %v9657_v44  ;;  %6307 = vmatprep.subr.msk.bf16.mxu0 %vm9660_vm14, %v9461_v3  ;;  %v11603_v44 = vld [vmem:[#allocation46_spill] sm:$0xff] }
 0x923   : > { %6339 = vmatprep.subr.msk.bf16.mxu1 %vm9668_vm15, %v9461_v3 }
 0x924   : > { %4180 = vperm.xlu1 %6578, %v9399_v28   ;;  %v9695_v14 = vpop.permute.xlu1 %3564 }
 0x928   : > { %6579 = vset.pattern.permute.xlu1 %v11559_v5  ;;  %v9700_v16 = vpop.permute.xlu1 %3568 }
 0x929   : > { %3620 = vperm.xlu1 %6579, %v9414_v13  }
 0x92c   : > { %v9704_v5 = vpop.permute.xlu1 %4128 }
 0x92d   : > { %3624 = vperm.xlu1 %6579, %v9633_v27   ;;  %11583 = vst [vmem:[#allocation83_spill] sm:$0xff] %v9704_v5 }
 0x931   : > { %6581 = vset.pattern.permute.xlu1 %v11562_v36  ;;  %v9710_v36 = vpop.permute.xlu1 %4132 }
 0x932   : > { %4188 = vperm.xlu1 %6581, %v9633_v27   ;;  %11584 = vst [vmem:[#allocation84_spill] sm:$0xff] %v9710_v36 }
 0x934   : > { %3239 = vxpose.xlu0.b32.start [1/16] (narrow) %v9373_v11, 56  ;;  %v4823_v11 = vmul.f32 1.442695, %v9280_v43 }
 0x936   : > { %6582 = vset.pattern.permute.xlu1 %v7131_v8  ;;  %v9715_v8 = vpop.permute.xlu1 %3572  ;;  %6721 = vpow2.f32 %v4823_v11  ;;  %v11586_v11 = vld [vmem:[#allocation53_spill] sm:$0xff] }
 0x937   : > { %4430 = vperm.xlu1 %6582, %v9283_v18  }
 0x938   : > { %3240 = vxpose.xlu0.b32.cont [2/16] (narrow) %v9371_v17, 56  ;;  %v4827_v17 = vmul.f32 1.442695, %v9290_v7 }
 0x93a   : > { %6723 = vpow2.f32 %v4827_v17  ;;  %v9738_v17 = vrot.slane %v9633_v27, %v11586_v11 }
 0x93b   : > { %4434 = vperm.xlu1 %6582, %v9290_v7  }
 0x93c   : > { %3241 = vxpose.xlu0.b32.cont [3/16] (narrow) %v9378_v23, 56  ;;  %v9723_v23 = vpop.permute.xlu1 %3576  ;;  %11587 = vst [vmem:[#allocation86_spill] sm:$0xff] %v9738_v17 }
 0x93f   : > { %4442 = vperm.xlu1 %6582, %v9300_v56  }
 0x940   : > { %3242 = vxpose.xlu0.b32.cont [4/16] (narrow) %v9376_v55, 56  ;;  %v4831_v55 = vmul.f32 1.442695, %v9300_v56 }
 0x942   : > { %6725 = vpow2.f32 %v4831_v55 }
 0x943   : > { %4450 = vperm.xlu1 %6582, %v9310_v15   ;;  %v6722_v63 = vpop.eup %6721 }
 0x944   : > { %3243 = vxpose.xlu0.b32.cont [5/16] (narrow) %v9384_v48, 56  ;;  %v4835_v48 = vmul.f32 1.442695, %v9310_v15 }
 0x946   : > { %6727 = vpow2.f32 %v4835_v48 }
 0x947   : > { %4458 = vperm.xlu1 %6582, %v9340_v39   ;;  %v6724_v43 = vpop.eup %6723 }
 0x948   : > { %3244 = vxpose.xlu0.b32.cont [6/16] (narrow) %v9382_v30, 56  ;;  %v9728_v30 = vpop.permute.xlu1 %4136 }
 0x949   : > { %11585 = vst [vmem:[#allocation85_spill] sm:$0xff] %v9728_v30 }
 0x94b   : > { %4466 = vperm.xlu1 %6582, %v9352_v62  }
 0x94c   : > { %3245 = vxpose.xlu0.b32.cont [7/16] (narrow) %v9387_v53, 56  ;;  %v4839_v53 = vmul.f32 1.442695, %v9340_v39  ;;  %v9740_v55 = vpop.permute.xlu1 %4140 }
 0x94d   : > { %11588 = vst [vmem:[#allocation87_spill] sm:$0xff] %v9740_v55 }
 0x94e   : > { %6729 = vpow2.f32 %v4839_v53 }
 0x94f   : > { %4474 = vperm.xlu1 %6582, %v9410_v10   ;;  %v6726_v48 = vpop.eup %6725 }
 0x950   : > { %3246 = vxpose.xlu0.b32.cont [8/16] (narrow) %v9616_v4, 56  ;;  %v4843_v4 = vmul.f32 1.442695, %v9352_v62  ;;  %v9747_v53 = vpop.permute.xlu1 %3580 }
 0x952   : > { %6731 = vpow2.f32 %v4843_v4 }
 0x953   : > { %4482 = vperm.xlu1 %6582, %v9414_v13  }
 0x954   : > { %3247 = vxpose.xlu0.b32.cont [9/16] (narrow) %v9614_v22, 56  ;;  %v4847_v22 = vmul.f32 1.442695, %v9410_v10  ;;  %v9756_v4 = vpop.permute.xlu1 %3584 }
 0x956   : > { %6733 = vpow2.f32 %v4847_v22 }
 0x957   : > { %4871 = vrot.lane.b32.xlu1 %v6722_v63, %s7124_s30  ;;  %v4851_v63 = vmul.f32 1.442695, %v9414_v13 }
 0x958   : > { %3248 = vxpose.xlu0.b32.cont [10/16] (narrow) %v9608_v34, 56  ;;  %v4954_v34 = vsub.f32 %v9738_v17, %v9633_v27 }
 0x959   : > { %6735 = vpow2.f32 %v4851_v63 }
 0x95a   : > { %v4985_v61 = vmul.f32 1.442695, %v4954_v34  ;;  %v9764_v34 = vpop.permute.xlu1 %4144 }
 0x95b   : > { %4875 = vrot.lane.b32.xlu1 %v6724_v43, %s7124_s30  ;;  %v4951_v43 = vsub.f32 %v9738_v17, %v9410_v10  ;;  %v4947_v10 = vsub.f32 %v9738_v17, %v9340_v39  ;;  %11589 = vst [vmem:[#allocation88_spill] sm:$0xff] %v9764_v34 }
 0x95c   : > { %3249 = vxpose.xlu0.b32.cont [11/16] (narrow) %v9444_v58, 56  ;;  %v6728_v58 = vpop.eup %6727  ;;  %6737 = vpow2.f32 %v4985_v61  ;;  %v4945_v61 = vsub.f32 %v9738_v17, %v9310_v15  ;;  %v4941_v15 = vsub.f32 %v9738_v17, %v9290_v7 }
 0x95d   : > { %v4979_v1 = vmul.f32 1.442695, %v4951_v43  ;;  %v6730_v11 = vpop.eup %6729 }
 0x95e   : > { %v4967_v39 = vmul.f32 1.442695, %v4945_v61 }
 0x95f   : > { %4879 = vrot.lane.b32.xlu1 %v6726_v48, %s7124_s30  ;;  %v4949_v48 = vsub.f32 %v9738_v17, %v9352_v62  ;;  %6739 = vpow2.f32 %v4979_v1  ;;  %v6732_v22 = vpop.eup %6731 }
 0x960   : > { %3250 = vxpose.xlu0.b32.cont [12/16] (narrow) %v9620_v60, 56 }
 0x961   : > { %v4975_v60 = vmul.f32 1.442695, %v4949_v48 }
 0x963   : > { %4883 = vrot.lane.b32.xlu1 %v6728_v58, %s7124_s30  ;;  %6741 = vpow2.f32 %v4975_v60  ;;  %v6734_v62 = vpop.eup %6733 }
 0x964   : > { %3251 = vxpose.xlu0.b32.cont [13/16] (narrow) %v9618_v0, 56  ;;  %v4971_v0 = vmul.f32 1.442695, %v4947_v10  ;;  %v4959_v10 = vmul.f32 1.442695, %v4941_v15 }
 0x966   : > { %v6736_v1 = vpop.eup %6735  ;;  %6743 = vpow2.f32 %v4971_v0 }
 0x967   : > { %4887 = vrot.lane.b32.xlu1 %v6730_v11, %s7124_s30  ;;  %v4943_v11 = vsub.f32 %v9738_v17, %v9300_v56  ;;  %6745 = vpow2.f32 %v4967_v39 }
 0x968   : > { %3252 = vxpose.xlu0.b32.cont [14/16] (narrow) %v9628_v52, 56  ;;  %v9771_v52 = vpop.permute.xlu1 %4148 }
 0x969   : > { %11590 = vst [vmem:[#allocation89_spill] sm:$0xff] %v9771_v52  ;;  %v6738_v63 = vpop.eup %6737  ;;  %v4963_v43 = vmul.f32 1.442695, %v4943_v11 }
 0x96b   : > { %4891 = vrot.lane.b32.xlu1 %v6732_v22, %s7124_s30  ;;  %6747 = vpow2.f32 %v4963_v43  ;;  %v9783_v22 = vpop.permute.xlu0 %4164 }
 0x96c   : > { %3253 = vxpose.xlu0.b32.cont [15/16] (narrow) %v9626_v33, 56  ;;  %v5002_v33 = vmul.f32 %v6738_v63, %v11533_v32  ;;  %v6740_v58 = vpop.eup %6739  ;;  %v9779_v48 = vpop.permute.xlu1 %3588  ;;  %11591 = vst [vmem:[#allocation90_spill] sm:$0xff] %v9783_v22  ;;  %6749 = vpow2.f32 %v4959_v10  ;;  %v4950_v10 = vsub.f32 %v9738_v17, %v9393_v29 }
 0x96d   : > { %v4999_v60 = vmul.f32 %v6740_v58, %v11540_v54 }
 0x96f   : > { %4895 = vrot.lane.b32.xlu1 %v6734_v62, %s7124_s30 }
 0x970   : > { %v6742_v56 = vpop.eup %6741  ;;  %v9786_v32 = vpop.permute.xlu1 %3592 }
 0x971   : > { %v4997_v0 = vmul.f32 %v6742_v56, %v11541_v38 }
 0x973   : > { %4899 = vrot.lane.b32.xlu1 %v6736_v1, %s7124_s30  ;;  %v6744_v7 = vpop.eup %6743 }
 0x974   : > { %v4995_v62 = vmul.f32 %v6744_v7, %v11535_v47  ;;  %v6746_v54 = vpop.eup %6745  ;;  %v9791_v1 = vpop.permute.xlu1 %4152 }
 0x975   : > { %11592 = vst [vmem:[#allocation91_spill] sm:$0xff] %v9791_v1  ;;  %v4993_v39 = vmul.f32 %v6746_v54, %v11536_v42  ;;  %v4825_v54 = vmul.f32 1.442695, %v9283_v18  ;;  %v9928_v1 = vadd.s32 96, %v7259_v6 }
 0x977   : > { %5049 = vrot.lane.b32.xlu1 %v5002_v33, %s7124_s30  ;;  %vm3365_vm11 = vcmp.ge.s32.totalorder %v9928_v1, %v9436_v49 }
 0x978   : > { %v6748_v11 = vpop.eup %6747  ;;  %v9796_v63 = vpop.permute.xlu1 %4156 }
 0x979   : > { %11593 = vst [vmem:[#allocation92_spill] sm:$0xff] %v9796_v63  ;;  %v4991_v38 = vmul.f32 %v6748_v11, %v11537_v9  ;;  %v6750_v33 = vpop.eup %6749  ;;  %v4952_v9 = vsub.f32 %v9738_v17, %v9399_v28  ;;  %v4833_v11 = vmul.f32 1.442695, %v9303_v41 }
 0x97a   : > { %v4989_v43 = vmul.f32 %v6750_v33, %v11538_v25  ;;  %v4948_v25 = vsub.f32 %v9738_v17, %v9335_v51  ;;  %v4841_v33 = vmul.f32 1.442695, %v9335_v51 }
 0x97b   : > { %5043 = vrot.lane.b32.xlu1 %v4999_v60, %s7124_s30  ;;  %v4953_v60 = vsub.f32 %v9738_v17, %v9414_v13  ;;  %v4981_v7 = vmul.f32 1.442695, %v4952_v9  ;;  %v4845_v9 = vmul.f32 1.442695, %v9393_v29 }
 0x97c   : > { %v9801_v47 = vpop.permute.xlu1 %3596 }
 0x97f   : > { %5039 = vrot.lane.b32.xlu1 %v4997_v0, %s7124_s30  ;;  %v3222_v61 = vpop.permute.xlu0 %3221  ;;  %v4983_v0 = vmul.f32 1.442695, %v4953_v60  ;;  %v9832_v60 = vpop.f32.mrf.mxu1 }
 0x980   : > { %3254 = vxpose.xlu0.b32.end [16/16] (narrow) %v3222_v61, 56  ;;  %v9804_v15 = vpop.permute.xlu1 %3600  ;;  %v4977_v61 = vmul.f32 1.442695, %v4950_v10  ;;  %v4946_v10 = vsub.f32 %v9738_v17, %v9344_v46 }
 0x981   : > { %6751 = vpow2.f32 %v4983_v0  ;;  %v4944_v0 = vsub.f32 %v9738_v17, %v9303_v41 }
 0x982   : > { %6753 = vpow2.f32 %v4981_v7  ;;  %v4853_v7 = vmul.f32 1.442695, %v9633_v27 }
 0x983   : > { %5035 = vrot.lane.b32.xlu1 %v4995_v62, %s7124_s30  ;;  %v4973_v62 = vmul.f32 1.442695, %v4948_v25  ;;  %6755 = vpow2.f32 %v4977_v61  ;;  %v4849_v25 = vmul.f32 1.442695, %v9399_v28 }
 0x984   : > { %v9806_v58 = vpop.permute.xlu1 %4160 }
 0x985   : > { %11594 = vst [vmem:[#allocation93_spill] sm:$0xff] %v9806_v58  ;;  %6757 = vpow2.f32 %v4973_v62 }
 0x986   : > { %6759 = vpow2.f32 %v4825_v54 }
 0x987   : > { %5031 = vrot.lane.b32.xlu1 %v4993_v39, %s7124_s30  ;;  %v4829_v39 = vmul.f32 1.442695, %v9293_v21 }
 0x988   : > { %v9808_v42 = vpop.permute.xlu1 %3604 }
 0x989   : > { %6761 = vpow2.f32 %v4829_v39  ;;  %v9846_v39 = vpop.f32.mrf.mxu1 }
 0x98a   : > { %6763 = vpow2.f32 %v4833_v11 }
 0x98b   : > { %5027 = vrot.lane.b32.xlu1 %v4991_v38, %s7124_s30  ;;  %6765 = vpow2.f32 %v4841_v33  ;;  %v9850_v33 = vadd.s32 8, %v7259_v6 }
 0x98c   : > { %v9818_v56 = vpop.permute.xlu1 %3608  ;;  %v9842_v61 = vpop.permute.xlu0 %4184 }
 0x98d   : > { %11597 = vst [vmem:[#allocation96_spill] sm:$0xff] %v9842_v61  ;;  %v9878_v61 = vadd.s32 64, %v7259_v6  ;;  %vm3354_vm1 = vcmp.ge.s32.totalorder %v9850_v33, %v9436_v49 }
 0x98e   : > { %v6752_v54 = vpop.eup %6751 }
 0x98f   : > { %5023 = vrot.lane.b32.xlu1 %v4989_v43, %s7124_s30  ;;  %v4837_v43 = vmul.f32 1.442695, %v9344_v46  ;;  %v6754_v11 = vpop.eup %6753  ;;  %vm3361_vm8 = vcmp.ge.s32.totalorder %v9878_v61, %v9436_v49 }
 0x990   : > { %v9821_v13 = vpop.permute.xlu1 %4168  ;;  %v6756_v18 = vpop.eup %6755 }
 0x991   : > { %11595 = vst [vmem:[#allocation94_spill] sm:$0xff] %v9821_v13  ;;  %6767 = vpow2.f32 %v4837_v43  ;;  %v9853_v43 = vadd.s32 16, %v7259_v6  ;;  %v11601_v13 = vld [vmem:[#allocation34_spill] sm:$0xff]  ;;  %v9889_v58 = vmul.f32 %v6756_v18, %v11603_v44  ;;  %v9911_v44 = vadd.s32 72, %v7259_v6 }
 0x992   : > { %6769 = vpow2.f32 %v4845_v9  ;;  %v9859_v9 = vadd.s32 32, %v7259_v6  ;;  %v9886_v22 = vmul.f32 %v6754_v11, %v11601_v13 }
 0x993   : > { %6771 = vpow2.f32 %v4849_v25  ;;  %v9863_v25 = vpop.permute.xlu0 %4426  ;;  %11604 = vst [vmem:[#allocation46_spill] sm:$0xff] %v9889_v58  ;;  %vm3355_vm2 = vcmp.ge.s32.totalorder %v9853_v43, %v9436_v49  ;;  %vm3362_vm9 = vcmp.ge.s32.totalorder %v9911_v44, %v9436_v49 }
 0x994   : > { %v9827_v38 = vpop.permute.xlu1 %3809  ;;  %6773 = vpow2.f32 %v4853_v7  ;;  %11599 = vst [vmem:[#allocation98_spill] sm:$0xff] %v9863_v25  ;;  %v9872_v7 = vadd.s32 56, %v7259_v6  ;;  %11602 = vst [vmem:[#allocation34_spill] sm:$0xff] %v9886_v22  ;;  %vm3357_vm4 = vcmp.ge.s32.totalorder %v9859_v9, %v9436_v49 }
 0x995   : > { %11596 = vst [vmem:[#allocation95_spill] sm:$0xff] %v9827_v38 }
 0x996   : > { %vm11341_vm7 = vcmp.ge.s32.totalorder %v9872_v7, %v9436_v49 }
 0x998   : > { %v9844_v62 = vpop.permute.xlu1 %4172 }
 0x999   : > { %11598 = vst [vmem:[#allocation97_spill] sm:$0xff] %v9844_v62  ;;  %v9881_v62 = vmul.f32 %v6752_v54, %v11539_v31  ;;  %v11607_v54 = vld [vmem:[#allocation57_spill] sm:$0xff] }
 0x99b   : > { %11600 = vst [vmem:[#allocation99_spill] sm:$0xff] %v9881_v62 }
 0x99c   : > { %v9874_v17 = vpop.permute.xlu1 %3612 }
 0x9a0   : > { %v9941_v58 = vpop.permute.xlu1 %3616 }
 0x9a9   : > { %4438 = vperm.xlu0 %6580, %v9293_v21   ;;  %v9856_v21 = vadd.s32 24, %v7259_v6 }
 0x9ab   : > { %vm3356_vm3 = vcmp.ge.s32.totalorder %v9856_v21, %v9436_v49 }
 0x9ad   : > { %4446 = vperm.xlu0 %6580, %v9303_v41   ;;  %v6758_v41 = vpop.eup %6757 }
 0x9b1   : > { %4454 = vperm.xlu0 %6580, %v9344_v46   ;;  %v4969_v46 = vmul.f32 1.442695, %v4946_v10  ;;  %v9861_v10 = vpop.f32.mrf.mxu1 }
 0x9b3   : > { %6775 = vpow2.f32 %v4969_v46  ;;  %v11605_v46 = vld [vmem:[#allocation44_spill] sm:$0xff]  ;;  %v9902_v31 = vpop.f32.mrf.mxu1 }
 0x9b4   : > { %v9892_v63 = vmul.f32 %v6758_v41, %v11605_v46  ;;  %v9923_v41 = vadd.s32 88, %v7259_v6 }
 0x9b5   : > { %4462 = vperm.xlu0 %6580, %v9335_v51   ;;  %v4965_v51 = vmul.f32 1.442695, %v4944_v0  ;;  %v9869_v0 = vadd.s32 48, %v7259_v6  ;;  %v9953_v22 = vpop.f32.mrf.mxu1 }
 0x9b6   : > { %11606 = vst [vmem:[#allocation44_spill] sm:$0xff] %v9892_v63  ;;  %v9931_v63 = vadd.s32 104, %v7259_v6  ;;  %vm3364_vm13 = vcmp.ge.s32.totalorder %v9923_v41, %v9436_v49  ;;  %v11667_v41 = vld [vmem:[#allocation72_spill] sm:$0xff] }
 0x9b7   : > { %6777 = vpow2.f32 %v4965_v51  ;;  %vm11342_vm6 = vcmp.ge.s32.totalorder %v9869_v0, %v9436_v49  ;;  %v9920_v51 = vadd.s32 80, %v7259_v6 }
 0x9b8   : > { %vm3366_vm10 = vcmp.ge.s32.totalorder %v9931_v63, %v9436_v49 }
 0x9b9   : > { %4470 = vperm.xlu0 %6580, %v9393_v29   ;;  %v9866_v29 = vadd.s32 40, %v7259_v6  ;;  %vm3363_vm12 = vcmp.ge.s32.totalorder %v9920_v51, %v9436_v49 }
 0x9bb   : > { %vm3358_vm5 = vcmp.ge.s32.totalorder %v9866_v29, %v9436_v49 }
 0x9bd   : > { %4478 = vperm.xlu0 %6580, %v9399_v28   ;;  %v6760_v28 = vpop.eup %6759 }
 0x9be   : > { %v6762_v13 = vpop.eup %6761 }
 0x9bf   : > { %v9925_v46 = vpop.eup %6763 }
 0x9c0   : > { %v3255_v18 = vpop.trf.xlu0  ;;  %v9939_v52 = vpop.eup %6765 }
 0x9c1   : > { %v9914_v11 = vrot.slane %v3255_v18, %v11607_v54  ;;  %4486 = vperm.xlu0 %6580, %v9633_v27   ;;  %v9934_v18 = vadd.s32 112, %v7259_v6  ;;  %v9937_v27 = vadd.s32 120, %v7259_v6  ;;  %v9951_v5 = vpop.eup %6767 }
 0x9c2   : > { %v9963_v62 = vpop.eup %6769 }
 0x9c3   : > { %v3631_v34 = vsub.f32 %v9695_v14, %v9914_v11  ;;  %v3632_v55 = vsub.f32 %v9700_v16, %v9914_v11  ;;  %v3633_v30 = vsub.f32 %v9715_v8, %v9914_v11  ;;  %v3634_v36 = vsub.f32 %v9723_v23, %v9914_v11 }
 0x9c4   : > { %v3256_v38 = vpop.trf.xlu0  ;;  %v3635_v50 = vsub.f32 %v9747_v53, %v9914_v11  ;;  %v3636_v14 = vsub.f32 %v9756_v4, %v9914_v11  ;;  %v3637_v16 = vsub.f32 %v9779_v48, %v9914_v11  ;;  %v3638_v8 = vsub.f32 %v9786_v32, %v9914_v11  ;;  %v9979_v32 = vpop.eup %6771 }
 0x9c5   : > { %4873 = vrot.lane.b32.xlu0 %v6760_v28, %s7124_s30  ;;  %v3647_v23 = vsel %vm3353_vm0, %v3631_v34, -1e+30  ;;  %v3648_v53 = vsel %vm3354_vm1, %v3632_v55, -1e+30  ;;  %v3649_v4 = vsel %vm3355_vm2, %v3633_v30, -1e+30  ;;  %v3639_v48 = vsub.f32 %v9801_v47, %v9914_v11  ;;  %v9986_v25 = vpop.eup %6773 }
 0x9c6   : > { %v3663_v38 = vmul.f32 1.442695, %v3647_v23  ;;  %v3665_v28 = vmul.f32 1.442695, %v3648_v53  ;;  %v3650_v34 = vsel %vm3356_vm3, %v3634_v36, -1e+30  ;;  %v3640_v55 = vsub.f32 %v9804_v15, %v9914_v11  ;;  %v9993_v23 = vpop.f32.mrf.mxu1 }
 0x9c7   : > { %11608 = vst [vmem:[#allocation100_spill] sm:$0xff] %v9986_v25  ;;  %v3667_v30 = vmul.f32 1.442695, %v3649_v4  ;;  %v3669_v20 = vmul.f32 1.442695, %v3650_v34  ;;  %v10005_v34 = vpop.permute.xlu1 %4176 }
 0x9c8   : > { %v3651_v37 = vsel %vm3357_vm4, %v3635_v50, -1e+30  ;;  %v3257_v53 = vpop.trf.xlu0  ;;  %6779 = vpow2.f32 %v3663_v38  ;;  %v3652_v36 = vsel %vm3358_vm5, %v3636_v14, -1e+30  ;;  %v3653_v4 = vsel %vm11342_vm6, %v3637_v16, -1e+30  ;;  %v10003_v50 = vpop.eup %6775 }
 0x9c9   : > { %v3671_v15 = vmul.f32 1.442695, %v3651_v37  ;;  %11609 = vst [vmem:[#allocation101_spill] sm:$0xff] %v10005_v34  ;;  %v10008_v47 = vrot.slane %v3257_v53, %v11607_v54  ;;  %4877 = vrot.lane.b32.xlu0 %v6762_v13, %s7124_s30  ;;  %6781 = vpow2.f32 %v3665_v28  ;;  %v3673_v38 = vmul.f32 1.442695, %v3652_v36  ;;  %v10014_v14 = vpop.eup %6777  ;;  %v11610_v28 = vld [vmem:[#allocation33_spill] sm:$0xff] }
 0x9ca   : > { %v3654_v37 = vsel %vm11341_vm7, %v3638_v8, -1e+30  ;;  %6783 = vpow2.f32 %v3667_v30  ;;  %v3675_v16 = vmul.f32 1.442695, %v3653_v4  ;;  %v3655_v34 = vsel %vm3361_vm8, %v3639_v48, -1e+30  ;;  %v10027_v30 = vpop.f32.mrf.mxu1 }
 0x9cb   : > { %v3677_v12 = vmul.f32 1.442695, %v3654_v37  ;;  %6785 = vpow2.f32 %v3669_v20  ;;  %v3816_v13 = vsub.f32 %v9500_v26, %v10008_v47  ;;  %v3817_v53 = vsub.f32 %v11610_v28, %v10008_v47  ;;  %v11611_v8 = vld [vmem:[#allocation41_spill] sm:$0xff] }
 0x9cc   : > { %v3818_v36 = vsub.f32 %v11611_v8, %v10008_v47  ;;  %v3258_v4 = vpop.trf.xlu0  ;;  %6787 = vpow2.f32 %v3671_v15  ;;  %v3819_v48 = vsub.f32 %v9511_v59, %v10008_v47  ;;  %v3820_v37 = vsub.f32 %v9503_v57, %v10008_v47 }
 0x9cd   : > { %v3821_v20 = vsub.f32 %v9534_v24, %v10008_v47  ;;  %4881 = vrot.lane.b32.xlu0 %v9925_v46, %s7124_s30  ;;  %6789 = vpow2.f32 %v3673_v38  ;;  %v3832_v26 = vsel %vm3353_vm0, %v3816_v13, -1e+30  ;;  %v3833_v15 = vsel %vm3354_vm1, %v3817_v53, -1e+30  ;;  %v10049_v46 = vpop.permute.xlu1 %4180  ;;  %v10054_v53 = vpop.f32.mrf.mxu1 }
 0x9ce   : > { %v3834_v59 = vsel %vm3355_vm2, %v3818_v36, -1e+30  ;;  %v3848_v57 = vmul.f32 1.442695, %v3832_v26  ;;  %v3850_v28 = vmul.f32 1.442695, %v3833_v15  ;;  %6791 = vpow2.f32 %v3675_v16 }
 0x9cf   : > { %v3835_v24 = vsel %vm3356_vm3, %v3819_v48, -1e+30  ;;  %v3852_v38 = vmul.f32 1.442695, %v3834_v59  ;;  %6793 = vpow2.f32 %v3677_v12  ;;  %v3836_v13 = vsel %vm3357_vm4, %v3820_v37, -1e+30 }
 0x9d0   : > { %v3854_v8 = vmul.f32 1.442695, %v3835_v24  ;;  %v3259_v4 = vpop.trf.xlu0  ;;  %6795 = vpow2.f32 %v3848_v57  ;;  %v3837_v36 = vsel %vm3358_vm5, %v3821_v20, -1e+30  ;;  %v3856_v26 = vmul.f32 1.442695, %v3836_v13  ;;  %v10071_v20 = vpop.f32.mrf.mxu1 }
 0x9d1   : > { %v3656_v16 = vsel %vm3362_vm9, %v3640_v55, -1e+30  ;;  %v10065_v12 = vrot.slane %v3259_v4, %v11607_v54  ;;  %4885 = vrot.lane.b32.xlu0 %v9951_v5, %s7124_s30  ;;  %6797 = vpow2.f32 %v3850_v28  ;;  %v3858_v48 = vmul.f32 1.442695, %v3837_v36  ;;  %v11612_v55 = vld [vmem:[#allocation37_spill] sm:$0xff] }
 0x9d2   : > { %v3679_v37 = vmul.f32 1.442695, %v3655_v34  ;;  %6799 = vpow2.f32 %v3852_v38  ;;  %v3681_v15 = vmul.f32 1.442695, %v3656_v16  ;;  %v3822_v59 = vsub.f32 %v11612_v55, %v10008_v47  ;;  %v10100_v16 = vpop.f32.mrf.mxu1 }
 0x9d3   : > { %v3823_v57 = vsub.f32 %v9631_v45, %v10008_v47  ;;  %6801 = vpow2.f32 %v3854_v8  ;;  %v3642_v5 = vsub.f32 %v9818_v56, %v9914_v11  ;;  %v11613_v34 = vsub.f32 %v9808_v42, %v9914_v11  ;;  %v10093_v42 = vpop.permute.xlu1 %3620 }
 0x9d4   : > { %v3824_v24 = vsub.f32 %v9612_v35, %v10008_v47  ;;  %v3260_v38 = vpop.trf.xlu0  ;;  %6803 = vpow2.f32 %v3856_v26  ;;  %v3838_v45 = vsel %vm11342_vm6, %v3822_v59, -1e+30  ;;  %vm3368_vm6 = vcmp.ge.s32.totalorder %v9937_v27, %v9436_v49 }
 0x9d5   : > { %v3657_v28 = vsel %vm3363_vm12, %v11613_v34, -1e+30  ;;  %v3839_v56 = vsel %vm11341_vm7, %v3823_v57, -1e+30  ;;  %v6780_v13 = vpop.eup %6779  ;;  %4889 = vrot.lane.b32.xlu0 %v9939_v52, %s7124_s30  ;;  %6805 = vpow2.f32 %v3858_v48  ;;  %v3860_v4 = vmul.f32 1.442695, %v3838_v45 }
 0x9d6   : > { %v3683_v8 = vmul.f32 1.442695, %v3657_v28  ;;  %v3862_v35 = vmul.f32 1.442695, %v3839_v56  ;;  %v3658_v36 = vsel %vm3364_vm13, %v3642_v5, -1e+30  ;;  %v6782_v26 = vpop.eup %6781  ;;  %v3695_v55 = vmul.f32 %v6780_v13, %v9846_v39 }
 0x9d7   : > { %6807 = vpow2.f32 %v3679_v37  ;;  %v3685_v59 = vmul.f32 1.442695, %v3658_v36  ;;  %v11614_v57 = vld [vmem:[#allocation78_spill] sm:$0xff]  ;;  %v6784_v28 = vpop.eup %6783  ;;  %v3696_v52 = vmul.f32 %v6782_v26, %v9902_v31  ;;  %v3840_v48 = vsel %vm3361_vm8, %v3824_v24, -1e+30 }
 0x9d8   : > { %v3825_v34 = vsub.f32 %v11614_v57, %v10008_v47  ;;  %6809 = vpow2.f32 %v3681_v15  ;;  %v3643_v5 = vsub.f32 %v9874_v17, %v9914_v11  ;;  %vm3367_vm7 = vcmp.ge.s32.totalorder %v9934_v18, %v9436_v49  ;;  %v6786_v37 = vpop.eup %6785  ;;  %v3261_v38 = vpop.trf.xlu0 }
 0x9d9   : > { %v3697_v45 = vmul.f32 %v6784_v28, %v9832_v60  ;;  %6811 = vpow2.f32 %v3860_v4  ;;  %v3864_v56 = vmul.f32 1.442695, %v3840_v48  ;;  %v6788_v24 = vpop.eup %6787  ;;  %v10120_v13 = vrot.slane %v3261_v38, %v11607_v54  ;;  %4893 = vrot.lane.b32.xlu0 %v9963_v62, %s7124_s30  ;;  %v10125_v57 = vpop.f32.mrf.mxu1 }
 0x9da   : > { %v3841_v15 = vsel %vm3362_vm9, %v3825_v34, -1e+30  ;;  %v3711_v17 = vpack.c.bf16 %v3696_v52, %v3695_v55  ;;  %v3698_v36 = vmul.f32 %v6786_v37, %v9861_v10  ;;  %6813 = vpow2.f32 %v3862_v35  ;;  %v6790_v26 = vpop.eup %6789  ;;  %v3625_v38 = vpop.permute.xlu1 %3624 }
 0x9db   : > { %v3699_v4 = vmul.f32 %v6788_v24, %v9993_v23  ;;  %6815 = vpow2.f32 %v3683_v8  ;;  %v3866_v28 = vmul.f32 1.442695, %v3841_v15  ;;  %v3644_v34 = vsub.f32 %v9941_v58, %v9914_v11  ;;  %v6792_v48 = vpop.eup %6791  ;;  %v10141_v24 = vpop.f32.mrf.mxu1 }
 0x9dc   : > { %6291 = vmatprep.mubr.bf16.mxu1 %v3711_v17  ;;  %v3712_v54 = vpack.c.bf16 %v3698_v36, %v3697_v45  ;;  %v3700_v62 = vmul.f32 %v6790_v26, %v10054_v53  ;;  %6817 = vpow2.f32 %v3685_v59  ;;  %v3659_v35 = vsel %vm3365_vm11, %v3643_v5, -1e+30  ;;  %v6794_v55 = vpop.eup %6793  ;;  %v11615_v36 = vld [vmem:[#allocation42_spill] sm:$0xff] }
 0x9dd   : > { %v3701_v52 = vmul.f32 %v6792_v48, %v9953_v22  ;;  %6819 = vpow2.f32 %v3864_v56  ;;  %v3660_v8 = vsel %vm3366_vm10, %v3644_v34, -1e+30  ;;  %v3687_v58 = vmul.f32 1.442695, %v3659_v35  ;;  %v6796_v37 = vpop.eup %6795  ;;  %4897 = vrot.lane.b32.xlu0 %v9979_v32, %s7124_s30  ;;  %v10157_v48 = vpop.f32.mrf.mxu1 }
 0x9de   : > { %6292 = vmatmul.mubr.bf16.vlgmr.msra.gmra.mxu1 %v3712_v54  ;;  %v3713_v15 = vpack.c.bf16 %v3700_v62, %v3699_v4  ;;  %v3702_v59 = vmul.f32 %v6794_v55, %v10027_v30  ;;  %6821 = vpow2.f32 %v3866_v28  ;;  %v3689_v45 = vmul.f32 1.442695, %v3660_v8  ;;  %v6798_v5 = vpop.eup %6797 }
 0x9df   : > { %6340 = vmatpush3.bf16.msk.msra.mxu1 %vm9668_vm15, %v9461_v3  ;;  %v3880_v56 = vmul.f32 %v6796_v37, %v9846_v39  ;;  %6823 = vpow2.f32 %v3687_v58  ;;  %v3826_v54 = vsub.f32 %v9646_v2, %v10008_v47  ;;  %v3827_v32 = vsub.f32 %v9638_v40, %v10008_v47  ;;  %v6800_v17 = vpop.eup %6799 }
 0x9e0   : > { %6295 = vmatprep.mubr.bf16.mxu1 %v3713_v15  ;;  %6341 = vmatprep.subr.msk.bf16.mxu1 %vm9668_vm15, %v11615_v36  ;;  %v3881_v26 = vmul.f32 %v6798_v5, %v9902_v31  ;;  %v3714_v4 = vpack.c.bf16 %v3702_v59, %v3701_v52  ;;  %6825 = vpow2.f32 %v3689_v45  ;;  %v3645_v28 = vsub.f32 %v10093_v42, %v9914_v11  ;;  %v6802_v34 = vpop.eup %6801  ;;  %v10167_v52 = vpop.permute.xlu1 %4188  ;;  %v11616_v45 = vld [vmem:[#allocation48_spill] sm:$0xff] }
 0x9e1   : > { %v3882_v2 = vmul.f32 %v6800_v17, %v9832_v60  ;;  %v3842_v40 = vsel %vm3363_vm12, %v3826_v54, -1e+30  ;;  %v3843_v62 = vsel %vm3364_vm13, %v3827_v32, -1e+30  ;;  %v3646_v35 = vsub.f32 %v3625_v38, %v9914_v11  ;;  %v6804_v55 = vpop.eup %6803  ;;  %4901 = vrot.lane.b32.xlu0 %v9986_v25, %s7124_s30  ;;  %v11617_v54 = vld [vmem:[#allocation39_spill] sm:$0xff] }
 0x9e2   : > { %v3896_v42 = vpack.c.bf16 %v3881_v26, %v3880_v56  ;;  %v3883_v8 = vmul.f32 %v6802_v34, %v9861_v10  ;;  %v3868_v58 = vmul.f32 1.442695, %v3842_v40  ;;  %v3870_v37 = vmul.f32 1.442695, %v3843_v62  ;;  %v6806_v15 = vpop.eup %6805 }
 0x9e3   : > { %6342 = vmatpush3.bf16.msk.msra.mxu1 %vm9668_vm15, %v11615_v36  ;;  %v3884_v59 = vmul.f32 %v6804_v55, %v9993_v23  ;;  %v3661_v11 = vsel %vm3367_vm7, %v3645_v28, -1e+30  ;;  %v3662_v38 = vsel %vm3368_vm6, %v3646_v35, -1e+30  ;;  %v3828_v5 = vsub.f32 %v11616_v45, %v10008_v47  ;;  %v10188_v28 = vpop.f32.mrf.mxu1  ;;  %v11618_v35 = vld [vmem:[#allocation81_spill] sm:$0xff] }
 0x9e4   : > { %v6808_v56 = vpop.eup %6807  ;;  %6343 = vmatprep.subr.msk.bf16.mxu1 %vm9668_vm15, %v11617_v54  ;;  %6259 = vmatprep.mubr.bf16.mxu0 %v3896_v42  ;;  %v3897_v32 = vpack.c.bf16 %v3883_v8, %v3882_v2  ;;  %v3885_v17 = vmul.f32 %v6806_v15, %v10054_v53  ;;  %6827 = vpow2.f32 %v3868_v58  ;;  %v3691_v26 = vmul.f32 1.442695, %v3661_v11  ;;  %v4431_v11 = vpop.permute.xlu1 %4430 }
 0x9e5   : > { %v6810_v34 = vpop.eup %6809  ;;  %v3703_v40 = vmul.f32 %v6808_v56, %v10100_v16  ;;  %6829 = vpow2.f32 %v3870_v37  ;;  %v3693_v62 = vmul.f32 1.442695, %v3662_v38  ;;  %v3829_v55 = vsub.f32 %v11618_v35, %v10008_v47  ;;  %v11620_v56 = vld [vmem:[#allocation98_spill] sm:$0xff] }
 0x9e6   : > { %v6812_v45 = vpop.eup %6811  ;;  %6260 = vmatmul.mubr.bf16.vlgmr.msra.gmra.mxu0 %v3897_v32  ;;  %6296 = vmatmul.mubr.bf16.gmra.mxu1 %v3714_v4  ;;  %v3898_v25 = vpack.c.bf16 %v3885_v17, %v3884_v59  ;;  %v3704_v2 = vmul.f32 %v6810_v34, %v10141_v24  ;;  %6831 = vpow2.f32 %v3691_v26  ;;  %v3844_v42 = vsel %vm3365_vm11, %v3828_v5, -1e+30  ;;  %v10213_v26 = vpop.f32.mrf.mxu1  ;;  %v11621_v34 = vld [vmem:[#allocation32_spill] sm:$0xff]  ;;  %v11623_v35 = vld [vmem:[#allocation82_spill] sm:$0xff] }
 0x9e7   : > { %v6814_v8 = vpop.eup %6813  ;;  %6308 = vmatpush3.bf16.msk.msra.mxu0 %vm9660_vm14, %v9461_v3  ;;  %6344 = vmatpush3.bf16.msk.msra.mxu1 %vm9668_vm15, %v11617_v54  ;;  %v3886_v37 = vmul.f32 %v6812_v45, %v9953_v22  ;;  %6833 = vpow2.f32 %v3693_v62  ;;  %v3845_v4 = vsel %vm3366_vm10, %v3829_v55, -1e+30  ;;  %v3872_v15 = vmul.f32 1.442695, %v3844_v42 }
 0x9e8   : > { %v6816_v59 = vpop.eup %6815  ;;  %6263 = vmatprep.mubr.bf16.mxu0 %v3898_v25  ;;  %v3715_v38 = vpack.c.bf16 %v3704_v2, %v3703_v40  ;;  %6309 = vmatprep.subr.msk.bf16.mxu0 %vm9660_vm14, %v11615_v36  ;;  %v3887_v3 = vmul.f32 %v6814_v8, %v10027_v30  ;;  %v3874_v5 = vmul.f32 1.442695, %v3845_v4  ;;  %v4493_v32 = vsub.f32 %v11620_v56, %v10120_v13  ;;  %v11622_v25 = vld [vmem:[#allocation99_spill] sm:$0xff] }
 0x9e9   : > { %v6818_v17 = vpop.eup %6817  ;;  %6345 = vmatprep.subr.msk.bf16.mxu1 %vm9668_vm15, %v11621_v34  ;;  %5047 = vrot.lane.b32.xlu0 %v11622_v25, %s7124_s30  ;;  %v3705_v40 = vmul.f32 %v6816_v59, %v10071_v20  ;;  %6835 = vpow2.f32 %v3872_v15  ;;  %v4494_v62 = vsub.f32 %v4431_v11, %v10120_v13  ;;  %v3830_v55 = vsub.f32 %v11623_v35, %v10008_v47  ;;  %v11624_v11 = vld [vmem:[#allocation95_spill] sm:$0xff] }
 0x9ea   : > { %v6820_v45 = vpop.eup %6819  ;;  %6299 = vmatprep.mubr.bf16.mxu1 %v3715_v38  ;;  %v3899_v2 = vpack.c.bf16 %v3887_v3, %v3886_v37  ;;  %v3706_v42 = vmul.f32 %v6818_v17, %v10125_v57  ;;  %6837 = vpow2.f32 %v3874_v5  ;;  %v4509_v8 = vsel %vm3353_vm0, %v4493_v32, -1e+30 }
 0x9eb   : > { %v6822_v4 = vpop.eup %6821  ;;  %6310 = vmatpush3.bf16.msk.msra.mxu0 %vm9660_vm14, %v11615_v36  ;;  %6346 = vmatpush3.bf16.msk.msra.mxu1 %vm9668_vm15, %v11621_v34  ;;  %v3888_v15 = vmul.f32 %v6820_v45, %v10100_v16  ;;  %v4510_v37 = vsel %vm3354_vm1, %v4494_v62, -1e+30  ;;  %v4525_v59 = vmul.f32 1.442695, %v4509_v8  ;;  %v3831_v38 = vsub.f32 %v11624_v11, %v10008_v47  ;;  %v11625_v36 = vld [vmem:[#allocation47_spill] sm:$0xff]  ;;  %v10250_v62 = vpop.f32.mrf.mxu1  ;;  %v11626_v47 = vld [vmem:[#allocation34_spill] sm:$0xff] }
 0x9ec   : > { %v6824_v3 = vpop.eup %6823  ;;  %6311 = vmatprep.subr.msk.bf16.mxu0 %vm9660_vm14, %v11617_v54  ;;  %6347 = vmatprep.subr.msk.bf16.mxu1 %vm9668_vm15, %v11625_v36  ;;  %v3716_v5 = vpack.c.bf16 %v3706_v42, %v3705_v40  ;;  %v3889_v56 = vmul.f32 %v6822_v4, %v10141_v24  ;;  %v4527_v32 = vmul.f32 1.442695, %v4510_v37  ;;  %v3846_v17 = vsel %vm3367_vm7, %v3830_v55, -1e+30  ;;  %v11627_v4 = vld [vmem:[#allocation83_spill] sm:$0xff] }
 0x9ed   : > { %v6826_v25 = vpop.eup %6825  ;;  %5045 = vrot.lane.b32.xlu0 %v11626_v47, %s7124_s30  ;;  %v3707_v35 = vmul.f32 %v6824_v3, %v10188_v28  ;;  %6839 = vpow2.f32 %v4525_v59  ;;  %v3847_v40 = vsel %vm3368_vm6, %v3831_v38, -1e+30  ;;  %v3876_v45 = vmul.f32 1.442695, %v3846_v17  ;;  %v11632_v17 = vld [vmem:[#allocation45_spill] sm:$0xff] }
 0x9ee   : > { %6264 = vmatmul.mubr.bf16.gmra.mxu0 %v3899_v2  ;;  %6300 = vmatmul.mubr.bf16.gmra.mxu1 %v3716_v5  ;;  %v3900_v42 = vpack.c.bf16 %v3889_v56, %v3888_v15  ;;  %v3708_v8 = vmul.f32 %v6826_v25, %v10250_v62  ;;  %6841 = vpow2.f32 %v4527_v32  ;;  %v3878_v55 = vmul.f32 1.442695, %v3847_v40  ;;  %v11628_v2 = vld [vmem:[#allocation84_spill] sm:$0xff]  ;;  %v11629_v15 = vld [vmem:[#allocation85_spill] sm:$0xff]  ;;  %v11633_v25 = vld [vmem:[#allocation46_spill] sm:$0xff] }
 0x9ef   : > { %6312 = vmatpush3.bf16.msk.msra.mxu0 %vm9660_vm14, %v11617_v54  ;;  %6348 = vmatpush3.bf16.msk.msra.mxu1 %vm9668_vm15, %v11625_v36  ;;  %6843 = vpow2.f32 %v3876_v45  ;;  %v4195_v37 = vsub.f32 %v11627_v4, %v10065_v12  ;;  %v4196_v59 = vsub.f32 %v11628_v2, %v10065_v12  ;;  %v4197_v11 = vsub.f32 %v11629_v15, %v10065_v12  ;;  %v11630_v54 = vld [vmem:[#allocation87_spill] sm:$0xff]  ;;  %v11631_v5 = vld [vmem:[#allocation88_spill] sm:$0xff]  ;;  %v11634_v45 = vld [vmem:[#allocation89_spill] sm:$0xff] }
 0x9f0   : > { %6267 = vmatprep.mubr.bf16.mxu0 %v3900_v42  ;;  %v3717_v38 = vpack.c.bf16 %v3708_v8, %v3707_v35  ;;  %6313 = vmatprep.subr.msk.bf16.mxu0 %vm9660_vm14, %v11621_v34  ;;  %6845 = vpow2.f32 %v3878_v55  ;;  %v4198_v3 = vsub.f32 %v11630_v54, %v10065_v12  ;;  %v4199_v56 = vsub.f32 %v11631_v5, %v10065_v12  ;;  %v11635_v54 = vld [vmem:[#allocation77_spill] sm:$0xff]  ;;  %v11636_v5 = vld [vmem:[#allocation44_spill] sm:$0xff] }
 0x9f1   : > { %v6828_v32 = vpop.eup %6827  ;;  %6349 = vmatprep.subr.msk.bf16.mxu1 %vm9668_vm15, %v11632_v17  ;;  %5041 = vrot.lane.b32.xlu0 %v11633_v25, %s7124_s30  ;;  %v4211_v47 = vsel %vm3353_vm0, %v4195_v37, -1e+30  ;;  %v4212_v35 = vsel %vm3354_vm1, %v4196_v59, -1e+30  ;;  %v4213_v40 = vsel %vm3355_vm2, %v4197_v11, -1e+30  ;;  %v4200_v42 = vsub.f32 %v11634_v45, %v10065_v12 }
 0x9f2   : > { %v6830_v8 = vpop.eup %6829  ;;  %6303 = vmatprep.mubr.bf16.mxu1 %v3717_v38  ;;  %v3890_v55 = vmul.f32 %v6828_v32, %v10071_v20  ;;  %v4227_v4 = vmul.f32 1.442695, %v4211_v47  ;;  %v4229_v2 = vmul.f32 1.442695, %v4212_v35  ;;  %v4214_v6 = vsel %vm3356_vm3, %v4198_v3, -1e+30 }
 0x9f3   : > { %v6832_v37 = vpop.eup %6831  ;;  %6314 = vmatpush3.bf16.msk.msra.mxu0 %vm9660_vm14, %v11621_v34  ;;  %6350 = vmatpush3.bf16.msk.msra.mxu1 %vm9668_vm15, %v11632_v17  ;;  %v3891_v33 = vmul.f32 %v6830_v8, %v10125_v57  ;;  %v4231_v59 = vmul.f32 1.442695, %v4213_v40  ;;  %v4233_v15 = vmul.f32 1.442695, %v4214_v6  ;;  %v4215_v11 = vsel %vm3357_vm4, %v4199_v56, -1e+30 }
 0x9f4   : > { %v6834_v38 = vpop.eup %6833  ;;  %6315 = vmatprep.subr.msk.bf16.mxu0 %vm9660_vm14, %v11625_v36  ;;  %6351 = vmatprep.subr.msk.bf16.mxu1 %vm9668_vm15, %v11635_v54  ;;  %v3709_v34 = vmul.f32 %v6832_v37, %v10157_v48  ;;  %6847 = vpow2.f32 %v4227_v4  ;;  %v4216_v3 = vsel %vm3358_vm5, %v4200_v42, -1e+30  ;;  %v4235_v25 = vmul.f32 1.442695, %v4215_v11  ;;  %v11637_v40 = vld [vmem:[#allocation91_spill] sm:$0xff]  ;;  %v11638_v8 = vld [vmem:[#allocation92_spill] sm:$0xff] }
 0x9f5   : > { %5037 = vrot.lane.b32.xlu0 %v11636_v5, %s7124_s30  ;;  %v3901_v56 = vpack.c.bf16 %v3891_v33, %v3890_v55  ;;  %v3710_v32 = vmul.f32 %v6834_v38, %v10213_v26  ;;  %6849 = vpow2.f32 %v4229_v2  ;;  %v4237_v35 = vmul.f32 1.442695, %v4216_v3  ;;  %v11639_v2 = vld [vmem:[#allocation93_spill] sm:$0xff]  ;;  %v11641_v11 = vld [vmem:[#allocation40_spill] sm:$0xff]  ;;  %v11644_v3 = vld [vmem:[#allocation90_spill] sm:$0xff] }
 0x9f6   : > { %v6836_v47 = vpop.eup %6835  ;;  %6851 = vpow2.f32 %v4231_v59  ;;  %v4201_v45 = vsub.f32 %v11637_v40, %v10065_v12  ;;  %v4202_v4 = vsub.f32 %v11638_v8, %v10065_v12  ;;  %v4203_v37 = vsub.f32 %v11639_v2, %v10065_v12  ;;  %v11640_v59 = vld [vmem:[#allocation79_spill] sm:$0xff]  ;;  %v11646_v2 = vld [vmem:[#allocation38_spill] sm:$0xff] }
 0x9f7   : > { %v6838_v6 = vpop.eup %6837  ;;  %6268 = vmatmul.mubr.bf16.gmra.mxu0 %v3901_v56  ;;  %v3718_v42 = vpack.c.bf16 %v3710_v32, %v3709_v34  ;;  %6352 = vmatpush3.bf16.msk.msra.mxu1 %vm9668_vm15, %v11635_v54  ;;  %v3892_v55 = vmul.f32 %v6836_v47, %v10188_v28  ;;  %6853 = vpow2.f32 %v4233_v15  ;;  %v4994_v38 = vmul.f32 %v10003_v50, %v11641_v11  ;;  %v11645_v47 = vld [vmem:[#allocation94_spill] sm:$0xff] }
 0x9f8   : > { %6316 = vmatpush3.bf16.msk.msra.mxu0 %vm9660_vm14, %v11625_v36  ;;  %v3893_v33 = vmul.f32 %v6838_v6, %v10250_v62  ;;  %6353 = vmatprep.subr.msk.bf16.mxu1 %vm9668_vm15, %v11640_v59  ;;  %6855 = vpow2.f32 %v4235_v25  ;;  %vm11642_vm0 = vcmp.ge.s32.totalorder %v9869_v0, %v9436_v49  ;;  %vm11643_vm1 = vcmp.ge.s32.totalorder %v9872_v7, %v9436_v49 }
 0x9f9   : > { %v4217_v15 = vsel %vm11642_vm0, %v4201_v45, -1e+30  ;;  %6304 = vmatmul.mubr.bf16.gmra.mxu1 %v3718_v42  ;;  %6317 = vmatprep.subr.msk.bf16.mxu0 %vm9660_vm14, %v11632_v17  ;;  %6857 = vpow2.f32 %v4237_v35  ;;  %v4218_v36 = vsel %vm11643_vm1, %v4202_v4, -1e+30  ;;  %v4204_v5 = vsub.f32 %v11644_v3, %v10065_v12  ;;  %v10357_v45 = vpop.permute.xlu1 %4434 }
 0x9fa   : > { %v4239_v34 = vmul.f32 1.442695, %v4217_v15  ;;  %v6840_v50 = vpop.eup %6839  ;;  %v3902_v56 = vpack.c.bf16 %v3893_v33, %v3892_v55  ;;  %5033 = vrot.lane.b32.xlu0 %v4994_v38, %s7124_s30  ;;  %v4241_v32 = vmul.f32 1.442695, %v4218_v36  ;;  %v4219_v25 = vsel %vm3361_vm8, %v4203_v37, -1e+30 }
 0x9fb   : > { %v4205_v35 = vsub.f32 %v11645_v47, %v10065_v12  ;;  %v6842_v40 = vpop.eup %6841  ;;  %v4557_v8 = vmul.f32 %v6840_v50, %v9846_v39  ;;  %6354 = vmatpush3.bf16.msk.msra.mxu1 %vm9668_vm15, %v11640_v59  ;;  %v4220_v4 = vsel %vm3362_vm9, %v4204_v5, -1e+30  ;;  %v4243_v6 = vmul.f32 1.442695, %v4219_v25  ;;  %v11647_v38 = vld [vmem:[#allocation97_spill] sm:$0xff]  ;;  %v4723_v5 = vld [vmem:[#allocation2] sm:$0xff] }
 0x9fc   : > { %6859 = vpow2.f32 %v4239_v34  ;;  %v6844_v42 = vpop.eup %6843  ;;  %6271 = vmatprep.mubr.bf16.mxu0 %v3902_v56  ;;  %v4558_v55 = vmul.f32 %v6842_v40, %v9902_v31  ;;  %6318 = vmatpush3.bf16.msk.msra.mxu0 %vm9660_vm14, %v11632_v17  ;;  %v4992_v37 = vmul.f32 %v10014_v14, %v11646_v2  ;;  %v4245_v19 = vmul.f32 1.442695, %v4220_v4  ;;  %v4724_v50 = vld [vmem:[#allocation2 + $0x8] sm:$0xff] }
 0x9fd   : > { %6861 = vpow2.f32 %v4241_v32  ;;  %v6846_v33 = vpop.eup %6845  ;;  %6319 = vmatprep.subr.msk.bf16.mxu0 %vm9660_vm14, %v11635_v54  ;;  %v3894_v11 = vmul.f32 %v6844_v42, %v10157_v48  ;;  %v4206_v15 = vsub.f32 %v11647_v38, %v10065_v12  ;;  %v4221_v17 = vsel %vm3363_vm12, %v4205_v35, -1e+30  ;;  %v11649_v32 = vld [vmem:[#allocation101_spill] sm:$0xff]  ;;  %v10396_v42 = vpop.permute.xlu1 %4442 }
 0x9fe   : > { %6863 = vpow2.f32 %v4243_v6  ;;  %v11648_v36 = vmov 0.0   ;;  %v4573_v14 = vpack.c.bf16 %v4558_v55, %v4557_v8  ;;  %5029 = vrot.lane.b32.xlu0 %v4992_v37, %s7124_s30  ;;  %v3895_v34 = vmul.f32 %v6846_v33, %v10213_v26  ;;  %v11650_v8 = vld [vmem:[#allocation96_spill] sm:$0xff] }
 0x9ff   : > { %6389 = vmatprep.subr.bf16.mxu1 %v11648_v36  ;;  %6865 = vpow2.f32 %v4245_v19  ;;  %v4247_v3 = vmul.f32 1.442695, %v4221_v17  ;;  %v4222_v56 = vsel %vm3364_vm13, %v4206_v15, -1e+30  ;;  %v4207_v25 = vsub.f32 %v11649_v32, %v10065_v12 }
 0xa00   : > { %v4208_v47 = vsub.f32 %v10049_v46, %v10065_v12  ;;  %6355 = vmatprep.mubr.bf16.mxu1 %v4573_v14  ;;  %v3903_v35 = vpack.c.bf16 %v3895_v34, %v3894_v11  ;;  %6320 = vmatpush3.bf16.msk.msra.mxu0 %vm9660_vm14, %v11635_v54  ;;  %v4249_v40 = vmul.f32 1.442695, %v4222_v56  ;;  %v4209_v4 = vsub.f32 %v11650_v8, %v10065_v12 }
 0xa01   : > { %v6848_v6 = vpop.eup %6847  ;;  %6321 = vmatprep.subr.msk.bf16.mxu0 %vm9660_vm14, %v11640_v59  ;;  %v4223_v46 = vsel %vm3365_vm11, %v4207_v25, -1e+30  ;;  %v4210_v54 = vsub.f32 %v10167_v52, %v10065_v12  ;;  %v4725_v2 = vpack.c.bf16 %v4724_v50, %v4723_v5  ;;  %6867 = vpow2.f32 %v4247_v3 }
 0xa02   : > { %v4224_v55 = vsel %vm3366_vm10, %v4208_v47, -1e+30  ;;  %v6850_v37 = vpop.eup %6849  ;;  %6272 = vmatmul.mubr.bf16.gmra.mxu0 %v3903_v35  ;;  %v4259_v19 = vmul.f32 %v6848_v6, %v9846_v39  ;;  %v4251_v33 = vmul.f32 1.442695, %v4223_v46  ;;  %6869 = vpow2.f32 %v4249_v40 }
 0xa03   : > { %v4253_v11 = vmul.f32 1.442695, %v4224_v55  ;;  %v6852_v38 = vpop.eup %6851  ;;  %v4260_v15 = vmul.f32 %v6850_v37, %v9902_v31  ;;  %v4225_v12 = vsel %vm3367_vm7, %v4209_v4, -1e+30  ;;  %v4226_v31 = vsel %vm3368_vm6, %v4210_v54, -1e+30 }
 0xa04   : > { %v6854_v17 = vpop.eup %6853  ;;  %6322 = vmatpush3.bf16.msk.msra.mxu0 %vm9660_vm14, %v11640_v59  ;;  %v4261_v14 = vmul.f32 %v6852_v38, %v9832_v60  ;;  %6871 = vpow2.f32 %v4251_v33  ;;  %v10423_v59 = vpop.permute.xlu1 %4450  ;;  %v4255_v50 = vmul.f32 1.442695, %v4225_v12  ;;  %v4257_v25 = vmul.f32 1.442695, %v4226_v31 }
 0xa05   : > { %v6856_v39 = vpop.eup %6855  ;;  %v4275_v52 = vpack.c.bf16 %v4260_v15, %v4259_v19  ;;  %v4262_v34 = vmul.f32 %v6854_v17, %v9861_v10  ;;  %6873 = vpow2.f32 %v4253_v11  ;;  %6371 = vmatprep.subr.bf16.mxu0 %v4725_v2  ;;  %vm11652_vm14 = vcmask 130048  }
 0xa06   : > { %v6858_v3 = vpop.eup %6857  ;;  %v4263_v58 = vmul.f32 %v6856_v39, %v9993_v23  ;;  %6875 = vpow2.f32 %v4255_v50  ;;  %v4499_v43 = vsub.f32 %v10423_v59, %v10120_v13  ;;  %vm11654_vm15 = vmmov %vm11652_vm14 }
 0xa07   : > { %6323 = vmatprep.mubr.bf16.mxu0 %v4275_v52  ;;  %v4264_v5 = vmul.f32 %v6858_v3, %v10054_v53  ;;  %v4276_v32 = vpack.c.bf16 %v4262_v34, %v4261_v14  ;;  %6877 = vpow2.f32 %v4257_v25 }
 0xa08   : > { %v4459_v46 = vpop.permute.xlu1 %4458 }
 0xa09   : > { %v6860_v56 = vpop.eup %6859  ;;  %v4277_v35 = vpack.c.bf16 %v4264_v5, %v4263_v58 }
 0xa0a   : > { %v6862_v47 = vpop.eup %6861  ;;  %6324 = vmatmul.mubr.bf16.vlgmr.msra.gmra.mxu0 %v4276_v32  ;;  %v4265_v4 = vmul.f32 %v6860_v56, %v9953_v22  ;;  %v4495_v56 = vsub.f32 %v10357_v45, %v10120_v13 }
 0xa0b   : > { %v6864_v40 = vpop.eup %6863  ;;  %6327 = vmatprep.mubr.bf16.mxu0 %v4277_v35  ;;  %6372 = vmatpush3.bf16.msra.mxu0 %v4725_v2  ;;  %v4266_v6 = vmul.f32 %v6862_v47, %v10027_v30  ;;  %v4497_v35 = vsub.f32 %v10396_v42, %v10120_v13 }
 0xa0c   : > { %v6866_v8 = vpop.eup %6865  ;;  %v4267_v55 = vmul.f32 %v6864_v40, %v10100_v16  ;;  %v4467_v17 = vpop.permute.xlu1 %4466  ;;  %v4511_v47 = vsel %vm3355_vm2, %v4495_v56, -1e+30  ;;  %v11651_v40 = vld [vmem:[#allocation62_spill] sm:$0xff]  ;;  %vm11655_vm2 = vmmov %vm11642_vm0 }
 0xa0d   : > { %v4268_v54 = vmul.f32 %v6866_v8, %v10141_v24  ;;  %v4278_v33 = vpack.c.bf16 %v4266_v6, %v4265_v4  ;;  %v4529_v6 = vmul.f32 1.442695, %v4511_v47  ;;  %v4513_v45 = vsel %vm3357_vm4, %v4497_v35, -1e+30  ;;  %vm11657_vm4 = vmmov %vm11652_vm14  ;;  %v11662_v56 = vld [vmem:[#allocation18_spill] sm:$0xff] }
 0xa0e   : > { %v6868_v37 = vpop.eup %6867  ;;  %v4515_v9 = vsel %vm11655_vm2, %v4499_v43, -1e+30 }
 0xa0f   : > { %v6870_v19 = vpop.eup %6869  ;;  %v4279_v38 = vpack.c.bf16 %v4268_v54, %v4267_v55  ;;  %v4269_v2 = vmul.f32 %v6868_v37, %v10071_v20  ;;  %6879 = vpow2.f32 %v4529_v6 }
 0xa10   : > { %v4270_v14 = vmul.f32 %v6870_v19, %v10125_v57  ;;  %v4475_v3 = vpop.permute.xlu1 %4474  ;;  %v4533_v19 = vmul.f32 1.442695, %v4513_v45 }
 0xa11   : > { %v6872_v11 = vpop.eup %6871 }
 0xa12   : > { %v6874_v15 = vpop.eup %6873  ;;  %6328 = vmatmul.mubr.bf16.gmra.mxu0 %v4278_v33  ;;  %v4271_v12 = vmul.f32 %v6872_v11, %v10188_v28  ;;  %v4280_v34 = vpack.c.bf16 %v4270_v14, %v4269_v2  ;;  %v11653_v33 = vld [vmem:[#allocation58_spill] sm:$0xff] }
 0xa13   : > { %6331 = vmatprep.mubr.bf16.mxu0 %v4279_v38  ;;  %v4272_v39 = vmul.f32 %v6874_v15, %v10250_v62  ;;  %v6876_v52 = vpop.eup %6875  ;;  %v4501_v38 = vsub.f32 %v4459_v46, %v10120_v13  ;;  %v11656_v15 = vld [vmem:[#allocation60_spill] sm:$0xff]  ;;  %v4503_v46 = vsub.f32 %v4467_v17, %v10120_v13 }
 0xa14   : > { %v6878_v31 = vpop.eup %6877  ;;  %v4273_v5 = vmul.f32 %v6876_v52, %v10157_v48  ;;  %v4483_v32 = vpop.permute.xlu1 %4482 }
 0xa15   : > { %v4281_v58 = vpack.c.bf16 %v4272_v39, %v4271_v12  ;;  %v4274_v50 = vmul.f32 %v6878_v31, %v10213_v26  ;;  %v4537_v12 = vmul.f32 1.442695, %v4515_v9  ;;  %v4517_v0 = vsel %vm3361_vm8, %v4501_v38, -1e+30  ;;  %vm11663_vm8 = vmmov %vm11657_vm4 }
 0xa16   : > { %v4519_v17 = vsel %vm3363_vm12, %v4503_v46, -1e+30 }
 0xa17   : > { %v4282_v25 = vpack.c.bf16 %v4274_v50, %v4273_v5  ;;  %v4505_v5 = vsub.f32 %v4475_v3, %v10120_v13  ;;  %v11660_v50 = vld [vmem:[#allocation43_spill] sm:$0xff]  ;;  %v4545_v35 = vmul.f32 1.442695, %v4519_v17 }
 0xa18   : > { %v10445_v8 = vpop.permute.xlu1 %4871 }
 0xa1a   : > { %6332 = vmatmul.mubr.bf16.gmra.mxu0 %v4280_v34 }
 0xa1b   : > { %6335 = vmatprep.mubr.bf16.mxu0 %v4281_v58  ;;  %v4541_v58 = vmul.f32 1.442695, %v4517_v0 }
 0xa1c   : > { %v10463_v59 = vpop.permute.xlu1 %4875  ;;  %v6880_v51 = vpop.eup %6879 }
 0xa1d   : > { %v4559_v1 = vmul.f32 %v6880_v51, %v9832_v60 }
 0xa20   : > { %v10478_v34 = vpop.permute.xlu1 %4879 }
 0xa21   : > { %11659 = vst [vmem:[#allocation33_spill] sm:$0xff] %v10478_v34  ;;  %v11716_v34 = vld [vmem:[#allocation21_spill] sm:$0xff] }
 0xa22   : > { %6336 = vmatmul.mubr.bf16.gmra.mxu0 %v4282_v25  ;;  %v4507_v25 = vsub.f32 %v4483_v32, %v10120_v13 }
 0xa23   : > { %6373 = vmatprep.mubr.msk.bf16.mxu0 %vm11652_vm14, %v11651_v40  ;;  %v4521_v40 = vsel %vm3365_vm11, %v4505_v5, -1e+30  ;;  %vm11666_vm11 = vmmov %vm11657_vm4 }
 0xa24   : > { %v4439_v4 = vpop.permute.xlu0 %4438  ;;  %v10497_v6 = vpop.permute.xlu1 %4883  ;;  %v4549_v32 = vmul.f32 1.442695, %v4521_v40  ;;  %v4523_v45 = vsel %vm3367_vm7, %v4507_v25, -1e+30 }
 0xa25   : > { %v4496_v55 = vsub.f32 %v4439_v4, %v10120_v13  ;;  %11664 = vst [vmem:[#allocation41_spill] sm:$0xff] %v10497_v6  ;;  %v4553_v60 = vmul.f32 1.442695, %v4523_v45 }
 0xa27   : > { %v4512_v42 = vsel %vm3356_vm3, %v4496_v55, -1e+30  ;;  %vm11658_vm3 = vmmov %vm11643_vm1 }
 0xa28   : > { %v4531_v54 = vmul.f32 1.442695, %v4512_v42  ;;  %v4447_v37 = vpop.permute.xlu0 %4446  ;;  %v10515_v38 = vpop.permute.xlu1 %4887 }
 0xa29   : > { %v4498_v11 = vsub.f32 %v4447_v37, %v10120_v13  ;;  %11669 = vst [vmem:[#allocation37_spill] sm:$0xff] %v10515_v38 }
 0xa2a   : > { %6374 = vmatmul.mubr.msk.bf16.vlgmr.msra.gmra.mxu0 %vm11654_vm15, %v11653_v33  ;;  %6881 = vpow2.f32 %v4531_v54 }
 0xa2b   : > { %6377 = vmatprep.mubr.msk.bf16.mxu0 %vm11657_vm4, %v11656_v15  ;;  %v4514_v21 = vsel %vm3358_vm5, %v4498_v11, -1e+30  ;;  %6883 = vpow2.f32 %v4533_v19  ;;  %vm11661_vm5 = vmmov %vm11657_vm4  ;;  %v11665_v19 = vld [vmem:[#allocation49_spill] sm:$0xff] }
 0xa2c   : > { %v4535_v2 = vmul.f32 1.442695, %v4514_v21  ;;  %v4455_v14 = vpop.permute.xlu0 %4454 }
 0xa2d   : > { %v4500_v39 = vsub.f32 %v4455_v14, %v10120_v13 }
 0xa2e   : > { %6885 = vpow2.f32 %v4535_v2 }
 0xa2f   : > { %v4516_v52 = vsel %vm11658_vm3, %v4500_v39, -1e+30  ;;  %6887 = vpow2.f32 %v4537_v12 }
 0xa30   : > { %v4539_v29 = vmul.f32 1.442695, %v4516_v52  ;;  %v4463_v31 = vpop.permute.xlu0 %4462 }
 0xa31   : > { %v4502_v61 = vsub.f32 %v4463_v31, %v10120_v13  ;;  %v11671_v31 = vld [vmem:[#allocation73_spill] sm:$0xff] }
 0xa32   : > { %6378 = vmatmul.mubr.msk.bf16.gmra.mxu0 %vm11661_vm5, %v11660_v50  ;;  %6889 = vpow2.f32 %v4539_v29 }
 0xa33   : > { %6381 = vmatprep.mubr.msk.bf16.mxu0 %vm11663_vm8, %v11662_v56  ;;  %v4518_v7 = vsel %vm3362_vm9, %v4502_v61, -1e+30  ;;  %6891 = vpow2.f32 %v4541_v58  ;;  %vm11668_vm9 = vmmov %vm11657_vm4 }
 0xa34   : > { %v4543_v3 = vmul.f32 1.442695, %v4518_v7  ;;  %v4471_v47 = vpop.permute.xlu0 %4470 }
 0xa35   : > { %v4504_v4 = vsub.f32 %v4471_v47, %v10120_v13 }
 0xa36   : > { %6893 = vpow2.f32 %v4543_v3 }
 0xa37   : > { %v6882_v55 = vpop.eup %6881  ;;  %v4520_v44 = vsel %vm3364_vm13, %v4504_v4, -1e+30  ;;  %6895 = vpow2.f32 %v4545_v35 }
 0xa38   : > { %v4547_v43 = vmul.f32 1.442695, %v4520_v44  ;;  %v4479_v42 = vpop.permute.xlu0 %4478  ;;  %v4560_v54 = vmul.f32 %v6882_v55, %v9861_v10  ;;  %v6884_v37 = vpop.eup %6883 }
 0xa39   : > { %v4506_v33 = vsub.f32 %v4479_v42, %v10120_v13  ;;  %v4561_v21 = vmul.f32 %v6884_v37, %v9993_v23 }
 0xa3a   : > { %6382 = vmatmul.mubr.msk.bf16.gmra.mxu0 %vm11666_vm11, %v11665_v19  ;;  %6897 = vpow2.f32 %v4547_v43  ;;  %v4574_v11 = vpack.c.bf16 %v4560_v54, %v4559_v1  ;;  %v11683_v19 = vld [vmem:[#allocation23_spill] sm:$0xff] }
 0xa3b   : > { %6385 = vmatprep.mubr.msk.bf16.mxu0 %vm11668_vm9, %v11667_v41  ;;  %v6886_v18 = vpop.eup %6885  ;;  %v4522_v9 = vsel %vm3366_vm10, %v4506_v33, -1e+30  ;;  %6899 = vpow2.f32 %v4549_v32  ;;  %vm11672_vm10 = vmmov %vm11657_vm4  ;;  %v11684_v41 = vld [vmem:[#allocation51_spill] sm:$0xff] }
 0xa3c   : > { %v4551_v10 = vmul.f32 1.442695, %v4522_v9  ;;  %6356 = vmatmul.mubr.bf16.vlgmr.msra.gmra.mxu1 %v4574_v11  ;;  %v4487_v15 = vpop.permute.xlu0 %4486  ;;  %v4562_v2 = vmul.f32 %v6886_v18, %v10054_v53  ;;  %v6888_v14 = vpop.eup %6887  ;;  %v11685_v9 = vld [vmem:[#allocation59_spill] sm:$0xff] }
 0xa3d   : > { %v4508_v12 = vsub.f32 %v4487_v15, %v10120_v13  ;;  %v4563_v29 = vmul.f32 %v6888_v14, %v9953_v22  ;;  %v10529_v13 = vpop.permute.xlu1 %4891  ;;  %v11687_v14 = vld [vmem:[#allocation61_spill] sm:$0xff] }
 0xa3e   : > { %6901 = vpow2.f32 %v4551_v10  ;;  %v4575_v39 = vpack.c.bf16 %v4562_v2, %v4561_v21  ;;  %11673 = vst [vmem:[#allocation42_spill] sm:$0xff] %v10529_v13  ;;  %v11715_v13 = vld [vmem:[#allocation19_spill] sm:$0xff] }
 0xa3f   : > { %v6890_v0 = vpop.eup %6889  ;;  %v4524_v63 = vsel %vm3368_vm6, %v4508_v12, -1e+30  ;;  %6903 = vpow2.f32 %v4553_v60  ;;  %v11686_v60 = vld [vmem:[#allocation8_spill] sm:$0xff]  ;;  %vm11771_vm6 = vcmask 523264  }
 0xa40   : > { %v4555_v46 = vmul.f32 1.442695, %v4524_v63  ;;  %6359 = vmatprep.mubr.bf16.mxu1 %v4575_v39  ;;  %v10523_v52 = vpop.permute.xlu0 %4873  ;;  %v4564_v23 = vmul.f32 %v6890_v0, %v10027_v30  ;;  %v6892_v53 = vpop.eup %6891  ;;  %v11688_v39 = vld [vmem:[#allocation50_spill] sm:$0xff]  ;;  %vm11776_vm7 = vmmov %vm11771_vm6 }
 0xa41   : > { %11670 = vst [vmem:[#allocation78_spill] sm:$0xff] %v10523_v52  ;;  %v4565_v27 = vmul.f32 %v6892_v53, %v10100_v16  ;;  %v10535_v17 = vpop.permute.xlu1 %4895  ;;  %vm11780_vm12 = vmmov %vm11771_vm6 }
 0xa42   : > { %6386 = vmatmul.mubr.msk.bf16.gmra.mxu0 %vm11672_vm10, %v11671_v31  ;;  %6905 = vpow2.f32 %v4555_v46  ;;  %v4576_v58 = vpack.c.bf16 %v4564_v23, %v4563_v29  ;;  %11675 = vst [vmem:[#allocation39_spill] sm:$0xff] %v10535_v17  ;;  %v11689_v23 = vld [vmem:[#allocation20_spill] sm:$0xff]  ;;  %vm11782_vm13 = vmmov %vm11771_vm6 }
 0xa43   : > { %v6894_v5 = vpop.eup %6893  ;;  %v11690_v31 = vld [vmem:[#allocation56_spill] sm:$0xff]  ;;  %vm11785_vm0 = vmmov %vm11771_vm6 }
 0xa44   : > { %6360 = vmatmul.mubr.bf16.gmra.mxu1 %v4576_v58  ;;  %v10531_v49 = vpop.permute.xlu0 %4877  ;;  %v4566_v50 = vmul.f32 %v6894_v5, %v10141_v24  ;;  %v6896_v22 = vpop.eup %6895  ;;  %vm11789_vm1 = vmmov %vm11785_vm0 }
 0xa45   : > { %11674 = vst [vmem:[#allocation48_spill] sm:$0xff] %v10531_v49  ;;  %v4567_v7 = vmul.f32 %v6896_v22, %v10071_v20  ;;  %v10545_v4 = vpop.permute.xlu1 %4899  ;;  %vm11791_vm14 = vmmov %vm11785_vm0 }
 0xa46   : > { %v4577_v61 = vpack.c.bf16 %v4566_v50, %v4565_v27  ;;  %11678 = vst [vmem:[#allocation98_spill] sm:$0xff] %v10545_v4  ;;  %v11691_v50 = vld [vmem:[#allocation63_spill] sm:$0xff]  ;;  %vm11793_vm15 = vmmov %vm11785_vm0 }
 0xa47   : > { %v6898_v30 = vpop.eup %6897  ;;  %vm11798_vm2 = vmmov %vm11785_vm0 }
 0xa48   : > { %6363 = vmatprep.mubr.bf16.mxu1 %v4577_v61  ;;  %v10537_v56 = vpop.permute.xlu0 %4881  ;;  %v4568_v25 = vmul.f32 %v6898_v30, %v10125_v57  ;;  %v6900_v3 = vpop.eup %6899  ;;  %v11692_v61 = vld [vmem:[#allocation14_spill] sm:$0xff]  ;;  %vm11801_vm4 = vmmov %vm11785_vm0 }
 0xa49   : > { %11676 = vst [vmem:[#allocation81_spill] sm:$0xff] %v10537_v56  ;;  %v4569_v16 = vmul.f32 %v6900_v3, %v10188_v28  ;;  %v5050_v43 = vpop.permute.xlu1 %5049  ;;  %v5994_v56 = vmul.f32 -1.442695, %v11715_v13  ;;  %vm11802_vm3 = vmmov %vm11785_vm0 }
 0xa4a   : > { %v4578_v47 = vpack.c.bf16 %v4568_v25, %v4567_v7  ;;  %v5082_v33 = vmul.f32 %v5050_v43, %v11683_v19  ;;  %vm11803_vm5 = vmmov %vm11785_vm0 }
 0xa4b   : > { %v6902_v35 = vpop.eup %6901  ;;  %vm11804_vm8 = vmmov %vm11785_vm0 }
 0xa4c   : > { %6364 = vmatmul.mubr.bf16.gmra.mxu1 %v4578_v47  ;;  %v10541_v40 = vpop.permute.xlu0 %4885  ;;  %v4570_v24 = vmul.f32 %v6902_v35, %v10250_v62  ;;  %v6904_v51 = vpop.eup %6903  ;;  %v11693_v47 = vld [vmem:[#allocation67_spill] sm:$0xff]  ;;  %vm11808_vm11 = vmmov %vm11785_vm0 }
 0xa4d   : > { %11677 = vst [vmem:[#allocation80_spill] sm:$0xff] %v10541_v40  ;;  %v4571_v20 = vmul.f32 %v6904_v51, %v10157_v48  ;;  %v5044_v62 = vpop.permute.xlu1 %5043  ;;  %vm11820_vm9 = vmmov %vm11785_vm0 }
 0xa4e   : > { %v4579_v55 = vpack.c.bf16 %v4570_v24, %v4569_v16  ;;  %v11694_v16 = vld [vmem:[#allocation65_spill] sm:$0xff]  ;;  %vm11821_vm10 = vmmov %vm11785_vm0 }
 0xa4f   : > { %v6906_v44 = vpop.eup %6905 }
 0xa50   : > { %6367 = vmatprep.mubr.bf16.mxu1 %v4579_v55  ;;  %v10547_v32 = vpop.permute.xlu0 %4889  ;;  %v4572_v57 = vmul.f32 %v6906_v44, %v10213_v26  ;;  %v5079_v26 = vmul.f32 %v5044_v62, %v11685_v9 }
 0xa51   : > { %11679 = vst [vmem:[#allocation32_spill] sm:$0xff] %v10547_v32  ;;  %v5040_v54 = vpop.permute.xlu1 %5039  ;;  %v11714_v32 = vld [vmem:[#allocation17_spill] sm:$0xff] }
 0xa52   : > { %v4580_v45 = vpack.c.bf16 %v4572_v57, %v4571_v20  ;;  %v5077_v12 = vmul.f32 %v5040_v54, %v11687_v14 }
 0xa54   : > { %6368 = vmatmul.mubr.bf16.gmra.mxu1 %v4580_v45  ;;  %v10551_v42 = vpop.permute.xlu0 %4893 }
 0xa55   : > { %11680 = vst [vmem:[#allocation99_spill] sm:$0xff] %v10551_v42  ;;  %v5036_v15 = vpop.permute.xlu1 %5035  ;;  %v5993_v42 = vmul.f32 -1.442695, %v11714_v32 }
 0xa56   : > { %v5075_v53 = vmul.f32 %v5036_v15, %v11689_v23 }
 0xa58   : > { %v10553_v28 = vpop.permute.xlu0 %4897 }
 0xa59   : > { %11681 = vst [vmem:[#allocation82_spill] sm:$0xff] %v10553_v28  ;;  %v5032_v46 = vpop.permute.xlu1 %5031 }
 0xa5a   : > { %v5073_v22 = vmul.f32 %v5032_v46, %v11691_v50 }
 0xa5c   : > { %v10555_v1 = vpop.permute.xlu0 %4901 }
 0xa5d   : > { %11682 = vst [vmem:[#allocation95_spill] sm:$0xff] %v10555_v1  ;;  %v5028_v7 = vpop.permute.xlu1 %5027  ;;  %v11713_v1 = vld [vmem:[#allocation15_spill] sm:$0xff] }
 0xa5e   : > { %v5071_v35 = vmul.f32 %v5028_v7, %v11693_v47  ;;  %v5992_v9 = vmul.f32 -1.442695, %v11713_v1 }
 0xa60   : > { %v5048_v37 = vpop.permute.xlu0 %5047 }
 0xa61   : > { %v5081_v11 = vmul.f32 %v5048_v37, %v11684_v41 }
 0xa63   : > { %v5090_v18 = vpack.c.bf16 %v5082_v33, %v5081_v11 }
 0xa64   : > { %v5046_v48 = vpop.permute.xlu0 %5045 }
 0xa65   : > { %v5080_v10 = vmul.f32 %v5046_v48, %v11686_v60  ;;  %6390 = vmatpush3.bf16.msra.mxu1 %v5090_v18  ;;  %v11712_v60 = vld [vmem:[#allocation13_spill] sm:$0xff] }
 0xa66   : > { %6391 = vmatprep.subr.bf16.mxu1 %v11648_v36  ;;  %v5991_v19 = vmul.f32 -1.442695, %v11712_v60 }
 0xa67   : > { %v5089_v21 = vpack.c.bf16 %v5080_v10, %v5079_v26 }
 0xa68   : > { %v5042_v2 = vpop.permute.xlu0 %5041 }
 0xa69   : > { %v5078_v0 = vmul.f32 %v5042_v2, %v11688_v39  ;;  %6392 = vmatpush3.bf16.msra.mxu1 %v5089_v21 }
 0xa6a   : > { %6393 = vmatprep.subr.bf16.mxu1 %v11648_v36 }
 0xa6b   : > { %v5088_v63 = vpack.c.bf16 %v5078_v0, %v5077_v12 }
 0xa6c   : > { %v5038_v29 = vpop.permute.xlu0 %5037 }
 0xa6d   : > { %v5076_v58 = vmul.f32 %v5038_v29, %v11690_v31  ;;  %6394 = vmatpush3.bf16.msra.mxu1 %v5088_v63 }
 0xa6e   : > { %6395 = vmatprep.subr.bf16.mxu1 %v11648_v36 }
 0xa6f   : > { %v5087_v5 = vpack.c.bf16 %v5076_v58, %v5075_v53 }
 0xa70   : > { %v5034_v27 = vpop.permute.xlu0 %5033 }
 0xa71   : > { %v5074_v30 = vmul.f32 %v5034_v27, %v11692_v61  ;;  %6396 = vmatpush3.bf16.msra.mxu1 %v5087_v5 }
 0xa72   : > { %6397 = vmatprep.subr.bf16.mxu1 %v11648_v36 }
 0xa73   : > { %v5086_v25 = vpack.c.bf16 %v5074_v30, %v5073_v22  ;;  %v11708_v22 = vld [vmem:[#allocation7_spill] sm:$0xff] }
 0xa74   : > { %v5030_v3 = vpop.permute.xlu0 %5029  ;;  %v5988_v30 = vmul.f32 -1.442695, %v11708_v22 }
 0xa75   : > { %v5072_v24 = vmul.f32 %v5030_v3, %v11694_v16  ;;  %6398 = vmatpush3.bf16.msra.mxu1 %v5086_v25  ;;  %v11710_v3 = vld [vmem:[#allocation9_spill] sm:$0xff] }
 0xa76   : > { %6399 = vmatprep.subr.bf16.mxu1 %v11648_v36  ;;  %6907 = vpow2.f32 %v5988_v30 }
 0xa77   : > { %v5085_v51 = vpack.c.bf16 %v5072_v24, %v5071_v35  ;;  %v5989_v35 = vmul.f32 -1.442695, %v11710_v3  ;;  %v11711_v24 = vld [vmem:[#allocation11_spill] sm:$0xff] }
 0xa79   : > { %6400 = vmatpush3.bf16.msra.mxu1 %v5085_v51  ;;  %v5990_v51 = vmul.f32 -1.442695, %v11711_v24  ;;  %6909 = vpow2.f32 %v5989_v35  ;;  %v11717_v35 = vld [vmem:[#allocation22_spill] sm:$0xff] }
 0xa7a   : > { %6401 = vmatprep.subr.bf16.mxu1 %v11648_v36 }
 0xa7b   : > { %6911 = vpow2.f32 %v5990_v51 }
 0xa7c   : > { %6913 = vpow2.f32 %v5991_v19 }
 0xa7d   : > { %6915 = vpow2.f32 %v5992_v9 }
 0xa7e   : > { %6917 = vpow2.f32 %v5993_v42 }
 0xa7f   : > { %6919 = vpow2.f32 %v5994_v56 }
 0xa83   : > { %v6908_v9 = vpop.eup %6907 }
 0xa86   : > { %v6910_v56 = vpop.eup %6909 }
 0xa9e   : > { %v10575_v55 = vpop.f32.mrf.mxu1 }
 0xaa0   : > { %v10577_v44 = vpop.f32.mrf.mxu1 }
 0xaa2   : > { %v10579_v20 = vpop.f32.mrf.mxu1 }
 0xaa4   : > { %v10581_v57 = vpop.f32.mrf.mxu1 }
 0xaa6   : > { %v10583_v45 = vpop.f32.mrf.mxu0  ;;  %v10585_v43 = vpop.f32.mrf.mxu1 }
 0xaa8   : > { %v10587_v62 = vpop.f32.mrf.mxu0  ;;  %v10589_v54 = vpop.f32.mrf.mxu1 }
 0xaaa   : > { %v10591_v37 = vpop.f32.mrf.mxu0  ;;  %v10593_v33 = vpop.f32.mrf.mxu1 }
 0xaac   : > { %v10595_v11 = vpop.f32.mrf.mxu0  ;;  %v10597_v18 = vpop.f32.mrf.mxu1 }
 0xaad   : > { %11695 = vst [vmem:[#allocation47_spill] sm:$0xff] %v10597_v18  ;;  %v11740_v18 = vld [vmem:[#allocation53_spill] sm:$0xff] }
 0xaae   : > { %v10599_v48 = vpop.f32.mrf.mxu0  ;;  %v10601_v26 = vpop.f32.mrf.mxu1 }
 0xaaf   : > { %11696 = vst [vmem:[#allocation34_spill] sm:$0xff] %v10601_v26 }
 0xab0   : > { %v10603_v10 = vpop.f32.mrf.mxu0  ;;  %v10605_v15 = vpop.f32.mrf.mxu1 }
 0xab1   : > { %11697 = vst [vmem:[#allocation83_spill] sm:$0xff] %v10605_v15 }
 0xab2   : > { %v10607_v21 = vpop.f32.mrf.mxu0  ;;  %v10609_v2 = vpop.f32.mrf.mxu1 }
 0xab3   : > { %11698 = vst [vmem:[#allocation84_spill] sm:$0xff] %v10609_v2  ;;  %v5271_v2 = vadd.f32 1.0, %v6910_v56 }
 0xab4   : > { %v10611_v12 = vpop.f32.mrf.mxu0  ;;  %v10615_v63 = vpop.f32.mrf.mxu1 }
 0xab5   : > { %11699 = vst [vmem:[#allocation85_spill] sm:$0xff] %v10611_v12  ;;  %11701 = vst [vmem:[#allocation88_spill] sm:$0xff] %v10615_v63 }
 0xab7   : > { %v10613_v0 = vpop.f32.mrf.mxu0 }
 0xab8   : > { %11700 = vst [vmem:[#allocation87_spill] sm:$0xff] %v10613_v0 }
 0xab9   : > { %v10617_v46 = vpop.f32.mrf.mxu0  ;;  %v10621_v53 = vpop.f32.mrf.mxu1 }
 0xaba   : > { %11702 = vst [vmem:[#allocation45_spill] sm:$0xff] %v10617_v46  ;;  %11704 = vst [vmem:[#allocation89_spill] sm:$0xff] %v10621_v53 }
 0xabb   : > { %v10619_v29 = vpop.f32.mrf.mxu0  ;;  %v10625_v5 = vpop.f32.mrf.mxu1 }
 0xabc   : > { %11703 = vst [vmem:[#allocation46_spill] sm:$0xff] %v10619_v29  ;;  %11706 = vst [vmem:[#allocation44_spill] sm:$0xff] %v10625_v5  ;;  %v5996_v5 = vmul.f32 -1.442695, %v11717_v35 }
 0xabd   : > { %v10623_v58 = vpop.f32.mrf.mxu0  ;;  %v6306_v7 = vpop.f32.mrf.mxu1 }
 0xabe   : > { %11705 = vst [vmem:[#allocation77_spill] sm:$0xff] %v10623_v58 }
 0xabf   : > { %v4115_v17 = vpop.f32.mrf.mxu1 }
 0xac2   : > { %v10627_v27 = vpop.f32.mrf.mxu0 }
 0xac3   : > { %11707 = vst [vmem:[#allocation91_spill] sm:$0xff] %v10627_v27  ;;  %v6912_v27 = vpop.eup %6911 }
 0xac4   : > { %v10630_v25 = vpop.f32.mrf.mxu0  ;;  %v6914_v63 = vpop.eup %6913  ;;  %v5272_v15 = vadd.f32 1.0, %v6912_v27 }
 0xac5   : > { %11709 = vst [vmem:[#allocation92_spill] sm:$0xff] %v10630_v25  ;;  %v11720_v25 = vld [vmem:[#allocation26_spill] sm:$0xff]  ;;  %v6916_v52 = vpop.eup %6915 }
 0xac6   : > { %v6274_v36 = vpop.f32.mrf.mxu0  ;;  %v5999_v6 = vmul.f32 -1.442695, %v11720_v25  ;;  %v6918_v29 = vpop.eup %6917 }
 0xac7   : > { %v10635_v28 = vadd.f32 %v6306_v7, %v6274_v36  ;;  %v5995_v36 = vmul.f32 -1.442695, %v11716_v34 }
 0xac8   : > { %v4018_v4 = vpop.f32.mrf.mxu0 }
 0xac9   : > { %v10639_v38 = vadd.f32 %v4115_v17, %v4018_v4  ;;  %6921 = vpow2.f32 %v5995_v36  ;;  %v11718_v17 = vld [vmem:[#allocation25_spill] sm:$0xff]  ;;  %v5270_v36 = vadd.f32 1.0, %v6908_v9 }
 0xaca   : > { %v10642_v40 = vpop.f32.mrf.mxu0  ;;  %v5998_v4 = vmul.f32 -1.442695, %v11718_v17  ;;  %6923 = vpow2.f32 %v5996_v5  ;;  %v6920_v5 = vpop.eup %6919 }
 0xacb   : > { %v5276_v49 = vadd.f32 1.0, %v6920_v5 }
 0xacc   : > { %v10645_v7 = vpop.f32.mrf.mxu0  ;;  %6925 = vpow2.f32 %v5998_v4  ;;  %v5273_v4 = vadd.f32 1.0, %v6914_v63 }
 0xacd   : > { %6927 = vpow2.f32 %v5999_v6 }
 0xace   : > { %v10647_v30 = vpop.f32.mrf.mxu0  ;;  %6929 = vrcp.f32 %v5270_v36 }
 0xacf   : > { %6931 = vrcp.f32 %v5271_v2  ;;  %v11731_v2 = vld [vmem:[#allocation29_spill] sm:$0xff] }
 0xad0   : > { %v10651_v51 = vpop.f32.mrf.mxu0  ;;  %6933 = vrcp.f32 %v5272_v15 }
 0xad1   : > { %11719 = vst [vmem:[#allocation93_spill] sm:$0xff] %v10651_v51  ;;  %6935 = vrcp.f32 %v5273_v4 }
 0xad2   : > { %v10654_v53 = vpop.f32.mrf.mxu0 }
 0xad3   : > { %11721 = vst [vmem:[#allocation79_spill] sm:$0xff] %v10654_v53 }
 0xad4   : > { %v10656_v19 = vpop.f32.mrf.mxu0 }
 0xad5   : > { %11722 = vst [vmem:[#allocation40_spill] sm:$0xff] %v10656_v19  ;;  %v5274_v19 = vadd.f32 1.0, %v6916_v52  ;;  %v11730_v52 = vld [vmem:[#allocation27_spill] sm:$0xff] }
 0xad6   : > { %v10658_v42 = vpop.f32.mrf.mxu0  ;;  %v6922_v6 = vpop.eup %6921  ;;  %v6000_v36 = vmul.f32 -1.442695, %v11730_v52 }
 0xad7   : > { %11723 = vst [vmem:[#allocation90_spill] sm:$0xff] %v10658_v42  ;;  %v5275_v42 = vadd.f32 1.0, %v6918_v29  ;;  %v6924_v51 = vpop.eup %6923  ;;  %6937 = vrcp.f32 %v5274_v19  ;;  %v5277_v27 = vadd.f32 1.0, %v6922_v6  ;;  %v6002_v29 = vmul.f32 -1.442695, %v11731_v2 }
 0xad8   : > { %v10660_v58 = vpop.f32.mrf.mxu0  ;;  %v5278_v5 = vadd.f32 1.0, %v6924_v51 }
 0xad9   : > { %11724 = vst [vmem:[#allocation94_spill] sm:$0xff] %v10660_v58  ;;  %v11728_v58 = vld [vmem:[#allocation24_spill] sm:$0xff]  ;;  %v6926_v63 = vpop.eup %6925  ;;  %6939 = vrcp.f32 %v5275_v42 }
 0xada   : > { %v10662_v46 = vpop.f32.mrf.mxu0  ;;  %v5997_v56 = vmul.f32 -1.442695, %v11728_v58  ;;  %6941 = vrcp.f32 %v5276_v49  ;;  %v5280_v4 = vadd.f32 1.0, %v6926_v63 }
 0xadb   : > { %11725 = vst [vmem:[#allocation38_spill] sm:$0xff] %v10662_v46 }
 0xadc   : > { %v10664_v53 = vpop.f32.mrf.mxu0  ;;  %6943 = vpow2.f32 %v5997_v56 }
 0xadd   : > { %11726 = vst [vmem:[#allocation97_spill] sm:$0xff] %v10664_v53  ;;  %v6928_v53 = vpop.eup %6927  ;;  %6945 = vrcp.f32 %v5277_v27 }
 0xade   : > { %v10666_v9 = vpop.f32.mrf.mxu0  ;;  %v5281_v19 = vadd.f32 1.0, %v6928_v53  ;;  %6947 = vpow2.f32 %v6000_v36  ;;  %v6930_v52 = vpop.eup %6929 }
 0xadf   : > { %11727 = vst [vmem:[#allocation101_spill] sm:$0xff] %v10666_v9  ;;  %6949 = vpow2.f32 %v6002_v29  ;;  %v6932_v51 = vpop.eup %6931  ;;  %v10692_v0 = vmul.f32 %v6930_v52, %v11708_v22 }
 0xae0   : > { %v10669_v46 = vpop.f32.mrf.mxu0  ;;  %6951 = vrcp.f32 %v5278_v5  ;;  %v6934_v27 = vpop.eup %6933 }
 0xae1   : > { %11729 = vst [vmem:[#allocation96_spill] sm:$0xff] %v10669_v46  ;;  %6953 = vrcp.f32 %v5280_v4  ;;  %v6936_v63 = vpop.eup %6935 }
 0xae2   : > { %v10673_v15 = vpop.f32.mrf.mxu0  ;;  %6955 = vrcp.f32 %v5281_v19 }
 0xae3   : > { %11732 = vst [vmem:[#allocation62_spill] sm:$0xff] %v10673_v15 }
 0xae4   : > { %v10675_v58 = vpop.f32.mrf.mxu0  ;;  %v6938_v53 = vpop.eup %6937 }
 0xae5   : > { %11733 = vst [vmem:[#allocation58_spill] sm:$0xff] %v10675_v58 }
 0xae6   : > { %v6338_v6 = vpop.f32.mrf.mxu0  ;;  %v6940_v36 = vpop.eup %6939 }
 0xae7   : > { %v10678_v42 = vadd.f32 %v6338_v6, %v10635_v28  ;;  %v6942_v5 = vpop.eup %6941  ;;  %v10711_v22 = vmul.f32 %v6940_v36, %v11714_v32  ;;  %v4081_v36 = vadd.f32 %v10589_v54, %v10603_v10  ;;  %v11748_v54 = vld [vmem:[#allocation34_spill] sm:$0xff] }
 0xae8   : > { %v4397_v49 = vpop.f32.mrf.mxu0  ;;  %v10714_v52 = vmul.f32 %v6942_v5, %v11715_v13  ;;  %v4073_v13 = vadd.f32 %v10575_v55, %v10583_v45 }
 0xae9   : > { %11734 = vst [vmem:[#allocation60_spill] sm:$0xff] %v10678_v42  ;;  %v10681_v2 = vadd.f32 %v4397_v49, %v10639_v38  ;;  %v6944_v15 = vpop.eup %6943 }
 0xaea   : > { %v6375_v56 = vpop.f32.mrf.mxu0  ;;  %v6946_v4 = vpop.eup %6945  ;;  %v5279_v49 = vadd.f32 1.0, %v6944_v15  ;;  %v5320_v15 = vmul.f32 %v6934_v27, %v11711_v24  ;;  %v4411_v55 = vadd.f32 %v10642_v40, %v4073_v13  ;;  %v11750_v13 = vld [vmem:[#allocation48_spill] sm:$0xff] }
 0xaeb   : > { %11735 = vst [vmem:[#allocation43_spill] sm:$0xff] %v10681_v2  ;;  %v6948_v6 = vpop.eup %6947 }
 0xaec   : > { %v4760_v58 = vpop.f32.mrf.mxu0  ;;  %v6950_v19 = vpop.eup %6949  ;;  %v5282_v9 = vadd.f32 1.0, %v6948_v6  ;;  %v10708_v6 = vmul.f32 %v6938_v53, %v11713_v1  ;;  %6957 = vrcp.f32 %v5279_v49  ;;  %v4089_v53 = vadd.f32 %v10585_v43, %v10599_v48  ;;  %v11746_v43 = vld [vmem:[#allocation47_spill] sm:$0xff] }
 0xaed   : > { %v6952_v38 = vpop.eup %6951 }
 0xaee   : > { %v10683_v29 = vpop.f32.mrf.mxu0  ;;  %v6954_v46 = vpop.eup %6953  ;;  %v10722_v24 = vmul.f32 %v6952_v38, %v11717_v35  ;;  %6959 = vrcp.f32 %v5282_v9  ;;  %v11741_v35 = vld [vmem:[#allocation68_spill] sm:$0xff] }
 0xaef   : > { %11736 = vst [vmem:[#allocation18_spill] sm:$0xff] %v10683_v29  ;;  %v6956_v26 = vpop.eup %6955  ;;  %v5284_v29 = vadd.f32 1.0, %v6950_v19  ;;  %v11749_v19 = vld [vmem:[#allocation93_spill] sm:$0xff] }
 0xaf0   : > { %v10685_v28 = vpop.f32.mrf.mxu0  ;;  %v10728_v1 = vmul.f32 %v6956_v26, %v11720_v25 }
 0xaf1   : > { %11737 = vst [vmem:[#allocation49_spill] sm:$0xff] %v10685_v28  ;;  %v7010_v28 = vld [vmem:[%s11140_s3] sm:$0xff]  ;;  %6961 = vrcp.f32 %v5284_v29 }
 0xaf2   : > { %v10687_v42 = vpop.f32.mrf.mxu0  ;;  %v10698_v12 = vrot.slane %v7010_v28, %v11740_v18  ;;  %v10717_v28 = vmul.f32 %v6946_v4, %v11716_v34  ;;  %v11747_v4 = vld [vmem:[#allocation87_spill] sm:$0xff] }
 0xaf3   : > { %11738 = vst [vmem:[#allocation72_spill] sm:$0xff] %v10687_v42  ;;  %v10701_v42 = vmul.f32 %v6932_v51, %v11710_v3  ;;  %v4921_v51 = vmul.f32 %v6375_v56, %v10463_v59  ;;  %v4105_v10 = vadd.f32 %v11748_v54, %v11747_v4 }
 0xaf4   : > { %v10689_v2 = vpop.f32.mrf.mxu0  ;;  %v10734_v34 = vmul.f32 %v10698_v12, %v11687_v14  ;;  %v10738_v32 = vmul.f32 %v10698_v12, %v11684_v41  ;;  %v10746_v26 = vmul.f32 %v10698_v12, %v11689_v23  ;;  %v10750_v25 = vmul.f32 %v10698_v12, %v11688_v39 }
 0xaf5   : > { %11739 = vst [vmem:[#allocation73_spill] sm:$0xff] %v10689_v2  ;;  %v10705_v2 = vmul.f32 %v6936_v63, %v11712_v60  ;;  %v10725_v60 = vmul.f32 %v6954_v46, %v11718_v17  ;;  %v10742_v46 = vmul.f32 %v10698_v12, %v11691_v50  ;;  %v10754_v14 = vmul.f32 %v10698_v12, %v11690_v31  ;;  %v11742_v17 = vld [vmem:[#allocation70_spill] sm:$0xff] }
 0xaf6   : > { %v10719_v3 = vpop.f32.mrf.mxu0  ;;  %v4065_v41 = vadd.f32 %v10577_v44, %v10587_v62  ;;  %v10763_v50 = vmul.f32 %v10698_v12, %v11693_v47  ;;  %v10767_v23 = vmul.f32 %v10698_v12, %v11692_v61  ;;  %v5192_v31 = vmul.f32 %v10698_v12, %v11741_v35  ;;  %v11743_v44 = vld [vmem:[#allocation66_spill] sm:$0xff] }
 0xaf7   : > { %v5190_v9 = vmul.f32 %v10698_v12, %v11742_v17  ;;  %v5193_v40 = vmul.f32 %v10698_v12, %v11743_v44  ;;  %v10777_v62 = vmul.f32 %v10698_v12, %v11694_v16  ;;  %v4076_v47 = vadd.f32 %v10579_v20, %v10591_v37  ;;  %v11744_v16 = vld [vmem:[#allocation71_spill] sm:$0xff] }
 0xaf8   : > { %v10759_v45 = vpop.f32.mrf.mxu0  ;;  %v4409_v61 = vadd.f32 %v10645_v7, %v4065_v41  ;;  %v4068_v63 = vadd.f32 %v10581_v57, %v10595_v11  ;;  %v5191_v5 = vmul.f32 %v10698_v12, %v11744_v16  ;;  %v4919_v37 = vmul.f32 %v10445_v8, %v4760_v58  ;;  %v11745_v11 = vld [vmem:[#allocation85_spill] sm:$0xff] }
 0xaf9   : > { %v4412_v20 = vadd.f32 %v10647_v30, %v4076_v47  ;;  %v4092_v57 = vadd.f32 %v10593_v33, %v10607_v21  ;;  %v4084_v48 = vadd.f32 %v11746_v43, %v11745_v11  ;;  %v11751_v30 = vld [vmem:[#allocation18_spill] sm:$0xff]  ;;  %v11753_v47 = vld [vmem:[#allocation83_spill] sm:$0xff]  ;;  %v11755_v33 = vld [vmem:[#allocation84_spill] sm:$0xff] }
 0xafa   : > { %v10793_v7 = vpop.f32.mrf.mxu0  ;;  %v4410_v38 = vadd.f32 %v11749_v19, %v4068_v63  ;;  %v4922_v41 = vmul.f32 %v11751_v30, %v11750_v13  ;;  %v11757_v11 = vld [vmem:[#allocation49_spill] sm:$0xff]  ;;  %v11758_v43 = vld [vmem:[#allocation78_spill] sm:$0xff] }
 0xafb   : > { %v4920_v4 = vmul.f32 %v11758_v43, %v11757_v11  ;;  %v11767_v11 = vld [vmem:[#allocation44_spill] sm:$0xff] }
 0xafc   : > { %v6357_v39 = vpop.f32.mrf.mxu1  ;;  %v4792_v63 = vpop.f32.mrf.mxu0 }
 0xafd   : > { %v4709_v27 = vadd.f32 %v6357_v39, %v4411_v55  ;;  %v11752_v39 = vld [vmem:[#allocation45_spill] sm:$0xff] }
 0xafe   : > { %v4644_v29 = vpop.f32.mrf.mxu1 }
 0xaff   : > { %v5172_v59 = vadd.f32 %v4921_v51, %v4709_v27  ;;  %v4707_v56 = vadd.f32 %v4644_v29, %v4409_v61  ;;  %v4097_v61 = vadd.f32 %v11753_v47, %v11752_v39  ;;  %v11754_v51 = vld [vmem:[#allocation46_spill] sm:$0xff]  ;;  %v11756_v27 = vld [vmem:[#allocation79_spill] sm:$0xff]  ;;  %v11764_v47 = vld [vmem:[#allocation41_spill] sm:$0xff] }
 0xb00   : > { %v6358_v49 = vpop.f32.mrf.mxu1  ;;  %v4108_v21 = vadd.f32 %v11755_v33, %v11754_v51  ;;  %v4415_v29 = vadd.f32 %v11756_v27, %v4089_v53  ;;  %v11763_v53 = vld [vmem:[#allocation40_spill] sm:$0xff] }
 0xb01   : > { %v5208_v8 = vadd.f32 %v5192_v31, %v5172_v59  ;;  %v5170_v58 = vadd.f32 %v4919_v37, %v4707_v56  ;;  %v4710_v55 = vadd.f32 %v6358_v49, %v4412_v20  ;;  %v10813_v31 = vpop.eup %6957  ;;  %v11759_v20 = vld [vmem:[#allocation77_spill] sm:$0xff]  ;;  %v11760_v37 = vld [vmem:[#allocation88_spill] sm:$0xff]  ;;  %v11761_v56 = vld [vmem:[#allocation91_spill] sm:$0xff]  ;;  %v4413_v39 = vadd.f32 %v11763_v53, %v4081_v36 }
 0xb02   : > { %v4647_v54 = vpop.f32.mrf.mxu1  ;;  %v10817_v59 = vadd.f32 %v11760_v37, %v11759_v20  ;;  %v11762_v49 = vld [vmem:[#allocation89_spill] sm:$0xff]  ;;  %v11765_v51 = vld [vmem:[#allocation72_spill] sm:$0xff] }
 0xb03   : > { %v5206_v19 = vadd.f32 %v5190_v9, %v5170_v58  ;;  %v5173_v16 = vadd.f32 %v4922_v41, %v4710_v55  ;;  %v4708_v17 = vadd.f32 %v4647_v54, %v4410_v38  ;;  %v10811_v13 = vmul.f32 %v5320_v15, %v5208_v8  ;;  %v10826_v41 = vpop.eup %6959  ;;  %v11766_v27 = vld [vmem:[#allocation92_spill] sm:$0xff]  ;;  %v11768_v54 = vld [vmem:[#allocation90_spill] sm:$0xff]  ;;  %v11769_v36 = vld [vmem:[#allocation73_spill] sm:$0xff] }
 0xb04   : > { %v10821_v30 = vadd.f32 %v11762_v49, %v11761_v56  ;;  %v4925_v33 = vmul.f32 %v11765_v51, %v11764_v47  ;;  %v6361_v9 = vpop.f32.mrf.mxu1  ;;  %v10830_v55 = vpop.eup %6961  ;;  %v4113_v43 = vadd.f32 %v11767_v11, %v11766_v27  ;;  %v4416_v20 = vadd.f32 %v11768_v54, %v4092_v57  ;;  %v11770_v37 = vld [vmem:[#allocation33_spill] sm:$0xff]  ;;  %v11772_v47 = vld [vmem:[#allocation94_spill] sm:$0xff] }
 0xb05   : > { %v5209_v15 = vadd.f32 %v5193_v40, %v5173_v16  ;;  %v5171_v38 = vadd.f32 %v4920_v4, %v4708_v17  ;;  %v4713_v8 = vadd.f32 %v6361_v9, %v4415_v29  ;;  %v5352_v58 = vmul.f32 %v10811_v13, %v10811_v13  ;;  %v6384_v40 = vpop.f32.mrf.mxu0  ;;  %v11773_v9 = vld [vmem:[#allocation80_spill] sm:$0xff] }
 0xb06   : > { %v4923_v56 = vmul.f32 %v11770_v37, %v11769_v36  ;;  %v4660_v49 = vpop.f32.mrf.mxu1  ;;  %v10838_v53 = vmul.f32 %v10692_v0, %v5206_v19  ;;  %v4414_v51 = vadd.f32 %v11772_v47, %v4084_v48  ;;  %v4926_v27 = vmul.f32 %v10719_v3, %v11773_v9  ;;  %v11777_v37 = vld [vmem:[#allocation97_spill] sm:$0xff] }
 0xb07   : > { %v5207_v17 = vadd.f32 %v5191_v5, %v5171_v38  ;;  %v5176_v16 = vadd.f32 %v4925_v33, %v4713_v8  ;;  %v4711_v29 = vadd.f32 %v4660_v49, %v4413_v39  ;;  %v5372_v4 = vsel %vm11771_vm6, %v5352_v58, 0.0  ;;  %v11774_v33 = vld [vmem:[#allocation38_spill] sm:$0xff]  ;;  %v11775_v38 = vld [vmem:[#allocation81_spill] sm:$0xff] }
 0xb08   : > { %v6362_v11 = vpop.f32.mrf.mxu1  ;;  %5373 = vadd.xlane.f32.xlu0 %v5372_v4  ;;  %v5350_v57 = vmul.f32 %v10838_v53, %v10838_v53  ;;  %v10847_v54 = vmul.f32 %v10705_v2, %v5209_v15  ;;  %v4419_v48 = vadd.f32 %v11774_v33, %v4105_v10  ;;  %v4924_v3 = vmul.f32 %v11775_v38, %v10759_v45  ;;  %v4795_v2 = vpop.f32.mrf.mxu0  ;;  %v11779_v45 = vld [vmem:[#allocation42_spill] sm:$0xff]  ;;  %v11781_v9 = vld [vmem:[#allocation37_spill] sm:$0xff]  ;;  %v11784_v33 = vld [vmem:[#allocation99_spill] sm:$0xff] }
 0xb09   : > { %v5212_v0 = vadd.f32 %v10742_v46, %v5176_v16  ;;  %v5174_v5 = vadd.f32 %v4923_v56, %v4711_v29  ;;  %v4714_v19 = vadd.f32 %v6362_v11, %v4416_v20  ;;  %v10851_v39 = vmul.f32 %v10701_v42, %v5207_v17  ;;  %v11778_v56 = vld [vmem:[#allocation101_spill] sm:$0xff] }
 0xb0a   : > { %v5366_v8 = vsel %vm11776_vm7, %v5350_v57, 0.0  ;;  %v4663_v58 = vpop.f32.mrf.mxu1  ;;  %v5353_v36 = vmul.f32 %v10847_v54, %v10847_v54  ;;  %v4417_v10 = vadd.f32 %v11777_v37, %v4097_v61  ;;  %v4420_v49 = vadd.f32 %v11778_v56, %v4108_v21  ;;  %vm11832_vm7 = vmmov %vm11785_vm0 }
 0xb0b   : > { %v5210_v15 = vadd.f32 %v10763_v50, %v5174_v5  ;;  %v5177_v46 = vadd.f32 %v4926_v27, %v4714_v19  ;;  %5367 = vadd.xlane.f32.xlu1 %v5366_v8  ;;  %v4712_v20 = vadd.f32 %v4663_v58, %v4414_v51  ;;  %v5351_v42 = vmul.f32 %v10851_v39, %v10851_v39 }
 0xb0c   : > { %v4929_v17 = vmul.f32 %v10793_v7, %v11779_v45  ;;  %v6365_v16 = vpop.f32.mrf.mxu1  ;;  %v10867_v29 = vmul.f32 %v10714_v52, %v5212_v0  ;;  %v4927_v27 = vmul.f32 %v11781_v9, %v4792_v63  ;;  %v5375_v61 = vsel %vm11782_vm13, %v5353_v36, 0.0  ;;  %v6387_v52 = vpop.f32.mrf.mxu0  ;;  %v11783_v63 = vld [vmem:[#allocation96_spill] sm:$0xff]  ;;  %vm11836_vm13 = vmmov %vm11785_vm0 }
 0xb0d   : > { %v5213_v4 = vadd.f32 %v10767_v23, %v5177_v46  ;;  %v5175_v50 = vadd.f32 %v4924_v3, %v4712_v20  ;;  %v4717_v47 = vadd.f32 %v6365_v16, %v4419_v48  ;;  %v5369_v51 = vsel %vm11780_vm12, %v5351_v42, 0.0  ;;  %v11787_v46 = vld [vmem:[#allocation58_spill] sm:$0xff]  ;;  %v11788_v20 = vld [vmem:[#allocation32_spill] sm:$0xff]  ;;  %vm11833_vm12 = vmmov %vm11785_vm0 }
 0xb0e   : > { %v4676_v11 = vpop.f32.mrf.mxu1  ;;  %5370 = vadd.xlane.f32.xlu0 %v5369_v51  ;;  %v5356_v21 = vmul.f32 %v10867_v29, %v10867_v29  ;;  %v10876_v7 = vmul.f32 %v10708_v6, %v5210_v15  ;;  %v4418_v19 = vadd.f32 %v11783_v63, %v10817_v59  ;;  %v4930_v48 = vmul.f32 %v6384_v40, %v11784_v33  ;;  %v11792_v51 = vld [vmem:[#allocation39_spill] sm:$0xff] }
 0xb0f   : > { %v5211_v57 = vadd.f32 %v10777_v62, %v5175_v50  ;;  %v5180_v23 = vadd.f32 %v4929_v17, %v4717_v47  ;;  %v4715_v0 = vadd.f32 %v4676_v11, %v4417_v10  ;;  %5376 = vadd.xlane.f32.xlu1 %v5375_v61  ;;  %v10880_v5 = vmul.f32 %v10717_v28, %v5213_v4  ;;  %v11786_v28 = vld [vmem:[#allocation62_spill] sm:$0xff]  ;;  %v4808_v10 = vpop.f32.mrf.mxu0 }
 0xb10   : > { %v6366_v38 = vpop.f32.mrf.mxu1  ;;  %v5384_v3 = vsel %vm11785_vm0, %v5356_v21, 0.0  ;;  %v5354_v6 = vmul.f32 %v10876_v7, %v10876_v7  ;;  %v4423_v15 = vadd.f32 %v11786_v28, %v10821_v30  ;;  %v4421_v59 = vadd.f32 %v11787_v46, %v4113_v43  ;;  %v11790_v17 = vld [vmem:[#allocation98_spill] sm:$0xff] }
 0xb11   : > { %v5216_v8 = vadd.f32 %v10734_v34, %v5180_v23  ;;  %v5178_v62 = vadd.f32 %v4927_v27, %v4715_v0  ;;  %v4718_v58 = vadd.f32 %v6366_v38, %v4420_v49  ;;  %v5357_v36 = vmul.f32 %v10880_v5, %v10880_v5  ;;  %v11794_v21 = vld [vmem:[#allocation74_spill] sm:$0xff] }
 0xb12   : > { %v4928_v40 = vmul.f32 %v11788_v20, %v4795_v2  ;;  %v4679_v42 = vpop.f32.mrf.mxu1  ;;  %5385 = vadd.xlane.f32.xlu0 %v5384_v3  ;;  %v10896_v37 = vmul.f32 %v10711_v22, %v5211_v57  ;;  %v4933_v16 = vmul.f32 %v6387_v52, %v11790_v17  ;;  %v5378_v30 = vsel %vm11791_vm14, %v5354_v6, 0.0  ;;  %v11795_v52 = vld [vmem:[#allocation86_spill] sm:$0xff]  ;;  %vm11838_vm14 = vmmov %vm11785_vm0 }
 0xb13   : > { %v5214_v34 = vadd.f32 %v10746_v26, %v5178_v62  ;;  %v5181_v56 = vadd.f32 %v4930_v48, %v4718_v58  ;;  %v4716_v49 = vadd.f32 %v4679_v42, %v4418_v19  ;;  %v5387_v45 = vsel %vm11789_vm1, %v5357_v36, 0.0  ;;  %v11797_v19 = vld [vmem:[#allocation59_spill] sm:$0xff]  ;;  %vm11837_vm1 = vmmov %vm11785_vm0 }
 0xb14   : > { %v6369_v4 = vpop.f32.mrf.mxu1  ;;  %5388 = vadd.xlane.f32.xlu1 %v5387_v45  ;;  %v5355_v43 = vmul.f32 %v10896_v37, %v10896_v37  ;;  %v10905_v2 = vmul.f32 %v10725_v60, %v5216_v8  ;;  %v4931_v9 = vmul.f32 %v11792_v51, %v4808_v10  ;;  %v4939_v60 = vsub.f32 %v11795_v52, %v11794_v21  ;;  %v11800_v62 = vld [vmem:[#allocation27_spill] sm:$0xff]  ;;  %v11805_v10 = vld [vmem:[#allocation30_spill] sm:$0xff]  ;;  %v11807_v45 = vld [vmem:[#allocation28_spill] sm:$0xff] }
 0xb15   : > { %v5217_v22 = vadd.f32 %v10750_v25, %v5181_v56  ;;  %v5179_v50 = vadd.f32 %v4928_v40, %v4716_v49  ;;  %v4721_v26 = vadd.f32 %v6369_v4, %v4423_v15  ;;  %v10909_v47 = vmul.f32 %v10722_v24, %v5214_v34  ;;  %v11796_v24 = vld [vmem:[#allocation24_spill] sm:$0xff]  ;;  %v6590_v51 = vld [vmem:[%s11139_s2 + $0x10] sm:$0xff]  }
 0xb16   : > { %v4692_v27 = vpop.f32.mrf.mxu1  ;;  %5379 = vadd.xlane.f32.xlu0 %v5378_v30  ;;  %v5381_v11 = vsel %vm11793_vm15, %v5355_v43, 0.0  ;;  %v5360_v61 = vmul.f32 %v10905_v2, %v10905_v2  ;;  %v5327_v63 = vmul.f32 %v10813_v31, %v11796_v24  ;;  %v5202_v33 = vmul.f32 %v10698_v12, %v11797_v19  ;;  %v11806_v56 = vld [vmem:[#allocation76_spill] sm:$0xff]  ;;  %v11809_v30 = vld [vmem:[#allocation75_spill] sm:$0xff]  ;;  %vm11839_vm15 = vmmov %vm11785_vm0 }
 0xb17   : > { %v5215_v57 = vadd.f32 %v10754_v14, %v5179_v50  ;;  %v5184_v25 = vadd.f32 %v4933_v16, %v4721_v26  ;;  %v4719_v23 = vadd.f32 %v4692_v27, %v4421_v59  ;;  %v10919_v0 = vmul.f32 %v10728_v1, %v5217_v22  ;;  %v11799_v1 = vld [vmem:[#allocation29_spill] sm:$0xff]  ;;  %v6589_v26 = vld [vmem:[%s11139_s2 + $0x18] sm:$0xff]   ;;  %v6592_v21 = vld [vmem:[%s11139_s2] sm:$0xff]  }
 0xb18   : > { %5382 = vadd.xlane.f32.xlu1 %v5381_v11  ;;  %v5396_v48 = vsel %vm11798_vm2, %v5360_v61, 0.0  ;;  %v5358_v6 = vmul.f32 %v10909_v47, %v10909_v47  ;;  %v5332_v8 = vmul.f32 %v10830_v55, %v11799_v1  ;;  %v5330_v58 = vmul.f32 %v10826_v41, %v11800_v62  ;;  %6409 = vmatprep.subr.bf16.mxu0 %v6589_v26  ;;  %v6591_v11 = vld [vmem:[%s11139_s2 + $0x8] sm:$0xff]   ;;  %v6370_v19 = vpop.f32.mrf.mxu1  ;;  %v11814_v1 = vld [vmem:[#allocation95_spill] sm:$0xff]  ;;  %v11815_v62 = vld [vmem:[#allocation100_spill] sm:$0xff] }
 0xb19   : > { %v5220_v38 = vadd.f32 %v10738_v32, %v5184_v25  ;;  %v5182_v3 = vadd.f32 %v4931_v9, %v4719_v23  ;;  %v5361_v14 = vmul.f32 %v10919_v0, %v10919_v0  ;;  %v10933_v31 = vmul.f32 %v5327_v63, %v5215_v57  ;;  %v11810_v9 = vld [vmem:[#allocation31_spill] sm:$0xff]  ;;  %6410 = vmatpush3.bf16.msra.mxu0 %v6589_v26  ;;  %v11811_v23 = vld [vmem:[#allocation36_spill] sm:$0xff]  ;;  %vm11840_vm2 = vmmov %vm11785_vm0 }
 0xb1a   : > { %5397 = vadd.xlane.f32.xlu0 %v5396_v48  ;;  %v4955_v32 = vmul.f32 1.442695, %v4939_v60  ;;  %v5390_v59 = vsel %vm11802_vm3, %v5358_v6, 0.0  ;;  %v6003_v34 = vmul.f32 -1.442695, %v11805_v10  ;;  %v4942_v49 = vsub.f32 %v11795_v52, %v11806_v56  ;;  %6411 = vmatprep.subr.bf16.mxu0 %v6590_v51  ;;  %v4695_v6 = vpop.f32.mrf.mxu1  ;;  %vm11842_vm3 = vmmov %vm11785_vm0 }
 0xb1b   : > { %v5218_v36 = vadd.f32 %v5202_v33, %v5182_v3  ;;  %v5399_v28 = vsel %vm11801_vm4, %v5361_v14, 0.0  ;;  %v5359_v15 = vmul.f32 %v10933_v31, %v10933_v31  ;;  %v10940_v46 = vmul.f32 %v5332_v8, %v5220_v38  ;;  %v11812_v33 = vld [vmem:[#allocation35_spill] sm:$0xff]  ;;  %v6388_v38 = vpop.f32.mrf.mxu0  ;;  %v11813_v3 = vld [vmem:[#allocation60_spill] sm:$0xff]  ;;  %vm11841_vm4 = vmmov %vm11785_vm0 }
 0xb1c   : > { %5400 = vadd.xlane.f32.xlu1 %v5399_v28  ;;  %6963 = vpow2.f32 %v4955_v32  ;;  %v6001_v17 = vmul.f32 -1.442695, %v11807_v45  ;;  %v4961_v4 = vmul.f32 1.442695, %v4942_v49  ;;  %v4940_v43 = vsub.f32 %v11795_v52, %v11809_v30  ;;  %v11816_v32 = vld [vmem:[#allocation43_spill] sm:$0xff] }
 0xb1d   : > { %v10943_v20 = vmul.f32 %v5330_v58, %v5218_v36  ;;  %v5364_v55 = vmul.f32 %v10940_v46, %v10940_v46  ;;  %v5393_v41 = vsel %vm11803_vm5, %v5359_v15, 0.0  ;;  %6965 = vpow2.f32 %v6003_v34  ;;  %6412 = vmatpush3.bf16.msra.mxu0 %v6590_v51  ;;  %v4811_v36 = vpop.f32.mrf.mxu0 }
 0xb1e   : > { %5391 = vadd.xlane.f32.xlu0 %v5390_v59  ;;  %6967 = vpow2.f32 %v6001_v17  ;;  %v4957_v22 = vmul.f32 1.442695, %v4940_v43  ;;  %6413 = vmatprep.subr.bf16.mxu0 %v6591_v11  ;;  %v4722_v14 = vadd.f32 %v6370_v19, %v11813_v3  ;;  %v4934_v8 = vmul.f32 %v6388_v38, %v11814_v1  ;;  %v11817_v59 = vld [vmem:[#allocation82_spill] sm:$0xff]  ;;  %v11819_v17 = vld [vmem:[#allocation8_spill] sm:$0xff]  ;;  %v11828_v3 = vld [vmem:[#allocation69_spill] sm:$0xff] }
 0xb1f   : > { %v5408_v40 = vsel %vm11804_vm8, %v5364_v55, 0.0  ;;  %v5362_v42 = vmul.f32 %v10943_v20, %v10943_v20  ;;  %6969 = vpow2.f32 %v4961_v4  ;;  %v5159_v58 = vrot.slane %v11815_v62, %v11740_v18 }
 0xb20   : > { %5394 = vadd.xlane.f32.xlu1 %v5393_v41  ;;  %6971 = vpow2.f32 %v4957_v22  ;;  %v5185_v28 = vadd.f32 %v4934_v8, %v4722_v14  ;;  %v4720_v15 = vadd.f32 %v4695_v6, %v11816_v32  ;;  %v4932_v55 = vmul.f32 %v11817_v59, %v4811_v36  ;;  %v11818_v41 = vld [vmem:[#allocation23_spill] sm:$0xff] }
 0xb21   : > { %v5402_v16 = vsel %vm11808_vm11, %v5362_v42, 0.0  ;;  %6414 = vmatpush3.bf16.msra.mxu0 %v6591_v11  ;;  %vm7132_vm6 = vmmov 0   ;;  %v11003_v11 = vpop.permute.xlu1 %5023 }
 0xb22   : > { %5409 = vadd.xlane.f32.xlu0 %v5408_v40  ;;  %6415 = vmatprep.subr.bf16.mxu0 %v6592_v21  ;;  %v5205_v40 = vmul.f32 %v10698_v12, %v11818_v41  ;;  %v5183_v56 = vadd.f32 %v4932_v55, %v4720_v15 }
 0xb24   : > { %v5221_v34 = vadd.f32 %v5205_v40, %v5185_v28  ;;  %v11830_v40 = vld [vmem:[#allocation52_spill] sm:$0xff] }
 0xb25   : > { %6416 = vmatpush3.bf16.msra.mxu0 %v6592_v21 }
 0xb26   : > { %5403 = vadd.xlane.f32.xlu0 %v5402_v16  ;;  %v5203_v16 = vmul.f32 %v10698_v12, %v11819_v17  ;;  %v11822_v12 = vmov 0.0  }
 0xb27   : > { %6405 = vmatprep.mubr.msk.bf16.mxu1 %vm7132_vm6, %v11822_v12 }
 0xb28   : > { %v5219_v4 = vadd.f32 %v5203_v16, %v5183_v56 }
 0xb29   : > { %v6964_v50 = vpop.eup %6963 }
 0xb2a   : > { %v4987_v27 = vmul.f32 %v6964_v50, %v11810_v9  ;;  %v6966_v61 = vpop.eup %6965  ;;  %v11823_v9 = vld [vmem:[#allocation54_spill] sm:$0xff] }
 0xb2b   : > { %v6968_v52 = vpop.eup %6967  ;;  %v5285_v60 = vadd.f32 1.0, %v6966_v61 }
 0xb2c   : > { %v6970_v57 = vpop.eup %6969  ;;  %v5283_v25 = vadd.f32 1.0, %v6968_v52  ;;  %v11826_v52 = vld [vmem:[#allocation16_spill] sm:$0xff] }
 0xb2d   : > { %6973 = vrcp.f32 %v5285_v60  ;;  %v4990_v24 = vmul.f32 %v6970_v57, %v11811_v23  ;;  %v6972_v63 = vpop.eup %6971  ;;  %v11827_v23 = vld [vmem:[#allocation55_spill] sm:$0xff] }
 0xb2e   : > { %6975 = vrcp.f32 %v5283_v25  ;;  %v4988_v48 = vmul.f32 %v6972_v63, %v11812_v33 }
 0xb31   : > { %5019 = vrot.lane.b32.xlu1 %v4987_v27, %s7124_s30  ;;  %v11825_v27 = vld [vmem:[#allocation10_spill] sm:$0xff] }
 0xb3a   : > { %v6974_v42 = vpop.eup %6973 }
 0xb3b   : > { %v5333_v49 = vmul.f32 %v6974_v42, %v11805_v10  ;;  %v6976_v18 = vpop.eup %6975 }
 0xb3c   : > { %5025 = vrot.lane.b32.xlu0 %v4990_v24, %s7124_s30  ;;  %v5331_v43 = vmul.f32 %v6976_v18, %v11807_v45  ;;  %v11824_v45 = vld [vmem:[#allocation12_spill] sm:$0xff]  ;;  %v238_v18 = vld [vmem:[%s11140_s3 + $0x8] sm:$0xff] }
 0xb3d   : > { %v10988_v30 = vmul.f32 %v5333_v49, %v5221_v34 }
 0xb3e   : > { %v10993_v50 = vmul.f32 %v5331_v43, %v5219_v4 }
 0xb3f   : > { %v5365_v22 = vmul.f32 %v10988_v30, %v10988_v30 }
 0xb40   : > { %5021 = vrot.lane.b32.xlu0 %v4988_v48, %s7124_s30  ;;  %v5363_v51 = vmul.f32 %v10993_v50, %v10993_v50 }
 0xb41   : > { %v5411_v26 = vsel %vm11820_vm9, %v5365_v22, 0.0 }
 0xb42   : > { %v5405_v10 = vsel %vm11821_vm10, %v5363_v51, 0.0 }
 0xb44   : > { %5161 = vrot.lane.b32.xlu0 %v5159_v58, %s7124_s30  ;;  %v11829_v58 = vld [vmem:[#allocation64_spill] sm:$0xff]  ;;  %s7031_s30 = sshll.u32 %s7133_s13, 4  ;;  %s7032_s30 = int_to_ptr.vmem [resolvable:$false] %s7031_s30 }
 0xb45   : > { %s7033_s14 = scalar_lea.vmem %s7032_s30, 2048  ;;  %p7034_p5 = scmp.lt.s32.totalorder %s11073_s27, %s7032_s30 }
 0xb46   : > { %p7035_p6 = scmp.lt.s32.totalorder %s7033_s14, %s7027_s18 }
 0xb48   : > { %p7036_p7 = por %p7035_p6, %p7034_p5 }
 0xb4a   : > { %p7037_p9 = pnand %p7036_p7, %p7030_p4 }
 0xb55   : > { %5412 = vadd.xlane.f32.xlu1 %v5411_v26 }
 0xb59   : > { %5406 = vadd.xlane.f32.xlu1 %v5405_v10 }
 0xb86   : > { %5099 = vxpose.xlu1.c.b16.start [1/8] (narrow) %v11823_v9, 16 }
 0xb8a   : > { %5100 = vxpose.xlu1.c.b16.cont [2/8] (narrow) %v11824_v45, 16  ;;  %v11831_v45 = vld [vmem:[#allocation57_spill] sm:$0xff] }
 0xb8e   : > { %5101 = vxpose.xlu1.c.b16.cont [3/8] (narrow) %v11825_v27, 16  ;;  %v11015_v27 = vrot.slane %v238_v18, %v11831_v45 }
 0xb91   : > { %v5374_v61 = vpop.xlane.xlu0 %5373 }
 0xb92   : > { %v5417_v21 = vmul.f32 0.015625, %v5374_v61  ;;  %5102 = vxpose.xlu1.c.b16.cont [4/8] (narrow) %v11826_v52, 16 }
 0xb94   : > { %v5433_v60 = vadd.f32 1e-05, %v5417_v21  ;;  %v5368_v57 = vpop.xlane.xlu1 %5367 }
 0xb95   : > { %v5415_v25 = vmul.f32 0.015625, %v5368_v57 }
 0xb96   : > { %5103 = vxpose.xlu1.c.b16.cont [5/8] (narrow) %v11827_v23, 16  ;;  %6977 = vrsqrt.f32 %v5433_v60 }
 0xb97   : > { %v5431_v24 = vadd.f32 1e-05, %v5415_v25  ;;  %v5371_v63 = vpop.xlane.xlu0 %5370 }
 0xb98   : > { %v5377_v19 = vpop.xlane.xlu1 %5376  ;;  %v5416_v33 = vmul.f32 0.015625, %v5371_v63 }
 0xb99   : > { %6979 = vrsqrt.f32 %v5431_v24  ;;  %v5418_v48 = vmul.f32 0.015625, %v5377_v19 }
 0xb9a   : > { %v5432_v38 = vadd.f32 1e-05, %v5416_v33  ;;  %5104 = vxpose.xlu1.c.b16.cont [6/8] (narrow) %v11828_v3, 16 }
 0xb9b   : > { %v5434_v14 = vadd.f32 1e-05, %v5418_v48  ;;  %v5386_v6 = vpop.xlane.xlu0 %5385 }
 0xb9c   : > { %6981 = vrsqrt.f32 %v5432_v38  ;;  %v5421_v1 = vmul.f32 0.015625, %v5386_v6 }
 0xb9d   : > { %6983 = vrsqrt.f32 %v5434_v14  ;;  %v5389_v8 = vpop.xlane.xlu1 %5388 }
 0xb9e   : > { %v5422_v62 = vmul.f32 0.015625, %v5389_v8  ;;  %5105 = vxpose.xlu1.c.b16.cont [7/8] (narrow) %v11829_v58, 16  ;;  %v5437_v36 = vadd.f32 1e-05, %v5421_v1 }
 0xb9f   : > { %v5380_v28 = vpop.xlane.xlu0 %5379 }
 0xba0   : > { %v5438_v32 = vadd.f32 1e-05, %v5422_v62  ;;  %v5419_v15 = vmul.f32 0.015625, %v5380_v28 }
 0xba1   : > { %v5383_v59 = vpop.xlane.xlu1 %5382 }
 0xba2   : > { %6985 = vrsqrt.f32 %v5438_v32  ;;  %v5435_v55 = vadd.f32 1e-05, %v5419_v15  ;;  %v5420_v41 = vmul.f32 0.015625, %v5383_v59  ;;  %5106 = vxpose.xlu1.c.b16.end [8/8] (narrow) %v11830_v40, 16 }
 0xba3   : > { %6987 = vrsqrt.f32 %v5437_v36  ;;  %v5398_v42 = vpop.xlane.xlu0 %5397  ;;  %v6978_v49 = vpop.eup %6977  ;;  %v5069_v36 = vmul.f32 %v11003_v11, %v11741_v35  ;;  %v11835_v35 = vld [vmem:[#allocation71_spill] sm:$0xff] }
 0xba4   : > { %6989 = vrsqrt.f32 %v5435_v55  ;;  %v5436_v34 = vadd.f32 1e-05, %v5420_v41  ;;  %v5425_v56 = vmul.f32 0.015625, %v5398_v42  ;;  %v5465_v61 = vmul.f32 %v6978_v49, %v10811_v13 }
 0xba5   : > { %v5401_v17 = vpop.xlane.xlu1 %5400 }
 0xba6   : > { %v6980_v16 = vpop.eup %6979  ;;  %6991 = vrsqrt.f32 %v5436_v34  ;;  %v5426_v4 = vmul.f32 0.015625, %v5401_v17  ;;  %v5441_v43 = vadd.f32 1e-05, %v5425_v56  ;;  %v5485_v33 = vmul.f32 %v11015_v27, %v5465_v61  ;;  %v11834_v34 = vld [vmem:[#allocation70_spill] sm:$0xff] }
 0xba7   : > { %v5392_v22 = vpop.xlane.xlu0 %5391  ;;  %v5463_v10 = vmul.f32 %v6980_v16, %v10838_v53 }
 0xba8   : > { %v5442_v26 = vadd.f32 1e-05, %v5426_v4  ;;  %v5423_v51 = vmul.f32 0.015625, %v5392_v22 }
 0xba9   : > { %v6982_v9 = vpop.eup %6981  ;;  %v5395_v21 = vpop.xlane.xlu1 %5394  ;;  %v5483_v53 = vmul.f32 %v11015_v27, %v5463_v10 }
 0xbaa   : > { %v6984_v52 = vpop.eup %6983  ;;  %6993 = vrsqrt.f32 %v5442_v26  ;;  %v5439_v60 = vadd.f32 1e-05, %v5423_v51  ;;  %v5424_v57 = vmul.f32 0.015625, %v5395_v21  ;;  %v5464_v25 = vmul.f32 %v6982_v9, %v10851_v39 }
 0xbab   : > { %v5466_v23 = vmul.f32 %v6984_v52, %v10847_v54  ;;  %6995 = vrsqrt.f32 %v5441_v43  ;;  %v5410_v24 = vpop.xlane.xlu0 %5409 }
 0xbac   : > { %6997 = vrsqrt.f32 %v5439_v60  ;;  %v5440_v63 = vadd.f32 1e-05, %v5424_v57  ;;  %v5484_v19 = vmul.f32 %v11015_v27, %v5464_v25  ;;  %v5429_v45 = vmul.f32 0.015625, %v5410_v24 }
 0xbad   : > { %v5486_v13 = vmul.f32 %v11015_v27, %v5466_v23  ;;  %v5020_v15 = vpop.permute.xlu1 %5019 }
 0xbae   : > { %6999 = vrsqrt.f32 %v5440_v63  ;;  %v5499_v48 = vpack.c.bf16 %v5484_v19, %v5483_v53  ;;  %v5067_v56 = vmul.f32 %v5020_v15, %v11834_v34 }
 0xbaf   : > { %v6986_v38 = vpop.eup %6985  ;;  %v5404_v3 = vpop.xlane.xlu0 %5403  ;;  %v5500_v14 = vpack.c.bf16 %v5486_v13, %v5485_v33 }
 0xbb0   : > { %v6988_v39 = vpop.eup %6987  ;;  %6417 = vmatprep.mubr.msk.bf16.mxu0 %vm11832_vm7, %v5499_v48  ;;  %v5470_v6 = vmul.f32 %v6986_v38, %v10880_v5 }
 0xbb1   : > { %v6990_v54 = vpop.eup %6989  ;;  %6418 = vmatmul.mubr.msk.bf16.vlgmr.msra.gmra.mxu0 %vm11833_vm12, %v5500_v14  ;;  %v5469_v58 = vmul.f32 %v6988_v39, %v10867_v29 }
 0xbb2   : > { %v5467_v1 = vmul.f32 %v6990_v54, %v10876_v7  ;;  %v5490_v59 = vmul.f32 %v11015_v27, %v5470_v6 }
 0xbb3   : > { %v6992_v8 = vpop.eup %6991  ;;  %v5026_v62 = vpop.permute.xlu0 %5025  ;;  %v5489_v42 = vmul.f32 %v11015_v27, %v5469_v58 }
 0xbb4   : > { %v5070_v28 = vmul.f32 %v5026_v62, %v11743_v44  ;;  %v5468_v32 = vmul.f32 %v6992_v8, %v10896_v37  ;;  %v5487_v41 = vmul.f32 %v11015_v27, %v5467_v1 }
 0xbb5   : > { %v5502_v49 = vpack.c.bf16 %v5490_v59, %v5489_v42 }
 0xbb6   : > { %v5084_v55 = vpack.c.bf16 %v5070_v28, %v5069_v36  ;;  %v5488_v5 = vmul.f32 %v11015_v27, %v5468_v32 }
 0xbb7   : > { %v6994_v7 = vpop.eup %6993  ;;  %v5022_v40 = vpop.permute.xlu0 %5021 }
 0xbb8   : > { %v6996_v29 = vpop.eup %6995  ;;  %v5068_v11 = vmul.f32 %v5022_v40, %v11835_v35  ;;  %6402 = vmatpush3.bf16.msra.mxu1 %v5084_v55  ;;  %v5501_v44 = vpack.c.bf16 %v5488_v5, %v5487_v41  ;;  %v5474_v17 = vmul.f32 %v6994_v7, %v10919_v0 }
 0xbb9   : > { %v6998_v37 = vpop.eup %6997  ;;  %6403 = vmatprep.subr.bf16.mxu1 %v11822_v12  ;;  %v5473_v43 = vmul.f32 %v6996_v29, %v10905_v2  ;;  %v7011_v29 = vld [vmem:[#allocation2] sm:$0xff] }
 0xbba   : > { %v5083_v16 = vpack.c.bf16 %v5068_v11, %v5067_v56  ;;  %6421 = vmatprep.mubr.msk.bf16.mxu0 %vm11836_vm13, %v5501_v44  ;;  %v5471_v18 = vmul.f32 %v6998_v37, %v10909_v47  ;;  %v5494_v26 = vmul.f32 %v11015_v27, %v5474_v17  ;;  %v5427_v47 = vmul.f32 0.015625, %v5404_v3  ;;  %v7012_v44 = vld [vmem:[#allocation2 + $0x8] sm:$0xff] }
 0xbbb   : > { %v7000_v4 = vpop.eup %6999  ;;  %6422 = vmatmul.mubr.msk.bf16.gmra.mxu0 %vm11785_vm0, %v5502_v49  ;;  %v5493_v0 = vmul.f32 %v11015_v27, %v5473_v43  ;;  %v5162_v42 = vpop.permute.xlu0 %5161 }
 0xbbc   : > { %6404 = vmatpush3.bf16.msra.mxu1 %v5083_v16  ;;  %v5472_v22 = vmul.f32 %v7000_v4, %v10933_v31  ;;  %v5491_v12 = vmul.f32 %v11015_v27, %v5471_v18  ;;  %v5443_v2 = vadd.f32 1e-05, %v5427_v47  ;;  %v5445_v31 = vadd.f32 1e-05, %v5429_v45 }
 0xbbd   : > { %v5504_v9 = vpack.c.bf16 %v5494_v26, %v5493_v0  ;;  %v5164_v34 = vmul.f32 %v7011_v29, %v5162_v42  ;;  %v5165_v37 = vmul.f32 %v7012_v44, %v5162_v42 }
 0xbbe   : > { %v5492_v51 = vmul.f32 %v11015_v27, %v5472_v22  ;;  %7001 = vrsqrt.f32 %v5443_v2 }
 0xbc0   : > { %v5503_v10 = vpack.c.bf16 %v5492_v51, %v5491_v12 }
 0xbc2   : > { %6425 = vmatprep.mubr.msk.bf16.mxu0 %vm11837_vm1, %v5503_v10 }
 0xbc3   : > { %6426 = vmatmul.mubr.msk.bf16.gmra.mxu0 %vm11838_vm14, %v5504_v9 }
 0xbcb   : > { %v7002_v63 = vpop.eup %7001 }
 0xbcc   : > { %v5475_v24 = vmul.f32 %v7002_v63, %v10943_v20 }
 0xbce   : > { %v5495_v14 = vmul.f32 %v11015_v27, %v5475_v24 }
 0xbde   : > { %v5413_v61 = vpop.xlane.xlu1 %5412 }
 0xbdf   : > { %v5430_v21 = vmul.f32 0.015625, %v5413_v61 }
 0xbe1   : > { %v5446_v52 = vadd.f32 1e-05, %v5430_v21 }
 0xbe2   : > { %v5407_v60 = vpop.xlane.xlu1 %5406 }
 0xbe3   : > { %7003 = vrsqrt.f32 %v5446_v52  ;;  %v5428_v57 = vmul.f32 0.015625, %v5407_v60 }
 0xbe4   : > { %7005 = vrsqrt.f32 %v5445_v31 }
 0xbe5   : > { %v5444_v25 = vadd.f32 1e-05, %v5428_v57 }
 0xbe7   : > { %7007 = vrsqrt.f32 %v5444_v25 }
 0xbe8   : > { %v5107_v23 = vpop.trf.xlu1 }
 0xbe9   : > { %6406 = vmatmul.mubr.bf16.vlgmr.msra.gmra.mxu1 %v5107_v23 }
 0xbf0   : > { %v7004_v53 = vpop.eup %7003 }
 0xbf1   : > { %v7006_v19 = vpop.eup %7005  ;;  %v5478_v33 = vmul.f32 %v7004_v53, %v10988_v30 }
 0xbf2   : > { %v5477_v48 = vmul.f32 %v7006_v19, %v10940_v46 }
 0xbf3   : > { %v5498_v3 = vmul.f32 %v11015_v27, %v5478_v33 }
 0xbf4   : > { %v7008_v13 = vpop.eup %7007  ;;  %v5497_v54 = vmul.f32 %v11015_v27, %v5477_v48 }
 0xbf5   : > { %v5476_v38 = vmul.f32 %v7008_v13, %v10993_v50 }
 0xbf6   : > { %v5506_v1 = vpack.c.bf16 %v5498_v3, %v5497_v54 }
 0xbf7   : > { %v5496_v39 = vmul.f32 %v11015_v27, %v5476_v38 }
 0xbf9   : > { %v5505_v6 = vpack.c.bf16 %v5496_v39, %v5495_v14 }
 0xbfb   : > { %6429 = vmatprep.mubr.msk.bf16.mxu0 %vm11839_vm15, %v5505_v6 }
 0xbfc   : > { %6430 = vmatmul.mubr.msk.bf16.gmra.mxu0 %vm11840_vm2, %v5506_v1 }
 0xc71   : > { %v6419_v20 = vpop.f32.mrf.mxu0 }
 0xc73   : > { %v5597_v46 = vpop.f32.mrf.mxu0 }
 0xc75   : > { %v6420_v30 = vpop.f32.mrf.mxu0 }
 0xc76   : > { %v6062_v50 = vpack.c.bf16 %v6420_v30, %v6419_v20 }
 0xc77   : > { %v5600_v8 = vpop.f32.mrf.mxu0 }
 0xc78   : > { %6094 = vst [vmem:[%s7246_s5 + $0x8] sm:$0xff] %v6062_v50   ;;  %v6057_v62 = vpack.c.bf16 %v5600_v8, %v5597_v46 }
 0xc7a   : > { %6058 = vst [vmem:[%s7246_s5] sm:$0xff] %v6057_v62  }
 0xc7b   : > { %v6423_v58 = vpop.f32.mrf.mxu0 }
 0xc7d   : > { %v5613_v27 = vpop.f32.mrf.mxu0 }
 0xc7f   : > { %v6424_v36 = vpop.f32.mrf.mxu0 }
 0xc80   : > { %v6072_v28 = vpack.c.bf16 %v6424_v36, %v6423_v58 }
 0xc81   : > { %v5616_v32 = vpop.f32.mrf.mxu0 }
 0xc82   : > { %6096 = vst [vmem:[%s7246_s5 + $0x18] sm:$0xff] %v6072_v28   ;;  %v6067_v15 = vpack.c.bf16 %v5616_v32, %v5613_v27 }
 0xc83   : > { %v6427_v59 = vpop.f32.mrf.mxu0 }
 0xc84   : > { %6095 = vst [vmem:[%s7246_s5 + $0x10] sm:$0xff] %v6067_v15  }
 0xc85   : > { %v5629_v55 = vpop.f32.mrf.mxu0 }
 0xc87   : > { %v6428_v41 = vpop.f32.mrf.mxu0 }
 0xc88   : > { %v6082_v5 = vpack.c.bf16 %v6428_v41, %v6427_v59 }
 0xc89   : > { %v5632_v7 = vpop.f32.mrf.mxu0 }
 0xc8a   : > { %6098 = vst [vmem:[%s7246_s5 + $0x28] sm:$0xff] %v6082_v5   ;;  %v6077_v40 = vpack.c.bf16 %v5632_v7, %v5629_v55 }
 0xc8c   : > { %6097 = vst [vmem:[%s7246_s5 + $0x20] sm:$0xff] %v6077_v40  }
 0xca9   : > { %v5149_v56 = vpop.f32.mrf.mxu1 }
 0xcaa   : > { %v5166_v35 = vadd.f32 %v5164_v34, %v5149_v56 }
 0xcab   : > { %v6407_v11 = vpop.f32.mrf.mxu1 }
 0xcac   : > { %5168 = vst.msk [vmem:[#allocation2] sm:$0xff] %vm11841_vm4, %v5166_v35 }
 0xcad   : > { %v5152_v49 = vpop.f32.mrf.mxu1 }
 0xcae   : > { %v5167_v17 = vadd.f32 %v5165_v37, %v5152_v49 }
 0xcaf   : > { %v6408_v16 = vpop.f32.mrf.mxu1 }
 0xcb0   : > { %5169 = vst.msk [vmem:[#allocation2 + $0x8] sm:$0xff] %vm11842_vm3, %v5167_v17 }
 0xcbc   : > { %v6431_v18 = vpop.f32.mrf.mxu0 }
 0xcbe   : > { %v5645_v4 = vpop.f32.mrf.mxu0 }
 0xcc0   : > { %v6432_v43 = vpop.f32.mrf.mxu0 }
 0xcc1   : > { %v6092_v22 = vpack.c.bf16 %v6432_v43, %v6431_v18 }
 0xcc2   : > { %v5648_v26 = vpop.f32.mrf.mxu0 }
 0xcc3   : > { %6100 = vst [vmem:[%s7246_s5 + $0x38] sm:$0xff] %v6092_v22   ;;  %v6087_v12 = vpack.c.bf16 %v5648_v26, %v5645_v4 }
 0xcc5   : > { %6099 = vst [vmem:[%s7246_s5 + $0x30] sm:$0xff] %v6087_v12  }
 0xcc6   : > { %7040 = shalt.err (!%p7037_p9)
}
 0xcc7   : > { %s7041_s8 = scalar_lea.hbm %s11079_s19, 1024  ;;  %s7045_s24 = scalar_lea.hbm %s11141_s4, 4096 }
 0xcc8   : > { %p7042_p10 = scmp.ne.s32.totalorder %s11079_s19, %s7041_s8  ;;  %p7046_p13 = scmp.lt.s32.totalorder %s11079_s19, %s11141_s4 }
 0xcc9   : > { %p7047_p0 = scmp.lt.s32.totalorder %s7045_s24, %s7041_s8 }
 0xcca   : > { %p7043_p11 = pnand %p7042_p10, %p7211_p3 }
 0xccb   : > { %p7048_p1 = por %p7047_p0, %p7046_p13 }
 0xccc   : > { %p7044_p12 = pneg %p7043_p11 }
 0xcce   : > { %p7049_p2 = pnand %p7048_p1, %p7044_p12 }
 0xcd0   : > { %7052 = shalt.err (!%p7049_p2)
}
 0xcd1   : > { %s7134_s12 = smov 4  }
 0xcd2   : > { %6441 = dma.vmem_to_hbm [thread:$0]  (%p7211_p3), %s11073_s27, 1024, %s11079_s19, %s11084_s9, %s7126_s10, %s7126_s10, %s7134_s12  }
 0xcd3 PF: > { %p6447_p4 = scmp.ge.s32.totalorder %s7119_s22, 2  ;;  %s5771_s18 = sand.u32 1, %s7091_s15  }
 0xcd4   : > { %s5772_s13 = scalar_lea.sflag [#allocation5], %s5771_s18 }
 0xcd5   : > { %p6444_p5 = pnand %p6447_p4, %p7220_p8 }
 0xcd7   : > { %p6445_p6 = pneg %p6444_p5 }
 0xcd9   : > { %7086 = dma.done.wait (%p6445_p6), %s5772_s13, 1024  }
 0xcda   : > { %7088 = vsyncadd (%p6445_p6), %s5772_s13, 4294966272  ;;  %s17_s22 = sadd.s32 1, %s7119_s22   ;;  %s11843_s15 = smov %s7095_s16 }
 0xcdb   : > { %p14_p7 = scmp.ge.s32.totalorder %s17_s22, 6   ;;  %s11844_s16 = smov %s7099_s17 }
 0xcdc   : > { %s11845_s17 = smov %s7229_s7  ;;  %s11846_s18 = smov %s7111_s20 }
 0xcdd   : > { %s11847_s19 = smov %s7115_s21  ;;  %s11848_s20 = smov %s11851_s25 }
 0xcde   : > { %s11849_s21 = smov %s11855_s26  ;;  %16 = sbr.rel (!%p14_p7) target bundleno = 5 (0x5), region = 75 }
 0xce3   :  { %5777 = vsyncpa [#allocation5], 1 }
 0xce4   :  { %5779 = vsyncpa [#allocation5 + $0x1], 1 }

</bundles_post_ra>
